<compile_context>
chip_gen: v7x
topology: tpu7x:2x2x1
jax: 0.10.0
libtpu: 0.0.40
codegen_flags: <defaults>
</compile_context>

<pallas_src>
import functools

import jax
import jax.numpy as jnp
from jax.experimental import pallas as pl
from jax.experimental.pallas import tpu as pltpu


# ----------------------------- in-kernel helpers -----------------------------

def _layernorm(x, g, b, eps=1e-5):
    # x: (M, D) f32; g, b broadcastable (1, D) — PyTorch nn.LayerNorm semantics.
    mu = jnp.mean(x, axis=-1, keepdims=True)
    var = jnp.mean((x - mu) ** 2, axis=-1, keepdims=True)
    return (x - mu) * jax.lax.rsqrt(var + eps) * g + b


# ------------------------- kernel 1: transformer layers ----------------------

def layer_kernel(
    x_ref,                       # (B, S, D)      bf16  token + pos embeddings
    ln1g_ref, ln1b_ref,          # (1, 1, D)      f32
    wqkv_ref, bqkv_ref,          # (1, D, 3D) bf16, (1, 1, 3D) f32
    wo_ref, bo_ref,              # (1, D, D)  bf16, (1, 1, D) f32
    ln2g_ref, ln2b_ref,          # (1, 1, D)      f32
    w1_ref, b1_ref,              # (1, D, F)  bf16, (1, 1, F) f32
    w2_ref, b2_ref,              # (1, F, D)  bf16, (1, 1, D) f32
    lnfg_ref, lnfb_ref,          # (1, D)         f32
    hid_ref,                     # (B, S, D)      bf16  output (post final LN)
    x_scr,                       # VMEM (B*S, D)  f32   residual-stream carry
    *, num_heads, batch, seq,
):
    l = pl.program_id(0)
    B, S = batch, seq
    BS = B * S

    @pl.when(l == 0)
    def _():
        x_scr[...] = x_ref[...].reshape(BS, -1).astype(jnp.float32)

    x = x_scr[...]                               # (BS, D) f32
    D = x.shape[-1]
    H = num_heads
    Dh = D // H
    scale = 1.0 / float(Dh) ** 0.5

    # Additive causal bias, built once per layer (not per head); safe with the
    # row-max subtraction because the diagonal is always unmasked.
    row = jax.lax.broadcasted_iota(jnp.int32, (S, S), 0)
    col = jax.lax.broadcasted_iota(jnp.int32, (S, S), 1)
    bias = jnp.where(row >= col, 0.0, -1e30).astype(jnp.float32)

    # ---------------- multi-head causal self-attention (pre-LN) ---------------
    h = _layernorm(x, ln1g_ref[0], ln1b_ref[0]).astype(jnp.bfloat16)
    qkv = jnp.dot(h, wqkv_ref[0], preferred_element_type=jnp.float32) + bqkv_ref[0]

    # Scale q once (instead of scaling the f32 scores); bf16 operands, f32 acc.
    q_all = (qkv[:, 0:D] * scale).astype(jnp.bfloat16)          # (BS, D)
    k_all = qkv[:, D:2 * D].astype(jnp.bfloat16)
    v_all = qkv[:, 2 * D:3 * D].astype(jnp.bfloat16)

    # Per-head loop: 128-aligned lane slices fed straight into batched dots;
    # output projection accumulated per head into a single (BS, D) f32 buffer
    # (== concat(heads) @ Wo, without the (H,S,D) intermediate or lane concat).
    attn = None
    for hd in range(H):
        lo, hi = hd * Dh, (hd + 1) * Dh
        qh = q_all[:, lo:hi].reshape(B, S, Dh)
        kh = k_all[:, lo:hi].reshape(B, S, Dh)
        vh = v_all[:, lo:hi].reshape(B, S, Dh)
        s = jnp.einsum("bqd,bkd->bqk", qh, kh,
                       preferred_element_type=jnp.float32) + bias[None]
        s = s - jnp.max(s, axis=-1, keepdims=True)
        p = jnp.exp(s)
        p = p * pl.reciprocal(jnp.sum(p, axis=-1, keepdims=True), approx=True)
        o = jnp.einsum("bqk,bkd->bqd", p.astype(jnp.bfloat16), vh,
                       preferred_element_type=jnp.float32)       # (B, S, Dh)
        contrib = jnp.dot(o.reshape(BS, Dh).astype(jnp.bfloat16),
                          wo_ref[0, lo:hi, :],
                          preferred_element_type=jnp.float32)    # (BS, D)
        attn = contrib if attn is None else attn + contrib
    x = x + attn + bo_ref[0]

    # ------------------------------ feed-forward ------------------------------
    h2 = _layernorm(x, ln2g_ref[0], ln2b_ref[0]).astype(jnp.bfloat16)
    f = jnp.dot(h2, w1_ref[0], preferred_element_type=jnp.float32) + b1_ref[0]
    f = jax.nn.gelu(f, approximate=True)                         # f32 math
    f = jnp.dot(f.astype(jnp.bfloat16), w2_ref[0],
                preferred_element_type=jnp.float32) + b2_ref[0]
    x = x + f

    x_scr[...] = x

    @pl.when(l == pl.num_programs(0) - 1)
    def _():
        xn = _layernorm(x, lnfg_ref[...], lnfb_ref[...])
        hid_ref[...] = xn.reshape(B, S, D).astype(hid_ref.dtype)


# ------------------------- kernel 2: vocab projection -------------------------

def logits_kernel(hid_ref, wout_ref, bout_ref, out_ref):
    # hid (B, S, D) bf16, wout (D, TV) bf16, bout (1, TV) f32, out (B, S, TV) f32
    B, S, D = hid_ref.shape
    TV = out_ref.shape[-1]
    h = hid_ref[...].reshape(B * S, D)
    logits = jnp.dot(h, wout_ref[...], preferred_element_type=jnp.float32)
    out_ref[...] = (logits + bout_ref[...]).reshape(B, S, TV)


# ------------------------ one-time parameter preparation ----------------------

def prepare_params(params, *, vocab_tile=512):
    """One-time conversion: matmul weights -> bf16, LN params / biases reshaped,
    output projection padded to a vocab-tile multiple.  Call once, reuse across
    forwards (avoids per-call f32->bf16 re-casts and re-padding)."""
    bf16 = jnp.bfloat16
    L, D, threeD = params["wqkv"].shape
    F = params["w1"].shape[-1]
    V = params["wout"].shape[-1]
    TV = vocab_tile
    Vp = ((V + TV - 1) // TV) * TV
    wout_p = jnp.zeros((D, Vp), bf16).at[:, :V].set(params["wout"].astype(bf16))
    bout_p = jnp.zeros((1, Vp), jnp.float32).at[:, :V].set(
        params["bout"].reshape(1, V))
    return {
        "tok_emb": params["tok_emb"],
        "pos_emb": params["pos_emb"],
        "ln1_g": params["ln1_g"].reshape(L, 1, D),
        "ln1_b": params["ln1_b"].reshape(L, 1, D),
        "wqkv": params["wqkv"].astype(bf16),
        "bqkv": params["bqkv"].reshape(L, 1, threeD),
        "wo": params["wo"].astype(bf16),
        "bo": params["bo"].reshape(L, 1, D),
        "ln2_g": params["ln2_g"].reshape(L, 1, D),
        "ln2_b": params["ln2_b"].reshape(L, 1, D),
        "w1": params["w1"].astype(bf16),
        "b1": params["b1"].reshape(L, 1, F),
        "w2": params["w2"].astype(bf16),
        "b2": params["b2"].reshape(L, 1, D),
        "lnf_g": params["lnf_g"],
        "lnf_b": params["lnf_b"],
        "wout": wout_p,
        "bout": bout_p,
    }


# --------------------------------- wrapper ------------------------------------

def generative_transformer(indices, p, *, num_layers, num_heads, vocab,
                           vocab_tile=512):
    """indices: (B, S) int32. p: prepare_params() output. Returns (B, S, V) f32."""
    B, S = indices.shape
    D = p["tok_emb"].shape[1]
    L, H = num_layers, num_heads
    TV = vocab_tile
    Vp = p["wout"].shape[-1]

    # Glue: embedding gather + positional add in plain JAX (dropout = eval mode);
    # kernel input in bf16 (the f32 residual carry lives in VMEM scratch).
    x = (jnp.take(p["tok_emb"], indices, axis=0)
         + p["pos_emb"][None, :S, :]).astype(jnp.bfloat16)

    weight_args = (
        p["ln1_g"], p["ln1_b"],
        p["wqkv"], p["bqkv"],
        p["wo"], p["bo"],
        p["ln2_g"], p["ln2_b"],
        p["w1"], p["b1"],
        p["w2"], p["b2"],
        p["lnf_g"], p["lnf_b"],
    )

    def layer_spec(a):            # stream one layer's slice per grid step
        n = a.ndim - 1
        return pl.BlockSpec((1,) + tuple(a.shape[1:]),
                            lambda l, n=n: (l,) + (0,) * n)

    def shared_spec(a):           # final LayerNorm params (layer-independent)
        n = a.ndim
        return pl.BlockSpec(tuple(a.shape), lambda l, n=n: (0,) * n)

    in_specs = [pl.BlockSpec((B, S, D), lambda l: (0, 0, 0))]   # resident across L
    in_specs += [layer_spec(a) for a in weight_args[:-2]]
    in_specs += [shared_spec(a) for a in weight_args[-2:]]

    kernel = functools.partial(layer_kernel, num_heads=H, batch=B, seq=S)
    hid = pl.pallas_call(
        kernel,
        out_shape=jax.ShapeDtypeStruct((B, S, D), jnp.bfloat16),
        grid_spec=pltpu.PrefetchScalarGridSpec(
            num_scalar_prefetch=0,
            grid=(L,),                         # layer axis only: weights DMA'd once
            in_specs=in_specs,
            out_specs=pl.BlockSpec((B, S, D), lambda l: (0, 0, 0)),
            scratch_shapes=[pltpu.VMEM((B * S, D), jnp.float32)],
        ),
        compiler_params=pltpu.CompilerParams(
            # TODO(synk): on v7x, add a leading size-2 "parallel" axis (split an
            # N-dimension) so the second TensorCore is used; on v5e/v6e raise
            # vmem_limit_bytes toward ~100 MiB per generation.
            dimension_semantics=("arbitrary",),
            vmem_limit_bytes=48 * 1024 * 1024,
        ),
    )(x, *weight_args)

    # ---- vocab projection: lane-dense TV-wide blocks, wout streamed once ----
    logits = pl.pallas_call(
        logits_kernel,
        out_shape=jax.ShapeDtypeStruct((B, S, Vp), jnp.float32),
        grid_spec=pltpu.PrefetchScalarGridSpec(
            num_scalar_prefetch=0,
            grid=(Vp // TV,),
            in_specs=[
                pl.BlockSpec((B, S, D), lambda j: (0, 0, 0)),   # hid resident
                pl.BlockSpec((D, TV), lambda j: (0, j)),
                pl.BlockSpec((1, TV), lambda j: (0, j)),
            ],
            out_specs=pl.BlockSpec((B, S, TV), lambda j: (0, 0, j)),
        ),
        compiler_params=pltpu.CompilerParams(
            dimension_semantics=("parallel",),
            vmem_limit_bytes=48 * 1024 * 1024,
        ),
    )(hid, p["wout"], p["bout"])

    return logits[:, :, :vocab]


# ----------------------- deterministic parameter init ------------------------

def init_params(key, *, vocab, context, d_model, n_layers, d_ff):
    ks = jax.random.split(key, 10)
    std = 0.02
    L, D, F, V, C = n_layers, d_model, d_ff, vocab, context
    return {
        "tok_emb": jax.random.normal(ks[0], (V, D), jnp.float32) * std,
        "pos_emb": jax.random.normal(ks[1], (C, D), jnp.float32) * std,
        "ln1_g": jnp.ones((L, D), jnp.float32),
        "ln1_b": jnp.zeros((L, D), jnp.float32),
        "wqkv": jax.random.normal(ks[2], (L, D, 3 * D), jnp.float32) * std,
        "bqkv": jnp.zeros((L, 3 * D), jnp.float32),
        "wo": jax.random.normal(ks[3], (L, D, D), jnp.float32) * std,
        "bo": jnp.zeros((L, D), jnp.float32),
        "ln2_g": jnp.ones((L, D), jnp.float32),
        "ln2_b": jnp.zeros((L, D), jnp.float32),
        "w1": jax.random.normal(ks[4], (L, D, F), jnp.float32) * std,
        "b1": jnp.zeros((L, F), jnp.float32),
        "w2": jax.random.normal(ks[5], (L, F, D), jnp.float32) * std,
        "b2": jnp.zeros((L, D), jnp.float32),
        "lnf_g": jnp.ones((1, D), jnp.float32),
        "lnf_b": jnp.zeros((1, D), jnp.float32),
        "wout": jax.random.normal(ks[6], (D, V), jnp.float32) * std,
        "bout": jnp.zeros((1, V), jnp.float32),
    }


# ---------------------------- pure-JAX reference ------------------------------

def reference_forward(indices, p, *, num_layers, num_heads):
    tok_emb, pos_emb = p["tok_emb"], p["pos_emb"]
    B, S = indices.shape
    V, D = tok_emb.shape
    Dh = D // num_heads
    x = jnp.take(tok_emb, indices, axis=0) + pos_emb[None, :S, :]

    def ln(x, g, b, eps=1e-5):
        mu = x.mean(-1, keepdims=True)
        var = ((x - mu) ** 2).mean(-1, keepdims=True)
        return (x - mu) / jnp.sqrt(var + eps) * g + b

    mask = jnp.tril(jnp.ones((S, S), bool))
    for l in range(num_layers):
        h = ln(x, p["ln1_g"][l], p["ln1_b"][l])
        qkv = h @ p["wqkv"][l] + p["bqkv"][l]
        q, k, v = jnp.split(qkv, 3, axis=-1)
        q = q.reshape(B, S, num_heads, Dh).transpose(0, 2, 1, 3)
        k = k.reshape(B, S, num_heads, Dh).transpose(0, 2, 1, 3)
        v = v.reshape(B, S, num_heads, Dh).transpose(0, 2, 1, 3)
        s = jnp.einsum("bhqd,bhkd->bhqk", q, k) / jnp.sqrt(Dh)
        s = jnp.where(mask, s, -1e30)
        a = jax.nn.softmax(s, axis=-1)
        o = jnp.einsum("bhqk,bhkd->bhqd", a, v).transpose(0, 2, 1, 3).reshape(B, S, D)
        x = x + o @ p["wo"][l] + p["bo"][l]
        h = ln(x, p["ln2_g"][l], p["ln2_b"][l])
        f = jax.nn.gelu(h @ p["w1"][l] + p["b1"][l], approximate=True)
        x = x + f @ p["w2"][l] + p["b2"][l]
    x = ln(x, p["lnf_g"][0], p["lnf_b"][0])
    return x @ p["wout"] + p["bout"][0]


# ------------------------------------ main ------------------------------------

if __name__ == "__main__":
    # Small but TPU-aligned dims: D multiple of 128, head_dim = 128, S multiple of 8.
    VOCAB, CONTEXT, D_MODEL = 50, 128, 256
    N_HEADS, D_FF, N_LAYERS = 2, 512, 2
    B, S = 2, 64

    key = jax.random.PRNGKey(0)
    pkey, ikey = jax.random.split(key)
    params = init_params(
        pkey, vocab=VOCAB, context=CONTEXT, d_model=D_MODEL,
        n_layers=N_LAYERS, d_ff=D_FF,
    )
    indices = jax.random.randint(ikey, (B, S), 0, VOCAB, dtype=jnp.int32)

    # One-time weight cast / padding, then a jitted forward over prepared params.
    prepared = prepare_params(params)
    fwd = jax.jit(functools.partial(
        generative_transformer, num_layers=N_LAYERS, num_heads=N_HEADS,
        vocab=VOCAB))

    logits = jax.block_until_ready(fwd(indices, prepared))

    ref = reference_forward(indices, params, num_layers=N_LAYERS, num_heads=N_HEADS)
    assert logits.shape == (B, S, VOCAB)
    # bf16 inputs/matmul operands (f32 accumulation) vs f32 reference -> bf16
    # appropriate tolerance.
    max_err = jnp.max(jnp.abs(logits - ref))
    assert jnp.allclose(logits, ref, atol=4e-2, rtol=4e-2), (
        f"mismatch vs reference (max abs err {max_err})")

    print("KERNEL_OK")
</pallas_src>

<mosaic_0001>
module attributes {stable_mosaic.version = 11 : i64} {
  func.func @logits_kernel(%arg0: i32, %arg1: memref<2x64x256xbf16, #tpu.memory_space<vmem>>, %arg2: memref<256x512xbf16, #tpu.memory_space<vmem>>, %arg3: memref<1x512xf32, #tpu.memory_space<vmem>>, %arg4: memref<2x64x512xf32, #tpu.memory_space<vmem>>) attributes {dimension_semantics = [#tpu.dimension_semantics<parallel>], iteration_bounds = array<i64: 1>, scalar_prefetch = 0 : i64, scratch_operands = 0 : i64, tpu.core_type = #tpu.core_type<tc>, window_params = [{pipeline_mode = #tpu.pipeline_mode<synchronous>, transform_indices = @transform_0, window_bounds = array<i64: 2, 64, 256>}, {transform_indices = @transform_1, window_bounds = array<i64: 256, 512>}, {transform_indices = @transform_2, window_bounds = array<i64: 1, 512>}, {transform_indices = @transform_3, window_bounds = array<i64: 2, 64, 512>}]} {
    %c0 = arith.constant 0 : index
    %c0_0 = arith.constant 0 : index
    %c0_1 = arith.constant 0 : index
    %0 = vector.load %arg1[%c0, %c0_0, %c0_1] : memref<2x64x256xbf16, #tpu.memory_space<vmem>>, vector<2x64x256xbf16>
    %1 = vector.shape_cast %0 : vector<2x64x256xbf16> to vector<128x256xbf16>
    %c0_2 = arith.constant 0 : index
    %c0_3 = arith.constant 0 : index
    %2 = vector.load %arg2[%c0_2, %c0_3] : memref<256x512xbf16, #tpu.memory_space<vmem>>, vector<256x512xbf16>
    %cst = arith.constant dense<0.000000e+00> : vector<128x512xf32>
    %3 = tpu.matmul %1, %2, %cst {dimension_numbers = #tpu.dot_dimension_numbers<[1], [0], [0], [1], [0, 0, 1, 1], [], []>} : vector<128x256xbf16>, vector<256x512xbf16>, vector<128x512xf32> -> vector<128x512xf32>
    %c0_4 = arith.constant 0 : index
    %c0_5 = arith.constant 0 : index
    %4 = vector.load %arg3[%c0_4, %c0_5] : memref<1x512xf32, #tpu.memory_space<vmem>>, vector<1x512xf32>
    %5 = vector.broadcast %4 : vector<1x512xf32> to vector<128x512xf32>
    %6 = arith.addf %3, %5 : vector<128x512xf32>
    %7 = vector.shape_cast %6 : vector<128x512xf32> to vector<2x64x512xf32>
    %c0_6 = arith.constant 0 : index
    %c0_7 = arith.constant 0 : index
    %c0_8 = arith.constant 0 : index
    %8 = vector.load %arg4[%c0_6, %c0_7, %c0_8] : memref<2x64x512xf32, #tpu.memory_space<vmem>>, vector<2x64x512xf32>
    tpu.vector_store %arg4[%c0_6, %c0_7, %c0_8], %7 {strides = array<i32>} : memref<2x64x512xf32, #tpu.memory_space<vmem>>, vector<2x64x512xf32>,
    return
  }
  func.func @transform_0(%arg0: i32) -> (i32, i32, i32) {
    %c0_i32 = arith.constant 0 : i32
    %c0_i32_0 = arith.constant 0 : i32
    %c0_i32_1 = arith.constant 0 : i32
    %c0_i32_2 = arith.constant 0 : i32
    return %c0_i32, %c0_i32_0, %c0_i32_1 : i32, i32, i32
  }
  func.func @transform_1(%arg0: i32) -> (i32, i32) {
    %c0_i32 = arith.constant 0 : i32
    %c0_i32_0 = arith.constant 0 : i32
    return %c0_i32, %arg0 : i32, i32
  }
  func.func @transform_2(%arg0: i32) -> (i32, i32) {
    %c0_i32 = arith.constant 0 : i32
    %c0_i32_0 = arith.constant 0 : i32
    return %c0_i32, %arg0 : i32, i32
  }
  func.func @transform_3(%arg0: i32) -> (i32, i32, i32) {
    %c0_i32 = arith.constant 0 : i32
    %c0_i32_0 = arith.constant 0 : i32
    %c0_i32_1 = arith.constant 0 : i32
    return %c0_i32, %c0_i32_0, %arg0 : i32, i32, i32
  }
}

module attributes {stable_mosaic.version = 11 : i64} {
  func.func @layer_kernel(%arg0: i32, %arg1: memref<2x64x256xbf16, #tpu.memory_space<vmem>>, %arg2: memref<1x1x256xf32, #tpu.memory_space<vmem>>, %arg3: memref<1x1x256xf32, #tpu.memory_space<vmem>>, %arg4: memref<1x256x768xbf16, #tpu.memory_space<vmem>>, %arg5: memref<1x1x768xf32, #tpu.memory_space<vmem>>, %arg6: memref<1x256x256xbf16, #tpu.memory_space<vmem>>, %arg7: memref<1x1x256xf32, #tpu.memory_space<vmem>>, %arg8: memref<1x1x256xf32, #tpu.memory_space<vmem>>, %arg9: memref<1x1x256xf32, #tpu.memory_space<vmem>>, %arg10: memref<1x256x512xbf16, #tpu.memory_space<vmem>>, %arg11: memref<1x1x512xf32, #tpu.memory_space<vmem>>, %arg12: memref<1x512x256xbf16, #tpu.memory_space<vmem>>, %arg13: memref<1x1x256xf32, #tpu.memory_space<vmem>>, %arg14: memref<1x256xf32, #tpu.memory_space<vmem>>, %arg15: memref<1x256xf32, #tpu.memory_space<vmem>>, %arg16: memref<2x64x256xbf16, #tpu.memory_space<vmem>>, %arg17: memref<128x256xf32, #tpu.memory_space<vmem>>) attributes {dimension_semantics = [#tpu.dimension_semantics<arbitrary>], iteration_bounds = array<i64: 2>, scalar_prefetch = 0 : i64, scratch_operands = 1 : i64, tpu.core_type = #tpu.core_type<tc>, window_params = [{pipeline_mode = #tpu.pipeline_mode<synchronous>, transform_indices = @transform_0, window_bounds = array<i64: 2, 64, 256>}, {transform_indices = @transform_1, window_bounds = array<i64: 1, 1, 256>}, {transform_indices = @transform_2, window_bounds = array<i64: 1, 1, 256>}, {transform_indices = @transform_3, window_bounds = array<i64: 1, 256, 768>}, {transform_indices = @transform_4, window_bounds = array<i64: 1, 1, 768>}, {transform_indices = @transform_5, window_bounds = array<i64: 1, 256, 256>}, {transform_indices = @transform_6, window_bounds = array<i64: 1, 1, 256>}, {transform_indices = @transform_7, window_bounds = array<i64: 1, 1, 256>}, {transform_indices = @transform_8, window_bounds = array<i64: 1, 1, 256>}, {transform_indices = @transform_9, window_bounds = array<i64: 1, 256, 512>}, {transform_indices = @transform_10, window_bounds = array<i64: 1, 1, 512>}, {transform_indices = @transform_11, window_bounds = array<i64: 1, 512, 256>}, {transform_indices = @transform_12, window_bounds = array<i64: 1, 1, 256>}, {pipeline_mode = #tpu.pipeline_mode<synchronous>, transform_indices = @transform_13, window_bounds = array<i64: 1, 256>}, {pipeline_mode = #tpu.pipeline_mode<synchronous>, transform_indices = @transform_14, window_bounds = array<i64: 1, 256>}, {pipeline_mode = #tpu.pipeline_mode<synchronous>, transform_indices = @transform_15, window_bounds = array<i64: 2, 64, 256>}]} {
    %c0_i32 = arith.constant 0 : i32
    %0 = arith.cmpi eq, %arg0, %c0_i32 : i32
    %1 = arith.extui %0 : i1 to i32
    %c0_i32_0 = arith.constant 0 : i32
    %2 = arith.cmpi ne, %1, %c0_i32_0 : i32
    scf.if %2 {
      %c0_72 = arith.constant 0 : index
      %c0_73 = arith.constant 0 : index
      %c0_74 = arith.constant 0 : index
      %172 = vector.load %arg1[%c0_72, %c0_73, %c0_74] : memref<2x64x256xbf16, #tpu.memory_space<vmem>>, vector<2x64x256xbf16>
      %173 = vector.shape_cast %172 : vector<2x64x256xbf16> to vector<128x256xbf16>
      %174 = arith.extf %173 : vector<128x256xbf16> to vector<128x256xf32>
      %c0_75 = arith.constant 0 : index
      %c0_76 = arith.constant 0 : index
      %175 = vector.load %arg17[%c0_75, %c0_76] : memref<128x256xf32, #tpu.memory_space<vmem>>, vector<128x256xf32>
      tpu.vector_store %arg17[%c0_75, %c0_76], %174 {strides = array<i32>} : memref<128x256xf32, #tpu.memory_space<vmem>>, vector<128x256xf32>,
    } else {
    }
    %c0 = arith.constant 0 : index
    %c0_1 = arith.constant 0 : index
    %3 = vector.load %arg17[%c0, %c0_1] : memref<128x256xf32, #tpu.memory_space<vmem>>, vector<128x256xf32>
    %4 = tpu.iota {dimensions = array<i32: 0>} : vector<64x64xi32>
    %5 = tpu.iota {dimensions = array<i32: 1>} : vector<64x64xi32>
    %6 = arith.cmpi sge, %4, %5 : vector<64x64xi32>
    %cst = arith.constant 0.000000e+00 : f32
    %cst_2 = arith.constant -1.000000e+30 : f32
    %7 = vector.broadcast %cst : f32 to vector<64x64xf32>
    %8 = vector.broadcast %cst_2 : f32 to vector<64x64xf32>
    %9 = arith.select %6, %7, %8 : vector<64x64xi1>, vector<64x64xf32>
    %c0_3 = arith.constant 0 : index
    %c0_4 = arith.constant 0 : index
    %c0_5 = arith.constant 0 : index
    %10 = vector.load %arg2[%c0_3, %c0_4, %c0_5] : memref<1x1x256xf32, #tpu.memory_space<vmem>>, vector<1x1x256xf32>
    %11 = vector.shape_cast %10 : vector<1x1x256xf32> to vector<1x256xf32>
    %c0_6 = arith.constant 0 : index
    %c0_7 = arith.constant 0 : index
    %c0_8 = arith.constant 0 : index
    %12 = vector.load %arg3[%c0_6, %c0_7, %c0_8] : memref<1x1x256xf32, #tpu.memory_space<vmem>>, vector<1x1x256xf32>
    %13 = vector.shape_cast %12 : vector<1x1x256xf32> to vector<1x256xf32>
    %cst_9 = arith.constant dense<0.000000e+00> : vector<128xf32>
    %14 = vector.multi_reduction <add>, %3, %cst_9 [1] : vector<128x256xf32> to vector<128xf32>
    %15 = vector.shape_cast %14 : vector<128xf32> to vector<128x1xf32>
    %cst_10 = arith.constant 2.560000e+02 : f32
    %16 = vector.broadcast %cst_10 : f32 to vector<128x1xf32>
    %17 = arith.divf %15, %16 : vector<128x1xf32>
    %18 = vector.broadcast %17 : vector<128x1xf32> to vector<128x256xf32>
    %19 = arith.subf %3, %18 : vector<128x256xf32>
    %20 = arith.mulf %19, %19 : vector<128x256xf32>
    %cst_11 = arith.constant dense<0.000000e+00> : vector<128xf32>
    %21 = vector.multi_reduction <add>, %20, %cst_11 [1] : vector<128x256xf32> to vector<128xf32>
    %22 = vector.shape_cast %21 : vector<128xf32> to vector<128x1xf32>
    %cst_12 = arith.constant 2.560000e+02 : f32
    %23 = vector.broadcast %cst_12 : f32 to vector<128x1xf32>
    %24 = arith.divf %22, %23 : vector<128x1xf32>
    %25 = vector.broadcast %17 : vector<128x1xf32> to vector<128x256xf32>
    %26 = arith.subf %3, %25 : vector<128x256xf32>
    %cst_13 = arith.constant 9.99999974E-6 : f32
    %27 = vector.broadcast %cst_13 : f32 to vector<128x1xf32>
    %28 = arith.addf %24, %27 : vector<128x1xf32>
    %29 = math.rsqrt %28 : vector<128x1xf32>
    %30 = vector.broadcast %29 : vector<128x1xf32> to vector<128x256xf32>
    %31 = arith.mulf %26, %30 : vector<128x256xf32>
    %32 = vector.broadcast %11 : vector<1x256xf32> to vector<128x256xf32>
    %33 = arith.mulf %31, %32 : vector<128x256xf32>
    %34 = vector.broadcast %13 : vector<1x256xf32> to vector<128x256xf32>
    %35 = arith.addf %33, %34 : vector<128x256xf32>
    %36 = arith.truncf %35 : vector<128x256xf32> to vector<128x256xbf16>
    %c0_14 = arith.constant 0 : index
    %c0_15 = arith.constant 0 : index
    %c0_16 = arith.constant 0 : index
    %37 = vector.load %arg4[%c0_14, %c0_15, %c0_16] : memref<1x256x768xbf16, #tpu.memory_space<vmem>>, vector<1x256x768xbf16>
    %38 = vector.shape_cast %37 : vector<1x256x768xbf16> to vector<256x768xbf16>
    %cst_17 = arith.constant dense<0.000000e+00> : vector<128x768xf32>
    %39 = tpu.matmul %36, %38, %cst_17 {dimension_numbers = #tpu.dot_dimension_numbers<[1], [0], [0], [1], [0, 0, 1, 1], [], []>} : vector<128x256xbf16>, vector<256x768xbf16>, vector<128x768xf32> -> vector<128x768xf32>
    %c0_18 = arith.constant 0 : index
    %c0_19 = arith.constant 0 : index
    %c0_20 = arith.constant 0 : index
    %40 = vector.load %arg5[%c0_18, %c0_19, %c0_20] : memref<1x1x768xf32, #tpu.memory_space<vmem>>, vector<1x1x768xf32>
    %41 = vector.shape_cast %40 : vector<1x1x768xf32> to vector<1x768xf32>
    %42 = vector.broadcast %41 : vector<1x768xf32> to vector<128x768xf32>
    %43 = arith.addf %39, %42 : vector<128x768xf32>
    %44 = vector.extract_strided_slice %43 {offsets = [0, 0], sizes = [128, 256], strides = [1, 1]} : vector<128x768xf32> to vector<128x256xf32>
    %cst_21 = arith.constant 0.0883883461 : f32
    %45 = vector.broadcast %cst_21 : f32 to vector<128x256xf32>
    %46 = arith.mulf %44, %45 : vector<128x256xf32>
    %47 = arith.truncf %46 : vector<128x256xf32> to vector<128x256xbf16>
    %48 = vector.extract_strided_slice %43 {offsets = [0, 256], sizes = [128, 256], strides = [1, 1]} : vector<128x768xf32> to vector<128x256xf32>
    %49 = arith.truncf %48 : vector<128x256xf32> to vector<128x256xbf16>
    %50 = vector.extract_strided_slice %43 {offsets = [0, 512], sizes = [128, 256], strides = [1, 1]} : vector<128x768xf32> to vector<128x256xf32>
    %51 = arith.truncf %50 : vector<128x256xf32> to vector<128x256xbf16>
    %52 = vector.extract_strided_slice %47 {offsets = [0, 0], sizes = [128, 128], strides = [1, 1]} : vector<128x256xbf16> to vector<128x128xbf16>
    %53 = vector.shape_cast %52 : vector<128x128xbf16> to vector<2x64x128xbf16>
    %54 = vector.extract_strided_slice %49 {offsets = [0, 0], sizes = [128, 128], strides = [1, 1]} : vector<128x256xbf16> to vector<128x128xbf16>
    %55 = vector.shape_cast %54 : vector<128x128xbf16> to vector<2x64x128xbf16>
    %56 = vector.extract_strided_slice %51 {offsets = [0, 0], sizes = [128, 128], strides = [1, 1]} : vector<128x256xbf16> to vector<128x128xbf16>
    %57 = vector.shape_cast %56 : vector<128x128xbf16> to vector<2x64x128xbf16>
    "tpu.trace_start"() <{level = 10 : i32, message = "bqd,bkd->bqk"}> : () -> ()
    %cst_22 = arith.constant dense<0.000000e+00> : vector<2x64x64xf32>
    %58 = tpu.matmul %53, %55, %cst_22 {dimension_numbers = #tpu.dot_dimension_numbers<[2], [2], [1], [1], [0, 0, 0, 1, 1, 1], [0], [0]>} : vector<2x64x128xbf16>, vector<2x64x128xbf16>, vector<2x64x64xf32> -> vector<2x64x64xf32>
    "tpu.trace_stop"() : () -> ()
    %59 = vector.shape_cast %9 : vector<64x64xf32> to vector<1x64x64xf32>
    %60 = vector.broadcast %59 : vector<1x64x64xf32> to vector<2x64x64xf32>
    %61 = arith.addf %58, %60 : vector<2x64x64xf32>
    %cst_23 = arith.constant dense<0xFF800000> : vector<2x64xf32>
    %62 = vector.multi_reduction <maximumf>, %61, %cst_23 [2] : vector<2x64x64xf32> to vector<2x64xf32>
    %63 = vector.shape_cast %62 : vector<2x64xf32> to vector<2x64x1xf32>
    %64 = vector.broadcast %63 : vector<2x64x1xf32> to vector<2x64x64xf32>
    %65 = arith.subf %61, %64 : vector<2x64x64xf32>
    %66 = math.exp %65 : vector<2x64x64xf32>
    %cst_24 = arith.constant dense<0.000000e+00> : vector<2x64xf32>
    %67 = vector.multi_reduction <add>, %66, %cst_24 [2] : vector<2x64x64xf32> to vector<2x64xf32>
    %68 = vector.shape_cast %67 : vector<2x64xf32> to vector<2x64x1xf32>
    %69 = tpu.reciprocal %68 {approx = true} : vector<2x64x1xf32> -> vector<2x64x1xf32>
    %70 = vector.broadcast %69 : vector<2x64x1xf32> to vector<2x64x64xf32>
    %71 = arith.mulf %66, %70 : vector<2x64x64xf32>
    %72 = arith.truncf %71 : vector<2x64x64xf32> to vector<2x64x64xbf16>
    "tpu.trace_start"() <{level = 10 : i32, message = "bqk,bkd->bqd"}> : () -> ()
    %cst_25 = arith.constant dense<0.000000e+00> : vector<2x64x128xf32>
    %73 = tpu.matmul %72, %57, %cst_25 {dimension_numbers = #tpu.dot_dimension_numbers<[2], [1], [1], [2], [0, 0, 0, 1, 1, 2], [0], [0]>} : vector<2x64x64xbf16>, vector<2x64x128xbf16>, vector<2x64x128xf32> -> vector<2x64x128xf32>
    "tpu.trace_stop"() : () -> ()
    %74 = vector.shape_cast %73 : vector<2x64x128xf32> to vector<128x128xf32>
    %75 = arith.truncf %74 : vector<128x128xf32> to vector<128x128xbf16>
    %c0_26 = arith.constant 0 : index
    %c0_27 = arith.constant 0 : index
    %c0_28 = arith.constant 0 : index
    %76 = vector.load %arg6[%c0_26, %c0_27, %c0_28] : memref<1x256x256xbf16, #tpu.memory_space<vmem>>, vector<1x128x256xbf16>
    %77 = vector.shape_cast %76 : vector<1x128x256xbf16> to vector<128x256xbf16>
    %cst_29 = arith.constant dense<0.000000e+00> : vector<128x256xf32>
    %78 = tpu.matmul %75, %77, %cst_29 {dimension_numbers = #tpu.dot_dimension_numbers<[1], [0], [0], [1], [0, 0, 1, 1], [], []>} : vector<128x128xbf16>, vector<128x256xbf16>, vector<128x256xf32> -> vector<128x256xf32>
    %79 = vector.extract_strided_slice %47 {offsets = [0, 128], sizes = [128, 128], strides = [1, 1]} : vector<128x256xbf16> to vector<128x128xbf16>
    %80 = vector.shape_cast %79 : vector<128x128xbf16> to vector<2x64x128xbf16>
    %81 = vector.extract_strided_slice %49 {offsets = [0, 128], sizes = [128, 128], strides = [1, 1]} : vector<128x256xbf16> to vector<128x128xbf16>
    %82 = vector.shape_cast %81 : vector<128x128xbf16> to vector<2x64x128xbf16>
    %83 = vector.extract_strided_slice %51 {offsets = [0, 128], sizes = [128, 128], strides = [1, 1]} : vector<128x256xbf16> to vector<128x128xbf16>
    %84 = vector.shape_cast %83 : vector<128x128xbf16> to vector<2x64x128xbf16>
    "tpu.trace_start"() <{level = 10 : i32, message = "bqd,bkd->bqk"}> : () -> ()
    %cst_30 = arith.constant dense<0.000000e+00> : vector<2x64x64xf32>
    %85 = tpu.matmul %80, %82, %cst_30 {dimension_numbers = #tpu.dot_dimension_numbers<[2], [2], [1], [1], [0, 0, 0, 1, 1, 1], [0], [0]>} : vector<2x64x128xbf16>, vector<2x64x128xbf16>, vector<2x64x64xf32> -> vector<2x64x64xf32>
    "tpu.trace_stop"() : () -> ()
    %86 = vector.shape_cast %9 : vector<64x64xf32> to vector<1x64x64xf32>
    %87 = vector.broadcast %86 : vector<1x64x64xf32> to vector<2x64x64xf32>
    %88 = arith.addf %85, %87 : vector<2x64x64xf32>
    %cst_31 = arith.constant dense<0xFF800000> : vector<2x64xf32>
    %89 = vector.multi_reduction <maximumf>, %88, %cst_31 [2] : vector<2x64x64xf32> to vector<2x64xf32>
    %90 = vector.shape_cast %89 : vector<2x64xf32> to vector<2x64x1xf32>
    %91 = vector.broadcast %90 : vector<2x64x1xf32> to vector<2x64x64xf32>
    %92 = arith.subf %88, %91 : vector<2x64x64xf32>
    %93 = math.exp %92 : vector<2x64x64xf32>
    %cst_32 = arith.constant dense<0.000000e+00> : vector<2x64xf32>
    %94 = vector.multi_reduction <add>, %93, %cst_32 [2] : vector<2x64x64xf32> to vector<2x64xf32>
    %95 = vector.shape_cast %94 : vector<2x64xf32> to vector<2x64x1xf32>
    %96 = tpu.reciprocal %95 {approx = true} : vector<2x64x1xf32> -> vector<2x64x1xf32>
    %97 = vector.broadcast %96 : vector<2x64x1xf32> to vector<2x64x64xf32>
    %98 = arith.mulf %93, %97 : vector<2x64x64xf32>
    %99 = arith.truncf %98 : vector<2x64x64xf32> to vector<2x64x64xbf16>
    "tpu.trace_start"() <{level = 10 : i32, message = "bqk,bkd->bqd"}> : () -> ()
    %cst_33 = arith.constant dense<0.000000e+00> : vector<2x64x128xf32>
    %100 = tpu.matmul %99, %84, %cst_33 {dimension_numbers = #tpu.dot_dimension_numbers<[2], [1], [1], [2], [0, 0, 0, 1, 1, 2], [0], [0]>} : vector<2x64x64xbf16>, vector<2x64x128xbf16>, vector<2x64x128xf32> -> vector<2x64x128xf32>
    "tpu.trace_stop"() : () -> ()
    %101 = vector.shape_cast %100 : vector<2x64x128xf32> to vector<128x128xf32>
    %102 = arith.truncf %101 : vector<128x128xf32> to vector<128x128xbf16>
    %c0_34 = arith.constant 0 : index
    %c128 = arith.constant 128 : index
    %c0_35 = arith.constant 0 : index
    %103 = vector.load %arg6[%c0_34, %c128, %c0_35] : memref<1x256x256xbf16, #tpu.memory_space<vmem>>, vector<1x128x256xbf16>
    %104 = vector.shape_cast %103 : vector<1x128x256xbf16> to vector<128x256xbf16>
    %cst_36 = arith.constant dense<0.000000e+00> : vector<128x256xf32>
    %105 = tpu.matmul %102, %104, %cst_36 {dimension_numbers = #tpu.dot_dimension_numbers<[1], [0], [0], [1], [0, 0, 1, 1], [], []>} : vector<128x128xbf16>, vector<128x256xbf16>, vector<128x256xf32> -> vector<128x256xf32>
    %106 = arith.addf %78, %105 : vector<128x256xf32>
    %107 = arith.addf %3, %106 : vector<128x256xf32>
    %c0_37 = arith.constant 0 : index
    %c0_38 = arith.constant 0 : index
    %c0_39 = arith.constant 0 : index
    %108 = vector.load %arg7[%c0_37, %c0_38, %c0_39] : memref<1x1x256xf32, #tpu.memory_space<vmem>>, vector<1x1x256xf32>
    %109 = vector.shape_cast %108 : vector<1x1x256xf32> to vector<1x256xf32>
    %110 = vector.broadcast %109 : vector<1x256xf32> to vector<128x256xf32>
    %111 = arith.addf %107, %110 : vector<128x256xf32>
    %c0_40 = arith.constant 0 : index
    %c0_41 = arith.constant 0 : index
    %c0_42 = arith.constant 0 : index
    %112 = vector.load %arg8[%c0_40, %c0_41, %c0_42] : memref<1x1x256xf32, #tpu.memory_space<vmem>>, vector<1x1x256xf32>
    %113 = vector.shape_cast %112 : vector<1x1x256xf32> to vector<1x256xf32>
    %c0_43 = arith.constant 0 : index
    %c0_44 = arith.constant 0 : index
    %c0_45 = arith.constant 0 : index
    %114 = vector.load %arg9[%c0_43, %c0_44, %c0_45] : memref<1x1x256xf32, #tpu.memory_space<vmem>>, vector<1x1x256xf32>
    %115 = vector.shape_cast %114 : vector<1x1x256xf32> to vector<1x256xf32>
    %cst_46 = arith.constant dense<0.000000e+00> : vector<128xf32>
    %116 = vector.multi_reduction <add>, %111, %cst_46 [1] : vector<128x256xf32> to vector<128xf32>
    %117 = vector.shape_cast %116 : vector<128xf32> to vector<128x1xf32>
    %cst_47 = arith.constant 2.560000e+02 : f32
    %118 = vector.broadcast %cst_47 : f32 to vector<128x1xf32>
    %119 = arith.divf %117, %118 : vector<128x1xf32>
    %120 = vector.broadcast %119 : vector<128x1xf32> to vector<128x256xf32>
    %121 = arith.subf %111, %120 : vector<128x256xf32>
    %122 = arith.mulf %121, %121 : vector<128x256xf32>
    %cst_48 = arith.constant dense<0.000000e+00> : vector<128xf32>
    %123 = vector.multi_reduction <add>, %122, %cst_48 [1] : vector<128x256xf32> to vector<128xf32>
    %124 = vector.shape_cast %123 : vector<128xf32> to vector<128x1xf32>
    %cst_49 = arith.constant 2.560000e+02 : f32
    %125 = vector.broadcast %cst_49 : f32 to vector<128x1xf32>
    %126 = arith.divf %124, %125 : vector<128x1xf32>
    %127 = vector.broadcast %119 : vector<128x1xf32> to vector<128x256xf32>
    %128 = arith.subf %111, %127 : vector<128x256xf32>
    %cst_50 = arith.constant 9.99999974E-6 : f32
    %129 = vector.broadcast %cst_50 : f32 to vector<128x1xf32>
    %130 = arith.addf %126, %129 : vector<128x1xf32>
    %131 = math.rsqrt %130 : vector<128x1xf32>
    %132 = vector.broadcast %131 : vector<128x1xf32> to vector<128x256xf32>
    %133 = arith.mulf %128, %132 : vector<128x256xf32>
    %134 = vector.broadcast %113 : vector<1x256xf32> to vector<128x256xf32>
    %135 = arith.mulf %133, %134 : vector<128x256xf32>
    %136 = vector.broadcast %115 : vector<1x256xf32> to vector<128x256xf32>
    %137 = arith.addf %135, %136 : vector<128x256xf32>
    %138 = arith.truncf %137 : vector<128x256xf32> to vector<128x256xbf16>
    %c0_51 = arith.constant 0 : index
    %c0_52 = arith.constant 0 : index
    %c0_53 = arith.constant 0 : index
    %139 = vector.load %arg10[%c0_51, %c0_52, %c0_53] : memref<1x256x512xbf16, #tpu.memory_space<vmem>>, vector<1x256x512xbf16>
    %140 = vector.shape_cast %139 : vector<1x256x512xbf16> to vector<256x512xbf16>
    %cst_54 = arith.constant dense<0.000000e+00> : vector<128x512xf32>
    %141 = tpu.matmul %138, %140, %cst_54 {dimension_numbers = #tpu.dot_dimension_numbers<[1], [0], [0], [1], [0, 0, 1, 1], [], []>} : vector<128x256xbf16>, vector<256x512xbf16>, vector<128x512xf32> -> vector<128x512xf32>
    %c0_55 = arith.constant 0 : index
    %c0_56 = arith.constant 0 : index
    %c0_57 = arith.constant 0 : index
    %142 = vector.load %arg11[%c0_55, %c0_56, %c0_57] : memref<1x1x512xf32, #tpu.memory_space<vmem>>, vector<1x1x512xf32>
    %143 = vector.shape_cast %142 : vector<1x1x512xf32> to vector<1x512xf32>
    %144 = vector.broadcast %143 : vector<1x512xf32> to vector<128x512xf32>
    %145 = arith.addf %141, %144 : vector<128x512xf32>
    %146 = arith.mulf %145, %145 : vector<128x512xf32>
    %147 = arith.mulf %145, %146 : vector<128x512xf32>
    %cst_58 = arith.constant 4.471500e-02 : f32
    %148 = vector.broadcast %cst_58 : f32 to vector<128x512xf32>
    %149 = arith.mulf %148, %147 : vector<128x512xf32>
    %150 = arith.addf %145, %149 : vector<128x512xf32>
    %cst_59 = arith.constant 0.797884583 : f32
    %151 = vector.broadcast %cst_59 : f32 to vector<128x512xf32>
    %152 = arith.mulf %151, %150 : vector<128x512xf32>
    %153 = math.tanh %152 : vector<128x512xf32>
    %cst_60 = arith.constant 1.000000e+00 : f32
    %154 = vector.broadcast %cst_60 : f32 to vector<128x512xf32>
    %155 = arith.addf %154, %153 : vector<128x512xf32>
    %cst_61 = arith.constant 5.000000e-01 : f32
    %156 = vector.broadcast %cst_61 : f32 to vector<128x512xf32>
    %157 = arith.mulf %156, %155 : vector<128x512xf32>
    %158 = arith.mulf %145, %157 : vector<128x512xf32>
    %159 = arith.truncf %158 : vector<128x512xf32> to vector<128x512xbf16>
    %c0_62 = arith.constant 0 : index
    %c0_63 = arith.constant 0 : index
    %c0_64 = arith.constant 0 : index
    %160 = vector.load %arg12[%c0_62, %c0_63, %c0_64] : memref<1x512x256xbf16, #tpu.memory_space<vmem>>, vector<1x512x256xbf16>
    %161 = vector.shape_cast %160 : vector<1x512x256xbf16> to vector<512x256xbf16>
    %cst_65 = arith.constant dense<0.000000e+00> : vector<128x256xf32>
    %162 = tpu.matmul %159, %161, %cst_65 {dimension_numbers = #tpu.dot_dimension_numbers<[1], [0], [0], [1], [0, 0, 1, 1], [], []>} : vector<128x512xbf16>, vector<512x256xbf16>, vector<128x256xf32> -> vector<128x256xf32>
    %c0_66 = arith.constant 0 : index
    %c0_67 = arith.constant 0 : index
    %c0_68 = arith.constant 0 : index
    %163 = vector.load %arg13[%c0_66, %c0_67, %c0_68] : memref<1x1x256xf32, #tpu.memory_space<vmem>>, vector<1x1x256xf32>
    %164 = vector.shape_cast %163 : vector<1x1x256xf32> to vector<1x256xf32>
    %165 = vector.broadcast %164 : vector<1x256xf32> to vector<128x256xf32>
    %166 = arith.addf %162, %165 : vector<128x256xf32>
    %167 = arith.addf %111, %166 : vector<128x256xf32>
    %c0_69 = arith.constant 0 : index
    %c0_70 = arith.constant 0 : index
    %168 = vector.load %arg17[%c0_69, %c0_70] : memref<128x256xf32, #tpu.memory_space<vmem>>, vector<128x256xf32>
    tpu.vector_store %arg17[%c0_69, %c0_70], %167 {strides = array<i32>} : memref<128x256xf32, #tpu.memory_space<vmem>>, vector<128x256xf32>,
    %c1_i32 = arith.constant 1 : i32
    %169 = arith.cmpi eq, %arg0, %c1_i32 : i32
    %170 = arith.extui %169 : i1 to i32
    %c0_i32_71 = arith.constant 0 : i32
    %171 = arith.cmpi ne, %170, %c0_i32_71 : i32
    scf.if %171 {
      %c0_72 = arith.constant 0 : index
      %c0_73 = arith.constant 0 : index
      %172 = vector.load %arg14[%c0_72, %c0_73] : memref<1x256xf32, #tpu.memory_space<vmem>>, vector<1x256xf32>
      %c0_74 = arith.constant 0 : index
      %c0_75 = arith.constant 0 : index
      %173 = vector.load %arg15[%c0_74, %c0_75] : memref<1x256xf32, #tpu.memory_space<vmem>>, vector<1x256xf32>
      %cst_76 = arith.constant dense<0.000000e+00> : vector<128xf32>
      %174 = vector.multi_reduction <add>, %167, %cst_76 [1] : vector<128x256xf32> to vector<128xf32>
      %175 = vector.shape_cast %174 : vector<128xf32> to vector<128x1xf32>
      %cst_77 = arith.constant 2.560000e+02 : f32
      %176 = vector.broadcast %cst_77 : f32 to vector<128x1xf32>
      %177 = arith.divf %175, %176 : vector<128x1xf32>
      %178 = vector.broadcast %177 : vector<128x1xf32> to vector<128x256xf32>
      %179 = arith.subf %167, %178 : vector<128x256xf32>
      %180 = arith.mulf %179, %179 : vector<128x256xf32>
      %cst_78 = arith.constant dense<0.000000e+00> : vector<128xf32>
      %181 = vector.multi_reduction <add>, %180, %cst_78 [1] : vector<128x256xf32> to vector<128xf32>
      %182 = vector.shape_cast %181 : vector<128xf32> to vector<128x1xf32>
      %cst_79 = arith.constant 2.560000e+02 : f32
      %183 = vector.broadcast %cst_79 : f32 to vector<128x1xf32>
      %184 = arith.divf %182, %183 : vector<128x1xf32>
      %185 = vector.broadcast %177 : vector<128x1xf32> to vector<128x256xf32>
      %186 = arith.subf %167, %185 : vector<128x256xf32>
      %cst_80 = arith.constant 9.99999974E-6 : f32
      %187 = vector.broadcast %cst_80 : f32 to vector<128x1xf32>
      %188 = arith.addf %184, %187 : vector<128x1xf32>
      %189 = math.rsqrt %188 : vector<128x1xf32>
      %190 = vector.broadcast %189 : vector<128x1xf32> to vector<128x256xf32>
      %191 = arith.mulf %186, %190 : vector<128x256xf32>
      %192 = vector.broadcast %172 : vector<1x256xf32> to vector<128x256xf32>
      %193 = arith.mulf %191, %192 : vector<128x256xf32>
      %194 = vector.broadcast %173 : vector<1x256xf32> to vector<128x256xf32>
      %195 = arith.addf %193, %194 : vector<128x256xf32>
      %196 = vector.shape_cast %195 : vector<128x256xf32> to vector<2x64x256xf32>
      %197 = arith.truncf %196 : vector<2x64x256xf32> to vector<2x64x256xbf16>
      %c0_81 = arith.constant 0 : index
      %c0_82 = arith.constant 0 : index
      %c0_83 = arith.constant 0 : index
      %198 = vector.load %arg16[%c0_81, %c0_82, %c0_83] : memref<2x64x256xbf16, #tpu.memory_space<vmem>>, vector<2x64x256xbf16>
      tpu.vector_store %arg16[%c0_81, %c0_82, %c0_83], %197 {strides = array<i32>} : memref<2x64x256xbf16, #tpu.memory_space<vmem>>, vector<2x64x256xbf16>,
    } else {
    }
    return
  }
  func.func @transform_0(%arg0: i32) -> (i32, i32, i32) {
    %c0_i32 = arith.constant 0 : i32
    %c0_i32_0 = arith.constant 0 : i32
    %c0_i32_1 = arith.constant 0 : i32
    %c0_i32_2 = arith.constant 0 : i32
    return %c0_i32, %c0_i32_0, %c0_i32_1 : i32, i32, i32
  }
  func.func @transform_1(%arg0: i32) -> (i32, i32, i32) {
    %c0_i32 = arith.constant 0 : i32
    %c0_i32_0 = arith.constant 0 : i32
    %c0_i32_1 = arith.constant 0 : i32
    return %arg0, %c0_i32, %c0_i32_0 : i32, i32, i32
  }
  func.func @transform_2(%arg0: i32) -> (i32, i32, i32) {
    %c0_i32 = arith.constant 0 : i32
    %c0_i32_0 = arith.constant 0 : i32
    %c0_i32_1 = arith.constant 0 : i32
    return %arg0, %c0_i32, %c0_i32_0 : i32, i32, i32
  }
  func.func @transform_3(%arg0: i32) -> (i32, i32, i32) {
    %c0_i32 = arith.constant 0 : i32
    %c0_i32_0 = arith.constant 0 : i32
    %c0_i32_1 = arith.constant 0 : i32
    return %arg0, %c0_i32, %c0_i32_0 : i32, i32, i32
  }
  func.func @transform_4(%arg0: i32) -> (i32, i32, i32) {
    %c0_i32 = arith.constant 0 : i32
    %c0_i32_0 = arith.constant 0 : i32
    %c0_i32_1 = arith.constant 0 : i32
    return %arg0, %c0_i32, %c0_i32_0 : i32, i32, i32
  }
  func.func @transform_5(%arg0: i32) -> (i32, i32, i32) {
    %c0_i32 = arith.constant 0 : i32
    %c0_i32_0 = arith.constant 0 : i32
    %c0_i32_1 = arith.constant 0 : i32
    return %arg0, %c0_i32, %c0_i32_0 : i32, i32, i32
  }
  func.func @transform_6(%arg0: i32) -> (i32, i32, i32) {
    %c0_i32 = arith.constant 0 : i32
    %c0_i32_0 = arith.constant 0 : i32
    %c0_i32_1 = arith.constant 0 : i32
    return %arg0, %c0_i32, %c0_i32_0 : i32, i32, i32
  }
  func.func @transform_7(%arg0: i32) -> (i32, i32, i32) {
    %c0_i32 = arith.constant 0 : i32
    %c0_i32_0 = arith.constant 0 : i32
    %c0_i32_1 = arith.constant 0 : i32
    return %arg0, %c0_i32, %c0_i32_0 : i32, i32, i32
  }
  func.func @transform_8(%arg0: i32) -> (i32, i32, i32) {
    %c0_i32 = arith.constant 0 : i32
    %c0_i32_0 = arith.constant 0 : i32
    %c0_i32_1 = arith.constant 0 : i32
    return %arg0, %c0_i32, %c0_i32_0 : i32, i32, i32
  }
  func.func @transform_9(%arg0: i32) -> (i32, i32, i32) {
    %c0_i32 = arith.constant 0 : i32
    %c0_i32_0 = arith.constant 0 : i32
    %c0_i32_1 = arith.constant 0 : i32
    return %arg0, %c0_i32, %c0_i32_0 : i32, i32, i32
  }
  func.func @transform_10(%arg0: i32) -> (i32, i32, i32) {
    %c0_i32 = arith.constant 0 : i32
    %c0_i32_0 = arith.constant 0 : i32
    %c0_i32_1 = arith.constant 0 : i32
    return %arg0, %c0_i32, %c0_i32_0 : i32, i32, i32
  }
  func.func @transform_11(%arg0: i32) -> (i32, i32, i32) {
    %c0_i32 = arith.constant 0 : i32
    %c0_i32_0 = arith.constant 0 : i32
    %c0_i32_1 = arith.constant 0 : i32
    return %arg0, %c0_i32, %c0_i32_0 : i32, i32, i32
  }
  func.func @transform_12(%arg0: i32) -> (i32, i32, i32) {
    %c0_i32 = arith.constant 0 : i32
    %c0_i32_0 = arith.constant 0 : i32
    %c0_i32_1 = arith.constant 0 : i32
    return %arg0, %c0_i32, %c0_i32_0 : i32, i32, i32
  }
  func.func @transform_13(%arg0: i32) -> (i32, i32) {
    %c0_i32 = arith.constant 0 : i32
    %c0_i32_0 = arith.constant 0 : i32
    %c0_i32_1 = arith.constant 0 : i32
    return %c0_i32, %c0_i32_0 : i32, i32
  }
  func.func @transform_14(%arg0: i32) -> (i32, i32) {
    %c0_i32 = arith.constant 0 : i32
    %c0_i32_0 = arith.constant 0 : i32
    %c0_i32_1 = arith.constant 0 : i32
    return %c0_i32, %c0_i32_0 : i32, i32
  }
  func.func @transform_15(%arg0: i32) -> (i32, i32, i32) {
    %c0_i32 = arith.constant 0 : i32
    %c0_i32_0 = arith.constant 0 : i32
    %c0_i32_1 = arith.constant 0 : i32
    %c0_i32_2 = arith.constant 0 : i32
    return %c0_i32, %c0_i32_0, %c0_i32_1 : i32, i32, i32
  }
}

</mosaic_0001>

<bundles_post_ra>
// kernel: generative_transformer.3
= control target key start
LH: loop header
LB: loop body
LE: loop exit
PB: predicated region body
PF: predicated region fallthrough
CT: control target
= control target key end

     0   :  { %s1537_s1 = inlined_call_operand.vmem [shape: bf16[256,512], index: 1, kind: input, shape index: {}]   ;;  %s1538_s0 = inlined_call_operand.vmem [shape: bf16[2,64,256], index: 0, kind: input, shape index: {}]   ;;  %s1539_s2 = inlined_call_operand.vmem [shape: f32[1,512], index: 2, kind: input, shape index: {}]   ;;  %s1540_s3 = inlined_call_operand.vmem [shape: f32[2,64,512], index: 3, kind: output, shape index: {}]  }
   0x1   :  { %v890_v0 = vld [vmem:[%s1537_s1 + $0x4] ss:$16 sps:$4 sm:$0xff]   ;;  %v892_v1 = vld [vmem:[%s1537_s1 + $0xc] ss:$16 sps:$4 sm:$0xff]   ;;  %v894_v2 = vld [vmem:[%s1537_s1] ss:$16 sps:$4 sm:$0xff]  }
   0x2   :  { %516 = vmatprep.subr.bf16.mxu0 %v890_v0  ;;  %v895_v3 = vld [vmem:[%s1537_s1 + $0x8] ss:$16 sps:$4 sm:$0xff]   ;;  %629 = vmatprep.subr.bf16.mxu1 %v892_v1  ;;  %v896_v4 = vld [vmem:[%s1537_s1 + $0x24] ss:$16 sps:$4 sm:$0xff]   ;;  %v898_v5 = vld [vmem:[%s1537_s1 + $0x2c] ss:$16 sps:$4 sm:$0xff]  }
   0x3   :  { %517 = vmatpush1.bf16.msra.mxu0 %v894_v2  ;;  %630 = vmatpush1.bf16.msra.mxu1 %v895_v3  ;;  %v900_v6 = vld [vmem:[%s1537_s1 + $0x20] ss:$16 sps:$4 sm:$0xff]   ;;  %v901_v7 = vld [vmem:[%s1537_s1 + $0x28] ss:$16 sps:$4 sm:$0xff]   ;;  %v902_v8 = vld [vmem:[%s1537_s1 + $0x44] ss:$16 sps:$4 sm:$0xff]  }
   0x4   :  { %518 = vmatprep.subr.bf16.mxu0 %v896_v4  ;;  %631 = vmatprep.subr.bf16.mxu1 %v898_v5  ;;  %v904_v9 = vld [vmem:[%s1537_s1 + $0x4c] ss:$16 sps:$4 sm:$0xff]   ;;  %v906_v10 = vld [vmem:[%s1537_s1 + $0x40] ss:$16 sps:$4 sm:$0xff]   ;;  %v907_v11 = vld [vmem:[%s1537_s1 + $0x48] ss:$16 sps:$4 sm:$0xff]  }
   0x5   :  { %v908_v12 = vld [vmem:[%s1537_s1 + $0x64] ss:$16 sps:$4 sm:$0xff]   ;;  %v910_v13 = vld [vmem:[%s1537_s1 + $0x6c] ss:$16 sps:$4 sm:$0xff]   ;;  %v912_v14 = vld [vmem:[%s1537_s1 + $0x60] ss:$16 sps:$4 sm:$0xff]  }
   0x6   :  { %v913_v15 = vld [vmem:[%s1537_s1 + $0x68] ss:$16 sps:$4 sm:$0xff]   ;;  %v914_v16 = vld [vmem:[%s1537_s1 + $0x84] ss:$16 sps:$4 sm:$0xff]   ;;  %v916_v17 = vld [vmem:[%s1537_s1 + $0x8c] ss:$16 sps:$4 sm:$0xff]  }
   0x7   :  { %519 = vmatpush1.bf16.msra.mxu0 %v900_v6  ;;  %632 = vmatpush1.bf16.msra.mxu1 %v901_v7  ;;  %v918_v18 = vld [vmem:[%s1537_s1 + $0x80] ss:$16 sps:$4 sm:$0xff]   ;;  %v919_v19 = vld [vmem:[%s1537_s1 + $0x88] ss:$16 sps:$4 sm:$0xff]   ;;  %v920_v20 = vld [vmem:[%s1537_s1 + $0xa4] ss:$16 sps:$4 sm:$0xff]  }
   0x8   :  { %520 = vmatprep.subr.bf16.mxu0 %v902_v8  ;;  %633 = vmatprep.subr.bf16.mxu1 %v904_v9  ;;  %v922_v21 = vld [vmem:[%s1537_s1 + $0xac] ss:$16 sps:$4 sm:$0xff]   ;;  %v924_v22 = vld [vmem:[%s1537_s1 + $0xa0] ss:$16 sps:$4 sm:$0xff]   ;;  %v925_v23 = vld [vmem:[%s1537_s1 + $0xa8] ss:$16 sps:$4 sm:$0xff]  }
   0x9   :  { %v926_v24 = vld [vmem:[%s1537_s1 + $0xc4] ss:$16 sps:$4 sm:$0xff]   ;;  %v928_v25 = vld [vmem:[%s1537_s1 + $0xcc] ss:$16 sps:$4 sm:$0xff]   ;;  %v930_v26 = vld [vmem:[%s1537_s1 + $0xc0] ss:$16 sps:$4 sm:$0xff]  }
   0xa   :  { %v931_v27 = vld [vmem:[%s1537_s1 + $0xc8] ss:$16 sps:$4 sm:$0xff]   ;;  %v932_v28 = vld [vmem:[%s1537_s1 + $0xe4] ss:$16 sps:$4 sm:$0xff]   ;;  %v934_v29 = vld [vmem:[%s1537_s1 + $0xec] ss:$16 sps:$4 sm:$0xff]  }
   0xb   :  { %521 = vmatpush1.bf16.msra.mxu0 %v906_v10  ;;  %634 = vmatpush1.bf16.msra.mxu1 %v907_v11  ;;  %v936_v30 = vld [vmem:[%s1537_s1 + $0xe0] ss:$16 sps:$4 sm:$0xff]   ;;  %v937_v31 = vld [vmem:[%s1537_s1 + $0xe8] ss:$16 sps:$4 sm:$0xff]   ;;  %v938_v32 = vld [vmem:[%s1537_s1 + $0x104] ss:$16 sps:$4 sm:$0xff]  }
   0xc   :  { %522 = vmatprep.subr.bf16.mxu0 %v908_v12  ;;  %635 = vmatprep.subr.bf16.mxu1 %v910_v13  ;;  %v940_v33 = vld [vmem:[%s1537_s1 + $0x10c] ss:$16 sps:$4 sm:$0xff]   ;;  %v942_v34 = vld [vmem:[%s1537_s1 + $0x100] ss:$16 sps:$4 sm:$0xff]   ;;  %v943_v35 = vld [vmem:[%s1537_s1 + $0x108] ss:$16 sps:$4 sm:$0xff]  }
   0xd   :  { %v944_v36 = vld [vmem:[%s1537_s1 + $0x124] ss:$16 sps:$4 sm:$0xff]   ;;  %v946_v37 = vld [vmem:[%s1537_s1 + $0x12c] ss:$16 sps:$4 sm:$0xff]   ;;  %v948_v38 = vld [vmem:[%s1537_s1 + $0x120] ss:$16 sps:$4 sm:$0xff]  }
   0xe   :  { %v949_v39 = vld [vmem:[%s1537_s1 + $0x128] ss:$16 sps:$4 sm:$0xff]   ;;  %v950_v40 = vld [vmem:[%s1537_s1 + $0x144] ss:$16 sps:$4 sm:$0xff]   ;;  %v952_v41 = vld [vmem:[%s1537_s1 + $0x14c] ss:$16 sps:$4 sm:$0xff]  }
   0xf   :  { %523 = vmatpush1.bf16.msra.mxu0 %v912_v14  ;;  %636 = vmatpush1.bf16.msra.mxu1 %v913_v15  ;;  %v954_v42 = vld [vmem:[%s1537_s1 + $0x140] ss:$16 sps:$4 sm:$0xff]   ;;  %v955_v43 = vld [vmem:[%s1537_s1 + $0x148] ss:$16 sps:$4 sm:$0xff]   ;;  %v956_v44 = vld [vmem:[%s1537_s1 + $0x164] ss:$16 sps:$4 sm:$0xff]  }
  0x10   :  { %524 = vmatprep.subr.bf16.mxu0 %v914_v16  ;;  %637 = vmatprep.subr.bf16.mxu1 %v916_v17  ;;  %v958_v45 = vld [vmem:[%s1537_s1 + $0x16c] ss:$16 sps:$4 sm:$0xff]   ;;  %v960_v46 = vld [vmem:[%s1537_s1 + $0x160] ss:$16 sps:$4 sm:$0xff]   ;;  %v961_v47 = vld [vmem:[%s1537_s1 + $0x168] ss:$16 sps:$4 sm:$0xff]   ;;  %v96_v16 = vlaneseq }
  0x11   :  { %v988_v48 = vld [vmem:[%s1538_s0 + $0x4] ss:$8 sps:$4 sm:$0xff]   ;;  %v966_v51 = vld [vmem:[%s1537_s1 + $0x180] ss:$16 sps:$4 sm:$0xff]   ;;  %v967_v52 = vld [vmem:[%s1537_s1 + $0x188] ss:$16 sps:$4 sm:$0xff]  }
  0x12   :  { %v962_v49 = vld [vmem:[%s1537_s1 + $0x184] ss:$16 sps:$4 sm:$0xff]   ;;  %v964_v50 = vld [vmem:[%s1537_s1 + $0x18c] ss:$16 sps:$4 sm:$0xff]   ;;  %548 = vmatprep.mubr.bf16.mxu0 %v988_v48  ;;  %661 = vmatprep.mubr.bf16.mxu1 %v988_v48  ;;  %v972_v55 = vld [vmem:[%s1537_s1 + $0x1a0] ss:$16 sps:$4 sm:$0xff]  }
  0x13   :  { %525 = vmatpush1.bf16.msra.mxu0 %v918_v18  ;;  %638 = vmatpush1.bf16.msra.mxu1 %v919_v19  ;;  %v968_v53 = vld [vmem:[%s1537_s1 + $0x1a4] ss:$16 sps:$4 sm:$0xff]   ;;  %v970_v54 = vld [vmem:[%s1537_s1 + $0x1ac] ss:$16 sps:$4 sm:$0xff]   ;;  %v973_v56 = vld [vmem:[%s1537_s1 + $0x1a8] ss:$16 sps:$4 sm:$0xff]  }
  0x14   :  { %526 = vmatprep.subr.bf16.mxu0 %v920_v20  ;;  %639 = vmatprep.subr.bf16.mxu1 %v922_v21  ;;  %v974_v57 = vld [vmem:[%s1537_s1 + $0x1c4] ss:$16 sps:$4 sm:$0xff]   ;;  %v976_v58 = vld [vmem:[%s1537_s1 + $0x1cc] ss:$16 sps:$4 sm:$0xff]   ;;  %v978_v59 = vld [vmem:[%s1537_s1 + $0x1c0] ss:$16 sps:$4 sm:$0xff]  }
  0x15   :  { %v979_v60 = vld [vmem:[%s1537_s1 + $0x1c8] ss:$16 sps:$4 sm:$0xff]   ;;  %v980_v61 = vld [vmem:[%s1537_s1 + $0x1e4] ss:$16 sps:$4 sm:$0xff]   ;;  %v982_v62 = vld [vmem:[%s1537_s1 + $0x1ec] ss:$16 sps:$4 sm:$0xff]  }
  0x16   :  { %v984_v63 = vld [vmem:[%s1537_s1 + $0x1e0] ss:$16 sps:$4 sm:$0xff]   ;;  %v985_v0 = vld [vmem:[%s1537_s1 + $0x1e8] ss:$16 sps:$4 sm:$0xff]   ;;  %v989_v2 = vld [vmem:[%s1538_s0 + $0x14] ss:$8 sps:$4 sm:$0xff]  }
  0x17   :  { %527 = vmatpush1.bf16.msra.mxu0 %v924_v22  ;;  %640 = vmatpush1.bf16.msra.mxu1 %v925_v23  ;;  %v986_v1 = vld [vmem:[%s1538_s0] ss:$8 sps:$4 sm:$0xff]   ;;  %v991_v3 = vld [vmem:[%s1538_s0 + $0x10] ss:$8 sps:$4 sm:$0xff]   ;;  %v992_v4 = vld [vmem:[%s1538_s0 + $0x24] ss:$8 sps:$4 sm:$0xff]  }
  0x18   :  { %528 = vmatprep.subr.bf16.mxu0 %v926_v24  ;;  %641 = vmatprep.subr.bf16.mxu1 %v928_v25  ;;  %v994_v5 = vld [vmem:[%s1538_s0 + $0x20] ss:$8 sps:$4 sm:$0xff]   ;;  %v995_v6 = vld [vmem:[%s1538_s0 + $0x34] ss:$8 sps:$4 sm:$0xff]   ;;  %v997_v7 = vld [vmem:[%s1538_s0 + $0x30] ss:$8 sps:$4 sm:$0xff]  }
  0x19   :  { %v998_v8 = vld [vmem:[%s1538_s0 + $0x44] ss:$8 sps:$4 sm:$0xff]   ;;  %v1000_v9 = vld [vmem:[%s1538_s0 + $0x40] ss:$8 sps:$4 sm:$0xff]   ;;  %v1001_v10 = vld [vmem:[%s1538_s0 + $0x54] ss:$8 sps:$4 sm:$0xff]  }
  0x1a   :  { %v1003_v11 = vld [vmem:[%s1538_s0 + $0x50] ss:$8 sps:$4 sm:$0xff]   ;;  %v1004_v12 = vld [vmem:[%s1538_s0 + $0x64] ss:$8 sps:$4 sm:$0xff]   ;;  %v1006_v13 = vld [vmem:[%s1538_s0 + $0x60] ss:$8 sps:$4 sm:$0xff]  }
  0x1b   :  { %529 = vmatpush1.bf16.msra.mxu0 %v930_v26  ;;  %642 = vmatpush1.bf16.msra.mxu1 %v931_v27  ;;  %v1007_v14 = vld [vmem:[%s1538_s0 + $0x74] ss:$8 sps:$4 sm:$0xff]   ;;  %v1009_v15 = vld [vmem:[%s1538_s0 + $0x70] ss:$8 sps:$4 sm:$0xff]   ;;  %v97_v17 = vshrl.u32 %v96_v16, 7 }
  0x1c   :  { %530 = vmatprep.subr.bf16.mxu0 %v932_v28  ;;  %643 = vmatprep.subr.bf16.mxu1 %v934_v29  ;;  %v94_v20 = vld [vmem:[%s1539_s2] sm:$0xf] }
  0x1d   :  { %v98_v18 = vsub.s32 0, %v97_v17  ;;  %v106_v19 = vsub.s32 2, %v97_v17  ;;  %v102_v21 = vsub.s32 1, %v97_v17  ;;  %v110_v22 = vsub.s32 3, %v97_v17 }
  0x1f   :  { %531 = vmatpush1.bf16.msra.mxu0 %v936_v30  ;;  %644 = vmatpush1.bf16.msra.mxu1 %v937_v31  ;;  %v1273_v23 = vrot.slane %v94_v20, %v98_v18  ;;  %v1275_v24 = vrot.slane %v94_v20, %v106_v19  ;;  %v1277_v25 = vrot.slane %v94_v20, %v102_v21 }
  0x20   :  { %532 = vmatprep.subr.bf16.mxu0 %v938_v32  ;;  %645 = vmatprep.subr.bf16.mxu1 %v940_v33  ;;  %v1279_v26 = vrot.slane %v94_v20, %v110_v22 }
  0x23   :  { %533 = vmatpush1.bf16.msra.mxu0 %v942_v34  ;;  %646 = vmatpush1.bf16.msra.mxu1 %v943_v35 }
  0x24   :  { %534 = vmatprep.subr.bf16.mxu0 %v944_v36  ;;  %647 = vmatprep.subr.bf16.mxu1 %v946_v37 }
  0x27   :  { %535 = vmatpush1.bf16.msra.mxu0 %v948_v38  ;;  %648 = vmatpush1.bf16.msra.mxu1 %v949_v39 }
  0x28   :  { %536 = vmatprep.subr.bf16.mxu0 %v950_v40  ;;  %649 = vmatprep.subr.bf16.mxu1 %v952_v41 }
  0x2b   :  { %537 = vmatpush1.bf16.msra.mxu0 %v954_v42  ;;  %650 = vmatpush1.bf16.msra.mxu1 %v955_v43 }
  0x2c   :  { %538 = vmatprep.subr.bf16.mxu0 %v956_v44  ;;  %651 = vmatprep.subr.bf16.mxu1 %v958_v45 }
  0x2f   :  { %539 = vmatpush1.bf16.msra.mxu0 %v960_v46  ;;  %652 = vmatpush1.bf16.msra.mxu1 %v961_v47 }
  0x30   :  { %540 = vmatprep.subr.bf16.mxu0 %v962_v49  ;;  %653 = vmatprep.subr.bf16.mxu1 %v964_v50 }
  0x33   :  { %541 = vmatpush1.bf16.msra.mxu0 %v966_v51  ;;  %654 = vmatpush1.bf16.msra.mxu1 %v967_v52 }
  0x34   :  { %542 = vmatprep.subr.bf16.mxu0 %v968_v53  ;;  %655 = vmatprep.subr.bf16.mxu1 %v970_v54 }
  0x37   :  { %543 = vmatpush1.bf16.msra.mxu0 %v972_v55  ;;  %656 = vmatpush1.bf16.msra.mxu1 %v973_v56 }
  0x38   :  { %544 = vmatprep.subr.bf16.mxu0 %v974_v57  ;;  %657 = vmatprep.subr.bf16.mxu1 %v976_v58 }
  0x3b   :  { %545 = vmatpush1.bf16.msra.mxu0 %v978_v59  ;;  %658 = vmatpush1.bf16.msra.mxu1 %v979_v60 }
  0x3c   :  { %546 = vmatprep.subr.bf16.mxu0 %v980_v61  ;;  %659 = vmatprep.subr.bf16.mxu1 %v982_v62 }
  0x3f   :  { %547 = vmatpush1.bf16.msra.mxu0 %v984_v63  ;;  %660 = vmatpush1.bf16.msra.mxu1 %v985_v0 }
  0x42   :  { %549 = vmatmul.mubr.bf16.vlgmr.msra.gmra.mrb[0].mxu0 %v986_v1  ;;  %662 = vmatmul.mubr.bf16.vlgmr.msra.gmra.mrb[0].mxu1 %v986_v1 }
  0x43   :  { %558 = vmatprep.mubr.bf16.mxu0 %v989_v2  ;;  %671 = vmatprep.mubr.bf16.mxu1 %v989_v2 }
  0x4a   :  { %559 = vmatmul.mubr.bf16.gmra.mrb[4].mxu0 %v991_v3  ;;  %672 = vmatmul.mubr.bf16.gmra.mrb[4].mxu1 %v991_v3 }
  0x4b   :  { %568 = vmatprep.mubr.bf16.mxu0 %v992_v4  ;;  %681 = vmatprep.mubr.bf16.mxu1 %v992_v4 }
  0x52   :  { %569 = vmatmul.mubr.bf16.gmra.mrb[8].mxu0 %v994_v5  ;;  %682 = vmatmul.mubr.bf16.gmra.mrb[8].mxu1 %v994_v5 }
  0x53   :  { %578 = vmatprep.mubr.bf16.mxu0 %v995_v6  ;;  %691 = vmatprep.mubr.bf16.mxu1 %v995_v6 }
  0x5a   :  { %579 = vmatmul.mubr.bf16.gmra.mrb[12].mxu0 %v997_v7  ;;  %692 = vmatmul.mubr.bf16.gmra.mrb[12].mxu1 %v997_v7 }
  0x5b   :  { %588 = vmatprep.mubr.bf16.mxu0 %v998_v8  ;;  %701 = vmatprep.mubr.bf16.mxu1 %v998_v8 }
  0x62   :  { %589 = vmatmul.mubr.bf16.gmra.mrb[16].mxu0 %v1000_v9  ;;  %702 = vmatmul.mubr.bf16.gmra.mrb[16].mxu1 %v1000_v9 }
  0x63   :  { %598 = vmatprep.mubr.bf16.mxu0 %v1001_v10  ;;  %711 = vmatprep.mubr.bf16.mxu1 %v1001_v10 }
  0x6a   :  { %599 = vmatmul.mubr.bf16.gmra.mrb[20].mxu0 %v1003_v11  ;;  %712 = vmatmul.mubr.bf16.gmra.mrb[20].mxu1 %v1003_v11 }
  0x6b   :  { %608 = vmatprep.mubr.bf16.mxu0 %v1004_v12  ;;  %721 = vmatprep.mubr.bf16.mxu1 %v1004_v12 }
  0x72   :  { %609 = vmatmul.mubr.bf16.gmra.mrb[24].mxu0 %v1006_v13  ;;  %722 = vmatmul.mubr.bf16.gmra.mrb[24].mxu1 %v1006_v13 }
  0x73   :  { %618 = vmatprep.mubr.bf16.mxu0 %v1007_v14  ;;  %731 = vmatprep.mubr.bf16.mxu1 %v1007_v14 }
  0x7a   :  { %619 = vmatmul.mubr.bf16.gmra.mrb[28].mxu0 %v1009_v15  ;;  %732 = vmatmul.mubr.bf16.gmra.mrb[28].mxu1 %v1009_v15 }
 0x115   :  { %v550_v27 = vpop.f32.mrb[0].mxu0  ;;  %v663_v28 = vpop.f32.mrb[0].mxu1 }
 0x116   :  { %v551_v29 = vadd.f32 %v550_v27, %v1273_v23  ;;  %v664_v30 = vadd.f32 %v663_v28, %v1275_v24  ;;  %v552_v31 = vpop.f32.mrb[1].mxu0  ;;  %v665_v32 = vpop.f32.mrb[1].mxu1 }
 0x117   :  { %v553_v33 = vadd.f32 %v552_v31, %v1277_v25  ;;  %v666_v34 = vadd.f32 %v665_v32, %v1279_v26  ;;  %v554_v35 = vpop.f32.mrb[2].mxu0  ;;  %v667_v36 = vpop.f32.mrb[2].mxu1 }
 0x118   :  { %742 = vst [vmem:[%s1540_s3] sm:$0xff] %v551_v29  ;;  %744 = vst [vmem:[%s1540_s3 + $0x10] sm:$0xff] %v664_v30  ;;  %v555_v37 = vadd.f32 %v554_v35, %v1273_v23  ;;  %v668_v38 = vadd.f32 %v667_v36, %v1275_v24  ;;  %v556_v39 = vpop.f32.mrb[3].mxu0  ;;  %v669_v40 = vpop.f32.mrb[3].mxu1 }
 0x119   :  { %743 = vst [vmem:[%s1540_s3 + $0x8] sm:$0xff] %v553_v33  ;;  %745 = vst [vmem:[%s1540_s3 + $0x18] sm:$0xff] %v666_v34  ;;  %v557_v41 = vadd.f32 %v556_v39, %v1277_v25  ;;  %v670_v42 = vadd.f32 %v669_v40, %v1279_v26 }
 0x11a   :  { %746 = vst [vmem:[%s1540_s3 + $0x20] sm:$0xff] %v555_v37  ;;  %748 = vst [vmem:[%s1540_s3 + $0x30] sm:$0xff] %v668_v38 }
 0x11b   :  { %747 = vst [vmem:[%s1540_s3 + $0x28] sm:$0xff] %v557_v41  ;;  %749 = vst [vmem:[%s1540_s3 + $0x38] sm:$0xff] %v670_v42 }
 0x11d   :  { %v560_v43 = vpop.f32.mrb[4].mxu0  ;;  %v673_v44 = vpop.f32.mrb[4].mxu1 }
 0x11e   :  { %v561_v45 = vadd.f32 %v560_v43, %v1273_v23  ;;  %v674_v46 = vadd.f32 %v673_v44, %v1275_v24  ;;  %v562_v47 = vpop.f32.mrb[5].mxu0  ;;  %v675_v48 = vpop.f32.mrb[5].mxu1 }
 0x11f   :  { %v563_v49 = vadd.f32 %v562_v47, %v1277_v25  ;;  %v676_v50 = vadd.f32 %v675_v48, %v1279_v26  ;;  %v564_v51 = vpop.f32.mrb[6].mxu0  ;;  %v677_v52 = vpop.f32.mrb[6].mxu1 }
 0x120   :  { %750 = vst [vmem:[%s1540_s3 + $0x40] sm:$0xff] %v561_v45  ;;  %752 = vst [vmem:[%s1540_s3 + $0x50] sm:$0xff] %v674_v46  ;;  %v565_v53 = vadd.f32 %v564_v51, %v1273_v23  ;;  %v678_v54 = vadd.f32 %v677_v52, %v1275_v24  ;;  %v566_v55 = vpop.f32.mrb[7].mxu0  ;;  %v679_v56 = vpop.f32.mrb[7].mxu1 }
 0x121   :  { %751 = vst [vmem:[%s1540_s3 + $0x48] sm:$0xff] %v563_v49  ;;  %753 = vst [vmem:[%s1540_s3 + $0x58] sm:$0xff] %v676_v50  ;;  %v567_v57 = vadd.f32 %v566_v55, %v1277_v25  ;;  %v680_v58 = vadd.f32 %v679_v56, %v1279_v26 }
 0x122   :  { %754 = vst [vmem:[%s1540_s3 + $0x60] sm:$0xff] %v565_v53  ;;  %756 = vst [vmem:[%s1540_s3 + $0x70] sm:$0xff] %v678_v54 }
 0x123   :  { %755 = vst [vmem:[%s1540_s3 + $0x68] sm:$0xff] %v567_v57  ;;  %757 = vst [vmem:[%s1540_s3 + $0x78] sm:$0xff] %v680_v58 }
 0x125   :  { %v570_v59 = vpop.f32.mrb[8].mxu0  ;;  %v683_v60 = vpop.f32.mrb[8].mxu1 }
 0x126   :  { %v571_v61 = vadd.f32 %v570_v59, %v1273_v23  ;;  %v684_v62 = vadd.f32 %v683_v60, %v1275_v24  ;;  %v572_v63 = vpop.f32.mrb[9].mxu0  ;;  %v685_v0 = vpop.f32.mrb[9].mxu1 }
 0x127   :  { %v573_v1 = vadd.f32 %v572_v63, %v1277_v25  ;;  %v686_v2 = vadd.f32 %v685_v0, %v1279_v26  ;;  %v574_v3 = vpop.f32.mrb[10].mxu0  ;;  %v687_v4 = vpop.f32.mrb[10].mxu1 }
 0x128   :  { %758 = vst [vmem:[%s1540_s3 + $0x80] sm:$0xff] %v571_v61  ;;  %760 = vst [vmem:[%s1540_s3 + $0x90] sm:$0xff] %v684_v62  ;;  %v575_v5 = vadd.f32 %v574_v3, %v1273_v23  ;;  %v688_v6 = vadd.f32 %v687_v4, %v1275_v24  ;;  %v576_v7 = vpop.f32.mrb[11].mxu0  ;;  %v689_v8 = vpop.f32.mrb[11].mxu1 }
 0x129   :  { %759 = vst [vmem:[%s1540_s3 + $0x88] sm:$0xff] %v573_v1  ;;  %761 = vst [vmem:[%s1540_s3 + $0x98] sm:$0xff] %v686_v2  ;;  %v577_v9 = vadd.f32 %v576_v7, %v1277_v25  ;;  %v690_v10 = vadd.f32 %v689_v8, %v1279_v26 }
 0x12a   :  { %762 = vst [vmem:[%s1540_s3 + $0xa0] sm:$0xff] %v575_v5  ;;  %764 = vst [vmem:[%s1540_s3 + $0xb0] sm:$0xff] %v688_v6 }
 0x12b   :  { %763 = vst [vmem:[%s1540_s3 + $0xa8] sm:$0xff] %v577_v9  ;;  %765 = vst [vmem:[%s1540_s3 + $0xb8] sm:$0xff] %v690_v10 }
 0x12d   :  { %v580_v11 = vpop.f32.mrb[12].mxu0  ;;  %v693_v12 = vpop.f32.mrb[12].mxu1 }
 0x12e   :  { %v581_v13 = vadd.f32 %v580_v11, %v1273_v23  ;;  %v694_v14 = vadd.f32 %v693_v12, %v1275_v24  ;;  %v582_v15 = vpop.f32.mrb[13].mxu0  ;;  %v695_v16 = vpop.f32.mrb[13].mxu1 }
 0x12f   :  { %v583_v17 = vadd.f32 %v582_v15, %v1277_v25  ;;  %v696_v18 = vadd.f32 %v695_v16, %v1279_v26  ;;  %v584_v19 = vpop.f32.mrb[14].mxu0  ;;  %v697_v20 = vpop.f32.mrb[14].mxu1 }
 0x130   :  { %766 = vst [vmem:[%s1540_s3 + $0xc0] sm:$0xff] %v581_v13  ;;  %768 = vst [vmem:[%s1540_s3 + $0xd0] sm:$0xff] %v694_v14  ;;  %v585_v21 = vadd.f32 %v584_v19, %v1273_v23  ;;  %v698_v22 = vadd.f32 %v697_v20, %v1275_v24  ;;  %v586_v27 = vpop.f32.mrb[15].mxu0  ;;  %v699_v28 = vpop.f32.mrb[15].mxu1 }
 0x131   :  { %767 = vst [vmem:[%s1540_s3 + $0xc8] sm:$0xff] %v583_v17  ;;  %769 = vst [vmem:[%s1540_s3 + $0xd8] sm:$0xff] %v696_v18  ;;  %v587_v29 = vadd.f32 %v586_v27, %v1277_v25  ;;  %v700_v30 = vadd.f32 %v699_v28, %v1279_v26 }
 0x132   :  { %770 = vst [vmem:[%s1540_s3 + $0xe0] sm:$0xff] %v585_v21  ;;  %772 = vst [vmem:[%s1540_s3 + $0xf0] sm:$0xff] %v698_v22 }
 0x133   :  { %771 = vst [vmem:[%s1540_s3 + $0xe8] sm:$0xff] %v587_v29  ;;  %773 = vst [vmem:[%s1540_s3 + $0xf8] sm:$0xff] %v700_v30 }
 0x135   :  { %v590_v31 = vpop.f32.mrb[16].mxu0  ;;  %v703_v32 = vpop.f32.mrb[16].mxu1 }
 0x136   :  { %v591_v33 = vadd.f32 %v590_v31, %v1273_v23  ;;  %v704_v34 = vadd.f32 %v703_v32, %v1275_v24  ;;  %v592_v35 = vpop.f32.mrb[17].mxu0  ;;  %v705_v36 = vpop.f32.mrb[17].mxu1 }
 0x137   :  { %v593_v37 = vadd.f32 %v592_v35, %v1277_v25  ;;  %v706_v38 = vadd.f32 %v705_v36, %v1279_v26  ;;  %v594_v39 = vpop.f32.mrb[18].mxu0  ;;  %v707_v40 = vpop.f32.mrb[18].mxu1 }
 0x138   :  { %774 = vst [vmem:[%s1540_s3 + $0x100] sm:$0xff] %v591_v33  ;;  %776 = vst [vmem:[%s1540_s3 + $0x110] sm:$0xff] %v704_v34  ;;  %v595_v41 = vadd.f32 %v594_v39, %v1273_v23  ;;  %v708_v42 = vadd.f32 %v707_v40, %v1275_v24  ;;  %v596_v43 = vpop.f32.mrb[19].mxu0  ;;  %v709_v44 = vpop.f32.mrb[19].mxu1 }
 0x139   :  { %775 = vst [vmem:[%s1540_s3 + $0x108] sm:$0xff] %v593_v37  ;;  %777 = vst [vmem:[%s1540_s3 + $0x118] sm:$0xff] %v706_v38  ;;  %v597_v45 = vadd.f32 %v596_v43, %v1277_v25  ;;  %v710_v46 = vadd.f32 %v709_v44, %v1279_v26 }
 0x13a   :  { %778 = vst [vmem:[%s1540_s3 + $0x120] sm:$0xff] %v595_v41  ;;  %780 = vst [vmem:[%s1540_s3 + $0x130] sm:$0xff] %v708_v42 }
 0x13b   :  { %779 = vst [vmem:[%s1540_s3 + $0x128] sm:$0xff] %v597_v45  ;;  %781 = vst [vmem:[%s1540_s3 + $0x138] sm:$0xff] %v710_v46 }
 0x13d   :  { %v600_v47 = vpop.f32.mrb[20].mxu0  ;;  %v713_v48 = vpop.f32.mrb[20].mxu1 }
 0x13e   :  { %v601_v49 = vadd.f32 %v600_v47, %v1273_v23  ;;  %v714_v50 = vadd.f32 %v713_v48, %v1275_v24  ;;  %v602_v51 = vpop.f32.mrb[21].mxu0  ;;  %v715_v52 = vpop.f32.mrb[21].mxu1 }
 0x13f   :  { %v603_v53 = vadd.f32 %v602_v51, %v1277_v25  ;;  %v716_v54 = vadd.f32 %v715_v52, %v1279_v26  ;;  %v604_v55 = vpop.f32.mrb[22].mxu0  ;;  %v717_v56 = vpop.f32.mrb[22].mxu1 }
 0x140   :  { %782 = vst [vmem:[%s1540_s3 + $0x140] sm:$0xff] %v601_v49  ;;  %784 = vst [vmem:[%s1540_s3 + $0x150] sm:$0xff] %v714_v50  ;;  %v605_v57 = vadd.f32 %v604_v55, %v1273_v23  ;;  %v718_v58 = vadd.f32 %v717_v56, %v1275_v24  ;;  %v606_v59 = vpop.f32.mrb[23].mxu0  ;;  %v719_v60 = vpop.f32.mrb[23].mxu1 }
 0x141   :  { %783 = vst [vmem:[%s1540_s3 + $0x148] sm:$0xff] %v603_v53  ;;  %785 = vst [vmem:[%s1540_s3 + $0x158] sm:$0xff] %v716_v54  ;;  %v607_v61 = vadd.f32 %v606_v59, %v1277_v25  ;;  %v720_v62 = vadd.f32 %v719_v60, %v1279_v26 }
 0x142   :  { %786 = vst [vmem:[%s1540_s3 + $0x160] sm:$0xff] %v605_v57  ;;  %788 = vst [vmem:[%s1540_s3 + $0x170] sm:$0xff] %v718_v58 }
 0x143   :  { %787 = vst [vmem:[%s1540_s3 + $0x168] sm:$0xff] %v607_v61  ;;  %789 = vst [vmem:[%s1540_s3 + $0x178] sm:$0xff] %v720_v62 }
 0x145   :  { %v610_v63 = vpop.f32.mrb[24].mxu0  ;;  %v723_v0 = vpop.f32.mrb[24].mxu1 }
 0x146   :  { %v611_v1 = vadd.f32 %v610_v63, %v1273_v23  ;;  %v724_v2 = vadd.f32 %v723_v0, %v1275_v24  ;;  %v612_v3 = vpop.f32.mrb[25].mxu0  ;;  %v725_v4 = vpop.f32.mrb[25].mxu1 }
 0x147   :  { %v613_v5 = vadd.f32 %v612_v3, %v1277_v25  ;;  %v726_v6 = vadd.f32 %v725_v4, %v1279_v26  ;;  %v614_v7 = vpop.f32.mrb[26].mxu0  ;;  %v727_v8 = vpop.f32.mrb[26].mxu1 }
 0x148   :  { %790 = vst [vmem:[%s1540_s3 + $0x180] sm:$0xff] %v611_v1  ;;  %792 = vst [vmem:[%s1540_s3 + $0x190] sm:$0xff] %v724_v2  ;;  %v615_v9 = vadd.f32 %v614_v7, %v1273_v23  ;;  %v728_v10 = vadd.f32 %v727_v8, %v1275_v24  ;;  %v616_v11 = vpop.f32.mrb[27].mxu0  ;;  %v729_v12 = vpop.f32.mrb[27].mxu1 }
 0x149   :  { %791 = vst [vmem:[%s1540_s3 + $0x188] sm:$0xff] %v613_v5  ;;  %793 = vst [vmem:[%s1540_s3 + $0x198] sm:$0xff] %v726_v6  ;;  %v617_v13 = vadd.f32 %v616_v11, %v1277_v25  ;;  %v730_v14 = vadd.f32 %v729_v12, %v1279_v26 }
 0x14a   :  { %794 = vst [vmem:[%s1540_s3 + $0x1a0] sm:$0xff] %v615_v9  ;;  %796 = vst [vmem:[%s1540_s3 + $0x1b0] sm:$0xff] %v728_v10 }
 0x14b   :  { %795 = vst [vmem:[%s1540_s3 + $0x1a8] sm:$0xff] %v617_v13  ;;  %797 = vst [vmem:[%s1540_s3 + $0x1b8] sm:$0xff] %v730_v14 }
 0x14d   :  { %v620_v15 = vpop.f32.mrb[28].mxu0  ;;  %v733_v16 = vpop.f32.mrb[28].mxu1 }
 0x14e   :  { %v621_v17 = vadd.f32 %v620_v15, %v1273_v23  ;;  %v734_v18 = vadd.f32 %v733_v16, %v1275_v24  ;;  %v622_v19 = vpop.f32.mrb[29].mxu0  ;;  %v735_v20 = vpop.f32.mrb[29].mxu1 }
 0x14f   :  { %v623_v21 = vadd.f32 %v622_v19, %v1277_v25  ;;  %v736_v22 = vadd.f32 %v735_v20, %v1279_v26  ;;  %v624_v27 = vpop.f32.mrb[30].mxu0  ;;  %v737_v28 = vpop.f32.mrb[30].mxu1 }
 0x150   :  { %798 = vst [vmem:[%s1540_s3 + $0x1c0] sm:$0xff] %v621_v17  ;;  %800 = vst [vmem:[%s1540_s3 + $0x1d0] sm:$0xff] %v734_v18  ;;  %v625_v29 = vadd.f32 %v624_v27, %v1273_v23  ;;  %v738_v30 = vadd.f32 %v737_v28, %v1275_v24  ;;  %v626_v31 = vpop.f32.mrb[31].mxu0  ;;  %v739_v32 = vpop.f32.mrb[31].mxu1 }
 0x151   :  { %799 = vst [vmem:[%s1540_s3 + $0x1c8] sm:$0xff] %v623_v21  ;;  %801 = vst [vmem:[%s1540_s3 + $0x1d8] sm:$0xff] %v736_v22  ;;  %v627_v33 = vadd.f32 %v626_v31, %v1277_v25  ;;  %v740_v34 = vadd.f32 %v739_v32, %v1279_v26 }
 0x152   :  { %802 = vst [vmem:[%s1540_s3 + $0x1e0] sm:$0xff] %v625_v29  ;;  %804 = vst [vmem:[%s1540_s3 + $0x1f0] sm:$0xff] %v738_v30 }
 0x153   :  { %803 = vst [vmem:[%s1540_s3 + $0x1e8] sm:$0xff] %v627_v33  ;;  %805 = vst [vmem:[%s1540_s3 + $0x1f8] sm:$0xff] %v740_v34 }

// kernel: generative_transformer.2
= control target key start
LH: loop header
LB: loop body
LE: loop exit
PB: predicated region body
PF: predicated region fallthrough
CT: control target
= control target key end

     0   :  { %s12021_s0 = inlined_call_operand.vmem [shape: bf16[2,64,256], index: 0, kind: input, shape index: {}]   ;;  %s12022_s1 = inlined_call_operand.vmem [shape: f32[2,1,256], index: 1, kind: input, shape index: {}]   ;;  %s12023_s2 = inlined_call_operand.vmem [shape: f32[2,1,256], index: 2, kind: input, shape index: {}]   ;;  %s12024_s3 = inlined_call_operand.vmem [shape: bf16[2,256,768], index: 3, kind: input, shape index: {}]   ;;  %s12025_s4 = inlined_call_operand.vmem [shape: f32[2,1,768], index: 4, kind: input, shape index: {}]   ;;  %s12026_s5 = inlined_call_operand.vmem [shape: bf16[2,256,256], index: 5, kind: input, shape index: {}]   ;;  %s12027_s6 = inlined_call_operand.hbm [shape: f32[2,1,256], index: 6, kind: input, shape index: {}]   ;;  %s12028_s7 = inlined_call_operand.vmem [shape: f32[2,1,256], index: 7, kind: input, shape index: {}]   ;;  %s12029_s8 = inlined_call_operand.vmem [shape: f32[2,1,256], index: 8, kind: input, shape index: {}]   ;;  %s12030_s9 = inlined_call_operand.vmem [shape: bf16[2,256,512], index: 9, kind: input, shape index: {}]   ;;  %s12031_s10 = inlined_call_operand.hbm [shape: f32[2,1,512], index: 10, kind: input, shape index: {}]   ;;  %s12032_s11 = inlined_call_operand.hbm [shape: bf16[2,512,256], index: 11, kind: input, shape index: {}]   ;;  %s12033_s12 = inlined_call_operand.hbm [shape: f32[2,1,256], index: 12, kind: input, shape index: {}]   ;;  %s12034_s13 = inlined_call_operand.vmem [shape: f32[1,256], index: 13, kind: input, shape index: {}]   ;;  %s12035_s14 = inlined_call_operand.vmem [shape: f32[1,256], index: 14, kind: input, shape index: {}]   ;;  %s12036_s15 = inlined_call_operand.vmem [shape: bf16[2,64,256], index: 15, kind: output, shape index: {}]  }
   0x1   :  { %12101 = sst [smem:[#allocation51_spill]] %s12021_s0 }
   0x2   :  { %12102 = sst [smem:[#allocation52_spill]] %s12024_s3 }
   0x3   :  { %12103 = sst [smem:[#allocation53_spill]] %s12027_s6 }
   0x4   :  { %12104 = sst [smem:[#allocation54_spill]] %s12030_s9 }
   0x5   :  { %12105 = sst [smem:[#allocation55_spill]] %s12031_s10 }
   0x6   :  { %12106 = sst [smem:[#allocation56_spill]] %s12032_s11 }
   0x7   :  { %12107 = sst [smem:[#allocation57_spill]] %s12033_s12 }
   0x8   :  { %12108 = sst [smem:[#allocation58_spill]] %s12034_s13 }
   0x9   :  { %12109 = sst [smem:[#allocation59_spill]] %s12035_s14 }
   0xa   :  { %12110 = sst [smem:[#allocation60_spill]] %s12036_s15 }
   0xb   :  { %20 = vsyncpa [#allocation4], 0 }
   0xc   :  { %22 = vsyncpa [#allocation4 + $0x1], 0 }
   0xd   :  { %23 = vsyncpa [#allocation6], 0 }
   0xe   :  { %25 = vsyncpa [#allocation6 + $0x1], 0 }
   0xf   :  { %26 = vsyncpa [#allocation9], 0 }
  0x10   :  { %28 = vsyncpa [#allocation9 + $0x1], 0  ;;  %s8393_s18 = smov 0   ;;  %s8395_s19 = smov 0  }
  0x11   :  { %s8397_s20 = smov 0   ;;  %s8399_s21 = smov 0  }
  0x12 LB: > { %12111 = sst [smem:[#allocation13_spill]] %s8295_s19  ;;  %s8412_s22 = sadd.s32 4294967295, %s8303_s21   ;;  %s8303_s21 = sphi %s8399_s21, %s12232_s21   ;;  %s8299_s20 = sphi %s8397_s20, %s12235_s20   ;;  %s8295_s19 = sphi %s8395_s19, %s12234_s19   ;;  %s8291_s18 = sphi %s8393_s18, %s12233_s18  }
  0x13   : > { %12112 = sst [smem:[#allocation14_spill]] %s8299_s20  ;;  %s8415_s23 = sadd.s32 1, %s8303_s21  }
  0x14   : > { %12113 = sst [smem:[#allocation15_spill]] %s8415_s23  ;;  %s189_s24 = ssub.s32 %s8303_s21, %s8415_s23 }
  0x15   : > { %s192_s25 = sadd.s32 1, %s8299_s20  ;;  %p190_p0 = scmp.eq.s32.totalorder %s189_s24, 0 }
  0x16   : > { %p199_p1 = scmp.ne.s32.totalorder %s8299_s20, %s8295_s19  ;;  %p200_p2 = scmp.eq.s32.totalorder %s8303_s21, 0 }
  0x17   : > { %p205_p3 = scmp.ne.s32.totalorder %s8295_s19, %s8291_s18  ;;  %p206_p5 = scmp.eq.s32.totalorder %s8412_s22, 0 }
  0x18   : > { %s8425_s26 = scalar_select %p190_p0, %s8299_s20, %s192_s25  }
  0x19   : > { %p201_p4 = por %p200_p2, %p199_p1  ;;  %p7336_p6 = scmp.lt.s32.totalorder %s8303_s21, 2 }
  0x1a   : > { %12114 = sst [smem:[#allocation16_spill]] %s8425_s26  ;;  %p8429_p7 = por %p206_p5, %p205_p3 }
  0x1b   : > { %s8434_s28 = sand.u32 1, %s8299_s20   ;;  %p8436_p8 = pnand %p7336_p6, %p201_p4 }
  0x1c   : > { %s12115_s27 = scalar_select %p8429_p7, 1, 0 }
  0x1d   : > { %s12116_s29 = scalar_select %p8436_p8, 1, 0 }
  0x1e   : > { %s535_s30 = sand.u32 1, %s8303_s21   ;;  %s6688_s16 = sshll.u32 %s8434_s28, 2 }
  0x1f   : > { %s7004_s17 = sshll.u32 %s8303_s21, 6  ;;  %s539_s18 = scalar_lea.vmem [#allocation5], %s6688_s16 }
  0x20   : > { %s547_s24 = sshll.u32 %s539_s18, 4  ;;  %s12117_s10 = sld [smem:[#allocation55_spill]]  ;;  %s8448_s24 = int_to_ptr.vmem [resolvable:$true] %s547_s24 }
  0x21   : > { %s8450_s20 = scalar_lea.sflag [#allocation6], %s535_s30  ;;  %p8456_p10 = pneg %p8436_p8 }
  0x26   : > { %s8446_s23 = scalar_lea.hbm %s12117_s10, %s7004_s17  ;;  %s8146_s17 = scalar_lea.hbm %s12117_s10, 128 }
  0x27   : > { %s8141_s15 = scalar_lea.hbm %s8446_s23, 64  ;;  %p8147_p13 = scmp.lt.u32.totalorder %s8446_s23, %s12117_s10 }
  0x28   : > { %p8142_p9 = scmp.ne.s32.totalorder %s8446_s23, %s8141_s15  ;;  %p8148_p0 = scmp.lt.u32.totalorder %s8146_s17, %s8141_s15 }
  0x29   : > { %p8150_p2 = scmp.lt.u32.totalorder %s8141_s15, %s8446_s23 }
  0x2a   : > { %p8144_p11 = pnand %p8456_p10, %p8142_p9  ;;  %p8149_p1 = por %p8148_p0, %p8147_p13 }
  0x2c   : > { %p8145_p12 = pneg %p8144_p11  ;;  %p8151_p3 = por %p8150_p2, %p8149_p1 }
  0x2e   : > { %p8152_p4 = pnand %p8151_p3, %p8145_p12 }
  0x30   : > { %8155 = shalt.err (!%p8152_p4)
}
  0x31   : > { %s8156_s30 = scalar_lea.vmem %s8448_s24, 64  ;;  %s8305_s26 = smov [#allocation5]  }
  0x32   : > { %p8157_p5 = scmp.ne.s32.totalorder %s8448_s24, %s8156_s30  ;;  %s8161_s16 = sshll.u32 %s8305_s26, 4  ;;  %s8162_s16 = int_to_ptr.vmem [resolvable:$false] %s8161_s16 }
  0x33   : > { %s8163_s18 = scalar_lea.vmem %s8162_s16, 128  ;;  %p8164_p11 = scmp.lt.s32.totalorder %s8448_s24, %s8162_s16 }
  0x34   : > { %p8159_p6 = pnand %p8157_p5, %p8456_p10  ;;  %p8165_p7 = scmp.lt.s32.totalorder %s8163_s18, %s8156_s30 }
  0x36   : > { %p8160_p9 = pneg %p8159_p6  ;;  %p8166_p13 = por %p8165_p7, %p8164_p11 }
  0x38   : > { %p8167_p0 = pnand %p8166_p13, %p8160_p9 }
  0x3a   : > { %8170 = shalt.err (!%p8167_p0)
}
  0x3b   : > { %7329 = dma.hbm_to_vmem [thread:$0]  (!%p8436_p8), %s8446_s23, 64, %s8448_s24, %s8450_s20  }
  0x3c   : > { %p6697_p12 = scmp.ge.s32.totalorder %s8303_s21, 1  ;;  %p592_p1 = scmp.lt.s32.totalorder %s8303_s21, 3 }
  0x3d   : > { %s12042_s15 = sshll.u32 %s8434_s28, 1  ;;  %s12044_s25 = sshll.u32 %s8303_s21, 5 }
  0x3e   : > { %p8483_p7 = pnand %p6697_p12, %p592_p1  ;;  %s498_s30 = scalar_lea.vmem [#allocation3], %s12042_s15 }
  0x3f   : > { %s506_s26 = sshll.u32 %s498_s30, 4  ;;  %s12120_s6 = sld [smem:[#allocation53_spill]]  ;;  %s507_s26 = int_to_ptr.vmem [resolvable:$true] %s506_s26 }
  0x40   : > { %s12119_s17 = scalar_select %p8483_p7, 1, 0 }
  0x41   : > { %s495_s23 = scalar_lea.sflag [#allocation4], %s8434_s28 }
  0x45   : > { %s8495_s10 = scalar_lea.hbm %s12120_s6, %s12044_s25  ;;  %s8176_s30 = scalar_lea.hbm %s12120_s6, 64 }
  0x46   : > { %s8171_s24 = scalar_lea.hbm %s8495_s10, 32  ;;  %p8177_p5 = scmp.lt.u32.totalorder %s8495_s10, %s12120_s6 }
  0x47   : > { %p8172_p2 = scmp.ne.s32.totalorder %s8495_s10, %s8171_s24  ;;  %p8178_p6 = scmp.lt.u32.totalorder %s8176_s30, %s8171_s24 }
  0x48   : > { %p8180_p11 = scmp.lt.u32.totalorder %s8171_s24, %s8495_s10 }
  0x49   : > { %p8174_p3 = pnand %p8172_p2, %p8456_p10  ;;  %p8179_p9 = por %p8178_p6, %p8177_p5 }
  0x4b   : > { %p8175_p4 = pneg %p8174_p3  ;;  %p8181_p13 = por %p8180_p11, %p8179_p9 }
  0x4d   : > { %p8182_p0 = pnand %p8181_p13, %p8175_p4 }
  0x4f   : > { %8185 = shalt.err (!%p8182_p0)
}
  0x50   : > { %s8186_s16 = scalar_lea.vmem %s507_s26, 32  ;;  %s8306_s18 = smov [#allocation3]  }
  0x51   : > { %p8187_p12 = scmp.ne.s32.totalorder %s507_s26, %s8186_s16  ;;  %s8191_s25 = sshll.u32 %s8306_s18, 4  ;;  %s8192_s25 = int_to_ptr.vmem [resolvable:$false] %s8191_s25 }
  0x52   : > { %s8193_s13 = scalar_lea.vmem %s8192_s25, 64  ;;  %p8194_p3 = scmp.lt.s32.totalorder %s507_s26, %s8192_s25 }
  0x53   : > { %p8189_p1 = pnand %p8187_p12, %p8456_p10  ;;  %p8195_p7 = scmp.lt.s32.totalorder %s8193_s13, %s8186_s16 }
  0x55   : > { %p8190_p2 = pneg %p8189_p1  ;;  %p8196_p8 = por %p8195_p7, %p8194_p3 }
  0x57   : > { %p8197_p5 = pnand %p8196_p8, %p8190_p2 }
  0x59   : > { %8200 = shalt.err (!%p8197_p5)
}
  0x5a   : > { %p12121_p6 = scmp.ne.s32.totalorder %s12116_s29, 0  ;;  %s6691_s0 = sshll.u32 %s8434_s28, 9 }
  0x5b   : > { %s7005_s9 = sshll.u32 %s8303_s21, 13  ;;  %s12122_s11 = sld [smem:[#allocation56_spill]] }
  0x5c   : > { %7326 = dma.hbm_to_vmem [thread:$0]  (!%p12121_p6), %s8495_s10, 32, %s507_s26, %s495_s23  }
  0x5d   : > { %s558_s25 = scalar_lea.vmem [#allocation7], %s6691_s0 }
  0x5e   : > { %s565_s16 = sshll.u32 %s558_s25, 4  ;;  %s8522_s16 = int_to_ptr.vmem [resolvable:$true] %s565_s16 }
  0x61   : > { %s8520_s30 = scalar_lea.hbm %s12122_s11, %s7005_s9  ;;  %s8206_s23 = scalar_lea.hbm %s12122_s11, 16384 }
  0x62   : > { %s8201_s18 = scalar_lea.hbm %s8520_s30, 8192  ;;  %p8207_p9 = scmp.lt.u32.totalorder %s8520_s30, %s12122_s11 }
  0x63   : > { %p8202_p8 = scmp.ne.s32.totalorder %s8520_s30, %s8201_s18  ;;  %p8208_p11 = scmp.lt.u32.totalorder %s8206_s23, %s8201_s18 }
  0x64   : > { %p8210_p0 = scmp.lt.u32.totalorder %s8201_s18, %s8520_s30 }
  0x65   : > { %p8204_p7 = pnand %p8202_p8, %p8456_p10  ;;  %p8209_p13 = por %p8208_p11, %p8207_p9 }
  0x67   : > { %p8205_p4 = pneg %p8204_p7  ;;  %p8211_p12 = por %p8210_p0, %p8209_p13 }
  0x69   : > { %p8212_p1 = pnand %p8211_p12, %p8205_p4 }
  0x6b   : > { %8215 = shalt.err (!%p8212_p1)
}
  0x6c   : > { %s8216_s0 = scalar_lea.vmem %s8522_s16, 8192  ;;  %s8307_s15 = smov [#allocation7]  }
  0x6d   : > { %p8217_p2 = scmp.ne.s32.totalorder %s8522_s16, %s8216_s0  ;;  %s8221_s24 = sshll.u32 %s8307_s15, 4  ;;  %s8222_s24 = int_to_ptr.vmem [resolvable:$false] %s8221_s24 }
  0x6e   : > { %s8223_s25 = scalar_lea.vmem %s8222_s24, 16384  ;;  %p8224_p8 = scmp.lt.s32.totalorder %s8522_s16, %s8222_s24 }
  0x6f   : > { %p8219_p3 = pnand %p8217_p2, %p8456_p10  ;;  %p8225_p7 = scmp.lt.s32.totalorder %s8223_s25, %s8216_s0 }
  0x71   : > { %p8220_p5 = pneg %p8219_p3  ;;  %p8226_p9 = por %p8225_p7, %p8224_p8 }
  0x73   : > { %p8227_p11 = pnand %p8226_p9, %p8220_p5 }
  0x75   : > { %8230 = shalt.err (!%p8227_p11)
}
  0x76   : > { %s8308_s18 = smov 128   ;;  %s8309_s10 = smov 8  }
  0x77   : > { %7332 = dma.hbm_to_vmem [thread:$0]  (!%p12121_p6), %s8520_s30, 8192, %s8522_s16, %s8450_s20, %s8308_s18, %s8308_s18, %s8309_s10  }
  0x78   : > { %s12123_s26 = sshll.u32 %s8303_s21, 5  ;;  %s12124_s12 = sld [smem:[#allocation57_spill]] }
  0x79   : > { %s12125_s0 = sshll.u32 %s8434_s28, 1  ;;  %s576_s25 = scalar_lea.sflag [#allocation9], %s8434_s28 }
  0x7a   : > { %s579_s15 = scalar_lea.vmem [#allocation8], %s12125_s0 }
  0x7b   : > { %s587_s24 = sshll.u32 %s579_s15, 4  ;;  %s588_s24 = int_to_ptr.vmem [resolvable:$true] %s587_s24 }
  0x7e   : > { %s8551_s9 = scalar_lea.hbm %s12124_s12, %s12123_s26  ;;  %s8236_s30 = scalar_lea.hbm %s12124_s12, 64 }
  0x7f   : > { %s8231_s6 = scalar_lea.hbm %s8551_s9, 32  ;;  %p8237_p12 = scmp.lt.u32.totalorder %s8551_s9, %s12124_s12 }
  0x80   : > { %p8232_p4 = scmp.ne.s32.totalorder %s8551_s9, %s8231_s6  ;;  %p8238_p1 = scmp.lt.u32.totalorder %s8236_s30, %s8231_s6 }
  0x81   : > { %p8240_p3 = scmp.lt.u32.totalorder %s8231_s6, %s8551_s9 }
  0x82   : > { %p8234_p13 = pnand %p8232_p4, %p8456_p10  ;;  %p8239_p2 = por %p8238_p1, %p8237_p12 }
  0x84   : > { %p8235_p0 = pneg %p8234_p13  ;;  %p8241_p5 = por %p8240_p3, %p8239_p2 }
  0x86   : > { %p8242_p8 = pnand %p8241_p5, %p8235_p0 }
  0x88   : > { %8245 = shalt.err (!%p8242_p8)
}
  0x89   : > { %s8246_s28 = scalar_lea.vmem %s588_s24, 32  ;;  %s8310_s10 = smov [#allocation8]  }
  0x8a   : > { %p8247_p7 = scmp.ne.s32.totalorder %s588_s24, %s8246_s28  ;;  %s8251_s26 = sshll.u32 %s8310_s10, 4  ;;  %s8252_s26 = int_to_ptr.vmem [resolvable:$false] %s8251_s26 }
  0x8b   : > { %s8253_s23 = scalar_lea.vmem %s8252_s26, 64  ;;  %p8254_p4 = scmp.lt.s32.totalorder %s588_s24, %s8252_s26 }
  0x8c   : > { %p8249_p9 = pnand %p8247_p7, %p8456_p10  ;;  %p8255_p13 = scmp.lt.s32.totalorder %s8253_s23, %s8246_s28 }
  0x8e   : > { %p8250_p11 = pneg %p8249_p9  ;;  %p8256_p6 = por %p8255_p13, %p8254_p4 }
  0x90   : > { %p8257_p1 = pnand %p8256_p6, %p8250_p11 }
  0x92   : > { %8260 = shalt.err (!%p8257_p1)
}
  0x93   : > { %p12126_p12 = scmp.ne.s32.totalorder %s12116_s29, 0  ;;  %p12127_p0 = scmp.ne.s32.totalorder %s12119_s17, 0 }
  0x95   : > { %7335 = dma.hbm_to_vmem [thread:$0]  (!%p12126_p12), %s8551_s9, 32, %s588_s24, %s576_s25  }
  0x96   : > { %596 = sbr.rel (%p12127_p0) target bundleno = 3614 (0xe1e), region = 80 }
  0x9d   : > { %s598_s6 = sand.u32 1, %s8295_s19   ;;  %p12128_p10 = scmp.ne.s32.totalorder %s12115_s27, 0 }
  0x9e   : > { %s6698_s14 = sshll.u32 %s598_s6, 1  ;;  %s599_s13 = scalar_lea.sflag [#allocation4], %s598_s6 }
  0x9f   : > { %s8576_s0 = scalar_lea.vmem [#allocation3], %s6698_s14 }
  0xa0   : > { %8278 = dma.done.wait (%p12128_p10), %s599_s13, 32  }
  0xa1   : > { %8280 = vsyncadd (%p12128_p10), %s599_s13, 4294967264  ;;  %s607_s29 = sand.u32 1, %s8412_s22   ;;  %s6699_s15 = sshll.u32 %s598_s6, 2 }
  0xa2   : > { %s608_s9 = scalar_lea.sflag [#allocation6], %s607_s29  ;;  %s8583_s24 = scalar_lea.vmem [#allocation5], %s6699_s15 }
  0xa3   : > { %8282 = dma.done.wait (%p12128_p10), %s608_s9, 8256  }
  0xa4   : > { %8284 = vsyncadd (%p12128_p10), %s608_s9, 4294959040  ;;  %s6700_s17 = sshll.u32 %s598_s6, 9  ;;  %s626_s20 = scalar_lea.sflag [#allocation9], %s598_s6 }
  0xa5   : > { %s8589_s25 = scalar_lea.vmem [#allocation7], %s6700_s17  ;;  %s8591_s21 = scalar_lea.vmem [#allocation8], %s6698_s14 }
  0xa6   : > { %12129 = sst [smem:[#allocation17_spill]] %s8591_s21 }
  0xa7   : > { %8286 = dma.done.wait (%p12128_p10), %s626_s20, 32  }
  0xa8   : > { %8288 = vsyncadd (%p12128_p10), %s626_s20, 4294967264  ;;  %p721_p6 = scmp.lt.s32.totalorder %s8412_s22, 1  ;;  %s12130_s3 = sld [smem:[#allocation52_spill]] }
  0xa9   : > { %s12131_s21 = sld [smem:[#allocation54_spill]]  ;;  %p6711_p2 = scmp.ne.s32.totalorder %s8412_s22, 0 }
  0xaa   : > { %s722_s30 = scalar_select %p721_p6, %s8412_s22, 1 }
  0xab   : > { %760 = sbr.rel (%p6711_p2) target bundleno = 202 (0xca), region = 100 }
  0xac   : > { %s8599_s16 = sshll.u32 %s722_s30, 1  ;;  %s7313_s18 = smul.u32 768, %s722_s30 }
  0xad   : > { %s7314_s15 = smul.u32 6, %s722_s30  ;;  %s7007_s9 = sshll.u32 %s722_s30, 8 }
  0xae   : > { %s8612_s29 = scalar_lea.vmem %s12130_s3, %s7313_s18  ;;  %s746_s11 = scalar_lea.vmem %s12028_s7, %s8599_s16 }
  0xaf   : > { %s8621_s28 = scalar_lea.vmem %s12025_s4, %s7314_s15  ;;  %s8626_s23 = scalar_lea.vmem %s12026_s5, %s7007_s9 }
  0xb0   : > { %s750_s18 = scalar_lea.vmem %s12029_s8, %s8599_s16  ;;  %s7008_s13 = sshll.u32 %s722_s30, 9 }
  0xb1   : > { %s8635_s17 = scalar_lea.vmem %s12131_s21, %s7008_s13  ;;  %s12132_s15 = sld [smem:[#allocation51_spill]] (!%p6711_p2) }
  0xb7   : > { %v761_v0 = vld [vmem:[%s12132_s15] sm:$0xff]  ;;  %v762_v1 = vld [vmem:[%s12132_s15 + $0x8] sm:$0xff]  ;;  %v763_v2 = vld [vmem:[%s12132_s15 + $0x10] sm:$0xff] }
  0xb8   : > { %v777_v3 = vunpack.c.l.bf16 %v761_v0  ;;  %v778_v4 = vunpack.c.h.bf16 %v761_v0  ;;  %v779_v5 = vunpack.c.l.bf16 %v762_v1  ;;  %v780_v6 = vunpack.c.h.bf16 %v762_v1  ;;  %v764_v7 = vld [vmem:[%s12132_s15 + $0x18] sm:$0xff]  ;;  %v765_v8 = vld [vmem:[%s12132_s15 + $0x20] sm:$0xff]  ;;  %v766_v9 = vld [vmem:[%s12132_s15 + $0x28] sm:$0xff] }
  0xb9   : > { %v781_v10 = vunpack.c.l.bf16 %v763_v2  ;;  %v782_v11 = vunpack.c.h.bf16 %v763_v2  ;;  %v783_v12 = vunpack.c.l.bf16 %v764_v7  ;;  %v784_v13 = vunpack.c.h.bf16 %v764_v7  ;;  %v767_v14 = vld [vmem:[%s12132_s15 + $0x30] sm:$0xff]  ;;  %v768_v15 = vld [vmem:[%s12132_s15 + $0x38] sm:$0xff]  ;;  %v769_v16 = vld [vmem:[%s12132_s15 + $0x40] sm:$0xff] }
  0xba   : > { %809 = vst [vmem:[#allocation2] sm:$0xff] %v777_v3  ;;  %810 = vst [vmem:[#allocation2 + $0x8] sm:$0xff] %v778_v4  ;;  %v785_v17 = vunpack.c.l.bf16 %v765_v8  ;;  %v786_v18 = vunpack.c.h.bf16 %v765_v8  ;;  %v787_v19 = vunpack.c.l.bf16 %v766_v9  ;;  %v788_v20 = vunpack.c.h.bf16 %v766_v9  ;;  %v770_v21 = vld [vmem:[%s12132_s15 + $0x48] sm:$0xff]  ;;  %v771_v22 = vld [vmem:[%s12132_s15 + $0x50] sm:$0xff] }
  0xbb   : > { %811 = vst [vmem:[#allocation2 + $0x10] sm:$0xff] %v779_v5  ;;  %812 = vst [vmem:[#allocation2 + $0x18] sm:$0xff] %v780_v6  ;;  %v772_v23 = vld [vmem:[%s12132_s15 + $0x58] sm:$0xff]  ;;  %v789_v24 = vunpack.c.l.bf16 %v767_v14  ;;  %v790_v25 = vunpack.c.h.bf16 %v767_v14  ;;  %v791_v26 = vunpack.c.l.bf16 %v768_v15  ;;  %v792_v27 = vunpack.c.h.bf16 %v768_v15  ;;  %v773_v28 = vld [vmem:[%s12132_s15 + $0x60] sm:$0xff] }
  0xbc   : > { %813 = vst [vmem:[#allocation2 + $0x20] sm:$0xff] %v781_v10  ;;  %814 = vst [vmem:[#allocation2 + $0x28] sm:$0xff] %v782_v11  ;;  %v774_v29 = vld [vmem:[%s12132_s15 + $0x68] sm:$0xff]  ;;  %v793_v30 = vunpack.c.l.bf16 %v769_v16  ;;  %v794_v31 = vunpack.c.h.bf16 %v769_v16  ;;  %v795_v32 = vunpack.c.l.bf16 %v770_v21  ;;  %v796_v33 = vunpack.c.h.bf16 %v770_v21  ;;  %v775_v34 = vld [vmem:[%s12132_s15 + $0x70] sm:$0xff] }
  0xbd   : > { %815 = vst [vmem:[#allocation2 + $0x30] sm:$0xff] %v783_v12  ;;  %816 = vst [vmem:[#allocation2 + $0x38] sm:$0xff] %v784_v13  ;;  %v776_v35 = vld [vmem:[%s12132_s15 + $0x78] sm:$0xff]  ;;  %v797_v36 = vunpack.c.l.bf16 %v771_v22  ;;  %v798_v37 = vunpack.c.h.bf16 %v771_v22  ;;  %v799_v38 = vunpack.c.l.bf16 %v772_v23  ;;  %v800_v39 = vunpack.c.h.bf16 %v772_v23 }
  0xbe   : > { %817 = vst [vmem:[#allocation2 + $0x40] sm:$0xff] %v785_v17  ;;  %818 = vst [vmem:[#allocation2 + $0x48] sm:$0xff] %v786_v18  ;;  %v801_v40 = vunpack.c.l.bf16 %v773_v28  ;;  %v802_v41 = vunpack.c.h.bf16 %v773_v28  ;;  %v803_v42 = vunpack.c.l.bf16 %v774_v29  ;;  %v804_v43 = vunpack.c.h.bf16 %v774_v29 }
  0xbf   : > { %819 = vst [vmem:[#allocation2 + $0x50] sm:$0xff] %v787_v19  ;;  %820 = vst [vmem:[#allocation2 + $0x58] sm:$0xff] %v788_v20  ;;  %v805_v44 = vunpack.c.l.bf16 %v775_v34  ;;  %v806_v45 = vunpack.c.h.bf16 %v775_v34  ;;  %v807_v46 = vunpack.c.l.bf16 %v776_v35  ;;  %v808_v47 = vunpack.c.h.bf16 %v776_v35 }
  0xc0   : > { %821 = vst [vmem:[#allocation2 + $0x60] sm:$0xff] %v789_v24  ;;  %822 = vst [vmem:[#allocation2 + $0x68] sm:$0xff] %v790_v25 }
  0xc1   : > { %823 = vst [vmem:[#allocation2 + $0x70] sm:$0xff] %v791_v26  ;;  %824 = vst [vmem:[#allocation2 + $0x78] sm:$0xff] %v792_v27 }
  0xc2   : > { %825 = vst [vmem:[#allocation2 + $0x80] sm:$0xff] %v793_v30  ;;  %826 = vst [vmem:[#allocation2 + $0x88] sm:$0xff] %v794_v31 }
  0xc3   : > { %827 = vst [vmem:[#allocation2 + $0x90] sm:$0xff] %v795_v32  ;;  %828 = vst [vmem:[#allocation2 + $0x98] sm:$0xff] %v796_v33 }
  0xc4   : > { %829 = vst [vmem:[#allocation2 + $0xa0] sm:$0xff] %v797_v36  ;;  %830 = vst [vmem:[#allocation2 + $0xa8] sm:$0xff] %v798_v37 }
  0xc5   : > { %831 = vst [vmem:[#allocation2 + $0xb0] sm:$0xff] %v799_v38  ;;  %832 = vst [vmem:[#allocation2 + $0xb8] sm:$0xff] %v800_v39 }
  0xc6   : > { %833 = vst [vmem:[#allocation2 + $0xc0] sm:$0xff] %v801_v40  ;;  %834 = vst [vmem:[#allocation2 + $0xc8] sm:$0xff] %v802_v41 }
  0xc7   : > { %835 = vst [vmem:[#allocation2 + $0xd0] sm:$0xff] %v803_v42  ;;  %836 = vst [vmem:[#allocation2 + $0xd8] sm:$0xff] %v804_v43 }
  0xc8   : > { %837 = vst [vmem:[#allocation2 + $0xe0] sm:$0xff] %v805_v44  ;;  %838 = vst [vmem:[#allocation2 + $0xe8] sm:$0xff] %v806_v45 }
  0xc9   : > { %839 = vst [vmem:[#allocation2 + $0xf0] sm:$0xff] %v807_v46  ;;  %840 = vst [vmem:[#allocation2 + $0xf8] sm:$0xff] %v808_v47 }
  0xca PF: > { %v8686_v48 = vld [vmem:[#allocation2] sm:$0xff]  ;;  %v8688_v49 = vld [vmem:[#allocation2 + $0x8] sm:$0xff]  ;;  %v8696_v53 = vld [vmem:[#allocation2 + $0x10] sm:$0xff]  ;;  %s12136_s30 = scalar_lea.vmem %s12022_s1, %s8599_s16  ;;  %s12137_s14 = scalar_lea.vmem %s12023_s2, %s8599_s16  ;;  %vm2418_vm4 = vcmask 523264  }
  0xcb   : > { %v8690_v50 = vld [vmem:[#allocation2 + $0x20] sm:$0xff]  ;;  %v902_v51 = vadd.f32 %v8688_v49, %v8686_v48  ;;  %v8694_v52 = vld [vmem:[#allocation2 + $0x28] sm:$0xff]  ;;  %v8698_v54 = vld [vmem:[#allocation2 + $0x18] sm:$0xff]  ;;  %p6984_p3 = scmp.ne.s32.totalorder %s8412_s22, 1 }
  0xcc   : > { %v908_v55 = vadd.f32 %v8694_v52, %v8690_v50  ;;  %v8702_v56 = vld [vmem:[#allocation2 + $0x30] sm:$0xff]  ;;  %v8704_v57 = vld [vmem:[#allocation2 + $0x38] sm:$0xff]  ;;  %v905_v58 = vadd.f32 %v8698_v54, %v8696_v53  ;;  %v8710_v60 = vld [vmem:[#allocation2 + $0x40] sm:$0xff]  ;;  %s12230_s19 = sld [smem:[#allocation60_spill]] (!%p6984_p3) }
  0xcd   : > { %903 = vadd.xlane.f32.xlu0 %v902_v51  ;;  %v911_v59 = vadd.f32 %v8704_v57, %v8702_v56  ;;  %v8712_v61 = vld [vmem:[#allocation2 + $0x48] sm:$0xff]  ;;  %v8714_v62 = vld [vmem:[#allocation2 + $0x50] sm:$0xff]  ;;  %v8716_v63 = vld [vmem:[#allocation2 + $0x58] sm:$0xff] }
  0xce   : > { %909 = vadd.xlane.f32.xlu1 %v908_v55  ;;  %v914_v0 = vadd.f32 %v8712_v61, %v8710_v60  ;;  %v917_v1 = vadd.f32 %v8716_v63, %v8714_v62  ;;  %v8722_v2 = vld [vmem:[#allocation2 + $0x60] sm:$0xff]  ;;  %v8724_v3 = vld [vmem:[#allocation2 + $0x68] sm:$0xff]  ;;  %v8726_v4 = vld [vmem:[#allocation2 + $0x70] sm:$0xff] }
  0xcf   : > { %v8728_v5 = vld [vmem:[#allocation2 + $0x78] sm:$0xff]  ;;  %v8730_v6 = vld [vmem:[#allocation2 + $0x80] sm:$0xff]  ;;  %v8732_v7 = vld [vmem:[#allocation2 + $0x88] sm:$0xff]  ;;  %v920_v8 = vadd.f32 %v8724_v3, %v8722_v2 }
  0xd0   : > { %v8736_v9 = vld [vmem:[#allocation2 + $0x90] sm:$0xff]  ;;  %v8738_v10 = vld [vmem:[#allocation2 + $0x98] sm:$0xff]  ;;  %v923_v11 = vadd.f32 %v8728_v5, %v8726_v4  ;;  %v8742_v12 = vld [vmem:[#allocation2 + $0xa0] sm:$0xff]  ;;  %v926_v14 = vadd.f32 %v8732_v7, %v8730_v6 }
  0xd1   : > { %906 = vadd.xlane.f32.xlu0 %v905_v58  ;;  %v8744_v13 = vld [vmem:[#allocation2 + $0xa8] sm:$0xff]  ;;  %v8748_v15 = vld [vmem:[#allocation2 + $0xb0] sm:$0xff]  ;;  %v8750_v16 = vld [vmem:[#allocation2 + $0xb8] sm:$0xff]  ;;  %v929_v17 = vadd.f32 %v8738_v10, %v8736_v9 }
  0xd2   : > { %912 = vadd.xlane.f32.xlu1 %v911_v59  ;;  %v8754_v18 = vld [vmem:[#allocation2 + $0xc0] sm:$0xff]  ;;  %v8756_v19 = vld [vmem:[#allocation2 + $0xc8] sm:$0xff]  ;;  %v932_v20 = vadd.f32 %v8744_v13, %v8742_v12  ;;  %v8760_v21 = vld [vmem:[#allocation2 + $0xd0] sm:$0xff]  ;;  %v935_v23 = vadd.f32 %v8750_v16, %v8748_v15  ;;  %s12231_s26 = smov (!%p6984_p3), %s12230_s19 }
  0xd3   : > { %v8762_v22 = vld [vmem:[#allocation2 + $0xd8] sm:$0xff]  ;;  %v8766_v24 = vld [vmem:[#allocation2 + $0xe0] sm:$0xff]  ;;  %v8768_v25 = vld [vmem:[#allocation2 + $0xe8] sm:$0xff]  ;;  %v938_v26 = vadd.f32 %v8756_v19, %v8754_v18 }
  0xd4   : > { %v8772_v27 = vld [vmem:[#allocation2 + $0xf0] sm:$0xff]  ;;  %v8774_v28 = vld [vmem:[#allocation2 + $0xf8] sm:$0xff]  ;;  %v941_v29 = vadd.f32 %v8762_v22, %v8760_v21  ;;  %v944_v30 = vadd.f32 %v8768_v25, %v8766_v24  ;;  %v7375_v33 = vld [vmem:[%s8612_s29 + $0xc] ss:$24 sps:$4 sm:$0xff]  }
  0xd5   : > { %915 = vadd.xlane.f32.xlu0 %v914_v0  ;;  %v947_v31 = vadd.f32 %v8774_v28, %v8772_v27  ;;  %v7373_v32 = vld [vmem:[%s8612_s29 + $0x4] ss:$24 sps:$4 sm:$0xff]   ;;  %v7377_v34 = vld [vmem:[%s8612_s29] ss:$24 sps:$4 sm:$0xff]   ;;  %v7379_v36 = vld [vmem:[%s8612_s29 + $0x34] ss:$24 sps:$4 sm:$0xff]   ;;  %1982 = vmatprep.subr.bf16.mxu1 %v7375_v33 }
  0xd6   : > { %918 = vadd.xlane.f32.xlu1 %v917_v1  ;;  %v7378_v35 = vld [vmem:[%s8612_s29 + $0x8] ss:$24 sps:$4 sm:$0xff]   ;;  %v7381_v37 = vld [vmem:[%s8612_s29 + $0x3c] ss:$24 sps:$4 sm:$0xff]   ;;  %1869 = vmatprep.subr.bf16.mxu0 %v7373_v32  ;;  %v7384_v39 = vld [vmem:[%s8612_s29 + $0x38] ss:$24 sps:$4 sm:$0xff]  }
  0xd7   : > { %1870 = vmatpush1.bf16.msra.mxu0 %v7377_v34  ;;  %1983 = vmatpush1.bf16.msra.mxu1 %v7378_v35  ;;  %v7383_v38 = vld [vmem:[%s8612_s29 + $0x30] ss:$24 sps:$4 sm:$0xff]   ;;  %v7385_v40 = vld [vmem:[%s8612_s29 + $0x64] ss:$24 sps:$4 sm:$0xff]   ;;  %v7389_v42 = vld [vmem:[%s8612_s29 + $0x60] ss:$24 sps:$4 sm:$0xff]  }
  0xd8   : > { %1871 = vmatprep.subr.bf16.mxu0 %v7379_v36  ;;  %1984 = vmatprep.subr.bf16.mxu1 %v7381_v37  ;;  %v7387_v41 = vld [vmem:[%s8612_s29 + $0x6c] ss:$24 sps:$4 sm:$0xff]   ;;  %v7390_v43 = vld [vmem:[%s8612_s29 + $0x68] ss:$24 sps:$4 sm:$0xff]   ;;  %v7393_v45 = vld [vmem:[%s8612_s29 + $0x9c] ss:$24 sps:$4 sm:$0xff]  }
  0xd9   : > { %921 = vadd.xlane.f32.xlu0 %v920_v8  ;;  %v7391_v44 = vld [vmem:[%s8612_s29 + $0x94] ss:$24 sps:$4 sm:$0xff]   ;;  %v7395_v46 = vld [vmem:[%s8612_s29 + $0x90] ss:$24 sps:$4 sm:$0xff]   ;;  %v7397_v51 = vld [vmem:[%s8612_s29 + $0xc4] ss:$24 sps:$4 sm:$0xff]  }
  0xda   : > { %924 = vadd.xlane.f32.xlu1 %v923_v11  ;;  %v7396_v47 = vld [vmem:[%s8612_s29 + $0x98] ss:$24 sps:$4 sm:$0xff]   ;;  %v7399_v55 = vld [vmem:[%s8612_s29 + $0xcc] ss:$24 sps:$4 sm:$0xff]   ;;  %v7402_v59 = vld [vmem:[%s8612_s29 + $0xc8] ss:$24 sps:$4 sm:$0xff]  }
  0xdb   : > { %1872 = vmatpush1.bf16.msra.mxu0 %v7383_v38  ;;  %1985 = vmatpush1.bf16.msra.mxu1 %v7384_v39  ;;  %v7401_v58 = vld [vmem:[%s8612_s29 + $0xc0] ss:$24 sps:$4 sm:$0xff]   ;;  %v7403_v0 = vld [vmem:[%s8612_s29 + $0xf4] ss:$24 sps:$4 sm:$0xff]   ;;  %v7407_v8 = vld [vmem:[%s8612_s29 + $0xf0] ss:$24 sps:$4 sm:$0xff]  }
  0xdc   : > { %1873 = vmatprep.subr.bf16.mxu0 %v7385_v40  ;;  %1986 = vmatprep.subr.bf16.mxu1 %v7387_v41  ;;  %v7405_v1 = vld [vmem:[%s8612_s29 + $0xfc] ss:$24 sps:$4 sm:$0xff]   ;;  %v7408_v11 = vld [vmem:[%s8612_s29 + $0xf8] ss:$24 sps:$4 sm:$0xff]   ;;  %v7423_v33 = vld [vmem:[%s8612_s29 + $0x18c] ss:$24 sps:$4 sm:$0xff]  }
  0xdd   : > { %927 = vadd.xlane.f32.xlu0 %v926_v14  ;;  %v7409_v14 = vld [vmem:[%s8612_s29 + $0x124] ss:$24 sps:$4 sm:$0xff]   ;;  %v7425_v34 = vld [vmem:[%s8612_s29 + $0x180] ss:$24 sps:$4 sm:$0xff]  }
  0xde   : > { %930 = vadd.xlane.f32.xlu1 %v929_v17  ;;  %v7411_v17 = vld [vmem:[%s8612_s29 + $0x12c] ss:$24 sps:$4 sm:$0xff]   ;;  %v7426_v35 = vld [vmem:[%s8612_s29 + $0x188] ss:$24 sps:$4 sm:$0xff]  }
  0xdf   : > { %1874 = vmatpush1.bf16.msra.mxu0 %v7389_v42  ;;  %1987 = vmatpush1.bf16.msra.mxu1 %v7390_v43  ;;  %v7421_v32 = vld [vmem:[%s8612_s29 + $0x184] ss:$24 sps:$4 sm:$0xff]  }
  0xe0   : > { %1875 = vmatprep.subr.bf16.mxu0 %v7391_v44  ;;  %1988 = vmatprep.subr.bf16.mxu1 %v7393_v45 }
  0xe1   : > { %933 = vadd.xlane.f32.xlu0 %v932_v20  ;;  %v7413_v20 = vld [vmem:[%s8612_s29 + $0x120] ss:$24 sps:$4 sm:$0xff]  }
  0xe2   : > { %936 = vadd.xlane.f32.xlu1 %v935_v23  ;;  %v7414_v23 = vld [vmem:[%s8612_s29 + $0x128] ss:$24 sps:$4 sm:$0xff]  }
  0xe3   : > { %1876 = vmatpush1.bf16.msra.mxu0 %v7395_v46  ;;  %1989 = vmatpush1.bf16.msra.mxu1 %v7396_v47 }
  0xe4   : > { %1877 = vmatprep.subr.bf16.mxu0 %v7397_v51  ;;  %1990 = vmatprep.subr.bf16.mxu1 %v7399_v55 }
  0xe5   : > { %939 = vadd.xlane.f32.xlu0 %v938_v26  ;;  %v7415_v26 = vld [vmem:[%s8612_s29 + $0x154] ss:$24 sps:$4 sm:$0xff]  }
  0xe6   : > { %942 = vadd.xlane.f32.xlu1 %v941_v29  ;;  %v7417_v29 = vld [vmem:[%s8612_s29 + $0x15c] ss:$24 sps:$4 sm:$0xff]  }
  0xe7   : > { %1878 = vmatpush1.bf16.msra.mxu0 %v7401_v58  ;;  %1991 = vmatpush1.bf16.msra.mxu1 %v7402_v59 }
  0xe8   : > { %1879 = vmatprep.subr.bf16.mxu0 %v7403_v0  ;;  %1992 = vmatprep.subr.bf16.mxu1 %v7405_v1 }
  0xe9   : > { %945 = vadd.xlane.f32.xlu0 %v944_v30  ;;  %v7419_v30 = vld [vmem:[%s8612_s29 + $0x150] ss:$24 sps:$4 sm:$0xff]  }
  0xea   : > { %948 = vadd.xlane.f32.xlu1 %v947_v31  ;;  %v7420_v31 = vld [vmem:[%s8612_s29 + $0x158] ss:$24 sps:$4 sm:$0xff]  }
  0xeb   : > { %1880 = vmatpush1.bf16.msra.mxu0 %v7407_v8  ;;  %1993 = vmatpush1.bf16.msra.mxu1 %v7408_v11 }
  0xec   : > { %1881 = vmatprep.subr.bf16.mxu0 %v7409_v14  ;;  %1994 = vmatprep.subr.bf16.mxu1 %v7411_v17 }
  0xef   : > { %1882 = vmatpush1.bf16.msra.mxu0 %v7413_v20  ;;  %1995 = vmatpush1.bf16.msra.mxu1 %v7414_v23 }
  0xf0   : > { %1883 = vmatprep.subr.bf16.mxu0 %v7415_v26  ;;  %1996 = vmatprep.subr.bf16.mxu1 %v7417_v29 }
  0xf3   : > { %1884 = vmatpush1.bf16.msra.mxu0 %v7419_v30  ;;  %1997 = vmatpush1.bf16.msra.mxu1 %v7420_v31 }
  0xf4   : > { %1885 = vmatprep.subr.bf16.mxu0 %v7421_v32  ;;  %1998 = vmatprep.subr.bf16.mxu1 %v7423_v33 }
  0xf7   : > { %1886 = vmatpush1.bf16.msra.mxu0 %v7425_v34  ;;  %1999 = vmatpush1.bf16.msra.mxu1 %v7426_v35 }
 0x15a   : > { %v904_v36 = vpop.xlane.xlu0 %903 }
 0x15b   : > { %v951_v37 = vmul.f32 0.00390625, %v904_v36  ;;  %v910_v38 = vpop.xlane.xlu1 %909 }
 0x15c   : > { %v953_v39 = vmul.f32 0.00390625, %v910_v38 }
 0x15d   : > { %v8819_v40 = vsub.f32 %v8686_v48, %v951_v37  ;;  %v8822_v41 = vsub.f32 %v8688_v49, %v951_v37 }
 0x15e   : > { %v8825_v42 = vsub.f32 %v8690_v50, %v953_v39  ;;  %v8828_v43 = vsub.f32 %v8694_v52, %v953_v39  ;;  %v907_v44 = vpop.xlane.xlu0 %906 }
 0x15f   : > { %v952_v45 = vmul.f32 0.00390625, %v907_v44  ;;  %v913_v46 = vpop.xlane.xlu1 %912  ;;  %v999_v47 = vmul.f32 %v8819_v40, %v8819_v40  ;;  %v1000_v51 = vmul.f32 %v8822_v41, %v8822_v41 }
 0x160   : > { %v954_v48 = vmul.f32 0.00390625, %v913_v46  ;;  %v1003_v49 = vmul.f32 %v8825_v42, %v8825_v42  ;;  %v1004_v50 = vmul.f32 %v8828_v43, %v8828_v43 }
 0x161   : > { %v8839_v55 = vsub.f32 %v8696_v53, %v952_v45  ;;  %v8842_v52 = vsub.f32 %v8698_v54, %v952_v45  ;;  %v1031_v58 = vadd.f32 %v1000_v51, %v999_v47 }
 0x162   : > { %v8845_v59 = vsub.f32 %v8702_v56, %v954_v48  ;;  %v8848_v0 = vsub.f32 %v8704_v57, %v954_v48  ;;  %v916_v1 = vpop.xlane.xlu0 %915  ;;  %v1037_v14 = vadd.f32 %v1004_v50, %v1003_v49 }
 0x163   : > { %v955_v8 = vmul.f32 0.00390625, %v916_v1  ;;  %1032 = vadd.xlane.f32.xlu0 %v1031_v58  ;;  %v919_v11 = vpop.xlane.xlu1 %918  ;;  %v1001_v17 = vmul.f32 %v8839_v55, %v8839_v55  ;;  %v1002_v53 = vmul.f32 %v8842_v52, %v8842_v52 }
 0x164   : > { %v956_v54 = vmul.f32 0.00390625, %v919_v11  ;;  %v1005_v20 = vmul.f32 %v8845_v59, %v8845_v59  ;;  %v1006_v56 = vmul.f32 %v8848_v0, %v8848_v0 }
 0x165   : > { %v8859_v57 = vsub.f32 %v8710_v60, %v955_v8  ;;  %v8862_v23 = vsub.f32 %v8712_v61, %v955_v8  ;;  %v1034_v26 = vadd.f32 %v1002_v53, %v1001_v17 }
 0x166   : > { %v8865_v29 = vsub.f32 %v8714_v62, %v956_v54  ;;  %v8868_v30 = vsub.f32 %v8716_v63, %v956_v54  ;;  %v922_v31 = vpop.xlane.xlu0 %921  ;;  %v1040_v34 = vadd.f32 %v1006_v56, %v1005_v20  ;;  %v7427_v54 = vld [vmem:[%s8612_s29 + $0x1b4] ss:$24 sps:$4 sm:$0xff]  }
 0x167   : > { %v957_v32 = vmul.f32 0.00390625, %v922_v31  ;;  %1038 = vadd.xlane.f32.xlu0 %v1037_v14  ;;  %1035 = vadd.xlane.f32.xlu1 %v1034_v26  ;;  %v925_v33 = vpop.xlane.xlu1 %924  ;;  %v1007_v60 = vmul.f32 %v8859_v57, %v8859_v57  ;;  %v1008_v61 = vmul.f32 %v8862_v23, %v8862_v23  ;;  %v7429_v20 = vld [vmem:[%s8612_s29 + $0x1bc] ss:$24 sps:$4 sm:$0xff]   ;;  %v7431_v26 = vld [vmem:[%s8612_s29 + $0x1b0] ss:$24 sps:$4 sm:$0xff]  }
 0x168   : > { %v958_v35 = vmul.f32 0.00390625, %v925_v33  ;;  %v1009_v62 = vmul.f32 %v8865_v29, %v8865_v29  ;;  %v1010_v63 = vmul.f32 %v8868_v30, %v8868_v30  ;;  %v7432_v31 = vld [vmem:[%s8612_s29 + $0x1b8] ss:$24 sps:$4 sm:$0xff]   ;;  %1887 = vmatprep.subr.bf16.mxu0 %v7427_v54  ;;  %2000 = vmatprep.subr.bf16.mxu1 %v7429_v20  ;;  %v7441_v54 = vld [vmem:[%s8612_s29 + $0x21c] ss:$24 sps:$4 sm:$0xff]  }
 0x169   : > { %v8879_v36 = vsub.f32 %v8722_v2, %v957_v32  ;;  %v8882_v37 = vsub.f32 %v8724_v3, %v957_v32  ;;  %v1043_v38 = vadd.f32 %v1008_v61, %v1007_v60  ;;  %1888 = vmatpush1.bf16.msra.mxu0 %v7431_v26  ;;  %2001 = vmatpush1.bf16.msra.mxu1 %v7432_v31  ;;  %v7444_v26 = vld [vmem:[%s8612_s29 + $0x218] ss:$24 sps:$4 sm:$0xff]  }
 0x16a   : > { %v8885_v39 = vsub.f32 %v8726_v4, %v958_v35  ;;  %v8888_v44 = vsub.f32 %v8728_v5, %v958_v35  ;;  %v928_v45 = vpop.xlane.xlu0 %927  ;;  %v1046_v51 = vadd.f32 %v1010_v63, %v1009_v62 }
 0x16b   : > { %v959_v46 = vmul.f32 0.00390625, %v928_v45  ;;  %1041 = vadd.xlane.f32.xlu1 %v1040_v34  ;;  %1044 = vadd.xlane.f32.xlu0 %v1043_v38  ;;  %v931_v47 = vpop.xlane.xlu1 %930  ;;  %v1011_v2 = vmul.f32 %v8879_v36, %v8879_v36  ;;  %v1012_v3 = vmul.f32 %v8882_v37, %v8882_v37 }
 0x16c   : > { %v960_v48 = vmul.f32 0.00390625, %v931_v47  ;;  %v1013_v4 = vmul.f32 %v8885_v39, %v8885_v39  ;;  %v1014_v5 = vmul.f32 %v8888_v44, %v8888_v44  ;;  %v7435_v47 = vld [vmem:[%s8612_s29 + $0x1ec] ss:$24 sps:$4 sm:$0xff]  }
 0x16d   : > { %v8899_v49 = vsub.f32 %v8730_v6, %v959_v46  ;;  %v8902_v50 = vsub.f32 %v8732_v7, %v959_v46  ;;  %v1049_v58 = vadd.f32 %v1012_v3, %v1011_v2  ;;  %v7433_v46 = vld [vmem:[%s8612_s29 + $0x1e4] ss:$24 sps:$4 sm:$0xff]   ;;  %2002 = vmatprep.subr.bf16.mxu1 %v7435_v47  ;;  %v7456_v47 = vld [vmem:[%s8612_s29 + $0x278] ss:$24 sps:$4 sm:$0xff]  }
 0x16e   : > { %v8905_v1 = vsub.f32 %v8736_v9, %v960_v48  ;;  %v8908_v8 = vsub.f32 %v8738_v10, %v960_v48  ;;  %v934_v11 = vpop.xlane.xlu0 %933  ;;  %v1052_v53 = vadd.f32 %v1014_v5, %v1013_v4  ;;  %v7437_v48 = vld [vmem:[%s8612_s29 + $0x1e0] ss:$24 sps:$4 sm:$0xff]   ;;  %1889 = vmatprep.subr.bf16.mxu0 %v7433_v46  ;;  %v7455_v46 = vld [vmem:[%s8612_s29 + $0x270] ss:$24 sps:$4 sm:$0xff]  }
 0x16f   : > { %v961_v14 = vmul.f32 0.00390625, %v934_v11  ;;  %1047 = vadd.xlane.f32.xlu1 %v1046_v51  ;;  %1050 = vadd.xlane.f32.xlu0 %v1049_v58  ;;  %v937_v17 = vpop.xlane.xlu1 %936  ;;  %v1015_v6 = vmul.f32 %v8899_v49, %v8899_v49  ;;  %v1016_v7 = vmul.f32 %v8902_v50, %v8902_v50  ;;  %v7438_v4 = vld [vmem:[%s8612_s29 + $0x1e8] ss:$24 sps:$4 sm:$0xff]  }
 0x170   : > { %v962_v9 = vmul.f32 0.00390625, %v937_v17  ;;  %v1017_v56 = vmul.f32 %v8905_v1, %v8905_v1  ;;  %v1018_v10 = vmul.f32 %v8908_v8, %v8908_v8  ;;  %1890 = vmatpush1.bf16.msra.mxu0 %v7437_v48  ;;  %2003 = vmatpush1.bf16.msra.mxu1 %v7438_v4  ;;  %v7459_v48 = vld [vmem:[%s8612_s29 + $0x2ac] ss:$24 sps:$4 sm:$0xff]   ;;  %v7461_v4 = vld [vmem:[%s8612_s29 + $0x2a0] ss:$24 sps:$4 sm:$0xff]  }
 0x171   : > { %v8923_v32 = vsub.f32 %v8742_v12, %v961_v14  ;;  %v8926_v33 = vsub.f32 %v8744_v13, %v961_v14  ;;  %v1055_v34 = vadd.f32 %v1016_v7, %v1015_v6  ;;  %v7439_v7 = vld [vmem:[%s8612_s29 + $0x214] ss:$24 sps:$4 sm:$0xff]   ;;  %2004 = vmatprep.subr.bf16.mxu1 %v7441_v54 }
 0x172   : > { %v8929_v60 = vsub.f32 %v8748_v15, %v962_v9  ;;  %v8932_v61 = vsub.f32 %v8750_v16, %v962_v9  ;;  %v940_v35 = vpop.xlane.xlu0 %939  ;;  %v1058_v62 = vadd.f32 %v1018_v10, %v1017_v56  ;;  %v7443_v10 = vld [vmem:[%s8612_s29 + $0x210] ss:$24 sps:$4 sm:$0xff]   ;;  %1891 = vmatprep.subr.bf16.mxu0 %v7439_v7  ;;  %v873_v7 = vlaneseq }
 0x173   : > { %v963_v12 = vmul.f32 0.00390625, %v940_v35  ;;  %1053 = vadd.xlane.f32.xlu1 %v1052_v53  ;;  %1056 = vadd.xlane.f32.xlu0 %v1055_v34  ;;  %v943_v13 = vpop.xlane.xlu1 %942  ;;  %v1019_v63 = vmul.f32 %v8923_v32, %v8923_v32  ;;  %v1020_v15 = vmul.f32 %v8926_v33, %v8926_v33 }
 0x174   : > { %v964_v38 = vmul.f32 0.00390625, %v943_v13  ;;  %v1021_v16 = vmul.f32 %v8929_v60, %v8929_v60  ;;  %v1022_v45 = vmul.f32 %v8932_v61, %v8932_v61  ;;  %1892 = vmatpush1.bf16.msra.mxu0 %v7443_v10  ;;  %2005 = vmatpush1.bf16.msra.mxu1 %v7444_v26  ;;  %v7447_v13 = vld [vmem:[%s8612_s29 + $0x24c] ss:$24 sps:$4 sm:$0xff]  }
 0x175   : > { %v8945_v51 = vsub.f32 %v8754_v18, %v963_v12  ;;  %v8948_v2 = vsub.f32 %v8756_v19, %v963_v12  ;;  %v1061_v3 = vadd.f32 %v1020_v15, %v1019_v63  ;;  %v7445_v12 = vld [vmem:[%s8612_s29 + $0x244] ss:$24 sps:$4 sm:$0xff]   ;;  %v7449_v63 = vld [vmem:[%s8612_s29 + $0x240] ss:$24 sps:$4 sm:$0xff]   ;;  %2006 = vmatprep.subr.bf16.mxu1 %v7447_v13 }
 0x176   : > { %v8953_v5 = vsub.f32 %v8760_v21, %v964_v38  ;;  %v8956_v58 = vsub.f32 %v8762_v22, %v964_v38  ;;  %v946_v11 = vpop.xlane.xlu0 %945  ;;  %v1064_v19 = vadd.f32 %v1022_v45, %v1021_v16  ;;  %v7450_v15 = vld [vmem:[%s8612_s29 + $0x248] ss:$24 sps:$4 sm:$0xff]   ;;  %1893 = vmatprep.subr.bf16.mxu0 %v7445_v12  ;;  %v7451_v16 = vld [vmem:[%s8612_s29 + $0x274] ss:$24 sps:$4 sm:$0xff]  }
 0x177   : > { %v965_v14 = vmul.f32 0.00390625, %v946_v11  ;;  %1059 = vadd.xlane.f32.xlu1 %v1058_v62  ;;  %1062 = vadd.xlane.f32.xlu0 %v1061_v3  ;;  %v949_v18 = vpop.xlane.xlu1 %948  ;;  %v1023_v17 = vmul.f32 %v8945_v51, %v8945_v51  ;;  %v1024_v21 = vmul.f32 %v8948_v2, %v8948_v2  ;;  %v7453_v45 = vld [vmem:[%s8612_s29 + $0x27c] ss:$24 sps:$4 sm:$0xff]   ;;  %v7462_v11 = vld [vmem:[%s8612_s29 + $0x2a8] ss:$24 sps:$4 sm:$0xff]  }
 0x178   : > { %v966_v22 = vmul.f32 0.00390625, %v949_v18  ;;  %v1025_v53 = vmul.f32 %v8953_v5, %v8953_v5  ;;  %v1026_v6 = vmul.f32 %v8956_v58, %v8956_v58  ;;  %1894 = vmatpush1.bf16.msra.mxu0 %v7449_v63  ;;  %2007 = vmatpush1.bf16.msra.mxu1 %v7450_v15  ;;  %v7457_v3 = vld [vmem:[%s8612_s29 + $0x2a4] ss:$24 sps:$4 sm:$0xff]  }
 0x179   : > { %v8969_v20 = vsub.f32 %v8766_v24, %v965_v14  ;;  %v8972_v9 = vsub.f32 %v8768_v25, %v965_v14  ;;  %v1067_v56 = vadd.f32 %v1024_v21, %v1023_v17  ;;  %1895 = vmatprep.subr.bf16.mxu0 %v7451_v16  ;;  %2008 = vmatprep.subr.bf16.mxu1 %v7453_v45  ;;  %v7463_v14 = vld [vmem:[%s8612_s29 + $0x2d4] ss:$24 sps:$4 sm:$0xff]   ;;  %v7468_v17 = vld [vmem:[%s8612_s29 + $0x2d8] ss:$24 sps:$4 sm:$0xff]  }
 0x17a   : > { %v8977_v31 = vsub.f32 %v8772_v27, %v966_v22  ;;  %v8980_v34 = vsub.f32 %v8774_v28, %v966_v22  ;;  %v1070_v24 = vadd.f32 %v1026_v6, %v1025_v53  ;;  %v7465_v18 = vld [vmem:[%s8612_s29 + $0x2dc] ss:$24 sps:$4 sm:$0xff]  }
 0x17b   : > { %1065 = vadd.xlane.f32.xlu1 %v1064_v19  ;;  %1068 = vadd.xlane.f32.xlu0 %v1067_v56  ;;  %v1027_v25 = vmul.f32 %v8969_v20, %v8969_v20  ;;  %v1028_v35 = vmul.f32 %v8972_v9, %v8972_v9  ;;  %v7467_v19 = vld [vmem:[%s8612_s29 + $0x2d0] ss:$24 sps:$4 sm:$0xff]   ;;  %v7471_v21 = vld [vmem:[%s8612_s29 + $0x14] ss:$24 sps:$4 sm:$0xff]  }
 0x17c   : > { %v1029_v27 = vmul.f32 %v8977_v31, %v8977_v31  ;;  %v1030_v28 = vmul.f32 %v8980_v34, %v8980_v34  ;;  %1896 = vmatpush1.bf16.msra.mxu0 %v7455_v46  ;;  %2009 = vmatpush1.bf16.msra.mxu1 %v7456_v47  ;;  %v900_v46 = vld [vmem:[%s12136_s30] sm:$0x3] }
 0x17d   : > { %v1073_v62 = vadd.f32 %v1028_v35, %v1027_v25  ;;  %1897 = vmatprep.subr.bf16.mxu0 %v7457_v3  ;;  %2010 = vmatprep.subr.bf16.mxu1 %v7459_v48  ;;  %v9008_v35 = vshrl.u32 %v873_v7, 7 }
 0x17e   : > { %v1076_v38 = vadd.f32 %v1030_v28, %v1029_v27 }
 0x17f   : > { %1071 = vadd.xlane.f32.xlu1 %v1070_v24  ;;  %1074 = vadd.xlane.f32.xlu0 %v1073_v62  ;;  %12133 = vst [vmem:[#allocation18_spill] sm:$0xff] %v9008_v35  ;;  %v9011_v15 = vsub.s32 1, %v9008_v35 }
 0x180   : > { %1898 = vmatpush1.bf16.msra.mxu0 %v7461_v4  ;;  %2011 = vmatpush1.bf16.msra.mxu1 %v7462_v11  ;;  %v901_v11 = vld [vmem:[%s12137_s14] sm:$0x3] }
 0x181   : > { %1899 = vmatprep.subr.bf16.mxu0 %v7463_v14  ;;  %2012 = vmatprep.subr.bf16.mxu1 %v7465_v18  ;;  %12134 = vst [vmem:[#allocation19_spill] sm:$0xff] %v9011_v15  ;;  %v9027_v14 = vrot.slane %v900_v46, %v9011_v15 }
 0x183   : > { %1077 = vadd.xlane.f32.xlu1 %v1076_v38  ;;  %v9014_v38 = vsub.s32 0, %v9008_v35 }
 0x184   : > { %1900 = vmatpush1.bf16.msra.mxu0 %v7467_v19  ;;  %2013 = vmatpush1.bf16.msra.mxu1 %v7468_v17 }
 0x185   : > { %2095 = vmatprep.subr.bf16.mxu0 %v7471_v21  ;;  %12135 = vst [vmem:[#allocation20_spill] sm:$0xff] %v9014_v38  ;;  %v9030_v18 = vrot.slane %v900_v46, %v9014_v38 }
 0x1f0   : > { %v1033_v22 = vpop.xlane.xlu0 %1032 }
 0x1f1   : > { %v1079_v53 = vmul.f32 0.00390625, %v1033_v22 }
 0x1f3   : > { %v1095_v6 = vadd.f32 1e-05, %v1079_v53 }
 0x1f4   : > { %v1036_v54 = vpop.xlane.xlu1 %1035  ;;  %v1039_v56 = vpop.xlane.xlu0 %1038 }
 0x1f5   : > { %7757 = vrsqrt.f32 %v1095_v6  ;;  %v1080_v10 = vmul.f32 0.00390625, %v1036_v54  ;;  %v1081_v26 = vmul.f32 0.00390625, %v1039_v56  ;;  %v9035_v54 = vrot.slane %v901_v11, %v9011_v15 }
 0x1f7   : > { %v1096_v24 = vadd.f32 1e-05, %v1080_v10  ;;  %v1097_v25 = vadd.f32 1e-05, %v1081_v26 }
 0x1f8   : > { %v1042_v27 = vpop.xlane.xlu1 %1041  ;;  %v1045_v28 = vpop.xlane.xlu0 %1044 }
 0x1f9   : > { %7759 = vrsqrt.f32 %v1096_v24  ;;  %v1082_v12 = vmul.f32 0.00390625, %v1042_v27  ;;  %v1083_v13 = vmul.f32 0.00390625, %v1045_v28 }
 0x1fa   : > { %7761 = vrsqrt.f32 %v1097_v25  ;;  %v9040_v25 = vrot.slane %v901_v11, %v9014_v38 }
 0x1fb   : > { %v1098_v62 = vadd.f32 1e-05, %v1082_v12  ;;  %v1099_v63 = vadd.f32 1e-05, %v1083_v13 }
 0x1fc   : > { %v1048_v16 = vpop.xlane.xlu1 %1047  ;;  %v1051_v45 = vpop.xlane.xlu0 %1050 }
 0x1fd   : > { %7763 = vrsqrt.f32 %v1098_v62  ;;  %v1084_v47 = vmul.f32 0.00390625, %v1048_v16  ;;  %v1085_v3 = vmul.f32 0.00390625, %v1051_v45 }
 0x1fe   : > { %7765 = vrsqrt.f32 %v1099_v63 }
 0x1ff   : > { %v7758_v48 = vpop.eup %7757  ;;  %v1100_v4 = vadd.f32 1e-05, %v1084_v47  ;;  %v1101_v19 = vadd.f32 1e-05, %v1085_v3 }
 0x200   : > { %v1054_v17 = vpop.xlane.xlu1 %1053  ;;  %v1128_v21 = vmul.f32 %v7758_v48, %v8822_v41  ;;  %v1127_v22 = vmul.f32 %v7758_v48, %v8819_v40  ;;  %v1057_v6 = vpop.xlane.xlu0 %1056 }
 0x201   : > { %7767 = vrsqrt.f32 %v1100_v4  ;;  %v1086_v53 = vmul.f32 0.00390625, %v1054_v17  ;;  %v1087_v12 = vmul.f32 0.00390625, %v1057_v6 }
 0x202   : > { %v1171_v26 = vmul.f32 %v9027_v14, %v1128_v21  ;;  %v1170_v24 = vmul.f32 %v9030_v18, %v1127_v22  ;;  %7769 = vrsqrt.f32 %v1101_v19 }
 0x203   : > { %v7760_v56 = vpop.eup %7759  ;;  %v1102_v10 = vadd.f32 1e-05, %v1086_v53  ;;  %v1103_v17 = vadd.f32 1e-05, %v1087_v12 }
 0x204   : > { %v7762_v27 = vpop.eup %7761  ;;  %v1060_v41 = vpop.xlane.xlu1 %1059  ;;  %v1130_v40 = vmul.f32 %v7760_v56, %v8842_v52  ;;  %v1129_v28 = vmul.f32 %v7760_v56, %v8839_v55  ;;  %v1214_v47 = vadd.f32 %v9035_v54, %v1171_v26  ;;  %v1213_v3 = vadd.f32 %v9040_v25, %v1170_v24  ;;  %v7469_v56 = vld [vmem:[%s8612_s29 + $0x10] ss:$24 sps:$4 sm:$0xff]  }
 0x205   : > { %7771 = vrsqrt.f32 %v1102_v10  ;;  %v1088_v13 = vmul.f32 0.00390625, %v1060_v41  ;;  %v1132_v62 = vmul.f32 %v7762_v27, %v8828_v43  ;;  %v1131_v21 = vmul.f32 %v7762_v27, %v8825_v42  ;;  %v1063_v22 = vpop.xlane.xlu0 %1062 }
 0x206   : > { %v1173_v63 = vmul.f32 %v9027_v14, %v1130_v40  ;;  %v1172_v16 = vmul.f32 %v9030_v18, %v1129_v28  ;;  %v1089_v28 = vmul.f32 0.00390625, %v1063_v22 }
 0x207   : > { %v7764_v45 = vpop.eup %7763  ;;  %v1104_v46 = vadd.f32 1e-05, %v1088_v13  ;;  %v1175_v52 = vmul.f32 %v9027_v14, %v1132_v62  ;;  %v1174_v12 = vmul.f32 %v9030_v18, %v1131_v21 }
 0x208   : > { %v1066_v48 = vpop.xlane.xlu1 %1065  ;;  %v1216_v55 = vadd.f32 %v9035_v54, %v1173_v63  ;;  %v1215_v4 = vadd.f32 %v9040_v25, %v1172_v16  ;;  %v1134_v43 = vmul.f32 %v7764_v45, %v8848_v0  ;;  %v1133_v11 = vmul.f32 %v7764_v45, %v8845_v59  ;;  %v7766_v19 = vpop.eup %7765  ;;  %v7474_v0 = vld [vmem:[%s8612_s29 + $0x44] ss:$24 sps:$4 sm:$0xff]   ;;  %v7472_v63 = vld [vmem:[%s8612_s29 + $0x40] ss:$24 sps:$4 sm:$0xff]  }
 0x209   : > { %7773 = vrsqrt.f32 %v1104_v46  ;;  %v1090_v24 = vmul.f32 0.00390625, %v1066_v48  ;;  %v1218_v41 = vadd.f32 %v9035_v54, %v1175_v52  ;;  %v1136_v27 = vmul.f32 %v7766_v19, %v8862_v23  ;;  %v7477_v46 = vld [vmem:[%s8612_s29 + $0x74] ss:$24 sps:$4 sm:$0xff]  }
 0x20a   : > { %v9055_v53 = vpack.c.bf16 %v1216_v55, %v1214_v47  ;;  %v9057_v6 = vpack.c.bf16 %v1215_v4, %v1213_v3  ;;  %v1177_v10 = vmul.f32 %v9027_v14, %v1134_v43  ;;  %v1176_v59 = vmul.f32 %v9030_v18, %v1133_v11  ;;  %v1069_v11 = vpop.xlane.xlu0 %1068 }
 0x20b   : > { %v7768_v26 = vpop.eup %7767  ;;  %7775 = vrsqrt.f32 %v1103_v17  ;;  %v1179_v16 = vmul.f32 %v9027_v14, %v1136_v27  ;;  %v1106_v23 = vadd.f32 1e-05, %v1090_v24  ;;  %v1105_v48 = vadd.f32 1e-05, %v1089_v28  ;;  %v7478_v27 = vld [vmem:[%s8612_s29 + $0xa0] ss:$24 sps:$4 sm:$0xff]  }
 0x20c   : > { %1901 = vmatprep.mubr.bf16.mxu0 %v9055_v53  ;;  %2014 = vmatprep.mubr.bf16.mxu1 %v9055_v53  ;;  %v1220_v42 = vadd.f32 %v9035_v54, %v1177_v10  ;;  %v1138_v40 = vmul.f32 %v7768_v26, %v8868_v30  ;;  %v7770_v13 = vpop.eup %7769  ;;  %v1219_v30 = vadd.f32 %v9040_v25, %v1176_v59  ;;  %v1072_v3 = vpop.xlane.xlu1 %1071 }
 0x20d   : > { %1902 = vmatmul.mubr.bf16.vlgmr.msra.gmra.mrb[0].mxu0 %v9057_v6  ;;  %2015 = vmatmul.mubr.bf16.vlgmr.msra.gmra.mrb[0].mxu1 %v9057_v6  ;;  %v1137_v52 = vmul.f32 %v7768_v26, %v8865_v29  ;;  %v1217_v55 = vadd.f32 %v9040_v25, %v1174_v12  ;;  %v1135_v43 = vmul.f32 %v7766_v19, %v8859_v57  ;;  %7777 = vrsqrt.f32 %v1106_v23  ;;  %v7475_v29 = vld [vmem:[%s8612_s29 + $0x70] ss:$24 sps:$4 sm:$0xff]   ;;  %v7480_v57 = vld [vmem:[%s8612_s29 + $0xa4] ss:$24 sps:$4 sm:$0xff]  }
 0x20e   : > { %2096 = vmatpush1.bf16.msra.mxu0 %v7469_v56  ;;  %v9072_v62 = vpack.c.bf16 %v1220_v42, %v1218_v41  ;;  %v1181_v47 = vmul.f32 %v9027_v14, %v1138_v40  ;;  %v1222_v17 = vadd.f32 %v9035_v54, %v1179_v16  ;;  %v1140_v21 = vmul.f32 %v7770_v13, %v8882_v37 }
 0x20f   : > { %v7772_v45 = vpop.eup %7771  ;;  %2097 = vmatprep.subr.bf16.mxu0 %v7474_v0  ;;  %v1092_v56 = vmul.f32 0.00390625, %v1072_v3  ;;  %v9088_v10 = vpack.c.bf16 %v1219_v30, %v1217_v55  ;;  %v1180_v26 = vmul.f32 %v9030_v18, %v1137_v52  ;;  %7779 = vrsqrt.f32 %v1105_v48  ;;  %v1075_v3 = vpop.xlane.xlu0 %1074  ;;  %v7481_v55 = vld [vmem:[%s8612_s29 + $0xd0] ss:$24 sps:$4 sm:$0xff]  }
 0x210   : > { %1911 = vmatprep.mubr.bf16.mxu0 %v9072_v62  ;;  %2024 = vmatprep.mubr.bf16.mxu1 %v9072_v62  ;;  %v1224_v4 = vadd.f32 %v9035_v54, %v1181_v47  ;;  %v1142_v22 = vmul.f32 %v7772_v45, %v8888_v44  ;;  %v1091_v37 = vmul.f32 0.00390625, %v1069_v11  ;;  %v1178_v44 = vmul.f32 %v9030_v18, %v1135_v43  ;;  %v1078_v12 = vpop.xlane.xlu1 %1077  ;;  %v7486_v43 = vld [vmem:[%s8612_s29 + $0x104] ss:$24 sps:$4 sm:$0xff]  }
 0x211   : > { %v1183_v0 = vmul.f32 %v9027_v14, %v1140_v21  ;;  %v1108_v42 = vadd.f32 1e-05, %v1092_v56  ;;  %v1223_v40 = vadd.f32 %v9040_v25, %v1180_v26  ;;  %v1141_v28 = vmul.f32 %v7772_v45, %v8885_v39  ;;  %v7484_v56 = vld [vmem:[%s8612_s29 + $0x100] ss:$24 sps:$4 sm:$0xff]  }
 0x212   : > { %2098 = vmatpush1.bf16.msra.mxu0 %v7472_v63  ;;  %v9092_v24 = vpack.c.bf16 %v1224_v4, %v1222_v17  ;;  %v1185_v19 = vmul.f32 %v9027_v14, %v1142_v22  ;;  %v7483_v63 = vld [vmem:[%s8612_s29 + $0xd4] ss:$24 sps:$4 sm:$0xff]   ;;  %v1107_v30 = vadd.f32 1e-05, %v1091_v37  ;;  %v1139_v47 = vmul.f32 %v7770_v13, %v8879_v36 }
 0x213   : > { %2099 = vmatprep.subr.bf16.mxu0 %v7477_v46  ;;  %v7774_v41 = vpop.eup %7773  ;;  %v1221_v46 = vadd.f32 %v9040_v25, %v1178_v44  ;;  %v1226_v52 = vadd.f32 %v9035_v54, %v1183_v0  ;;  %7781 = vrsqrt.f32 %v1108_v42  ;;  %v1094_v39 = vmul.f32 0.00390625, %v1078_v12 }
 0x214   : > { %v1228_v16 = vadd.f32 %v9035_v54, %v1185_v19  ;;  %v1146_v23 = vmul.f32 %v7774_v41, %v8908_v8  ;;  %v1184_v4 = vmul.f32 %v9030_v18, %v1141_v28  ;;  %7783 = vrsqrt.f32 %v1107_v30 }
 0x215   : > { %1912 = vmatmul.mubr.bf16.gmra.mrb[4].mxu0 %v9088_v10  ;;  %2025 = vmatmul.mubr.bf16.gmra.mrb[4].mxu1 %v9088_v10  ;;  %v7776_v59 = vpop.eup %7775  ;;  %v9112_v45 = vpack.c.bf16 %v1223_v40, %v1221_v46  ;;  %v1093_v11 = vmul.f32 0.00390625, %v1075_v3  ;;  %v1110_v22 = vadd.f32 1e-05, %v1094_v39  ;;  %v1145_v26 = vmul.f32 %v7774_v41, %v8905_v1  ;;  %v7487_v1 = vld [vmem:[%s8612_s29 + $0x130] ss:$24 sps:$4 sm:$0xff]  }
 0x216   : > { %1921 = vmatprep.mubr.bf16.mxu0 %v9092_v24  ;;  %2034 = vmatprep.mubr.bf16.mxu1 %v9092_v24  ;;  %v1144_v48 = vmul.f32 %v7776_v59, %v8902_v50  ;;  %v9116_v8 = vpack.c.bf16 %v1228_v16, %v1226_v52  ;;  %v1189_v36 = vmul.f32 %v9027_v14, %v1146_v23  ;;  %v7490_v23 = vld [vmem:[%s8612_s29 + $0x160] ss:$24 sps:$4 sm:$0xff]  }
 0x217   : > { %2100 = vmatpush1.bf16.msra.mxu0 %v7475_v29  ;;  %v7778_v13 = vpop.eup %7777  ;;  %v1182_v50 = vmul.f32 %v9030_v18, %v1139_v47  ;;  %v1227_v29 = vadd.f32 %v9040_v25, %v1184_v4  ;;  %v1109_v44 = vadd.f32 1e-05, %v1093_v11  ;;  %v1143_v42 = vmul.f32 %v7776_v59, %v8899_v49  ;;  %v7495_v47 = vld [vmem:[%s8612_s29 + $0x194] ss:$24 sps:$4 sm:$0xff]  }
 0x218   : > { %2101 = vmatprep.subr.bf16.mxu0 %v7480_v57  ;;  %v1187_v17 = vmul.f32 %v9027_v14, %v1144_v48  ;;  %v7489_v57 = vld [vmem:[%s8612_s29 + $0x134] ss:$24 sps:$4 sm:$0xff]   ;;  %v1232_v19 = vadd.f32 %v9035_v54, %v1189_v36  ;;  %v1150_v37 = vmul.f32 %v7778_v13, %v8932_v61  ;;  %7785 = vrsqrt.f32 %v1110_v22  ;;  %v7492_v61 = vld [vmem:[%s8612_s29 + $0x164] ss:$24 sps:$4 sm:$0xff]   ;;  %v7493_v36 = vld [vmem:[%s8612_s29 + $0x190] ss:$24 sps:$4 sm:$0xff]  }
 0x219   : > { %v7780_v21 = vpop.eup %7779  ;;  %v1225_v0 = vadd.f32 %v9040_v25, %v1182_v50  ;;  %v1188_v41 = vmul.f32 %v9030_v18, %v1145_v26  ;;  %7787 = vrsqrt.f32 %v1109_v44  ;;  %v1149_v46 = vmul.f32 %v7778_v13, %v8929_v60 }
 0x21a   : > { %v1148_v40 = vmul.f32 %v7780_v21, %v8926_v33  ;;  %v1186_v33 = vmul.f32 %v9030_v18, %v1143_v42  ;;  %v1147_v39 = vmul.f32 %v7780_v21, %v8923_v32  ;;  %v7496_v21 = vld [vmem:[%s8612_s29 + $0x1c0] ss:$24 sps:$4 sm:$0xff]  }
 0x21b   : > { %2102 = vmatpush1.bf16.msra.mxu0 %v7478_v27  ;;  %v1230_v27 = vadd.f32 %v9035_v54, %v1187_v17  ;;  %v9136_v28 = vpack.c.bf16 %v1227_v29, %v1225_v0  ;;  %v1231_v30 = vadd.f32 %v9040_v25, %v1188_v41  ;;  %v1192_v60 = vmul.f32 %v9030_v18, %v1149_v46  ;;  %v7501_v29 = vld [vmem:[%s8612_s29 + $0x1f4] ss:$24 sps:$4 sm:$0xff]   ;;  %v7502_v41 = vld [vmem:[%s8612_s29 + $0x220] ss:$24 sps:$4 sm:$0xff]  }
 0x21c   : > { %2103 = vmatprep.subr.bf16.mxu0 %v7483_v63  ;;  %v1193_v63 = vmul.f32 %v9027_v14, %v1150_v37  ;;  %v1191_v59 = vmul.f32 %v9027_v14, %v1148_v40  ;;  %v1229_v48 = vadd.f32 %v9040_v25, %v1186_v33  ;;  %v1190_v32 = vmul.f32 %v9030_v18, %v1147_v39 }
 0x21d   : > { %1922 = vmatmul.mubr.bf16.gmra.mrb[8].mxu0 %v9112_v45  ;;  %2035 = vmatmul.mubr.bf16.gmra.mrb[8].mxu1 %v9112_v45  ;;  %v9140_v12 = vpack.c.bf16 %v1232_v19, %v1230_v27  ;;  %v7782_v49 = vpop.eup %7781  ;;  %v1235_v22 = vadd.f32 %v9040_v25, %v1192_v60  ;;  %v7499_v27 = vld [vmem:[%s8612_s29 + $0x1f0] ss:$24 sps:$4 sm:$0xff]  }
 0x21e   : > { %1931 = vmatprep.mubr.bf16.mxu0 %v9116_v8  ;;  %2044 = vmatprep.mubr.bf16.mxu1 %v9116_v8  ;;  %v7784_v16 = vpop.eup %7783  ;;  %v1236_v3 = vadd.f32 %v9035_v54, %v1193_v63  ;;  %v1154_v52 = vmul.f32 %v7782_v49, %v8956_v58  ;;  %v7498_v58 = vld [vmem:[%s8612_s29 + $0x1c4] ss:$24 sps:$4 sm:$0xff]   ;;  %v1233_v19 = vadd.f32 %v9040_v25, %v1190_v32 }
 0x21f   : > { %2104 = vmatpush1.bf16.msra.mxu0 %v7481_v55  ;;  %v1234_v55 = vadd.f32 %v9035_v54, %v1191_v59  ;;  %v1152_v4 = vmul.f32 %v7784_v16, %v8948_v2  ;;  %v1151_v37 = vmul.f32 %v7784_v16, %v8945_v51 }
 0x220   : > { %2105 = vmatprep.subr.bf16.mxu0 %v7486_v43  ;;  %v9160_v43 = vpack.c.bf16 %v1231_v30, %v1229_v48  ;;  %v1197_v11 = vmul.f32 %v9027_v14, %v1154_v52  ;;  %v1255_v42 = vpack.c.bf16 %v1235_v22, %v1233_v19  ;;  %v7505_v30 = vld [vmem:[%s8612_s29 + $0x250] ss:$24 sps:$4 sm:$0xff]   ;;  %v7513_v52 = vld [vmem:[%s8612_s29 + $0x2b4] ss:$24 sps:$4 sm:$0xff]  }
 0x221   : > { %v9164_v13 = vpack.c.bf16 %v1236_v3, %v1234_v55  ;;  %v1195_v2 = vmul.f32 %v9027_v14, %v1152_v4  ;;  %v1194_v51 = vmul.f32 %v9030_v18, %v1151_v37  ;;  %v7511_v55 = vld [vmem:[%s8612_s29 + $0x2b0] ss:$24 sps:$4 sm:$0xff]   ;;  %v7516_v4 = vld [vmem:[%s8612_s29 + $0x2e4] ss:$24 sps:$4 sm:$0xff]  }
 0x222   : > { %v7786_v50 = vpop.eup %7785  ;;  %v1240_v26 = vadd.f32 %v9035_v54, %v1197_v11 }
 0x223   : > { %2106 = vmatpush1.bf16.msra.mxu0 %v7484_v56  ;;  %v7788_v17 = vpop.eup %7787  ;;  %v1153_v56 = vmul.f32 %v7782_v49, %v8953_v5  ;;  %v1238_v44 = vadd.f32 %v9035_v54, %v1195_v2  ;;  %v1157_v63 = vmul.f32 %v7786_v50, %v8977_v31  ;;  %v7507_v49 = vld [vmem:[%s8612_s29 + $0x254] ss:$24 sps:$4 sm:$0xff]   ;;  %v1237_v59 = vadd.f32 %v9040_v25, %v1194_v51 }
 0x224   : > { %2107 = vmatprep.subr.bf16.mxu0 %v7489_v57  ;;  %v1158_v57 = vmul.f32 %v7786_v50, %v8980_v34  ;;  %v1156_v0 = vmul.f32 %v7788_v17, %v8972_v9  ;;  %v1155_v16 = vmul.f32 %v7788_v17, %v8969_v20  ;;  %v7508_v20 = vld [vmem:[%s8612_s29 + $0x280] ss:$24 sps:$4 sm:$0xff]  }
 0x225   : > { %1932 = vmatmul.mubr.bf16.gmra.mrb[12].mxu0 %v9136_v28  ;;  %2045 = vmatmul.mubr.bf16.gmra.mrb[12].mxu1 %v9136_v28  ;;  %v1196_v5 = vmul.f32 %v9030_v18, %v1153_v56  ;;  %v1258_v40 = vpack.c.bf16 %v1240_v26, %v1238_v44  ;;  %v1200_v46 = vmul.f32 %v9030_v18, %v1157_v63 }
 0x226   : > { %1941 = vmatprep.mubr.bf16.mxu0 %v9140_v12  ;;  %2054 = vmatprep.mubr.bf16.mxu1 %v9140_v12  ;;  %v1201_v34 = vmul.f32 %v9027_v14, %v1158_v57  ;;  %v1199_v9 = vmul.f32 %v9027_v14, %v1156_v0  ;;  %v1198_v3 = vmul.f32 %v9030_v18, %v1155_v16  ;;  %v7514_v18 = vld [vmem:[%s8612_s29 + $0x2e0] ss:$24 sps:$4 sm:$0xff]  }
 0x227   : > { %2108 = vmatpush1.bf16.msra.mxu0 %v7487_v1  ;;  %v7504_v1 = vld [vmem:[%s8612_s29 + $0x224] ss:$24 sps:$4 sm:$0xff]  }
 0x228   : > { %2109 = vmatprep.subr.bf16.mxu0 %v7492_v61  ;;  %v1239_v61 = vadd.f32 %v9040_v25, %v1196_v5  ;;  %v1244_v33 = vadd.f32 %v9035_v54, %v1201_v34  ;;  %v1241_v48 = vadd.f32 %v9040_v25, %v1198_v3 }
 0x22a   : > { %v1257_v14 = vpack.c.bf16 %v1239_v61, %v1237_v59 }
 0x22b   : > { %2110 = vmatpush1.bf16.msra.mxu0 %v7490_v23  ;;  %v1242_v23 = vadd.f32 %v9035_v54, %v1199_v9  ;;  %v1243_v54 = vadd.f32 %v9040_v25, %v1200_v46  ;;  %v9221_v25 = vld [vmem:[%s8621_s28] sm:$0x3f] }
 0x22c   : > { %2111 = vmatprep.subr.bf16.mxu0 %v7495_v47  ;;  %v7510_v47 = vld [vmem:[%s8612_s29 + $0x284] ss:$24 sps:$4 sm:$0xff]  }
 0x22d   : > { %1942 = vmatmul.mubr.bf16.gmra.mrb[16].mxu0 %v9160_v43  ;;  %2055 = vmatmul.mubr.bf16.gmra.mrb[16].mxu1 %v9160_v43  ;;  %v1260_v31 = vpack.c.bf16 %v1244_v33, %v1242_v23  ;;  %v1259_v39 = vpack.c.bf16 %v1243_v54, %v1241_v48 }
 0x22e   : > { %1951 = vmatprep.mubr.bf16.mxu0 %v9164_v13  ;;  %2064 = vmatprep.mubr.bf16.mxu1 %v9164_v13 }
 0x22f   : > { %2112 = vmatpush1.bf16.msra.mxu0 %v7493_v36 }
 0x230   : > { %2113 = vmatprep.subr.bf16.mxu0 %v7498_v58 }
 0x233   : > { %2114 = vmatpush1.bf16.msra.mxu0 %v7496_v21 }
 0x234   : > { %2115 = vmatprep.subr.bf16.mxu0 %v7501_v29 }
 0x235   : > { %1952 = vmatmul.mubr.bf16.gmra.mrb[20].mxu0 %v1255_v42  ;;  %2065 = vmatmul.mubr.bf16.gmra.mrb[20].mxu1 %v1255_v42 }
 0x236   : > { %1961 = vmatprep.mubr.bf16.mxu0 %v1258_v40  ;;  %2074 = vmatprep.mubr.bf16.mxu1 %v1258_v40 }
 0x237   : > { %2116 = vmatpush1.bf16.msra.mxu0 %v7499_v27 }
 0x238   : > { %2117 = vmatprep.subr.bf16.mxu0 %v7504_v1 }
 0x23b   : > { %2118 = vmatpush1.bf16.msra.mxu0 %v7502_v41 }
 0x23c   : > { %2119 = vmatprep.subr.bf16.mxu0 %v7507_v49 }
 0x23d   : > { %1962 = vmatmul.mubr.bf16.gmra.mrb[24].mxu0 %v1257_v14  ;;  %2075 = vmatmul.mubr.bf16.gmra.mrb[24].mxu1 %v1257_v14 }
 0x23e   : > { %1971 = vmatprep.mubr.bf16.mxu0 %v1260_v31  ;;  %2084 = vmatprep.mubr.bf16.mxu1 %v1260_v31 }
 0x23f   : > { %2120 = vmatpush1.bf16.msra.mxu0 %v7505_v30 }
 0x240   : > { %2121 = vmatprep.subr.bf16.mxu0 %v7510_v47 }
 0x243   : > { %2122 = vmatpush1.bf16.msra.mxu0 %v7508_v20 }
 0x244   : > { %2123 = vmatprep.subr.bf16.mxu0 %v7513_v52 }
 0x245   : > { %1972 = vmatmul.mubr.bf16.gmra.mrb[28].mxu0 %v1259_v39  ;;  %2085 = vmatmul.mubr.bf16.gmra.mrb[28].mxu1 %v1259_v39 }
 0x246   : > { %2127 = vmatprep.mubr.bf16.mxu0 %v9055_v53  ;;  %v12050_v53 = vsub.s32 2, %v9008_v35 }
 0x247   : > { %2124 = vmatpush1.bf16.msra.mxu0 %v7511_v55 }
 0x248   : > { %2125 = vmatprep.subr.bf16.mxu0 %v7516_v4 }
 0x24b   : > { %2126 = vmatpush1.bf16.msra.mxu0 %v7514_v18 }
 0x24e   : > { %2128 = vmatmul.mubr.bf16.vlgmr.msra.gmra.mrb[32].mxu0 %v9057_v6  ;;  %v12049_v6 = vsub.s32 3, %v9008_v35 }
 0x24f   : > { %2137 = vmatprep.mubr.bf16.mxu0 %v9072_v62  ;;  %v9227_v62 = vrot.slane %v9221_v25, %v9014_v38 }
 0x256   : > { %2138 = vmatmul.mubr.bf16.gmra.mrb[36].mxu0 %v9088_v10  ;;  %v9231_v10 = vrot.slane %v9221_v25, %v9011_v15 }
 0x257   : > { %2147 = vmatprep.mubr.bf16.mxu0 %v9092_v24  ;;  %v9236_v24 = vrot.slane %v9221_v25, %v12050_v53 }
 0x25e   : > { %2148 = vmatmul.mubr.bf16.gmra.mrb[40].mxu0 %v9112_v45 }
 0x25f   : > { %2157 = vmatprep.mubr.bf16.mxu0 %v9116_v8 }
 0x266   : > { %2158 = vmatmul.mubr.bf16.gmra.mrb[44].mxu0 %v9136_v28  ;;  %v9241_v28 = vrot.slane %v9221_v25, %v12049_v6 }
 0x267   : > { %2167 = vmatprep.mubr.bf16.mxu0 %v9140_v12 }
 0x26e   : > { %2168 = vmatmul.mubr.bf16.gmra.mrb[48].mxu0 %v9160_v43 }
 0x26f   : > { %2177 = vmatprep.mubr.bf16.mxu0 %v9164_v13 }
 0x276   : > { %2178 = vmatmul.mubr.bf16.gmra.mrb[52].mxu0 %v1255_v42 }
 0x277   : > { %2187 = vmatprep.mubr.bf16.mxu0 %v1258_v40 }
 0x27e   : > { %2188 = vmatmul.mubr.bf16.gmra.mrb[56].mxu0 %v1257_v14 }
 0x27f   : > { %2197 = vmatprep.mubr.bf16.mxu0 %v1260_v31 }
 0x286   : > { %2198 = vmatmul.mubr.bf16.gmra.mrb[60].mxu0 %v1259_v39 }
 0x2e0   : > { %v1903_v45 = vpop.f32.mrb[0].mxu0  ;;  %v2016_v8 = vpop.f32.mrb[0].mxu1 }
 0x2e1   : > { %v1904_v12 = vadd.f32 %v1903_v45, %v9227_v62  ;;  %v1905_v43 = vpop.f32.mrb[1].mxu0  ;;  %v2018_v36 = vpop.f32.mrb[1].mxu1  ;;  %v2017_v11 = vadd.f32 %v2016_v8, %v9236_v24 }
 0x2e2   : > { %v1906_v60 = vadd.f32 %v1905_v43, %v9231_v10  ;;  %v1907_v13 = vpop.f32.mrb[2].mxu0  ;;  %v2020_v58 = vpop.f32.mrb[2].mxu1  ;;  %v2019_v21 = vadd.f32 %v2018_v36, %v9241_v28 }
 0x2e3   : > { %v1908_v50 = vadd.f32 %v1907_v13, %v9227_v62  ;;  %v2021_v32 = vadd.f32 %v2020_v58, %v9236_v24  ;;  %v1909_v2 = vpop.f32.mrb[3].mxu0  ;;  %v2022_v17 = vpop.f32.mrb[3].mxu1  ;;  %v2208_v29 = vmul.f32 0.088388346, %v1904_v12 }
 0x2e4   : > { %v1910_v22 = vadd.f32 %v1909_v2, %v9231_v10  ;;  %v2023_v56 = vadd.f32 %v2022_v17, %v9241_v28  ;;  %v9251_v19 = vmul.f32 0.088388346, %v1906_v60 }
 0x2e5   : > { %v2210_v26 = vmul.f32 0.088388346, %v1908_v50  ;;  %v2256_v57 = vpack.c.bf16 %v2021_v32, %v2017_v11 }
 0x2e6   : > { %v9253_v37 = vmul.f32 0.088388346, %v1910_v22  ;;  %v9255_v44 = vpack.c.bf16 %v2023_v56, %v2019_v21 }
 0x2e7   : > { %v2240_v0 = vpack.c.bf16 %v2210_v26, %v2208_v29  ;;  %7089 = vmatprep.subr.bf16.mxu1 %v2256_v57 }
 0x2e8   : > { %v1913_v27 = vpop.f32.mrb[4].mxu0  ;;  %v2026_v5 = vpop.f32.mrb[4].mxu1  ;;  %7090 = vmatpush3.bf16.xpose.msra.mxu1 %v2256_v57 }
 0x2e9   : > { %v1914_v40 = vadd.f32 %v1913_v27, %v9227_v62  ;;  %v1915_v1 = vpop.f32.mrb[5].mxu0  ;;  %v2028_v34 = vpop.f32.mrb[5].mxu1  ;;  %7097 = vmatprep.mubr.bf16.mxu1 %v2240_v0  ;;  %v2027_v63 = vadd.f32 %v2026_v5, %v9236_v24 }
 0x2ea   : > { %v1916_v51 = vadd.f32 %v1915_v1, %v9231_v10  ;;  %v2029_v9 = vadd.f32 %v2028_v34, %v9241_v28  ;;  %v1917_v41 = vpop.f32.mrb[6].mxu0  ;;  %v2030_v61 = vpop.f32.mrb[6].mxu1 }
 0x2eb   : > { %v1918_v49 = vadd.f32 %v1917_v41, %v9227_v62  ;;  %v2031_v33 = vadd.f32 %v2030_v61, %v9236_v24  ;;  %v1919_v59 = vpop.f32.mrb[7].mxu0  ;;  %v2032_v16 = vpop.f32.mrb[7].mxu1  ;;  %v9267_v30 = vmul.f32 0.088388346, %v1914_v40 }
 0x2ec   : > { %v1920_v23 = vadd.f32 %v1919_v59, %v9231_v10  ;;  %v2033_v14 = vadd.f32 %v2032_v16, %v9241_v28  ;;  %v9271_v47 = vmul.f32 0.088388346, %v1916_v51 }
 0x2ed   : > { %v9269_v46 = vmul.f32 0.088388346, %v1918_v49  ;;  %v2258_v31 = vpack.c.bf16 %v2031_v33, %v2027_v63 }
 0x2ee   : > { %v9273_v3 = vmul.f32 0.088388346, %v1920_v23  ;;  %v9275_v20 = vpack.c.bf16 %v2033_v14, %v2029_v9 }
 0x2ef   : > { %v2242_v54 = vpack.c.bf16 %v9269_v46, %v9267_v30  ;;  %7091 = vmatprep.subr.bf16.mxu1 %v2258_v31 }
 0x2f0   : > { %v1923_v48 = vpop.f32.mrb[8].mxu0  ;;  %v2036_v39 = vpop.f32.mrb[8].mxu1  ;;  %7092 = vmatpush3.bf16.xpose.msra.mxu1 %v2258_v31 }
 0x2f1   : > { %v1924_v55 = vadd.f32 %v1923_v48, %v9227_v62  ;;  %v1925_v4 = vpop.f32.mrb[9].mxu0  ;;  %v2038_v18 = vpop.f32.mrb[9].mxu1  ;;  %v2037_v36 = vadd.f32 %v2036_v39, %v9236_v24 }
 0x2f2   : > { %v1926_v45 = vadd.f32 %v1925_v4, %v9231_v10  ;;  %v2039_v8 = vadd.f32 %v2038_v18, %v9241_v28  ;;  %v1927_v12 = vpop.f32.mrb[10].mxu0  ;;  %v2040_v43 = vpop.f32.mrb[10].mxu1 }
 0x2f3   : > { %v1928_v60 = vadd.f32 %v1927_v12, %v9227_v62  ;;  %v2041_v13 = vadd.f32 %v2040_v43, %v9236_v24  ;;  %v1929_v58 = vpop.f32.mrb[11].mxu0  ;;  %v2042_v11 = vpop.f32.mrb[11].mxu1  ;;  %v9289_v2 = vmul.f32 0.088388346, %v1924_v55 }
 0x2f4   : > { %v1930_v50 = vadd.f32 %v1929_v58, %v9231_v10  ;;  %v2043_v32 = vadd.f32 %v2042_v11, %v9241_v28  ;;  %v9293_v22 = vmul.f32 0.088388346, %v1926_v45 }
 0x2f5   : > { %v9291_v17 = vmul.f32 0.088388346, %v1928_v60  ;;  %v2260_v21 = vpack.c.bf16 %v2041_v13, %v2037_v36 }
 0x2f6   : > { %v9295_v56 = vmul.f32 0.088388346, %v1930_v50  ;;  %v9297_v29 = vpack.c.bf16 %v2043_v32, %v2039_v8 }
 0x2f7   : > { %v2244_v26 = vpack.c.bf16 %v9291_v17, %v9289_v2  ;;  %7093 = vmatprep.subr.bf16.mxu1 %v2260_v21 }
 0x2f8   : > { %v1933_v0 = vpop.f32.mrb[12].mxu0  ;;  %v2046_v27 = vpop.f32.mrb[12].mxu1  ;;  %7094 = vmatpush3.bf16.xpose.msra.mxu1 %v2260_v21 }
 0x2f9   : > { %v1934_v5 = vadd.f32 %v1933_v0, %v9227_v62  ;;  %v1935_v40 = vpop.f32.mrb[13].mxu0  ;;  %v2048_v1 = vpop.f32.mrb[13].mxu1  ;;  %v2047_v61 = vadd.f32 %v2046_v27, %v9236_v24 }
 0x2fa   : > { %v1936_v34 = vadd.f32 %v1935_v40, %v9231_v10  ;;  %v2049_v51 = vadd.f32 %v2048_v1, %v9241_v28  ;;  %v1937_v9 = vpop.f32.mrb[14].mxu0  ;;  %v2050_v41 = vpop.f32.mrb[14].mxu1 }
 0x2fb   : > { %v1938_v63 = vadd.f32 %v1937_v9, %v9227_v62  ;;  %v2051_v49 = vadd.f32 %v2050_v41, %v9236_v24  ;;  %v1939_v33 = vpop.f32.mrb[15].mxu0  ;;  %v2052_v59 = vpop.f32.mrb[15].mxu1  ;;  %v2220_v14 = vmul.f32 0.088388346, %v1934_v5 }
 0x2fc   : > { %v1940_v16 = vadd.f32 %v1939_v33, %v9231_v10  ;;  %v2053_v23 = vadd.f32 %v2052_v59, %v9241_v28  ;;  %v9311_v39 = vmul.f32 0.088388346, %v1936_v34 }
 0x2fd   : > { %v2222_v31 = vmul.f32 0.088388346, %v1938_v63  ;;  %v2262_v48 = vpack.c.bf16 %v2051_v49, %v2047_v61 }
 0x2fe   : > { %v9313_v55 = vmul.f32 0.088388346, %v1940_v16  ;;  %v9315_v4 = vpack.c.bf16 %v2053_v23, %v2049_v51 }
 0x2ff   : > { %v2246_v18 = vpack.c.bf16 %v2222_v31, %v2220_v14  ;;  %7095 = vmatprep.subr.bf16.mxu1 %v2262_v48 }
 0x300   : > { %v1943_v8 = vpop.f32.mrb[16].mxu0  ;;  %v2056_v12 = vpop.f32.mrb[16].mxu1  ;;  %7096 = vmatpush3.bf16.xpose.msra.mxu1 %v2262_v48 }
 0x301   : > { %v1944_v43 = vadd.f32 %v1943_v8, %v9227_v62  ;;  %v1945_v36 = vpop.f32.mrb[17].mxu0  ;;  %v2058_v60 = vpop.f32.mrb[17].mxu1  ;;  %v2057_v50 = vadd.f32 %v2056_v12, %v9236_v24 }
 0x302   : > { %v1946_v13 = vadd.f32 %v1945_v36, %v9231_v10  ;;  %v1947_v58 = vpop.f32.mrb[18].mxu0  ;;  %v2060_v11 = vpop.f32.mrb[18].mxu1  ;;  %v2059_v0 = vadd.f32 %v2058_v60, %v9241_v28 }
 0x303   : > { %v1948_v32 = vadd.f32 %v1947_v58, %v9227_v62  ;;  %v2061_v2 = vadd.f32 %v2060_v11, %v9236_v24  ;;  %v1949_v17 = vpop.f32.mrb[19].mxu0  ;;  %v2062_v21 = vpop.f32.mrb[19].mxu1  ;;  %v2224_v40 = vmul.f32 0.088388346, %v1944_v43 }
 0x304   : > { %v1950_v27 = vadd.f32 %v1949_v17, %v9231_v10  ;;  %v2063_v5 = vadd.f32 %v2062_v21, %v9241_v28  ;;  %v9327_v51 = vmul.f32 0.088388346, %v1946_v13 }
 0x305   : > { %v2226_v1 = vmul.f32 0.088388346, %v1948_v32  ;;  %v2264_v34 = vpack.c.bf16 %v2061_v2, %v2057_v50 }
 0x306   : > { %v9329_v9 = vmul.f32 0.088388346, %v1950_v27  ;;  %v9331_v41 = vpack.c.bf16 %v2063_v5, %v2059_v0 }
 0x307   : > { %v2248_v61 = vpack.c.bf16 %v2226_v1, %v2224_v40  ;;  %7098 = vmatmul.mubr.bf16.vlgmr.msra.gmra.mrb[32].mxu1 %v2242_v54  ;;  %7105 = vmatprep.subr.bf16.mxu1 %v2264_v34 }
 0x308   : > { %v1953_v49 = vpop.f32.mrb[20].mxu0  ;;  %v2066_v33 = vpop.f32.mrb[20].mxu1  ;;  %7101 = vmatprep.mubr.bf16.mxu1 %v2244_v26  ;;  %7106 = vmatpush3.bf16.xpose.msra.mxu1 %v2264_v34 }
 0x309   : > { %v1954_v59 = vadd.f32 %v1953_v49, %v9227_v62  ;;  %v1955_v16 = vpop.f32.mrb[21].mxu0  ;;  %v2068_v23 = vpop.f32.mrb[21].mxu1  ;;  %v2067_v30 = vadd.f32 %v2066_v33, %v9236_v24 }
 0x30a   : > { %v1956_v14 = vadd.f32 %v1955_v16, %v9231_v10  ;;  %v2069_v31 = vadd.f32 %v2068_v23, %v9241_v28  ;;  %v1957_v48 = vpop.f32.mrb[22].mxu0  ;;  %v2070_v8 = vpop.f32.mrb[22].mxu1 }
 0x30b   : > { %v1958_v46 = vadd.f32 %v1957_v48, %v9227_v62  ;;  %v2071_v54 = vadd.f32 %v2070_v8, %v9236_v24  ;;  %v1959_v12 = vpop.f32.mrb[23].mxu0  ;;  %v2072_v43 = vpop.f32.mrb[23].mxu1  ;;  %v9346_v60 = vmul.f32 0.088388346, %v1954_v59 }
 0x30c   : > { %v1960_v26 = vadd.f32 %v1959_v12, %v9231_v10  ;;  %v2073_v36 = vadd.f32 %v2072_v43, %v9241_v28  ;;  %v9350_v11 = vmul.f32 0.088388346, %v1956_v14 }
 0x30d   : > { %v9348_v13 = vmul.f32 0.088388346, %v1958_v46  ;;  %v2266_v58 = vpack.c.bf16 %v2071_v54, %v2067_v30 }
 0x30e   : > { %v9352_v50 = vmul.f32 0.088388346, %v1960_v26  ;;  %v9354_v32 = vpack.c.bf16 %v2073_v36, %v2069_v31 }
 0x30f   : > { %v2250_v2 = vpack.c.bf16 %v9348_v13, %v9346_v60  ;;  %7102 = vmatmul.mubr.bf16.gmra.mrb[36].mxu1 %v2246_v18  ;;  %7107 = vmatprep.subr.bf16.mxu1 %v2266_v58 }
 0x310   : > { %v1963_v21 = vpop.f32.mrb[24].mxu0  ;;  %v2076_v0 = vpop.f32.mrb[24].mxu1  ;;  %7108 = vmatpush3.bf16.xpose.msra.mxu1 %v2266_v58  ;;  %7113 = vmatprep.mubr.bf16.mxu1 %v2248_v61 }
 0x311   : > { %v1964_v27 = vadd.f32 %v1963_v21, %v9227_v62  ;;  %v1965_v5 = vpop.f32.mrb[25].mxu0  ;;  %v2078_v40 = vpop.f32.mrb[25].mxu1  ;;  %v2077_v18 = vadd.f32 %v2076_v0, %v9236_v24 }
 0x312   : > { %v1966_v1 = vadd.f32 %v1965_v5, %v9231_v10  ;;  %v2079_v34 = vadd.f32 %v2078_v40, %v9241_v28  ;;  %v1967_v49 = vpop.f32.mrb[26].mxu0  ;;  %v2080_v33 = vpop.f32.mrb[26].mxu1 }
 0x313   : > { %v1968_v59 = vadd.f32 %v1967_v49, %v9227_v62  ;;  %v2081_v16 = vadd.f32 %v2080_v33, %v9236_v24  ;;  %v1969_v23 = vpop.f32.mrb[27].mxu0  ;;  %v2082_v14 = vpop.f32.mrb[27].mxu1  ;;  %v2232_v48 = vmul.f32 0.088388346, %v1964_v27 }
 0x314   : > { %v1970_v61 = vadd.f32 %v1969_v23, %v9231_v10  ;;  %v2083_v31 = vadd.f32 %v2082_v14, %v9241_v28  ;;  %v9368_v46 = vmul.f32 0.088388346, %v1966_v1 }
 0x315   : > { %v2234_v8 = vmul.f32 0.088388346, %v1968_v59  ;;  %v2268_v30 = vpack.c.bf16 %v2081_v16, %v2077_v18 }
 0x316   : > { %v9370_v54 = vmul.f32 0.088388346, %v1970_v61  ;;  %v9372_v12 = vpack.c.bf16 %v2083_v31, %v2079_v34  ;;  %v1377_v61 = vsub.s32 4, %v9008_v35 }
 0x317   : > { %v2252_v43 = vpack.c.bf16 %v2234_v8, %v2232_v48  ;;  %7109 = vmatprep.subr.bf16.mxu1 %v2268_v30 }
 0x318   : > { %v1973_v36 = vpop.f32.mrb[28].mxu0  ;;  %v2086_v58 = vpop.f32.mrb[28].mxu1  ;;  %7110 = vmatpush3.bf16.xpose.msra.mxu1 %v2268_v30  ;;  %v1381_v30 = vsub.s32 5, %v9008_v35 }
 0x319   : > { %v1974_v21 = vadd.f32 %v1973_v36, %v9227_v62  ;;  %v1975_v0 = vpop.f32.mrb[29].mxu0  ;;  %v2088_v27 = vpop.f32.mrb[29].mxu1  ;;  %v2087_v34 = vadd.f32 %v2086_v58, %v9236_v24 }
 0x31a   : > { %v1976_v5 = vadd.f32 %v1975_v0, %v9231_v10  ;;  %v2089_v40 = vadd.f32 %v2088_v27, %v9241_v28  ;;  %v1977_v1 = vpop.f32.mrb[30].mxu0  ;;  %v2090_v49 = vpop.f32.mrb[30].mxu1  ;;  %v9398_v0 = vrot.slane %v9221_v25, %v1381_v30 }
 0x31b   : > { %v1978_v33 = vadd.f32 %v1977_v1, %v9227_v62  ;;  %v2091_v18 = vadd.f32 %v2090_v49, %v9236_v24  ;;  %v1979_v59 = vpop.f32.mrb[31].mxu0  ;;  %v2092_v16 = vpop.f32.mrb[31].mxu1  ;;  %v2236_v31 = vmul.f32 0.088388346, %v1974_v21 }
 0x31c   : > { %v1980_v23 = vadd.f32 %v1979_v59, %v9231_v10  ;;  %v2093_v14 = vadd.f32 %v2092_v16, %v9241_v28  ;;  %v9386_v36 = vmul.f32 0.088388346, %v1976_v5  ;;  %v9395_v28 = vrot.slane %v9221_v25, %v1377_v61 }
 0x31d   : > { %v2238_v48 = vmul.f32 0.088388346, %v1978_v33  ;;  %v2270_v8 = vpack.c.bf16 %v2091_v18, %v2087_v34 }
 0x31e   : > { %v9388_v58 = vmul.f32 0.088388346, %v1980_v23  ;;  %v9390_v62 = vpack.c.bf16 %v2093_v14, %v2089_v40 }
 0x31f   : > { %v2254_v24 = vpack.c.bf16 %v2238_v48, %v2236_v31  ;;  %7111 = vmatprep.subr.bf16.mxu1 %v2270_v8 }
 0x320   : > { %7112 = vmatpush3.bf16.xpose.msra.mxu1 %v2270_v8 }
 0x321   : > { %v2129_v21 = vpop.f32.mrb[32].mxu0 }
 0x322   : > { %v2131_v27 = vpop.f32.mrb[33].mxu0  ;;  %v2130_v1 = vadd.f32 %v2129_v21, %v9395_v28 }
 0x323   : > { %v2133_v5 = vpop.f32.mrb[34].mxu0  ;;  %v2132_v34 = vadd.f32 %v2131_v27, %v9398_v0 }
 0x324   : > { %v2134_v40 = vadd.f32 %v2133_v5, %v9395_v28  ;;  %v2135_v49 = vpop.f32.mrb[35].mxu0 }
 0x325   : > { %v2136_v33 = vadd.f32 %v2135_v49, %v9398_v0 }
 0x326   : > { %v2272_v18 = vpack.c.bf16 %v2134_v40, %v2130_v1 }
 0x327   : > { %v9404_v59 = vpack.c.bf16 %v2136_v33, %v2132_v34  ;;  %7114 = vmatmul.mubr.bf16.vlgmr.msra.gmra.mrb[40].mxu1 %v2250_v2 }
 0x328   : > { %7121 = vmatprep.subr.bf16.mxu1 %v2272_v18  ;;  %7117 = vmatprep.mubr.bf16.mxu1 %v2252_v43 }
 0x329   : > { %v2139_v25 = vpop.f32.mrb[36].mxu0  ;;  %7122 = vmatpush3.bf16.msra.mxu1 %v2272_v18 }
 0x32a   : > { %v2141_v16 = vpop.f32.mrb[37].mxu0  ;;  %v2140_v14 = vadd.f32 %v2139_v25, %v9395_v28 }
 0x32b   : > { %v2143_v23 = vpop.f32.mrb[38].mxu0  ;;  %v2142_v48 = vadd.f32 %v2141_v16, %v9398_v0 }
 0x32c   : > { %v2144_v61 = vadd.f32 %v2143_v23, %v9395_v28  ;;  %v2145_v31 = vpop.f32.mrb[39].mxu0 }
 0x32d   : > { %v2146_v8 = vadd.f32 %v2145_v31, %v9398_v0 }
 0x32e   : > { %v2274_v30 = vpack.c.bf16 %v2144_v61, %v2140_v14 }
 0x32f   : > { %v9413_v21 = vpack.c.bf16 %v2146_v8, %v2142_v48  ;;  %7118 = vmatmul.mubr.bf16.gmra.mrb[44].mxu1 %v2254_v24 }
 0x330   : > { %7123 = vmatprep.subr.bf16.mxu1 %v2274_v30 }
 0x331   : > { %v2149_v60 = vpop.f32.mrb[40].mxu0  ;;  %7124 = vmatpush3.bf16.msra.mxu1 %v2274_v30 }
 0x332   : > { %v2151_v13 = vpop.f32.mrb[41].mxu0  ;;  %v2150_v43 = vadd.f32 %v2149_v60, %v9395_v28 }
 0x333   : > { %v2153_v2 = vpop.f32.mrb[42].mxu0  ;;  %v2152_v1 = vadd.f32 %v2151_v13, %v9398_v0 }
 0x334   : > { %v2154_v27 = vadd.f32 %v2153_v2, %v9395_v28  ;;  %v2155_v5 = vpop.f32.mrb[43].mxu0 }
 0x335   : > { %v2156_v40 = vadd.f32 %v2155_v5, %v9398_v0 }
 0x336   : > { %v2276_v49 = vpack.c.bf16 %v2154_v27, %v2150_v43 }
 0x337   : > { %v9419_v34 = vpack.c.bf16 %v2156_v40, %v2152_v1 }
 0x338   : > { %7125 = vmatprep.subr.bf16.mxu1 %v2276_v49 }
 0x339   : > { %v2159_v33 = vpop.f32.mrb[44].mxu0  ;;  %7126 = vmatpush3.bf16.msra.mxu1 %v2276_v49 }
 0x33a   : > { %v2161_v24 = vpop.f32.mrb[45].mxu0  ;;  %v2160_v25 = vadd.f32 %v2159_v33, %v9395_v28 }
 0x33b   : > { %v2163_v18 = vpop.f32.mrb[46].mxu0  ;;  %v2162_v14 = vadd.f32 %v2161_v24, %v9398_v0 }
 0x33c   : > { %v2164_v16 = vadd.f32 %v2163_v18, %v9395_v28  ;;  %v2165_v23 = vpop.f32.mrb[47].mxu0 }
 0x33d   : > { %v2166_v61 = vadd.f32 %v2165_v23, %v9398_v0 }
 0x33e   : > { %v2278_v31 = vpack.c.bf16 %v2164_v16, %v2160_v25 }
 0x33f   : > { %v9425_v48 = vpack.c.bf16 %v2166_v61, %v2162_v14 }
 0x340   : > { %7127 = vmatprep.subr.bf16.mxu1 %v2278_v31 }
 0x341   : > { %v2169_v8 = vpop.f32.mrb[48].mxu0  ;;  %7128 = vmatpush3.bf16.msra.mxu1 %v2278_v31 }
 0x342   : > { %v2171_v30 = vpop.f32.mrb[49].mxu0  ;;  %7153 = vmatprep.subr.bf16.mxu1 %v9255_v44  ;;  %v2170_v13 = vadd.f32 %v2169_v8, %v9395_v28 }
 0x343   : > { %v2173_v60 = vpop.f32.mrb[50].mxu0  ;;  %v2172_v27 = vadd.f32 %v2171_v30, %v9398_v0 }
 0x344   : > { %v2174_v2 = vadd.f32 %v2173_v60, %v9395_v28  ;;  %v2175_v43 = vpop.f32.mrb[51].mxu0 }
 0x345   : > { %v2176_v5 = vadd.f32 %v2175_v43, %v9398_v0 }
 0x346   : > { %v2280_v1 = vpack.c.bf16 %v2174_v2, %v2170_v13 }
 0x347   : > { %v9432_v40 = vpack.c.bf16 %v2176_v5, %v2172_v27 }
 0x348   : > { %7137 = vmatprep.subr.bf16.mxu0 %v2280_v1 }
 0x349   : > { %v2179_v49 = vpop.f32.mrb[52].mxu0  ;;  %7138 = vmatpush3.bf16.msra.mxu0 %v2280_v1 }
 0x34a   : > { %v2181_v33 = vpop.f32.mrb[53].mxu0  ;;  %v2180_v18 = vadd.f32 %v2179_v49, %v9395_v28 }
 0x34b   : > { %v2183_v24 = vpop.f32.mrb[54].mxu0  ;;  %v2182_v23 = vadd.f32 %v2181_v33, %v9398_v0 }
 0x34c   : > { %v2184_v25 = vadd.f32 %v2183_v24, %v9395_v28  ;;  %v2185_v16 = vpop.f32.mrb[55].mxu0 }
 0x34d   : > { %v2186_v14 = vadd.f32 %v2185_v16, %v9398_v0 }
 0x34e   : > { %v2282_v61 = vpack.c.bf16 %v2184_v25, %v2180_v18 }
 0x34f   : > { %v9438_v31 = vpack.c.bf16 %v2186_v14, %v2182_v23 }
 0x350   : > { %7139 = vmatprep.subr.bf16.mxu0 %v2282_v61 }
 0x351   : > { %v2189_v8 = vpop.f32.mrb[56].mxu0  ;;  %7140 = vmatpush3.bf16.msra.mxu0 %v2282_v61 }
 0x352   : > { %v2191_v30 = vpop.f32.mrb[57].mxu0  ;;  %v2190_v13 = vadd.f32 %v2189_v8, %v9395_v28 }
 0x353   : > { %v2193_v60 = vpop.f32.mrb[58].mxu0  ;;  %v2192_v27 = vadd.f32 %v2191_v30, %v9398_v0 }
 0x354   : > { %v2194_v2 = vadd.f32 %v2193_v60, %v9395_v28  ;;  %v2195_v43 = vpop.f32.mrb[59].mxu0  ;;  %v883_v60 = vand.u32 127, %v873_v7 }
 0x355   : > { %v2196_v5 = vadd.f32 %v2195_v43, %v9398_v0 }
 0x356   : > { %v2284_v1 = vpack.c.bf16 %v2194_v2, %v2190_v13  ;;  %v876_v13 = vadd.s32 16, %v9008_v35  ;;  %v875_v2 = vadd.s32 8, %v9008_v35  ;;  %vm884_vm0 = vcmp.ge.s32.totalorder %v9008_v35, %v883_v60 }
 0x357   : > { %v9444_v49 = vpack.c.bf16 %v2196_v5, %v2192_v27  ;;  %v878_v5 = vadd.s32 32, %v9008_v35 }
 0x358   : > { %7141 = vmatprep.subr.bf16.mxu0 %v2284_v1  ;;  %vm886_vm1 = vcmp.ge.s32.totalorder %v876_v13, %v883_v60  ;;  %vm885_vm2 = vcmp.ge.s32.totalorder %v875_v2, %v883_v60 }
 0x359   : > { %v2199_v33 = vpop.f32.mrb[60].mxu0  ;;  %7142 = vmatpush3.bf16.msra.mxu0 %v2284_v1  ;;  %vm888_vm5 = vcmp.ge.s32.totalorder %v878_v5, %v883_v60 }
 0x35a   : > { %v2201_v24 = vpop.f32.mrb[61].mxu0  ;;  %v2200_v25 = vadd.f32 %v2199_v33, %v9395_v28 }
 0x35b   : > { %v2203_v18 = vpop.f32.mrb[62].mxu0  ;;  %v2202_v14 = vadd.f32 %v2201_v24, %v9398_v0 }
 0x35c   : > { %v2204_v16 = vadd.f32 %v2203_v18, %v9395_v28  ;;  %v2205_v23 = vpop.f32.mrb[63].mxu0  ;;  %v877_v28 = vadd.s32 24, %v9008_v35 }
 0x35d   : > { %v2206_v61 = vadd.f32 %v2205_v23, %v9398_v0  ;;  %v8311_v0 = vmov -1e+30  }
 0x35e   : > { %v2286_v8 = vpack.c.bf16 %v2204_v16, %v2200_v25  ;;  %v9458_v43 = vsel %vm884_vm0, 0.0, %v8311_v0  ;;  %vm887_vm3 = vcmp.ge.s32.totalorder %v877_v28, %v883_v60  ;;  %v9461_v1 = vsel %vm886_vm1, 0.0, %v8311_v0 }
 0x35f   : > { %v9450_v30 = vpack.c.bf16 %v2206_v61, %v2202_v14  ;;  %v9463_v33 = vsel %vm885_vm2, 0.0, %v8311_v0  ;;  %v880_v25 = vadd.s32 48, %v9008_v35  ;;  %v879_v16 = vadd.s32 40, %v9008_v35 }
 0x360   : > { %7143 = vmatprep.subr.bf16.mxu0 %v2286_v8  ;;  %12138 = vst [vmem:[#allocation21_spill] sm:$0xff] %v9463_v33  ;;  %v9470_v23 = vsel %vm887_vm3, 0.0, %v8311_v0  ;;  %v881_v61 = vadd.s32 56, %v9008_v35  ;;  %v9486_v6 = vsel %vm888_vm5, 0.0, %v8311_v0 }
 0x361   : > { %7144 = vmatpush3.bf16.msra.mxu0 %v2286_v8  ;;  %12139 = vst [vmem:[#allocation22_spill] sm:$0xff] %v9470_v23  ;;  %vm890_vm6 = vcmp.ge.s32.totalorder %v880_v25, %v883_v60  ;;  %vm889_vm7 = vcmp.ge.s32.totalorder %v879_v16, %v883_v60  ;;  %12140 = vst [vmem:[#allocation23_spill] sm:$0xff] %v9486_v6 }
 0x362   : > { %7169 = vmatprep.subr.bf16.mxu0 %v9331_v41  ;;  %vm891_vm8 = vcmp.ge.s32.totalorder %v881_v61, %v883_v60  ;;  %v9490_v53 = vsel %vm890_vm6, 0.0, %v8311_v0 }
 0x363   : > { %12141 = vst [vmem:[#allocation24_spill] sm:$0xff] %v9490_v53  ;;  %v9499_v16 = vsel %vm891_vm8, 0.0, %v8311_v0 }
 0x364   : > { %12143 = vst [vmem:[#allocation26_spill] sm:$0xff] %v9499_v16 }
 0x3da   : > { %v7099_v27 = vpop.f32.mrb[32].mxu1 }
 0x3db   : > { %v2322_v7 = vpop.f32.mrb[33].mxu1  ;;  %v9474_v8 = vadd.f32 %v7099_v27, %v9461_v1 }
 0x3dc   : > { %v9466_v24 = vadd.f32 %v2322_v7, %v9458_v43  ;;  %v7100_v18 = vpop.f32.mrb[34].mxu1 }
 0x3dd   : > { %v2325_v14 = vpop.f32.mrb[35].mxu1  ;;  %v9482_v28 = vadd.f32 %v7100_v18, %v9470_v23 }
 0x3de   : > { %v9477_v13 = vadd.f32 %v2325_v14, %v9463_v33  ;;  %v2419_v2 = vsel %vm2418_vm4, %v9466_v24, -inf  ;;  %v2425_v14 = vsel %vm2418_vm4, %v9474_v8, -inf }
 0x3df   : > { %2420 = vmax.xlane.f32.xlu0 %v2419_v2  ;;  %v9492_v2 = vsel %vm889_vm7, 0.0, %v8311_v0  ;;  %v2428_v25 = vsel %vm2418_vm4, %v9482_v28, -inf }
 0x3e0   : > { %v2422_v7 = vsel %vm2418_vm4, %v9477_v13, -inf  ;;  %12142 = vst [vmem:[#allocation25_spill] sm:$0xff] %v9492_v2 }
 0x3e1   : > { %2423 = vmax.xlane.f32.xlu1 %v2422_v7 }
 0x3e2   : > { %v7103_v27 = vpop.f32.mrb[36].mxu1 }
 0x3e3   : > { %v2338_v5 = vpop.f32.mrb[37].mxu1  ;;  %2426 = vmax.xlane.f32.xlu0 %v2425_v14  ;;  %v9502_v26 = vadd.f32 %v7103_v27, %v9490_v53 }
 0x3e4   : > { %v9495_v18 = vadd.f32 %v2338_v5, %v9486_v6  ;;  %v7104_v10 = vpop.f32.mrb[38].mxu1 }
 0x3e5   : > { %v2341_v7 = vpop.f32.mrb[39].mxu1  ;;  %2429 = vmax.xlane.f32.xlu1 %v2428_v25  ;;  %v9510_v14 = vadd.f32 %v7104_v10, %v9499_v16  ;;  %v2437_v0 = vsel %vm2418_vm4, %v9502_v26, -inf }
 0x3e6   : > { %v9505_v60 = vadd.f32 %v2341_v7, %v9492_v2  ;;  %v2431_v61 = vsel %vm2418_vm4, %v9495_v18, -inf }
 0x3e7   : > { %2432 = vmax.xlane.f32.xlu0 %v2431_v61  ;;  %v2440_v27 = vsel %vm2418_vm4, %v9510_v14, -inf }
 0x3e8   : > { %v2434_v5 = vsel %vm2418_vm4, %v9505_v60, -inf }
 0x3e9   : > { %2435 = vmax.xlane.f32.xlu1 %v2434_v5 }
 0x3eb   : > { %2438 = vmax.xlane.f32.xlu0 %v2437_v0 }
 0x3ed   : > { %2441 = vmax.xlane.f32.xlu1 %v2440_v27 }
 0x3fa   : > { %v7115_v25 = vpop.f32.mrb[40].mxu1 }
 0x3fb   : > { %v2387_v7 = vpop.f32.mrb[41].mxu1  ;;  %v9522_v63 = vadd.f32 %v7115_v25, %v9461_v1 }
 0x3fc   : > { %v9519_v17 = vadd.f32 %v2387_v7, %v9458_v43  ;;  %v7116_v61 = vpop.f32.mrb[42].mxu1 }
 0x3fd   : > { %v2390_v10 = vpop.f32.mrb[43].mxu1  ;;  %v9530_v45 = vadd.f32 %v7116_v61, %v9470_v23  ;;  %v2449_v57 = vsel %vm2418_vm4, %v9522_v63, -inf }
 0x3fe   : > { %v9525_v5 = vadd.f32 %v2390_v10, %v9463_v33  ;;  %v2443_v0 = vsel %vm2418_vm4, %v9519_v17, -inf }
 0x3ff   : > { %2444 = vmax.xlane.f32.xlu0 %v2443_v0  ;;  %v2452_v0 = vsel %vm2418_vm4, %v9530_v45, -inf }
 0x400   : > { %v2446_v27 = vsel %vm2418_vm4, %v9525_v5, -inf }
 0x401   : > { %2447 = vmax.xlane.f32.xlu1 %v2446_v27 }
 0x402   : > { %v7119_v7 = vpop.f32.mrb[44].mxu1 }
 0x403   : > { %2450 = vmax.xlane.f32.xlu0 %v2449_v57  ;;  %v2403_v25 = vpop.f32.mrb[45].mxu1  ;;  %v9542_v42 = vadd.f32 %v7119_v7, %v9490_v53 }
 0x404   : > { %v9537_v10 = vadd.f32 %v2403_v25, %v9486_v6  ;;  %v7120_v52 = vpop.f32.mrb[46].mxu1 }
 0x405   : > { %2453 = vmax.xlane.f32.xlu1 %v2452_v0  ;;  %v2406_v61 = vpop.f32.mrb[47].mxu1  ;;  %v9550_v57 = vadd.f32 %v7120_v52, %v9499_v16  ;;  %v2461_v0 = vsel %vm2418_vm4, %v9542_v42, -inf }
 0x406   : > { %v9545_v27 = vadd.f32 %v2406_v61, %v9492_v2  ;;  %v2455_v35 = vsel %vm2418_vm4, %v9537_v10, -inf }
 0x407   : > { %2456 = vmax.xlane.f32.xlu0 %v2455_v35  ;;  %v2464_v7 = vsel %vm2418_vm4, %v9550_v57, -inf }
 0x408   : > { %v2458_v25 = vsel %vm2418_vm4, %v9545_v27, -inf }
 0x409   : > { %2459 = vmax.xlane.f32.xlu1 %v2458_v25 }
 0x40b   : > { %2462 = vmax.xlane.f32.xlu0 %v2461_v0 }
 0x40d   : > { %2465 = vmax.xlane.f32.xlu1 %v2464_v7 }
 0x46c   : > { %v2421_v61 = vpop.xlane.xlu0 %2420 }
 0x46d   : > { %v2467_v15 = vsub.f32 %v9466_v24, %v2421_v61 }
 0x46e   : > { %v2424_v38 = vpop.xlane.xlu1 %2423 }
 0x46f   : > { %v2483_v35 = vmul.f32 1.442695, %v2467_v15  ;;  %v2468_v52 = vsub.f32 %v9477_v13, %v2424_v38 }
 0x470   : > { %v2427_v16 = vpop.xlane.xlu0 %2426 }
 0x471   : > { %7789 = vpow2.f32 %v2483_v35  ;;  %v2485_v2 = vmul.f32 1.442695, %v2468_v52  ;;  %v2469_v25 = vsub.f32 %v9474_v8, %v2427_v16 }
 0x472   : > { %v2430_v53 = vpop.xlane.xlu1 %2429 }
 0x473   : > { %7791 = vpow2.f32 %v2485_v2  ;;  %v2487_v6 = vmul.f32 1.442695, %v2469_v25  ;;  %v2470_v0 = vsub.f32 %v9482_v28, %v2430_v53 }
 0x474   : > { %v2433_v23 = vpop.xlane.xlu0 %2432 }
 0x475   : > { %7793 = vpow2.f32 %v2487_v6  ;;  %v2489_v7 = vmul.f32 1.442695, %v2470_v0  ;;  %v2471_v33 = vsub.f32 %v9495_v18, %v2433_v23 }
 0x476   : > { %v2436_v24 = vpop.xlane.xlu1 %2435 }
 0x477   : > { %7795 = vpow2.f32 %v2489_v7  ;;  %v2491_v15 = vmul.f32 1.442695, %v2471_v33  ;;  %v2472_v38 = vsub.f32 %v9505_v60, %v2436_v24 }
 0x478   : > { %v2439_v13 = vpop.xlane.xlu0 %2438 }
 0x479   : > { %7797 = vpow2.f32 %v2491_v15  ;;  %v2493_v61 = vmul.f32 1.442695, %v2472_v38  ;;  %v2473_v8 = vsub.f32 %v9502_v26, %v2439_v13 }
 0x47a   : > { %v2442_v16 = vpop.xlane.xlu1 %2441 }
 0x47b   : > { %v9565_v2 = vpop.eup %7789  ;;  %7799 = vpow2.f32 %v2493_v61  ;;  %v2495_v53 = vmul.f32 1.442695, %v2473_v8  ;;  %v2474_v6 = vsub.f32 %v9510_v14, %v2442_v16 }
 0x47c   : > { %v2515_v23 = vsel %vm2418_vm4, %v9565_v2, 0.0 }
 0x47d   : > { %v9570_v28 = vpop.eup %7791  ;;  %7801 = vpow2.f32 %v2495_v53  ;;  %v2497_v33 = vmul.f32 1.442695, %v2474_v6  ;;  %2516 = vadd.xlane.f32.xlu0 %v2515_v23 }
 0x47e   : > { %v2518_v18 = vsel %vm2418_vm4, %v9570_v28, 0.0 }
 0x47f   : > { %v9574_v60 = vpop.eup %7793  ;;  %7803 = vpow2.f32 %v2497_v33  ;;  %2519 = vadd.xlane.f32.xlu1 %v2518_v18 }
 0x480   : > { %v2521_v26 = vsel %vm2418_vm4, %v9574_v60, 0.0 }
 0x481   : > { %v9578_v35 = vpop.eup %7795  ;;  %2522 = vadd.xlane.f32.xlu0 %v2521_v26 }
 0x482   : > { %v2524_v14 = vsel %vm2418_vm4, %v9578_v35, 0.0 }
 0x483   : > { %v9582_v52 = vpop.eup %7797  ;;  %2525 = vadd.xlane.f32.xlu1 %v2524_v14 }
 0x484   : > { %v2527_v25 = vsel %vm2418_vm4, %v9582_v52, 0.0 }
 0x485   : > { %v9586_v0 = vpop.eup %7799  ;;  %2528 = vadd.xlane.f32.xlu0 %v2527_v25 }
 0x486   : > { %v2530_v7 = vsel %vm2418_vm4, %v9586_v0, 0.0 }
 0x487   : > { %v9590_v24 = vpop.eup %7801  ;;  %2531 = vadd.xlane.f32.xlu1 %v2530_v7 }
 0x488   : > { %v2533_v15 = vsel %vm2418_vm4, %v9590_v24, 0.0 }
 0x489   : > { %v9594_v38 = vpop.eup %7803  ;;  %2534 = vadd.xlane.f32.xlu0 %v2533_v15 }
 0x48a   : > { %v2536_v13 = vsel %vm2418_vm4, %v9594_v38, 0.0 }
 0x48b   : > { %2537 = vadd.xlane.f32.xlu1 %v2536_v13 }
 0x48c   : > { %v2445_v61 = vpop.xlane.xlu0 %2444 }
 0x48d   : > { %v2475_v8 = vsub.f32 %v9519_v17, %v2445_v61 }
 0x48e   : > { %v2448_v16 = vpop.xlane.xlu1 %2447 }
 0x48f   : > { %v2499_v53 = vmul.f32 1.442695, %v2475_v8  ;;  %v2476_v6 = vsub.f32 %v9525_v5, %v2448_v16 }
 0x490   : > { %v2451_v23 = vpop.xlane.xlu0 %2450 }
 0x491   : > { %7805 = vpow2.f32 %v2499_v53  ;;  %v2501_v33 = vmul.f32 1.442695, %v2476_v6  ;;  %v2477_v18 = vsub.f32 %v9522_v63, %v2451_v23 }
 0x492   : > { %v2454_v26 = vpop.xlane.xlu1 %2453 }
 0x493   : > { %7807 = vpow2.f32 %v2501_v33  ;;  %v2503_v14 = vmul.f32 1.442695, %v2477_v18  ;;  %v2478_v25 = vsub.f32 %v9530_v45, %v2454_v26 }
 0x494   : > { %v2457_v7 = vpop.xlane.xlu0 %2456 }
 0x495   : > { %7809 = vpow2.f32 %v2503_v14  ;;  %v2505_v15 = vmul.f32 1.442695, %v2478_v25  ;;  %v2479_v13 = vsub.f32 %v9537_v10, %v2457_v7 }
 0x496   : > { %v2460_v17 = vpop.xlane.xlu1 %2459 }
 0x497   : > { %7811 = vpow2.f32 %v2505_v15  ;;  %v2507_v61 = vmul.f32 1.442695, %v2479_v13  ;;  %v2480_v5 = vsub.f32 %v9545_v27, %v2460_v17 }
 0x498   : > { %v2463_v8 = vpop.xlane.xlu0 %2462 }
 0x499   : > { %7813 = vpow2.f32 %v2507_v61  ;;  %v2509_v16 = vmul.f32 1.442695, %v2480_v5  ;;  %v2481_v63 = vsub.f32 %v9542_v42, %v2463_v8 }
 0x49a   : > { %v2466_v53 = vpop.xlane.xlu1 %2465 }
 0x49b   : > { %v9605_v6 = vpop.eup %7805  ;;  %7815 = vpow2.f32 %v2509_v16  ;;  %v2511_v45 = vmul.f32 1.442695, %v2481_v63  ;;  %v2482_v23 = vsub.f32 %v9550_v57, %v2466_v53 }
 0x49c   : > { %v2539_v10 = vsel %vm2418_vm4, %v9605_v6, 0.0 }
 0x49d   : > { %v9610_v33 = vpop.eup %7807  ;;  %7817 = vpow2.f32 %v2511_v45  ;;  %v2513_v18 = vmul.f32 1.442695, %v2482_v23  ;;  %2540 = vadd.xlane.f32.xlu0 %v2539_v10 }
 0x49e   : > { %v2542_v27 = vsel %vm2418_vm4, %v9610_v33, 0.0 }
 0x49f   : > { %v9614_v26 = vpop.eup %7809  ;;  %7819 = vpow2.f32 %v2513_v18  ;;  %2543 = vadd.xlane.f32.xlu1 %v2542_v27 }
 0x4a0   : > { %v2545_v42 = vsel %vm2418_vm4, %v9614_v26, 0.0 }
 0x4a1   : > { %v9618_v14 = vpop.eup %7811  ;;  %2546 = vadd.xlane.f32.xlu0 %v2545_v42 }
 0x4a2   : > { %v2548_v57 = vsel %vm2418_vm4, %v9618_v14, 0.0 }
 0x4a3   : > { %v9622_v25 = vpop.eup %7813  ;;  %2549 = vadd.xlane.f32.xlu1 %v2548_v57 }
 0x4a4   : > { %v2551_v7 = vsel %vm2418_vm4, %v9622_v25, 0.0 }
 0x4a5   : > { %v9626_v15 = vpop.eup %7815  ;;  %2552 = vadd.xlane.f32.xlu0 %v2551_v7 }
 0x4a6   : > { %v2554_v13 = vsel %vm2418_vm4, %v9626_v15, 0.0 }
 0x4a7   : > { %v9630_v17 = vpop.eup %7817  ;;  %2555 = vadd.xlane.f32.xlu1 %v2554_v13 }
 0x4a8   : > { %v2557_v61 = vsel %vm2418_vm4, %v9630_v17, 0.0 }
 0x4a9   : > { %v9634_v5 = vpop.eup %7819  ;;  %2558 = vadd.xlane.f32.xlu0 %v2557_v61 }
 0x4aa   : > { %v2560_v8 = vsel %vm2418_vm4, %v9634_v5, 0.0 }
 0x4ab   : > { %2561 = vadd.xlane.f32.xlu1 %v2560_v8 }
 0x50a   : > { %v2517_v16 = vpop.xlane.xlu0 %2516 }
 0x50b   : > { %7821 = vrcp.f32 %v2517_v16 }
 0x50c   : > { %v2520_v63 = vpop.xlane.xlu1 %2519 }
 0x50d   : > { %7823 = vrcp.f32 %v2520_v63 }
 0x50e   : > { %v2523_v53 = vpop.xlane.xlu0 %2522 }
 0x50f   : > { %7825 = vrcp.f32 %v2523_v53 }
 0x510   : > { %v2526_v45 = vpop.xlane.xlu1 %2525 }
 0x511   : > { %7827 = vrcp.f32 %v2526_v45 }
 0x512   : > { %v2529_v23 = vpop.xlane.xlu0 %2528 }
 0x513   : > { %7829 = vrcp.f32 %v2529_v23 }
 0x514   : > { %v2532_v10 = vpop.xlane.xlu1 %2531 }
 0x515   : > { %v7822_v18 = vpop.eup %7821  ;;  %7831 = vrcp.f32 %v2532_v10 }
 0x516   : > { %v2535_v27 = vpop.xlane.xlu0 %2534  ;;  %v2579_v7 = vmul.f32 %v7822_v18, %v9565_v2 }
 0x517   : > { %v7824_v42 = vpop.eup %7823  ;;  %7833 = vrcp.f32 %v2535_v27 }
 0x518   : > { %v2538_v57 = vpop.xlane.xlu1 %2537  ;;  %v2580_v13 = vmul.f32 %v7824_v42, %v9570_v28 }
 0x519   : > { %v7826_v61 = vpop.eup %7825  ;;  %7835 = vrcp.f32 %v2538_v57 }
 0x51a   : > { %v2595_v8 = vpack.c.bf16 %v2580_v13, %v2579_v7  ;;  %v2581_v63 = vmul.f32 %v7826_v61, %v9574_v60 }
 0x51b   : > { %v7828_v16 = vpop.eup %7827 }
 0x51c   : > { %v2582_v53 = vmul.f32 %v7828_v16, %v9578_v35  ;;  %7129 = vmatprep.mubr.msk.bf16.mxu1 %vm2418_vm4, %v2595_v8 }
 0x51d   : > { %v7830_v45 = vpop.eup %7829 }
 0x51e   : > { %v2596_v23 = vpack.c.bf16 %v2582_v53, %v2581_v63  ;;  %v2583_v27 = vmul.f32 %v7830_v45, %v9582_v52  ;;  %v12144_v52 = vpack.c.bf16 %v9253_v37, %v9251_v19 }
 0x51f   : > { %v7832_v10 = vpop.eup %7831 }
 0x520   : > { %7130 = vmatmul.mubr.msk.bf16.vlgmr.msra.gmra.mrb[48].mxu1 %vm2418_vm4, %v2596_v23  ;;  %v2584_v2 = vmul.f32 %v7832_v10, %v9586_v0 }
 0x521   : > { %v7834_v28 = vpop.eup %7833  ;;  %7154 = vmatpush3.bf16.xpose.msra.mxu1 %v9255_v44 }
 0x522   : > { %7155 = vmatprep.subr.bf16.mxu1 %v9275_v20  ;;  %v2597_v18 = vpack.c.bf16 %v2584_v2, %v2583_v27  ;;  %v2585_v35 = vmul.f32 %v7834_v28, %v9590_v24 }
 0x523   : > { %v7836_v60 = vpop.eup %7835 }
 0x524   : > { %7133 = vmatprep.mubr.msk.bf16.mxu1 %vm2418_vm4, %v2597_v18  ;;  %v2586_v42 = vmul.f32 %v7836_v60, %v9594_v38 }
 0x526   : > { %v2598_v57 = vpack.c.bf16 %v2586_v42, %v2585_v35  ;;  %v12152_v35 = vld [vmem:[#allocation21_spill] sm:$0xff] }
 0x528   : > { %7134 = vmatmul.mubr.msk.bf16.gmra.mrb[52].mxu1 %vm2418_vm4, %v2598_v57 }
 0x529   : > { %7156 = vmatpush3.bf16.xpose.msra.mxu1 %v9275_v20  ;;  %7161 = vmatprep.mubr.bf16.mxu1 %v12144_v52 }
 0x52a   : > { %7157 = vmatprep.subr.bf16.mxu1 %v9297_v29  ;;  %v2541_v44 = vpop.xlane.xlu0 %2540 }
 0x52b   : > { %7837 = vrcp.f32 %v2541_v44  ;;  %v12153_v44 = vld [vmem:[#allocation22_spill] sm:$0xff] }
 0x52c   : > { %v2544_v0 = vpop.xlane.xlu1 %2543 }
 0x52d   : > { %7839 = vrcp.f32 %v2544_v0 }
 0x52e   : > { %v2547_v7 = vpop.xlane.xlu0 %2546 }
 0x52f   : > { %7841 = vrcp.f32 %v2547_v7 }
 0x530   : > { %v2550_v24 = vpop.xlane.xlu1 %2549 }
 0x531   : > { %7843 = vrcp.f32 %v2550_v24  ;;  %7158 = vmatpush3.bf16.xpose.msra.mxu1 %v9297_v29 }
 0x532   : > { %7159 = vmatprep.subr.bf16.mxu1 %v9315_v4  ;;  %v2553_v38 = vpop.xlane.xlu0 %2552 }
 0x533   : > { %7845 = vrcp.f32 %v2553_v38 }
 0x534   : > { %v2556_v20 = vpop.xlane.xlu1 %2555 }
 0x535   : > { %v7838_v13 = vpop.eup %7837  ;;  %7847 = vrcp.f32 %v2556_v20 }
 0x536   : > { %v2559_v19 = vpop.xlane.xlu0 %2558  ;;  %v2587_v8 = vmul.f32 %v7838_v13, %v9605_v6  ;;  %v12145_v6 = vpack.c.bf16 %v9273_v3, %v9271_v47 }
 0x537   : > { %v7840_v37 = vpop.eup %7839  ;;  %7849 = vrcp.f32 %v2559_v19 }
 0x538   : > { %v2562_v61 = vpop.xlane.xlu1 %2561  ;;  %v2588_v16 = vmul.f32 %v7840_v37, %v9610_v33  ;;  %v12154_v37 = vld [vmem:[#allocation23_spill] sm:$0xff] }
 0x539   : > { %v7842_v63 = vpop.eup %7841  ;;  %7851 = vrcp.f32 %v2562_v61  ;;  %7160 = vmatpush3.bf16.xpose.msra.mxu1 %v9315_v4 }
 0x53a   : > { %7185 = vmatprep.subr.bf16.mxu1 %v9404_v59  ;;  %v2599_v29 = vpack.c.bf16 %v2588_v16, %v2587_v8  ;;  %v2589_v45 = vmul.f32 %v7842_v63, %v9614_v26  ;;  %v12146_v26 = vpack.c.bf16 %v9295_v56, %v9293_v22  ;;  %v12147_v56 = vpack.c.bf16 %v9313_v55, %v9311_v39 }
 0x53b   : > { %v7844_v53 = vpop.eup %7843  ;;  %v12149_v39 = vpack.c.bf16 %v9352_v50, %v9350_v11  ;;  %v12150_v55 = vpack.c.bf16 %v9370_v54, %v9368_v46 }
 0x53c   : > { %v2590_v23 = vmul.f32 %v7844_v53, %v9618_v14  ;;  %7145 = vmatprep.mubr.msk.bf16.mxu0 %vm2418_vm4, %v2599_v29 }
 0x53d   : > { %v7846_v10 = vpop.eup %7845 }
 0x53e   : > { %v2600_v27 = vpack.c.bf16 %v2590_v23, %v2589_v45  ;;  %v2591_v4 = vmul.f32 %v7846_v10, %v9622_v25  ;;  %v12155_v23 = vld [vmem:[#allocation24_spill] sm:$0xff] }
 0x53f   : > { %v7848_v2 = vpop.eup %7847 }
 0x540   : > { %7162 = vmatmul.mubr.bf16.vlgmr.msra.gmra.mrb[56].mxu1 %v12145_v6  ;;  %7146 = vmatmul.mubr.msk.bf16.vlgmr.msra.gmra.mrb[64].mxu0 %vm2418_vm4, %v2600_v27  ;;  %v2592_v33 = vmul.f32 %v7848_v2, %v9626_v15  ;;  %v12156_v27 = vld [vmem:[#allocation25_spill] sm:$0xff] }
 0x541   : > { %v7850_v28 = vpop.eup %7849  ;;  %7165 = vmatprep.mubr.bf16.mxu1 %v12146_v26  ;;  %7170 = vmatpush3.bf16.xpose.msra.mxu0 %v9331_v41  ;;  %v12148_v41 = vpack.c.bf16 %v9329_v9, %v9327_v51  ;;  %v12151_v51 = vpack.c.bf16 %v9388_v58, %v9386_v36 }
 0x542   : > { %7186 = vmatpush3.bf16.msra.mxu1 %v9404_v59  ;;  %7171 = vmatprep.subr.bf16.mxu0 %v9354_v32  ;;  %v2601_v14 = vpack.c.bf16 %v2592_v33, %v2591_v4  ;;  %v2593_v3 = vmul.f32 %v7850_v28, %v9630_v17  ;;  %v12157_v33 = vld [vmem:[#allocation26_spill] sm:$0xff] }
 0x543   : > { %v7852_v47 = vpop.eup %7851  ;;  %7187 = vmatprep.subr.bf16.mxu1 %v9413_v21 }
 0x544   : > { %7149 = vmatprep.mubr.msk.bf16.mxu0 %vm2418_vm4, %v2601_v14  ;;  %v2594_v25 = vmul.f32 %v7852_v47, %v9634_v5 }
 0x546   : > { %7188 = vmatpush3.bf16.msra.mxu1 %v9413_v21  ;;  %v2602_v22 = vpack.c.bf16 %v2594_v25, %v2593_v3 }
 0x547   : > { %7189 = vmatprep.subr.bf16.mxu1 %v9419_v34 }
 0x548   : > { %7166 = vmatmul.mubr.bf16.gmra.mrb[60].mxu1 %v12147_v56  ;;  %7150 = vmatmul.mubr.msk.bf16.gmra.mrb[68].mxu0 %vm2418_vm4, %v2602_v22 }
 0x549   : > { %7172 = vmatpush3.bf16.xpose.msra.mxu0 %v9354_v32  ;;  %7177 = vmatprep.mubr.bf16.mxu0 %v12148_v41 }
 0x54a   : > { %7190 = vmatpush3.bf16.msra.mxu1 %v9419_v34  ;;  %7173 = vmatprep.subr.bf16.mxu0 %v9372_v12 }
 0x54b   : > { %7191 = vmatprep.subr.bf16.mxu1 %v9425_v48 }
 0x54e   : > { %7192 = vmatpush3.bf16.msra.mxu1 %v9425_v48 }
 0x551   : > { %7174 = vmatpush3.bf16.xpose.msra.mxu0 %v9372_v12 }
 0x552   : > { %7175 = vmatprep.subr.bf16.mxu0 %v9390_v62 }
 0x559   : > { %7176 = vmatpush3.bf16.xpose.msra.mxu0 %v9390_v62 }
 0x55a   : > { %7201 = vmatprep.subr.bf16.mxu0 %v9432_v40 }
 0x560   : > { %7178 = vmatmul.mubr.bf16.vlgmr.msra.gmra.mrb[72].mxu0 %v12149_v39 }
 0x561   : > { %7181 = vmatprep.mubr.bf16.mxu0 %v12150_v55  ;;  %7202 = vmatpush3.bf16.msra.mxu0 %v9432_v40 }
 0x562   : > { %7203 = vmatprep.subr.bf16.mxu0 %v9438_v31 }
 0x565   : > { %7204 = vmatpush3.bf16.msra.mxu0 %v9438_v31 }
 0x566   : > { %7205 = vmatprep.subr.bf16.mxu0 %v9444_v49 }
 0x568   : > { %7182 = vmatmul.mubr.bf16.gmra.mrb[76].mxu0 %v12151_v51 }
 0x569   : > { %7206 = vmatpush3.bf16.msra.mxu0 %v9444_v49 }
 0x56a   : > { %7207 = vmatprep.subr.bf16.mxu0 %v9450_v30 }
 0x56d   : > { %7208 = vmatpush3.bf16.msra.mxu0 %v9450_v30 }
 0x5f3   : > { %v9716_v9 = vpop.f32.mrb[48].mxu1 }
 0x5f4   : > { %v9718_v11 = vpop.f32.mrb[49].mxu1 }
 0x5f5   : > { %v9720_v50 = vpop.f32.mrb[50].mxu1 }
 0x5f6   : > { %v2758_v32 = vpack.c.bf16 %v9720_v50, %v9716_v9  ;;  %v9724_v46 = vpop.f32.mrb[51].mxu1  ;;  %v7556_v9 = vld [vmem:[%s8626_s23 + $0xd0] ss:$8 sps:$4 sm:$0xff]   ;;  %v7561_v50 = vld [vmem:[%s8626_s23 + $0xe4] ss:$8 sps:$4 sm:$0xff]  }
 0x5f7   : > { %v2757_v54 = vpack.c.bf16 %v9724_v46, %v9718_v11 }
 0x5fb   : > { %v9728_v12 = vpop.f32.mrb[52].mxu1 }
 0x5fc   : > { %v9730_v36 = vpop.f32.mrb[53].mxu1 }
 0x5fd   : > { %v9732_v58 = vpop.f32.mrb[54].mxu1 }
 0x5fe   : > { %v2760_v62 = vpack.c.bf16 %v9732_v58, %v9728_v12  ;;  %v9736_v59 = vpop.f32.mrb[55].mxu1  ;;  %v7562_v12 = vld [vmem:[%s8626_s23 + $0xf0] ss:$8 sps:$4 sm:$0xff]  }
 0x5ff   : > { %v2759_v21 = vpack.c.bf16 %v9736_v59, %v9730_v36  ;;  %v7564_v36 = vld [vmem:[%s8626_s23 + $0xf4] ss:$8 sps:$4 sm:$0xff]  }
 0x613   : > { %v7163_v34 = vpop.f32.mrb[56].mxu1  ;;  %v9740_v48 = vpop.f32.mrb[64].mxu0 }
 0x614   : > { %v2815_v40 = vpop.f32.mrb[57].mxu1  ;;  %v9742_v31 = vpop.f32.mrb[65].mxu0  ;;  %v9754_v60 = vadd.f32 %v7163_v34, %v9461_v1 }
 0x615   : > { %v9745_v49 = vadd.f32 %v2815_v40, %v9458_v43  ;;  %v7164_v30 = vpop.f32.mrb[58].mxu1  ;;  %v9747_v15 = vpop.f32.mrb[66].mxu0 }
 0x616   : > { %v2762_v17 = vpack.c.bf16 %v9747_v15, %v9740_v48  ;;  %v2818_v5 = vpop.f32.mrb[59].mxu1  ;;  %v9751_v18 = vpop.f32.mrb[67].mxu0  ;;  %v9764_v0 = vadd.f32 %v7164_v30, %v12153_v44  ;;  %v2917_v38 = vsel %vm2418_vm4, %v9754_v60, -inf }
 0x617   : > { %v9757_v42 = vadd.f32 %v2818_v5, %v12152_v35  ;;  %v2761_v57 = vpack.c.bf16 %v9751_v18, %v9742_v31  ;;  %v2911_v52 = vsel %vm2418_vm4, %v9745_v49, -inf }
 0x618   : > { %2912 = vmax.xlane.f32.xlu0 %v2911_v52  ;;  %v2920_v16 = vsel %vm2418_vm4, %v9764_v0, -inf }
 0x619   : > { %v2914_v7 = vsel %vm2418_vm4, %v9757_v42, -inf }
 0x61a   : > { %2915 = vmax.xlane.f32.xlu1 %v2914_v7 }
 0x61b   : > { %v7167_v24 = vpop.f32.mrb[60].mxu1  ;;  %v9770_v20 = vpop.f32.mrb[68].mxu0 }
 0x61c   : > { %v2831_v13 = vpop.f32.mrb[61].mxu1  ;;  %2918 = vmax.xlane.f32.xlu0 %v2917_v38  ;;  %v9772_v19 = vpop.f32.mrb[69].mxu0  ;;  %v9786_v10 = vadd.f32 %v7167_v24, %v12155_v23 }
 0x61d   : > { %v9775_v61 = vadd.f32 %v2831_v13, %v12154_v37  ;;  %v7168_v8 = vpop.f32.mrb[62].mxu1  ;;  %v9779_v63 = vpop.f32.mrb[70].mxu0 }
 0x61e   : > { %v2834_v29 = vpop.f32.mrb[63].mxu1  ;;  %2921 = vmax.xlane.f32.xlu1 %v2920_v16  ;;  %v2764_v53 = vpack.c.bf16 %v9779_v63, %v9770_v20  ;;  %v9783_v45 = vpop.f32.mrb[71].mxu0  ;;  %v9796_v28 = vadd.f32 %v7168_v8, %v12157_v33  ;;  %v2929_v14 = vsel %vm2418_vm4, %v9786_v10, -inf }
 0x61f   : > { %v9789_v2 = vadd.f32 %v2834_v29, %v12156_v27  ;;  %v2763_v6 = vpack.c.bf16 %v9783_v45, %v9772_v19  ;;  %v2923_v4 = vsel %vm2418_vm4, %v9775_v61, -inf }
 0x620   : > { %2924 = vmax.xlane.f32.xlu0 %v2923_v4  ;;  %v2932_v47 = vsel %vm2418_vm4, %v9796_v28, -inf }
 0x621   : > { %v2926_v26 = vsel %vm2418_vm4, %v9789_v2, -inf }
 0x622   : > { %2927 = vmax.xlane.f32.xlu1 %v2926_v26 }
 0x624   : > { %2930 = vmax.xlane.f32.xlu0 %v2929_v14 }
 0x626   : > { %2933 = vmax.xlane.f32.xlu1 %v2932_v47 }
 0x633   : > { %v7179_v3 = vpop.f32.mrb[72].mxu0 }
 0x634   : > { %v2880_v25 = vpop.f32.mrb[73].mxu0  ;;  %v9808_v39 = vadd.f32 %v7179_v3, %v9461_v1 }
 0x635   : > { %v9805_v22 = vadd.f32 %v2880_v25, %v9458_v43  ;;  %v7180_v56 = vpop.f32.mrb[74].mxu0 }
 0x636   : > { %v2883_v41 = vpop.f32.mrb[75].mxu0  ;;  %v9816_v34 = vadd.f32 %v7180_v56, %v12153_v44  ;;  %v2941_v30 = vsel %vm2418_vm4, %v9808_v39, -inf }
 0x637   : > { %v9811_v55 = vadd.f32 %v2883_v41, %v12152_v35  ;;  %v2935_v51 = vsel %vm2418_vm4, %v9805_v22, -inf }
 0x638   : > { %2936 = vmax.xlane.f32.xlu0 %v2935_v51  ;;  %v2944_v52 = vsel %vm2418_vm4, %v9816_v34, -inf }
 0x639   : > { %v2938_v40 = vsel %vm2418_vm4, %v9811_v55, -inf }
 0x63a   : > { %2939 = vmax.xlane.f32.xlu1 %v2938_v40 }
 0x63b   : > { %v7183_v43 = vpop.f32.mrb[76].mxu0 }
 0x63c   : > { %v2896_v1 = vpop.f32.mrb[77].mxu0  ;;  %2942 = vmax.xlane.f32.xlu0 %v2941_v30  ;;  %v9828_v44 = vadd.f32 %v7183_v43, %v12155_v23 }
 0x63d   : > { %v9823_v5 = vadd.f32 %v2896_v1, %v12154_v37  ;;  %v7184_v35 = vpop.f32.mrb[78].mxu0 }
 0x63e   : > { %v2899_v7 = vpop.f32.mrb[79].mxu0  ;;  %2945 = vmax.xlane.f32.xlu1 %v2944_v52  ;;  %v9836_v13 = vadd.f32 %v7184_v35, %v12157_v33  ;;  %v2953_v8 = vsel %vm2418_vm4, %v9828_v44, -inf }
 0x63f   : > { %v9831_v24 = vadd.f32 %v2899_v7, %v12156_v27  ;;  %v2947_v38 = vsel %vm2418_vm4, %v9823_v5, -inf }
 0x640   : > { %2948 = vmax.xlane.f32.xlu0 %v2947_v38  ;;  %v2956_v16 = vsel %vm2418_vm4, %v9836_v13, -inf }
 0x641   : > { %v2950_v37 = vsel %vm2418_vm4, %v9831_v24, -inf }
 0x642   : > { %2951 = vmax.xlane.f32.xlu1 %v2950_v37 }
 0x644   : > { %2954 = vmax.xlane.f32.xlu0 %v2953_v8 }
 0x646   : > { %2957 = vmax.xlane.f32.xlu1 %v2956_v16 }
 0x6a5   : > { %v2913_v29 = vpop.xlane.xlu0 %2912 }
 0x6a6   : > { %v2959_v23 = vsub.f32 %v9745_v49, %v2913_v29 }
 0x6a7   : > { %v2916_v27 = vpop.xlane.xlu1 %2915 }
 0x6a8   : > { %v2975_v4 = vmul.f32 1.442695, %v2959_v23  ;;  %v2960_v33 = vsub.f32 %v9757_v42, %v2916_v27 }
 0x6a9   : > { %v2919_v26 = vpop.xlane.xlu0 %2918 }
 0x6aa   : > { %7853 = vpow2.f32 %v2975_v4  ;;  %v2977_v14 = vmul.f32 1.442695, %v2960_v33  ;;  %v2961_v47 = vsub.f32 %v9754_v60, %v2919_v26 }
 0x6ab   : > { %v2922_v3 = vpop.xlane.xlu1 %2921 }
 0x6ac   : > { %7855 = vpow2.f32 %v2977_v14  ;;  %v2979_v25 = vmul.f32 1.442695, %v2961_v47  ;;  %v2962_v56 = vsub.f32 %v9764_v0, %v2922_v3 }
 0x6ad   : > { %v2925_v41 = vpop.xlane.xlu0 %2924 }
 0x6ae   : > { %7857 = vpow2.f32 %v2979_v25  ;;  %v2981_v51 = vmul.f32 1.442695, %v2962_v56  ;;  %v2963_v40 = vsub.f32 %v9775_v61, %v2925_v41 }
 0x6af   : > { %v2928_v49 = vpop.xlane.xlu1 %2927 }
 0x6b0   : > { %7859 = vpow2.f32 %v2981_v51  ;;  %v2983_v43 = vmul.f32 1.442695, %v2963_v40  ;;  %v2964_v42 = vsub.f32 %v9789_v2, %v2928_v49 }
 0x6b1   : > { %v2931_v30 = vpop.xlane.xlu0 %2930 }
 0x6b2   : > { %7861 = vpow2.f32 %v2983_v43  ;;  %v2985_v1 = vmul.f32 1.442695, %v2964_v42  ;;  %v2965_v60 = vsub.f32 %v9786_v10, %v2931_v30 }
 0x6b3   : > { %v2934_v35 = vpop.xlane.xlu1 %2933 }
 0x6b4   : > { %v9851_v52 = vpop.eup %7853  ;;  %7863 = vpow2.f32 %v2985_v1  ;;  %v2987_v0 = vmul.f32 1.442695, %v2965_v60  ;;  %v2966_v7 = vsub.f32 %v9796_v28, %v2934_v35 }
 0x6b5   : > { %v3007_v61 = vsel %vm2418_vm4, %v9851_v52, 0.0 }
 0x6b6   : > { %v9856_v38 = vpop.eup %7855  ;;  %7865 = vpow2.f32 %v2987_v0  ;;  %v2989_v37 = vmul.f32 1.442695, %v2966_v7  ;;  %3008 = vadd.xlane.f32.xlu0 %v3007_v61 }
 0x6b7   : > { %v3010_v2 = vsel %vm2418_vm4, %v9856_v38, 0.0 }
 0x6b8   : > { %v9860_v8 = vpop.eup %7857  ;;  %7867 = vpow2.f32 %v2989_v37  ;;  %3011 = vadd.xlane.f32.xlu1 %v3010_v2 }
 0x6b9   : > { %v3013_v10 = vsel %vm2418_vm4, %v9860_v8, 0.0 }
 0x6ba   : > { %v9864_v16 = vpop.eup %7859  ;;  %3014 = vadd.xlane.f32.xlu0 %v3013_v10 }
 0x6bb   : > { %v3016_v28 = vsel %vm2418_vm4, %v9864_v16, 0.0 }
 0x6bc   : > { %v9868_v29 = vpop.eup %7861  ;;  %3017 = vadd.xlane.f32.xlu1 %v3016_v28 }
 0x6bd   : > { %v3019_v23 = vsel %vm2418_vm4, %v9868_v29, 0.0 }
 0x6be   : > { %v9872_v27 = vpop.eup %7863  ;;  %3020 = vadd.xlane.f32.xlu0 %v3019_v23 }
 0x6bf   : > { %v3022_v4 = vsel %vm2418_vm4, %v9872_v27, 0.0 }
 0x6c0   : > { %v9876_v33 = vpop.eup %7865  ;;  %3023 = vadd.xlane.f32.xlu1 %v3022_v4 }
 0x6c1   : > { %v3025_v26 = vsel %vm2418_vm4, %v9876_v33, 0.0 }
 0x6c2   : > { %v9880_v14 = vpop.eup %7867  ;;  %3026 = vadd.xlane.f32.xlu0 %v3025_v26  ;;  %v7519_v26 = vld [vmem:[%s8626_s23 + $0x4] ss:$8 sps:$4 sm:$0xff]  }
 0x6c3   : > { %v3028_v47 = vsel %vm2418_vm4, %v9880_v14, 0.0  ;;  %3546 = vmatprep.subr.bf16.mxu1 %v7519_v26 }
 0x6c4   : > { %3029 = vadd.xlane.f32.xlu1 %v3028_v47 }
 0x6c5   : > { %v2937_v3 = vpop.xlane.xlu0 %2936 }
 0x6c6   : > { %v2967_v25 = vsub.f32 %v9805_v22, %v2937_v3 }
 0x6c7   : > { %v2940_v56 = vpop.xlane.xlu1 %2939 }
 0x6c8   : > { %v2991_v41 = vmul.f32 1.442695, %v2967_v25  ;;  %v2968_v51 = vsub.f32 %v9811_v55, %v2940_v56 }
 0x6c9   : > { %v2943_v40 = vpop.xlane.xlu0 %2942 }
 0x6ca   : > { %7869 = vpow2.f32 %v2991_v41  ;;  %v2993_v49 = vmul.f32 1.442695, %v2968_v51  ;;  %v2969_v43 = vsub.f32 %v9808_v39, %v2943_v40 }
 0x6cb   : > { %v2946_v42 = vpop.xlane.xlu1 %2945 }
 0x6cc   : > { %7871 = vpow2.f32 %v2993_v49  ;;  %v2995_v30 = vmul.f32 1.442695, %v2969_v43  ;;  %v2970_v1 = vsub.f32 %v9816_v34, %v2946_v42 }
 0x6cd   : > { %v2949_v60 = vpop.xlane.xlu0 %2948 }
 0x6ce   : > { %7873 = vpow2.f32 %v2995_v30  ;;  %v2997_v35 = vmul.f32 1.442695, %v2970_v1  ;;  %v2971_v0 = vsub.f32 %v9823_v5, %v2949_v60  ;;  %v7543_v30 = vld [vmem:[%s8626_s23 + $0x84] ss:$8 sps:$4 sm:$0xff]  }
 0x6cf   : > { %v2952_v22 = vpop.xlane.xlu1 %2951  ;;  %3353 = vmatprep.subr.bf16.mxu0 %v7543_v30  ;;  %v7525_v30 = vld [vmem:[%s8626_s23 + $0x24] ss:$8 sps:$4 sm:$0xff]  }
 0x6d0   : > { %7875 = vpow2.f32 %v2997_v35  ;;  %v2999_v7 = vmul.f32 1.442695, %v2971_v0  ;;  %v2972_v55 = vsub.f32 %v9831_v24, %v2952_v22 }
 0x6d1   : > { %v2955_v61 = vpop.xlane.xlu0 %2954 }
 0x6d2   : > { %7877 = vpow2.f32 %v2999_v7  ;;  %v3001_v37 = vmul.f32 1.442695, %v2972_v55  ;;  %v2973_v39 = vsub.f32 %v9828_v44, %v2955_v61 }
 0x6d3   : > { %v2958_v2 = vpop.xlane.xlu1 %2957 }
 0x6d4   : > { %v9891_v10 = vpop.eup %7869  ;;  %7879 = vpow2.f32 %v3001_v37  ;;  %v3003_v34 = vmul.f32 1.442695, %v2973_v39  ;;  %v2974_v28 = vsub.f32 %v9836_v13, %v2958_v2 }
 0x6d5   : > { %v3031_v5 = vsel %vm2418_vm4, %v9891_v10, 0.0 }
 0x6d6   : > { %v9896_v23 = vpop.eup %7871  ;;  %7881 = vpow2.f32 %v3003_v34  ;;  %v3005_v24 = vmul.f32 1.442695, %v2974_v28  ;;  %3032 = vadd.xlane.f32.xlu0 %v3031_v5 }
 0x6d7   : > { %v3034_v4 = vsel %vm2418_vm4, %v9896_v23, 0.0 }
 0x6d8   : > { %v9901_v44 = vpop.eup %7873  ;;  %7883 = vpow2.f32 %v3005_v24  ;;  %3035 = vadd.xlane.f32.xlu1 %v3034_v4 }
 0x6d9   : > { %v3037_v47 = vsel %vm2418_vm4, %v9901_v44, 0.0 }
 0x6da   : > { %v9905_v13 = vpop.eup %7875  ;;  %3038 = vadd.xlane.f32.xlu0 %v3037_v47 }
 0x6db   : > { %v3040_v3 = vsel %vm2418_vm4, %v9905_v13, 0.0 }
 0x6dc   : > { %v9909_v25 = vpop.eup %7877  ;;  %3041 = vadd.xlane.f32.xlu1 %v3040_v3  ;;  %v7517_v3 = vld [vmem:[%s8626_s23] ss:$8 sps:$4 sm:$0xff]  }
 0x6dd   : > { %v3043_v56 = vsel %vm2418_vm4, %v9909_v25, 0.0 }
 0x6de   : > { %v9913_v41 = vpop.eup %7879  ;;  %3044 = vadd.xlane.f32.xlu0 %v3043_v56 }
 0x6df   : > { %v3046_v51 = vsel %vm2418_vm4, %v9913_v41, 0.0 }
 0x6e0   : > { %v9917_v40 = vpop.eup %7881  ;;  %3047 = vadd.xlane.f32.xlu1 %v3046_v51  ;;  %v7522_v51 = vld [vmem:[%s8626_s23 + $0x14] ss:$8 sps:$4 sm:$0xff]  }
 0x6e1   : > { %v3049_v49 = vsel %vm2418_vm4, %v9917_v40, 0.0 }
 0x6e2   : > { %v9921_v43 = vpop.eup %7883  ;;  %3050 = vadd.xlane.f32.xlu0 %v3049_v49 }
 0x6e3   : > { %v3052_v42 = vsel %vm2418_vm4, %v9921_v43, 0.0 }
 0x6e4   : > { %3053 = vadd.xlane.f32.xlu1 %v3052_v42 }
 0x743   : > { %v3009_v1 = vpop.xlane.xlu0 %3008 }
 0x744   : > { %7885 = vrcp.f32 %v3009_v1 }
 0x745   : > { %v3012_v60 = vpop.xlane.xlu1 %3011 }
 0x746   : > { %7887 = vrcp.f32 %v3012_v60 }
 0x747   : > { %v3015_v35 = vpop.xlane.xlu0 %3014 }
 0x748   : > { %7889 = vrcp.f32 %v3015_v35 }
 0x749   : > { %v3018_v0 = vpop.xlane.xlu1 %3017 }
 0x74a   : > { %7891 = vrcp.f32 %v3018_v0  ;;  %v7528_v0 = vld [vmem:[%s8626_s23 + $0x34] ss:$8 sps:$4 sm:$0xff]  }
 0x74b   : > { %v3021_v22 = vpop.xlane.xlu0 %3020 }
 0x74c   : > { %7893 = vrcp.f32 %v3021_v22  ;;  %v7526_v22 = vld [vmem:[%s8626_s23 + $0x30] ss:$8 sps:$4 sm:$0xff]  }
 0x74d   : > { %v3024_v7 = vpop.xlane.xlu1 %3023 }
 0x74e   : > { %v7886_v55 = vpop.eup %7885  ;;  %7895 = vrcp.f32 %v3024_v7  ;;  %v8312_v7 = vmov 0  }
 0x74f   : > { %v3027_v61 = vpop.xlane.xlu0 %3026  ;;  %v3071_v2 = vmul.f32 %v7886_v55, %v9851_v52 }
 0x750   : > { %v7888_v37 = vpop.eup %7887  ;;  %7897 = vrcp.f32 %v3027_v61  ;;  %v7529_v61 = vld [vmem:[%s8626_s23 + $0x40] ss:$8 sps:$4 sm:$0xff]  }
 0x751   : > { %v3030_v39 = vpop.xlane.xlu1 %3029  ;;  %v3072_v34 = vmul.f32 %v7888_v37, %v9856_v38 }
 0x752   : > { %v7890_v28 = vpop.eup %7889  ;;  %7899 = vrcp.f32 %v3030_v39  ;;  %v7534_v39 = vld [vmem:[%s8626_s23 + $0x54] ss:$8 sps:$4 sm:$0xff]  }
 0x753   : > { %v3087_v5 = vpack.c.bf16 %v3072_v34, %v3071_v2  ;;  %v3073_v4 = vmul.f32 %v7890_v28, %v9860_v8  ;;  %v7520_v8 = vld [vmem:[%s8626_s23 + $0x10] ss:$8 sps:$4 sm:$0xff]  }
 0x754   : > { %v7892_v24 = vpop.eup %7891  ;;  %v7532_v34 = vld [vmem:[%s8626_s23 + $0x50] ss:$8 sps:$4 sm:$0xff]  }
 0x755   : > { %v3074_v26 = vmul.f32 %v7892_v24, %v9864_v16  ;;  %7193 = vmatprep.mubr.msk.bf16.mxu1 %vm2418_vm4, %v3087_v5  ;;  %v7537_v5 = vld [vmem:[%s8626_s23 + $0x64] ss:$8 sps:$4 sm:$0xff]  }
 0x756   : > { %v7894_v47 = vpop.eup %7893 }
 0x757   : > { %v3088_v56 = vpack.c.bf16 %v3074_v26, %v3073_v4  ;;  %v3075_v38 = vmul.f32 %v7894_v47, %v9868_v29  ;;  %v7523_v29 = vld [vmem:[%s8626_s23 + $0x20] ss:$8 sps:$4 sm:$0xff]  }
 0x758   : > { %v7896_v52 = vpop.eup %7895  ;;  %v7535_v26 = vld [vmem:[%s8626_s23 + $0x60] ss:$8 sps:$4 sm:$0xff]  }
 0x759   : > { %7194 = vmatmul.mubr.msk.bf16.vlgmr.msra.gmra.mrb[64].mxu1 %vm2418_vm4, %v3088_v56  ;;  %v3076_v49 = vmul.f32 %v7896_v52, %v9872_v27 }
 0x75a   : > { %v7898_v42 = vpop.eup %7897  ;;  %3547 = vmatpush1.bf16.msra.mxu1 %v7517_v3  ;;  %v7540_v3 = vld [vmem:[%s8626_s23 + $0x74] ss:$8 sps:$4 sm:$0xff]  }
 0x75b   : > { %3548 = vmatprep.subr.bf16.mxu1 %v7522_v51  ;;  %v3089_v16 = vpack.c.bf16 %v3076_v49, %v3075_v38  ;;  %v3077_v60 = vmul.f32 %v7898_v42, %v9876_v33  ;;  %v7531_v33 = vld [vmem:[%s8626_s23 + $0x44] ss:$8 sps:$4 sm:$0xff]   ;;  %v7538_v42 = vld [vmem:[%s8626_s23 + $0x70] ss:$8 sps:$4 sm:$0xff]  }
 0x75c   : > { %v7900_v1 = vpop.eup %7899 }
 0x75d   : > { %7197 = vmatprep.mubr.msk.bf16.mxu1 %vm2418_vm4, %v3089_v16  ;;  %v3078_v35 = vmul.f32 %v7900_v1, %v9880_v14 }
 0x75e   : > { %3549 = vmatpush1.bf16.msra.mxu1 %v7520_v8 }
 0x75f   : > { %3550 = vmatprep.subr.bf16.mxu1 %v7525_v30  ;;  %v3090_v27 = vpack.c.bf16 %v3078_v35, %v3077_v60 }
 0x761   : > { %7198 = vmatmul.mubr.msk.bf16.gmra.mrb[68].mxu1 %vm2418_vm4, %v3090_v27 }
 0x762   : > { %3551 = vmatpush1.bf16.msra.mxu1 %v7523_v29  ;;  %3578 = vmatprep.mubr.bf16.mxu1 %v8312_v7 }
 0x763   : > { %v3033_v55 = vpop.xlane.xlu0 %3032  ;;  %3552 = vmatprep.subr.bf16.mxu1 %v7528_v0  ;;  %v7544_v0 = vld [vmem:[%s8626_s23 + $0x90] ss:$8 sps:$4 sm:$0xff]  }
 0x764   : > { %7901 = vrcp.f32 %v3033_v55  ;;  %v7549_v55 = vld [vmem:[%s8626_s23 + $0xa4] ss:$8 sps:$4 sm:$0xff]  }
 0x765   : > { %v3036_v14 = vpop.xlane.xlu1 %3035 }
 0x766   : > { %7903 = vrcp.f32 %v3036_v14  ;;  %3553 = vmatpush1.bf16.msra.mxu1 %v7526_v22  ;;  %v7553_v14 = vld [vmem:[%s8626_s23 + $0xc0] ss:$8 sps:$4 sm:$0xff]  }
 0x767   : > { %v3039_v37 = vpop.xlane.xlu0 %3038  ;;  %3554 = vmatprep.subr.bf16.mxu1 %v7531_v33  ;;  %v7552_v33 = vld [vmem:[%s8626_s23 + $0xb4] ss:$8 sps:$4 sm:$0xff]  }
 0x768   : > { %7905 = vrcp.f32 %v3039_v37 }
 0x769   : > { %v3042_v2 = vpop.xlane.xlu1 %3041 }
 0x76a   : > { %7907 = vrcp.f32 %v3042_v2  ;;  %3555 = vmatpush1.bf16.msra.mxu1 %v7529_v61  ;;  %v7558_v61 = vld [vmem:[%s8626_s23 + $0xd4] ss:$8 sps:$4 sm:$0xff]  }
 0x76b   : > { %v3045_v28 = vpop.xlane.xlu0 %3044  ;;  %3556 = vmatprep.subr.bf16.mxu1 %v7534_v39 }
 0x76c   : > { %7909 = vrcp.f32 %v3045_v28 }
 0x76d   : > { %v3048_v24 = vpop.xlane.xlu1 %3047 }
 0x76e   : > { %v7902_v4 = vpop.eup %7901  ;;  %7911 = vrcp.f32 %v3048_v24  ;;  %3557 = vmatpush1.bf16.msra.mxu1 %v7532_v34 }
 0x76f   : > { %v3051_v47 = vpop.xlane.xlu0 %3050  ;;  %3558 = vmatprep.subr.bf16.mxu1 %v7537_v5  ;;  %v3079_v52 = vmul.f32 %v7902_v4, %v9891_v10  ;;  %v7541_v10 = vld [vmem:[%s8626_s23 + $0x80] ss:$8 sps:$4 sm:$0xff]  }
 0x770   : > { %v7904_v56 = vpop.eup %7903  ;;  %7913 = vrcp.f32 %v3051_v47 }
 0x771   : > { %v3054_v51 = vpop.xlane.xlu1 %3053  ;;  %v3080_v38 = vmul.f32 %v7904_v56, %v9896_v23  ;;  %v7546_v23 = vld [vmem:[%s8626_s23 + $0x94] ss:$8 sps:$4 sm:$0xff]  }
 0x772   : > { %v7906_v49 = vpop.eup %7905  ;;  %7915 = vrcp.f32 %v3054_v51  ;;  %3559 = vmatpush1.bf16.msra.mxu1 %v7535_v26 }
 0x773   : > { %3560 = vmatprep.subr.bf16.mxu1 %v7540_v3  ;;  %v3091_v8 = vpack.c.bf16 %v3080_v38, %v3079_v52  ;;  %v3081_v30 = vmul.f32 %v7906_v49, %v9901_v44 }
 0x774   : > { %v7908_v16 = vpop.eup %7907 }
 0x775   : > { %v3082_v1 = vmul.f32 %v7908_v16, %v9905_v13  ;;  %7209 = vmatprep.mubr.msk.bf16.mxu0 %vm2418_vm4, %v3091_v8 }
 0x776   : > { %v7910_v60 = vpop.eup %7909  ;;  %3561 = vmatpush1.bf16.msra.mxu1 %v7538_v42 }
 0x777   : > { %v3092_v35 = vpack.c.bf16 %v3082_v1, %v3081_v30  ;;  %v3083_v44 = vmul.f32 %v7910_v60, %v9909_v25  ;;  %v7547_v25 = vld [vmem:[%s8626_s23 + $0xa0] ss:$8 sps:$4 sm:$0xff]  }
 0x778   : > { %v7912_v29 = vpop.eup %7911 }
 0x779   : > { %3579 = vmatmul.mubr.bf16.vlgmr.msra.gmra.mrb[72].mxu1 %v2757_v54  ;;  %7210 = vmatmul.mubr.msk.bf16.vlgmr.msra.gmra.mrb[80].mxu0 %vm2418_vm4, %v3092_v35  ;;  %v3084_v13 = vmul.f32 %v7912_v29, %v9913_v41 }
 0x77a   : > { %v7914_v27 = vpop.eup %7913  ;;  %3588 = vmatprep.mubr.bf16.mxu1 %v8312_v7  ;;  %3354 = vmatpush1.bf16.msra.mxu0 %v7541_v10 }
 0x77b   : > { %v3093_v22 = vpack.c.bf16 %v3084_v13, %v3083_v44  ;;  %3355 = vmatprep.subr.bf16.mxu0 %v7546_v23  ;;  %v3085_v46 = vmul.f32 %v7914_v27, %v9917_v40  ;;  %v7550_v40 = vld [vmem:[%s8626_s23 + $0xb0] ss:$8 sps:$4 sm:$0xff]  }
 0x77c   : > { %v7916_v11 = vpop.eup %7915 }
 0x77d   : > { %7213 = vmatprep.mubr.msk.bf16.mxu0 %vm2418_vm4, %v3093_v22  ;;  %v3086_v54 = vmul.f32 %v7916_v11, %v9921_v43  ;;  %v7555_v43 = vld [vmem:[%s8626_s23 + $0xc4] ss:$8 sps:$4 sm:$0xff]  }
 0x77e   : > { %3356 = vmatpush1.bf16.msra.mxu0 %v7544_v0 }
 0x77f   : > { %v3094_v41 = vpack.c.bf16 %v3086_v54, %v3085_v46  ;;  %3357 = vmatprep.subr.bf16.mxu0 %v7549_v55 }
 0x781   : > { %3589 = vmatmul.mubr.bf16.gmra.mrb[76].mxu1 %v2758_v32  ;;  %7214 = vmatmul.mubr.msk.bf16.gmra.mrb[84].mxu0 %vm2418_vm4, %v3094_v41  ;;  %v7559_v32 = vld [vmem:[%s8626_s23 + $0xe0] ss:$8 sps:$4 sm:$0xff]  }
 0x782   : > { %3598 = vmatprep.mubr.bf16.mxu1 %v8312_v7  ;;  %3358 = vmatpush1.bf16.msra.mxu0 %v7547_v25 }
 0x783   : > { %3359 = vmatprep.subr.bf16.mxu0 %v7552_v33  ;;  %3385 = vmatprep.mubr.bf16.mxu0 %v8312_v7 }
 0x786   : > { %3360 = vmatpush1.bf16.msra.mxu0 %v7550_v40 }
 0x787   : > { %3361 = vmatprep.subr.bf16.mxu0 %v7555_v43  ;;  %v3691_v43 = vld [vmem:[%s8576_s0] sm:$0x3] }
 0x789   : > { %3599 = vmatmul.mubr.bf16.gmra.mrb[80].mxu1 %v2759_v21 }
 0x78a   : > { %3608 = vmatprep.mubr.bf16.mxu1 %v8312_v7  ;;  %3362 = vmatpush1.bf16.msra.mxu0 %v7553_v14 }
 0x78b   : > { %3363 = vmatprep.subr.bf16.mxu0 %v7558_v61 }
 0x78e   : > { %3364 = vmatpush1.bf16.msra.mxu0 %v7556_v9  ;;  %v12158_v9 = vld [vmem:[#allocation20_spill] sm:$0xff] }
 0x78f   : > { %3365 = vmatprep.subr.bf16.mxu0 %v7561_v50  ;;  %v10078_v50 = vrot.slane %v3691_v43, %v12158_v9 }
 0x791   : > { %3609 = vmatmul.mubr.bf16.gmra.mrb[84].mxu1 %v2760_v62 }
 0x792   : > { %3618 = vmatprep.mubr.bf16.mxu1 %v8312_v7  ;;  %3366 = vmatpush1.bf16.msra.mxu0 %v7559_v32 }
 0x793   : > { %3367 = vmatprep.subr.bf16.mxu0 %v7564_v36  ;;  %v12159_v36 = vld [vmem:[#allocation19_spill] sm:$0xff] }
 0x796   : > { %3368 = vmatpush1.bf16.msra.mxu0 %v7562_v12 }
 0x799   : > { %3619 = vmatmul.mubr.bf16.gmra.mrb[88].mxu1 %v2761_v57 }
 0x79a   : > { %3628 = vmatprep.mubr.bf16.mxu1 %v8312_v7 }
 0x7a1   : > { %3629 = vmatmul.mubr.bf16.gmra.mrb[92].mxu1 %v2762_v17 }
 0x7a2   : > { %3638 = vmatprep.mubr.bf16.mxu1 %v8312_v7 }
 0x7a9   : > { %3639 = vmatmul.mubr.bf16.gmra.mrb[96].mxu1 %v2763_v6 }
 0x7aa   : > { %3648 = vmatprep.mubr.bf16.mxu1 %v8312_v7 }
 0x7b1   : > { %3649 = vmatmul.mubr.bf16.gmra.mrb[100].mxu1 %v2764_v53 }
 0x82c   : > { %v7195_v58 = vpop.f32.mrb[64].mxu1 }
 0x82d   : > { %v3141_v62 = vpop.f32.mrb[65].mxu1 }
 0x82e   : > { %v7196_v59 = vpop.f32.mrb[66].mxu1 }
 0x82f   : > { %v3250_v21 = vpack.c.bf16 %v7196_v59, %v7195_v58  ;;  %v3144_v48 = vpop.f32.mrb[67].mxu1  ;;  %v10081_v58 = vrot.slane %v3691_v43, %v12159_v36  ;;  %v8077_v59 = vld [vmem:[#allocation2] sm:$0xff]  ;;  %v8082_v43 = vld [vmem:[#allocation2 + $0x28] sm:$0xff] }
 0x830   : > { %v3249_v31 = vpack.c.bf16 %v3144_v48, %v3141_v62 }
 0x832   : > { %3386 = vmatmul.mubr.bf16.vlgmr.msra.gmra.mrb[88].mxu0 %v3249_v31 }
 0x833   : > { %3395 = vmatprep.mubr.bf16.mxu0 %v8312_v7 }
 0x834   : > { %v7199_v15 = vpop.f32.mrb[68].mxu1 }
 0x835   : > { %v3157_v17 = vpop.f32.mrb[69].mxu1 }
 0x836   : > { %v7200_v18 = vpop.f32.mrb[70].mxu1 }
 0x837   : > { %v3252_v57 = vpack.c.bf16 %v7200_v18, %v7199_v15  ;;  %v3160_v19 = vpop.f32.mrb[71].mxu1  ;;  %v8078_v15 = vld [vmem:[#allocation2 + $0x8] sm:$0xff] }
 0x838   : > { %v3251_v45 = vpack.c.bf16 %v3160_v19, %v3157_v17  ;;  %v8079_v19 = vld [vmem:[#allocation2 + $0x10] sm:$0xff] }
 0x83a   : > { %3396 = vmatmul.mubr.bf16.gmra.mrb[92].mxu0 %v3250_v21 }
 0x83b   : > { %3405 = vmatprep.mubr.bf16.mxu0 %v8312_v7 }
 0x842   : > { %3406 = vmatmul.mubr.bf16.gmra.mrb[96].mxu0 %v3251_v45 }
 0x843   : > { %3415 = vmatprep.mubr.bf16.mxu0 %v8312_v7 }
 0x84a   : > { %3416 = vmatmul.mubr.bf16.gmra.mrb[100].mxu0 %v3252_v57 }
 0x84b   : > { %3425 = vmatprep.mubr.bf16.mxu0 %v8312_v7 }
 0x84c   : > { %v3580_v20 = vpop.f32.mrb[72].mxu1  ;;  %v7211_v63 = vpop.f32.mrb[80].mxu0 }
 0x84d   : > { %v3582_v53 = vpop.f32.mrb[73].mxu1  ;;  %v3218_v6 = vpop.f32.mrb[81].mxu0 }
 0x84e   : > { %v3584_v37 = vpop.f32.mrb[74].mxu1  ;;  %v7212_v39 = vpop.f32.mrb[82].mxu0 }
 0x84f   : > { %v3254_v2 = vpack.c.bf16 %v7212_v39, %v7211_v63  ;;  %v3586_v34 = vpop.f32.mrb[75].mxu1  ;;  %v3221_v28 = vpop.f32.mrb[83].mxu0  ;;  %v8080_v63 = vld [vmem:[#allocation2 + $0x18] sm:$0xff] }
 0x850   : > { %v3253_v5 = vpack.c.bf16 %v3221_v28, %v3218_v6 }
 0x852   : > { %3426 = vmatmul.mubr.bf16.gmra.mrb[104].mxu0 %v3253_v5 }
 0x853   : > { %3435 = vmatprep.mubr.bf16.mxu0 %v8312_v7 }
 0x854   : > { %v10018_v24 = vpop.f32.mrb[76].mxu1  ;;  %v7215_v4 = vpop.f32.mrb[84].mxu0 }
 0x855   : > { %v10020_v26 = vpop.f32.mrb[77].mxu1  ;;  %v3234_v47 = vpop.f32.mrb[85].mxu0 }
 0x856   : > { %v10022_v3 = vpop.f32.mrb[78].mxu1  ;;  %v7216_v56 = vpop.f32.mrb[86].mxu0 }
 0x857   : > { %v3256_v51 = vpack.c.bf16 %v7216_v56, %v7215_v4  ;;  %v10024_v52 = vpop.f32.mrb[79].mxu1  ;;  %v3237_v38 = vpop.f32.mrb[87].mxu0  ;;  %v8081_v56 = vld [vmem:[#allocation2 + $0x20] sm:$0xff] }
 0x858   : > { %v3255_v49 = vpack.c.bf16 %v3237_v38, %v3234_v47 }
 0x85a   : > { %3436 = vmatmul.mubr.bf16.gmra.mrb[108].mxu0 %v3254_v2 }
 0x85b   : > { %3445 = vmatprep.mubr.bf16.mxu0 %v8312_v7 }
 0x85c   : > { %v10027_v42 = vpop.f32.mrb[80].mxu1 }
 0x85d   : > { %v10029_v8 = vpop.f32.mrb[81].mxu1 }
 0x85e   : > { %v10031_v16 = vpop.f32.mrb[82].mxu1 }
 0x85f   : > { %v10033_v30 = vpop.f32.mrb[83].mxu1 }
 0x862   : > { %3446 = vmatmul.mubr.bf16.gmra.mrb[112].mxu0 %v3255_v49 }
 0x863   : > { %3455 = vmatprep.mubr.bf16.mxu0 %v8312_v7 }
 0x864   : > { %v10036_v1 = vpop.f32.mrb[84].mxu1 }
 0x865   : > { %v10038_v60 = vpop.f32.mrb[85].mxu1 }
 0x866   : > { %v10040_v10 = vpop.f32.mrb[86].mxu1 }
 0x867   : > { %v10042_v35 = vpop.f32.mrb[87].mxu1 }
 0x86a   : > { %3456 = vmatmul.mubr.bf16.gmra.mrb[116].mxu0 %v3256_v51 }
 0x86c   : > { %v10044_v23 = vpop.f32.mrb[88].mxu1 }
 0x86d   : > { %v10046_v29 = vpop.f32.mrb[89].mxu1 }
 0x86e   : > { %v10048_v44 = vpop.f32.mrb[90].mxu1 }
 0x86f   : > { %v10050_v13 = vpop.f32.mrb[91].mxu1 }
 0x874   : > { %v10052_v27 = vpop.f32.mrb[92].mxu1 }
 0x875   : > { %v10054_v7 = vpop.f32.mrb[93].mxu1 }
 0x876   : > { %v10056_v0 = vpop.f32.mrb[94].mxu1 }
 0x877   : > { %v10058_v22 = vpop.f32.mrb[95].mxu1 }
 0x87c   : > { %v10060_v55 = vpop.f32.mrb[96].mxu1 }
 0x87d   : > { %v10062_v11 = vpop.f32.mrb[97].mxu1 }
 0x87e   : > { %v10064_v46 = vpop.f32.mrb[98].mxu1 }
 0x87f   : > { %v10066_v54 = vpop.f32.mrb[99].mxu1 }
 0x884   : > { %v10068_v25 = vpop.f32.mrb[100].mxu1 }
 0x885   : > { %v10070_v41 = vpop.f32.mrb[101].mxu1 }
 0x886   : > { %v10072_v33 = vpop.f32.mrb[102].mxu1 }
 0x887   : > { %v10074_v40 = vpop.f32.mrb[103].mxu1 }
 0x905   : > { %v3387_v14 = vpop.f32.mrb[88].mxu0 }
 0x906   : > { %v3581_v61 = vadd.f32 %v3580_v20, %v3387_v14  ;;  %v3389_v32 = vpop.f32.mrb[89].mxu0 }
 0x907   : > { %v3583_v12 = vadd.f32 %v3582_v53, %v3389_v32  ;;  %v3391_v62 = vpop.f32.mrb[90].mxu0  ;;  %v8083_v32 = vld [vmem:[#allocation2 + $0x30] sm:$0xff] }
 0x908   : > { %v3659_v21 = vadd.f32 %v8077_v59, %v3581_v61  ;;  %v3585_v48 = vadd.f32 %v3584_v37, %v3391_v62  ;;  %v3393_v31 = vpop.f32.mrb[91].mxu0  ;;  %v8084_v62 = vld [vmem:[#allocation2 + $0x38] sm:$0xff] }
 0x909   : > { %v3660_v17 = vadd.f32 %v8078_v15, %v3583_v12  ;;  %v3587_v18 = vadd.f32 %v3586_v34, %v3393_v31 }
 0x90a   : > { %v10084_v57 = vadd.f32 %v10078_v50, %v3659_v21  ;;  %v3661_v45 = vadd.f32 %v8079_v19, %v3585_v48 }
 0x90b   : > { %v10087_v20 = vadd.f32 %v10081_v58, %v3660_v17  ;;  %v3662_v53 = vadd.f32 %v8080_v63, %v3587_v18 }
 0x90c   : > { %v10090_v6 = vadd.f32 %v10078_v50, %v3661_v45  ;;  %v8085_v45 = vld [vmem:[#allocation2 + $0x40] sm:$0xff] }
 0x90d   : > { %v10093_v39 = vadd.f32 %v10081_v58, %v3662_v53  ;;  %v3397_v37 = vpop.f32.mrb[92].mxu0  ;;  %v3737_v2 = vadd.f32 %v10087_v20, %v10084_v57 }
 0x90e   : > { %12160 = vst [vmem:[#allocation21_spill] sm:$0xff] %v10090_v6  ;;  %v3591_v34 = vadd.f32 %v10018_v24, %v3397_v37  ;;  %v3399_v28 = vpop.f32.mrb[93].mxu0 }
 0x90f   : > { %12161 = vst [vmem:[#allocation22_spill] sm:$0xff] %v10093_v39  ;;  %v3593_v5 = vadd.f32 %v10020_v26, %v3399_v28  ;;  %3738 = vadd.xlane.f32.xlu0 %v3737_v2  ;;  %v3401_v4 = vpop.f32.mrb[94].mxu0  ;;  %v3740_v47 = vadd.f32 %v10093_v39, %v10090_v6  ;;  %v8086_v2 = vld [vmem:[#allocation2 + $0x48] sm:$0xff] }
 0x910   : > { %v3663_v51 = vadd.f32 %v8081_v56, %v3591_v34  ;;  %v3595_v38 = vadd.f32 %v10022_v3, %v3401_v4  ;;  %v3403_v49 = vpop.f32.mrb[95].mxu0 }
 0x911   : > { %v3664_v14 = vadd.f32 %v8082_v43, %v3593_v5  ;;  %v3597_v61 = vadd.f32 %v10024_v52, %v3403_v49  ;;  %3741 = vadd.xlane.f32.xlu1 %v3740_v47  ;;  %v8087_v5 = vld [vmem:[#allocation2 + $0x50] sm:$0xff]  ;;  %v8088_v47 = vld [vmem:[#allocation2 + $0x58] sm:$0xff] }
 0x912   : > { %v10104_v24 = vadd.f32 %v10078_v50, %v3663_v51  ;;  %v3665_v26 = vadd.f32 %v8083_v32, %v3595_v38 }
 0x913   : > { %v10107_v12 = vadd.f32 %v10081_v58, %v3664_v14  ;;  %v3666_v59 = vadd.f32 %v8084_v62, %v3597_v61 }
 0x914   : > { %12162 = vst [vmem:[#allocation23_spill] sm:$0xff] %v10104_v24  ;;  %v10110_v21 = vadd.f32 %v10078_v50, %v3665_v26  ;;  %v8089_v26 = vld [vmem:[#allocation2 + $0x60] sm:$0xff] }
 0x915   : > { %12163 = vst [vmem:[#allocation24_spill] sm:$0xff] %v10107_v12  ;;  %v10113_v3 = vadd.f32 %v10081_v58, %v3666_v59  ;;  %v3407_v48 = vpop.f32.mrb[96].mxu0  ;;  %v3743_v52 = vadd.f32 %v10107_v12, %v10104_v24 }
 0x916   : > { %12164 = vst [vmem:[#allocation25_spill] sm:$0xff] %v10110_v21  ;;  %v3601_v31 = vadd.f32 %v10027_v42, %v3407_v48  ;;  %v3409_v15 = vpop.f32.mrb[97].mxu0 }
 0x917   : > { %12165 = vst [vmem:[#allocation26_spill] sm:$0xff] %v10113_v3  ;;  %v3603_v17 = vadd.f32 %v10029_v8, %v3409_v15  ;;  %3744 = vadd.xlane.f32.xlu0 %v3743_v52  ;;  %v3411_v18 = vpop.f32.mrb[98].mxu0  ;;  %v3746_v19 = vadd.f32 %v10113_v3, %v10110_v21  ;;  %v8090_v52 = vld [vmem:[#allocation2 + $0x68] sm:$0xff] }
 0x918   : > { %v3667_v63 = vadd.f32 %v8085_v45, %v3601_v31  ;;  %v3605_v53 = vadd.f32 %v10031_v16, %v3411_v18  ;;  %v3413_v37 = vpop.f32.mrb[99].mxu0 }
 0x919   : > { %v3668_v34 = vadd.f32 %v8086_v2, %v3603_v17  ;;  %v3607_v28 = vadd.f32 %v10033_v30, %v3413_v37  ;;  %3747 = vadd.xlane.f32.xlu1 %v3746_v19  ;;  %v8091_v17 = vld [vmem:[#allocation2 + $0x70] sm:$0xff]  ;;  %v8092_v19 = vld [vmem:[#allocation2 + $0x78] sm:$0xff] }
 0x91a   : > { %v10124_v42 = vadd.f32 %v10078_v50, %v3667_v63  ;;  %v3669_v8 = vadd.f32 %v8087_v5, %v3605_v53 }
 0x91b   : > { %v10127_v4 = vadd.f32 %v10081_v58, %v3668_v34  ;;  %v3670_v56 = vadd.f32 %v8088_v47, %v3607_v28 }
 0x91c   : > { %12166 = vst [vmem:[#allocation27_spill] sm:$0xff] %v10124_v42  ;;  %v10130_v51 = vadd.f32 %v10078_v50, %v3669_v8  ;;  %v8093_v8 = vld [vmem:[#allocation2 + $0x80] sm:$0xff] }
 0x91d   : > { %12167 = vst [vmem:[#allocation28_spill] sm:$0xff] %v10127_v4  ;;  %v10133_v16 = vadd.f32 %v10081_v58, %v3670_v56  ;;  %v3417_v38 = vpop.f32.mrb[100].mxu0  ;;  %v3749_v30 = vadd.f32 %v10127_v4, %v10124_v42 }
 0x91e   : > { %12168 = vst [vmem:[#allocation29_spill] sm:$0xff] %v10130_v51  ;;  %v3611_v49 = vadd.f32 %v10036_v1, %v3417_v38  ;;  %v3419_v43 = vpop.f32.mrb[101].mxu0 }
 0x91f   : > { %12169 = vst [vmem:[#allocation30_spill] sm:$0xff] %v10133_v16  ;;  %v3613_v14 = vadd.f32 %v10038_v60, %v3419_v43  ;;  %3750 = vadd.xlane.f32.xlu0 %v3749_v30  ;;  %v3421_v61 = vpop.f32.mrb[102].mxu0  ;;  %v3752_v32 = vadd.f32 %v10133_v16, %v10130_v51  ;;  %v8094_v30 = vld [vmem:[#allocation2 + $0x88] sm:$0xff] }
 0x920   : > { %v3671_v62 = vadd.f32 %v8089_v26, %v3611_v49  ;;  %v3615_v59 = vadd.f32 %v10040_v10, %v3421_v61  ;;  %v3423_v48 = vpop.f32.mrb[103].mxu0 }
 0x921   : > { %v3672_v31 = vadd.f32 %v8090_v52, %v3613_v14  ;;  %v3617_v15 = vadd.f32 %v10042_v35, %v3423_v48  ;;  %3753 = vadd.xlane.f32.xlu1 %v3752_v32  ;;  %v8095_v14 = vld [vmem:[#allocation2 + $0x90] sm:$0xff]  ;;  %v8096_v32 = vld [vmem:[#allocation2 + $0x98] sm:$0xff] }
 0x922   : > { %v10144_v1 = vadd.f32 %v10078_v50, %v3671_v62  ;;  %v3673_v60 = vadd.f32 %v8091_v17, %v3615_v59 }
 0x923   : > { %v10147_v18 = vadd.f32 %v10081_v58, %v3672_v31  ;;  %v3674_v45 = vadd.f32 %v8092_v19, %v3617_v15 }
 0x924   : > { %12170 = vst [vmem:[#allocation31_spill] sm:$0xff] %v10144_v1  ;;  %v10150_v63 = vadd.f32 %v10078_v50, %v3673_v60  ;;  %v8097_v60 = vld [vmem:[#allocation2 + $0xa0] sm:$0xff] }
 0x925   : > { %12171 = vst [vmem:[#allocation32_spill] sm:$0xff] %v10147_v18  ;;  %v10153_v10 = vadd.f32 %v10081_v58, %v3674_v45  ;;  %v3427_v53 = vpop.f32.mrb[104].mxu0  ;;  %v3755_v35 = vadd.f32 %v10147_v18, %v10144_v1 }
 0x926   : > { %12172 = vst [vmem:[#allocation33_spill] sm:$0xff] %v10150_v63  ;;  %v3621_v37 = vadd.f32 %v10044_v23, %v3427_v53  ;;  %v3429_v2 = vpop.f32.mrb[105].mxu0 }
 0x927   : > { %12173 = vst [vmem:[#allocation34_spill] sm:$0xff] %v10153_v10  ;;  %v3623_v34 = vadd.f32 %v10046_v29, %v3429_v2  ;;  %3756 = vadd.xlane.f32.xlu0 %v3755_v35  ;;  %v3431_v28 = vpop.f32.mrb[106].mxu0  ;;  %v3758_v5 = vadd.f32 %v10153_v10, %v10150_v63  ;;  %v8098_v35 = vld [vmem:[#allocation2 + $0xa8] sm:$0xff] }
 0x928   : > { %v3675_v47 = vadd.f32 %v8093_v8, %v3621_v37  ;;  %v3625_v56 = vadd.f32 %v10048_v44, %v3431_v28  ;;  %v3433_v38 = vpop.f32.mrb[107].mxu0 }
 0x929   : > { %v3676_v49 = vadd.f32 %v8094_v30, %v3623_v34  ;;  %v3627_v43 = vadd.f32 %v10050_v13, %v3433_v38  ;;  %3759 = vadd.xlane.f32.xlu1 %v3758_v5  ;;  %v8099_v34 = vld [vmem:[#allocation2 + $0xb0] sm:$0xff]  ;;  %v8100_v5 = vld [vmem:[#allocation2 + $0xb8] sm:$0xff] }
 0x92a   : > { %v10164_v23 = vadd.f32 %v10078_v50, %v3675_v47  ;;  %v3677_v29 = vadd.f32 %v8095_v14, %v3625_v56 }
 0x92b   : > { %v10167_v61 = vadd.f32 %v10081_v58, %v3676_v49  ;;  %v3678_v26 = vadd.f32 %v8096_v32, %v3627_v43 }
 0x92c   : > { %12174 = vst [vmem:[#allocation35_spill] sm:$0xff] %v10164_v23  ;;  %v10170_v62 = vadd.f32 %v10078_v50, %v3677_v29  ;;  %v8101_v29 = vld [vmem:[#allocation2 + $0xc0] sm:$0xff] }
 0x92d   : > { %12175 = vst [vmem:[#allocation36_spill] sm:$0xff] %v10167_v61  ;;  %v10173_v44 = vadd.f32 %v10081_v58, %v3678_v26  ;;  %v3437_v59 = vpop.f32.mrb[108].mxu0  ;;  %v3761_v13 = vadd.f32 %v10167_v61, %v10164_v23 }
 0x92e   : > { %12176 = vst [vmem:[#allocation37_spill] sm:$0xff] %v10170_v62  ;;  %v3631_v48 = vadd.f32 %v10052_v27, %v3437_v59  ;;  %v3439_v52 = vpop.f32.mrb[109].mxu0 }
 0x92f   : > { %12177 = vst [vmem:[#allocation38_spill] sm:$0xff] %v10173_v44  ;;  %v3633_v31 = vadd.f32 %v10054_v7, %v3439_v52  ;;  %3762 = vadd.xlane.f32.xlu0 %v3761_v13  ;;  %v3441_v15 = vpop.f32.mrb[110].mxu0  ;;  %v3764_v17 = vadd.f32 %v10173_v44, %v10170_v62  ;;  %v8102_v13 = vld [vmem:[#allocation2 + $0xc8] sm:$0xff] }
 0x930   : > { %v3679_v19 = vadd.f32 %v8097_v60, %v3631_v48  ;;  %v3635_v45 = vadd.f32 %v10056_v0, %v3441_v15  ;;  %v3443_v53 = vpop.f32.mrb[111].mxu0 }
 0x931   : > { %v3680_v37 = vadd.f32 %v8098_v35, %v3633_v31  ;;  %v3637_v2 = vadd.f32 %v10058_v22, %v3443_v53  ;;  %3765 = vadd.xlane.f32.xlu1 %v3764_v17  ;;  %v8103_v31 = vld [vmem:[#allocation2 + $0xd0] sm:$0xff]  ;;  %v8104_v17 = vld [vmem:[#allocation2 + $0xd8] sm:$0xff] }
 0x932   : > { %v10184_v27 = vadd.f32 %v10078_v50, %v3679_v19  ;;  %v3681_v7 = vadd.f32 %v8099_v34, %v3635_v45 }
 0x933   : > { %v10187_v28 = vadd.f32 %v10081_v58, %v3680_v37  ;;  %v3682_v8 = vadd.f32 %v8100_v5, %v3637_v2 }
 0x934   : > { %12178 = vst [vmem:[#allocation39_spill] sm:$0xff] %v10184_v27  ;;  %v10190_v47 = vadd.f32 %v10078_v50, %v3681_v7  ;;  %v8105_v7 = vld [vmem:[#allocation2 + $0xe0] sm:$0xff] }
 0x935   : > { %12179 = vst [vmem:[#allocation40_spill] sm:$0xff] %v10187_v28  ;;  %v10193_v0 = vadd.f32 %v10081_v58, %v3682_v8  ;;  %v3447_v56 = vpop.f32.mrb[112].mxu0  ;;  %v3767_v22 = vadd.f32 %v10187_v28, %v10184_v27 }
 0x936   : > { %12180 = vst [vmem:[#allocation41_spill] sm:$0xff] %v10190_v47  ;;  %v3641_v38 = vadd.f32 %v10060_v55, %v3447_v56  ;;  %v3449_v30 = vpop.f32.mrb[113].mxu0 }
 0x937   : > { %12181 = vst [vmem:[#allocation42_spill] sm:$0xff] %v10193_v0  ;;  %v3643_v49 = vadd.f32 %v10062_v11, %v3449_v30  ;;  %3768 = vadd.xlane.f32.xlu0 %v3767_v22  ;;  %v3451_v43 = vpop.f32.mrb[114].mxu0  ;;  %v3770_v14 = vadd.f32 %v10193_v0, %v10190_v47  ;;  %v8106_v22 = vld [vmem:[#allocation2 + $0xe8] sm:$0xff] }
 0x938   : > { %v3683_v32 = vadd.f32 %v8101_v29, %v3641_v38  ;;  %v3645_v26 = vadd.f32 %v10064_v46, %v3451_v43  ;;  %v3453_v59 = vpop.f32.mrb[115].mxu0 }
 0x939   : > { %v3684_v48 = vadd.f32 %v8102_v13, %v3643_v49  ;;  %v3647_v52 = vadd.f32 %v10066_v54, %v3453_v59  ;;  %3771 = vadd.xlane.f32.xlu1 %v3770_v14  ;;  %v7565_v59 = vld [vmem:[%s8635_s17] ss:$16 sps:$4 sm:$0xff]   ;;  %v7567_v13 = vld [vmem:[%s8635_s17 + $0x4] ss:$16 sps:$4 sm:$0xff]  }
 0x93a   : > { %v10204_v55 = vadd.f32 %v10078_v50, %v3683_v32  ;;  %v3685_v11 = vadd.f32 %v8103_v31, %v3645_v26  ;;  %4501 = vmatprep.subr.bf16.mxu0 %v7567_v13  ;;  %v7576_v31 = vld [vmem:[%s8635_s17 + $0x64] ss:$16 sps:$4 sm:$0xff]  }
 0x93b   : > { %v10207_v15 = vadd.f32 %v10081_v58, %v3684_v48  ;;  %v3686_v60 = vadd.f32 %v8104_v17, %v3647_v52  ;;  %v7570_v48 = vld [vmem:[%s8635_s17 + $0x24] ss:$16 sps:$4 sm:$0xff]   ;;  %4502 = vmatpush1.bf16.msra.mxu0 %v7565_v59  ;;  %v7571_v52 = vld [vmem:[%s8635_s17 + $0x40] ss:$16 sps:$4 sm:$0xff]  }
 0x93c   : > { %12182 = vst [vmem:[#allocation43_spill] sm:$0xff] %v10204_v55  ;;  %v10210_v19 = vadd.f32 %v10078_v50, %v3685_v11  ;;  %4503 = vmatprep.subr.bf16.mxu0 %v7570_v48  ;;  %v7574_v11 = vld [vmem:[%s8635_s17 + $0x60] ss:$16 sps:$4 sm:$0xff]   ;;  %v7579_v17 = vld [vmem:[%s8635_s17 + $0x84] ss:$16 sps:$4 sm:$0xff]  }
 0x93d   : > { %12183 = vst [vmem:[#allocation44_spill] sm:$0xff] %v10207_v15  ;;  %v10213_v46 = vadd.f32 %v10081_v58, %v3686_v60  ;;  %v3457_v45 = vpop.f32.mrb[116].mxu0  ;;  %v3773_v54 = vadd.f32 %v10207_v15, %v10204_v55  ;;  %v7577_v60 = vld [vmem:[%s8635_s17 + $0x80] ss:$16 sps:$4 sm:$0xff]  }
 0x93e   : > { %12184 = vst [vmem:[#allocation45_spill] sm:$0xff] %v10210_v19  ;;  %v3651_v53 = vadd.f32 %v10068_v25, %v3457_v45  ;;  %v3459_v35 = vpop.f32.mrb[117].mxu0  ;;  %v7582_v45 = vld [vmem:[%s8635_s17 + $0xa4] ss:$16 sps:$4 sm:$0xff]  }
 0x93f   : > { %12185 = vst [vmem:[#allocation46_spill] sm:$0xff] %v10213_v46  ;;  %v3653_v37 = vadd.f32 %v10070_v41, %v3459_v35  ;;  %3774 = vadd.xlane.f32.xlu0 %v3773_v54  ;;  %v3461_v2 = vpop.f32.mrb[118].mxu0  ;;  %v3776_v34 = vadd.f32 %v10213_v46, %v10210_v19  ;;  %v8107_v41 = vld [vmem:[#allocation2 + $0xf0] sm:$0xff] }
 0x940   : > { %v3687_v5 = vadd.f32 %v8105_v7, %v3651_v53  ;;  %v3655_v8 = vadd.f32 %v10072_v33, %v3461_v2  ;;  %v3463_v56 = vpop.f32.mrb[119].mxu0  ;;  %v8108_v33 = vld [vmem:[#allocation2 + $0xf8] sm:$0xff]  ;;  %v7580_v54 = vld [vmem:[%s8635_s17 + $0xa0] ss:$16 sps:$4 sm:$0xff]   ;;  %v7585_v53 = vld [vmem:[%s8635_s17 + $0xc4] ss:$16 sps:$4 sm:$0xff]  }
 0x941   : > { %v3688_v38 = vadd.f32 %v8106_v22, %v3653_v37  ;;  %v3657_v30 = vadd.f32 %v10074_v40, %v3463_v56  ;;  %3777 = vadd.xlane.f32.xlu1 %v3776_v34  ;;  %v7583_v35 = vld [vmem:[%s8635_s17 + $0xc0] ss:$16 sps:$4 sm:$0xff]   ;;  %v7588_v37 = vld [vmem:[%s8635_s17 + $0xe4] ss:$16 sps:$4 sm:$0xff]  }
 0x942   : > { %v10224_v25 = vadd.f32 %v10078_v50, %v3687_v5  ;;  %v3689_v49 = vadd.f32 %v8107_v41, %v3655_v8  ;;  %v7586_v2 = vld [vmem:[%s8635_s17 + $0xe0] ss:$16 sps:$4 sm:$0xff]   ;;  %v7591_v34 = vld [vmem:[%s8635_s17 + $0x104] ss:$16 sps:$4 sm:$0xff]  }
 0x943   : > { %v10227_v43 = vadd.f32 %v10081_v58, %v3688_v38  ;;  %v3690_v14 = vadd.f32 %v8108_v33, %v3657_v30  ;;  %v7589_v7 = vld [vmem:[%s8635_s17 + $0x100] ss:$16 sps:$4 sm:$0xff]   ;;  %v7594_v5 = vld [vmem:[%s8635_s17 + $0x124] ss:$16 sps:$4 sm:$0xff]  }
 0x944   : > { %12186 = vst [vmem:[#allocation47_spill] sm:$0xff] %v10224_v25  ;;  %v10230_v29 = vadd.f32 %v10078_v50, %v3689_v49  ;;  %v7568_v50 = vld [vmem:[%s8635_s17 + $0x20] ss:$16 sps:$4 sm:$0xff]  }
 0x945   : > { %12187 = vst [vmem:[#allocation48_spill] sm:$0xff] %v10227_v43  ;;  %v10233_v40 = vadd.f32 %v10081_v58, %v3690_v14  ;;  %v3779_v32 = vadd.f32 %v10227_v43, %v10224_v25  ;;  %v7573_v58 = vld [vmem:[%s8635_s17 + $0x44] ss:$16 sps:$4 sm:$0xff]   ;;  %4504 = vmatpush1.bf16.msra.mxu0 %v7568_v50  ;;  %v7592_v8 = vld [vmem:[%s8635_s17 + $0x120] ss:$16 sps:$4 sm:$0xff]  }
 0x946   : > { %12188 = vst [vmem:[#allocation49_spill] sm:$0xff] %v10230_v29  ;;  %4505 = vmatprep.subr.bf16.mxu0 %v7573_v58 }
 0x947   : > { %12189 = vst [vmem:[#allocation50_spill] sm:$0xff] %v10233_v40  ;;  %3780 = vadd.xlane.f32.xlu0 %v3779_v32  ;;  %v3782_v26 = vadd.f32 %v10233_v40, %v10230_v29 }
 0x949   : > { %3783 = vadd.xlane.f32.xlu1 %v3782_v26  ;;  %4506 = vmatpush1.bf16.msra.mxu0 %v7571_v52 }
 0x94a   : > { %4507 = vmatprep.subr.bf16.mxu0 %v7576_v31 }
 0x94d   : > { %4508 = vmatpush1.bf16.msra.mxu0 %v7574_v11 }
 0x94e   : > { %4509 = vmatprep.subr.bf16.mxu0 %v7579_v17 }
 0x951   : > { %4510 = vmatpush1.bf16.msra.mxu0 %v7577_v60 }
 0x952   : > { %4511 = vmatprep.subr.bf16.mxu0 %v7582_v45 }
 0x955   : > { %4512 = vmatpush1.bf16.msra.mxu0 %v7580_v54 }
 0x956   : > { %4513 = vmatprep.subr.bf16.mxu0 %v7585_v53 }
 0x959   : > { %4514 = vmatpush1.bf16.msra.mxu0 %v7583_v35 }
 0x95a   : > { %4515 = vmatprep.subr.bf16.mxu0 %v7588_v37 }
 0x95d   : > { %4516 = vmatpush1.bf16.msra.mxu0 %v7586_v2 }
 0x95e   : > { %4517 = vmatprep.subr.bf16.mxu0 %v7591_v34 }
 0x961   : > { %4518 = vmatpush1.bf16.msra.mxu0 %v7589_v7 }
 0x962   : > { %4519 = vmatprep.subr.bf16.mxu0 %v7594_v5 }
 0x965   : > { %4520 = vmatpush1.bf16.msra.mxu0 %v7592_v8 }
 0x99c   : > { %v3739_v56 = vpop.xlane.xlu0 %3738 }
 0x99d   : > { %v3785_v22 = vmul.f32 0.00390625, %v3739_v56 }
 0x99e   : > { %v3742_v38 = vpop.xlane.xlu1 %3741 }
 0x99f   : > { %v10260_v30 = vsub.f32 %v10084_v57, %v3785_v22  ;;  %v10263_v41 = vsub.f32 %v10087_v20, %v3785_v22  ;;  %v3786_v49 = vmul.f32 0.00390625, %v3742_v38 }
 0x9a1   : > { %v3833_v33 = vmul.f32 %v10260_v30, %v10260_v30  ;;  %v3834_v14 = vmul.f32 %v10263_v41, %v10263_v41  ;;  %v10270_v32 = vsub.f32 %v10090_v6, %v3786_v49  ;;  %v10273_v26 = vsub.f32 %v10093_v39, %v3786_v49 }
 0x9a3   : > { %v3835_v59 = vmul.f32 %v10270_v32, %v10270_v32  ;;  %v3836_v13 = vmul.f32 %v10273_v26, %v10273_v26  ;;  %v3865_v48 = vadd.f32 %v3834_v14, %v3833_v33 }
 0x9a4   : > { %v3745_v50 = vpop.xlane.xlu0 %3744 }
 0x9a5   : > { %v3787_v58 = vmul.f32 0.00390625, %v3745_v50  ;;  %3866 = vadd.xlane.f32.xlu0 %v3865_v48  ;;  %v3868_v52 = vadd.f32 %v3836_v13, %v3835_v59 }
 0x9a6   : > { %v3748_v31 = vpop.xlane.xlu1 %3747 }
 0x9a7   : > { %v10280_v11 = vsub.f32 %v10104_v24, %v3787_v58  ;;  %v10283_v17 = vsub.f32 %v10107_v12, %v3787_v58  ;;  %v3788_v60 = vmul.f32 0.00390625, %v3748_v31  ;;  %3869 = vadd.xlane.f32.xlu1 %v3868_v52 }
 0x9a9   : > { %v3837_v45 = vmul.f32 %v10280_v11, %v10280_v11  ;;  %v3838_v54 = vmul.f32 %v10283_v17, %v10283_v17  ;;  %v10290_v53 = vsub.f32 %v10110_v21, %v3788_v60  ;;  %v10293_v35 = vsub.f32 %v10113_v3, %v3788_v60 }
 0x9ab   : > { %v3839_v37 = vmul.f32 %v10290_v53, %v10290_v53  ;;  %v3840_v2 = vmul.f32 %v10293_v35, %v10293_v35  ;;  %v3871_v34 = vadd.f32 %v3838_v54, %v3837_v45 }
 0x9ac   : > { %v3751_v7 = vpop.xlane.xlu0 %3750 }
 0x9ad   : > { %v3789_v5 = vmul.f32 0.00390625, %v3751_v7  ;;  %3872 = vadd.xlane.f32.xlu0 %v3871_v34  ;;  %v3874_v8 = vadd.f32 %v3840_v2, %v3839_v37 }
 0x9ae   : > { %v3754_v56 = vpop.xlane.xlu1 %3753 }
 0x9af   : > { %v10300_v22 = vsub.f32 %v10124_v42, %v3789_v5  ;;  %v10303_v38 = vsub.f32 %v10127_v4, %v3789_v5  ;;  %v3790_v49 = vmul.f32 0.00390625, %v3754_v56  ;;  %3875 = vadd.xlane.f32.xlu1 %v3874_v8  ;;  %v7597_v56 = vld [vmem:[%s8635_s17 + $0x144] ss:$16 sps:$4 sm:$0xff]  }
 0x9b0   : > { %4521 = vmatprep.subr.bf16.mxu0 %v7597_v56 }
 0x9b1   : > { %v3841_v33 = vmul.f32 %v10300_v22, %v10300_v22  ;;  %v3842_v14 = vmul.f32 %v10303_v38, %v10303_v38  ;;  %v10310_v59 = vsub.f32 %v10130_v51, %v3790_v49  ;;  %v10313_v13 = vsub.f32 %v10133_v16, %v3790_v49 }
 0x9b3   : > { %v3843_v48 = vmul.f32 %v10310_v59, %v10310_v59  ;;  %v3844_v50 = vmul.f32 %v10313_v13, %v10313_v13  ;;  %v3877_v58 = vadd.f32 %v3842_v14, %v3841_v33 }
 0x9b4   : > { %v3757_v52 = vpop.xlane.xlu0 %3756 }
 0x9b5   : > { %v3791_v31 = vmul.f32 0.00390625, %v3757_v52  ;;  %3878 = vadd.xlane.f32.xlu0 %v3877_v58  ;;  %v3880_v60 = vadd.f32 %v3844_v50, %v3843_v48  ;;  %v7595_v48 = vld [vmem:[%s8635_s17 + $0x140] ss:$16 sps:$4 sm:$0xff]  }
 0x9b6   : > { %v3760_v45 = vpop.xlane.xlu1 %3759  ;;  %4522 = vmatpush1.bf16.msra.mxu0 %v7595_v48 }
 0x9b7   : > { %v10320_v54 = vsub.f32 %v10144_v1, %v3791_v31  ;;  %v10323_v37 = vsub.f32 %v10147_v18, %v3791_v31  ;;  %v3792_v2 = vmul.f32 0.00390625, %v3760_v45  ;;  %3881 = vadd.xlane.f32.xlu1 %v3880_v60  ;;  %v7600_v60 = vld [vmem:[%s8635_s17 + $0x164] ss:$16 sps:$4 sm:$0xff]   ;;  %v7663_v1 = vld [vmem:[%s8589_s25 + $0x4] ss:$8 sps:$4 sm:$0xff]  }
 0x9b8   : > { %4523 = vmatprep.subr.bf16.mxu0 %v7600_v60  ;;  %5731 = vmatprep.subr.bf16.mxu1 %v7663_v1  ;;  %v7618_v1 = vld [vmem:[%s8635_s17 + $0x2c] ss:$16 sps:$4 sm:$0xff]  }
 0x9b9   : > { %v3845_v34 = vmul.f32 %v10320_v54, %v10320_v54  ;;  %v3846_v7 = vmul.f32 %v10323_v37, %v10323_v37  ;;  %v10330_v5 = vsub.f32 %v10150_v63, %v3792_v2  ;;  %v10333_v8 = vsub.f32 %v10153_v10, %v3792_v2 }
 0x9bb   : > { %v3847_v49 = vmul.f32 %v10330_v5, %v10330_v5  ;;  %v3848_v33 = vmul.f32 %v10333_v8, %v10333_v8  ;;  %v3883_v14 = vadd.f32 %v3846_v7, %v3845_v34  ;;  %v7598_v34 = vld [vmem:[%s8635_s17 + $0x160] ss:$16 sps:$4 sm:$0xff]  }
 0x9bc   : > { %v3763_v50 = vpop.xlane.xlu0 %3762  ;;  %4524 = vmatpush1.bf16.msra.mxu0 %v7598_v34  ;;  %v7604_v34 = vld [vmem:[%s8635_s17 + $0x1a0] ss:$16 sps:$4 sm:$0xff]  }
 0x9bd   : > { %v3793_v58 = vmul.f32 0.00390625, %v3763_v50  ;;  %3884 = vadd.xlane.f32.xlu0 %v3883_v14  ;;  %v3886_v52 = vadd.f32 %v3848_v33, %v3847_v49  ;;  %v7603_v14 = vld [vmem:[%s8635_s17 + $0x184] ss:$16 sps:$4 sm:$0xff]  }
 0x9be   : > { %v3766_v31 = vpop.xlane.xlu1 %3765  ;;  %4525 = vmatprep.subr.bf16.mxu0 %v7603_v14 }
 0x9bf   : > { %v10343_v45 = vsub.f32 %v10164_v23, %v3793_v58  ;;  %v10346_v2 = vsub.f32 %v10167_v61, %v3793_v58  ;;  %v3794_v10 = vmul.f32 0.00390625, %v3766_v31  ;;  %3887 = vadd.xlane.f32.xlu1 %v3886_v52  ;;  %v7601_v52 = vld [vmem:[%s8635_s17 + $0x180] ss:$16 sps:$4 sm:$0xff]  }
 0x9c0   : > { %4526 = vmatpush1.bf16.msra.mxu0 %v7601_v52  ;;  %v7609_v52 = vld [vmem:[%s8635_s17 + $0x1c4] ss:$16 sps:$4 sm:$0xff]  }
 0x9c1   : > { %v3849_v7 = vmul.f32 %v10343_v45, %v10343_v45  ;;  %v3850_v56 = vmul.f32 %v10346_v2, %v10346_v2  ;;  %v10354_v49 = vsub.f32 %v10170_v62, %v3794_v10  ;;  %v10357_v33 = vsub.f32 %v10173_v44, %v3794_v10  ;;  %v7606_v44 = vld [vmem:[%s8635_s17 + $0x1a4] ss:$16 sps:$4 sm:$0xff]  }
 0x9c2   : > { %4527 = vmatprep.subr.bf16.mxu0 %v7606_v44 }
 0x9c3   : > { %v3851_v48 = vmul.f32 %v10354_v49, %v10354_v49  ;;  %v3852_v50 = vmul.f32 %v10357_v33, %v10357_v33  ;;  %v3889_v58 = vadd.f32 %v3850_v56, %v3849_v7 }
 0x9c4   : > { %v3769_v31 = vpop.xlane.xlu0 %3768  ;;  %4528 = vmatpush1.bf16.msra.mxu0 %v7604_v34 }
 0x9c5   : > { %v3795_v60 = vmul.f32 0.00390625, %v3769_v31  ;;  %3890 = vadd.xlane.f32.xlu0 %v3889_v58  ;;  %v3892_v62 = vadd.f32 %v3852_v50, %v3851_v48  ;;  %v7607_v58 = vld [vmem:[%s8635_s17 + $0x1c0] ss:$16 sps:$4 sm:$0xff]   ;;  %v7612_v31 = vld [vmem:[%s8635_s17 + $0x1e4] ss:$16 sps:$4 sm:$0xff]   ;;  %4529 = vmatprep.subr.bf16.mxu0 %v7609_v52 }
 0x9c6   : > { %v3772_v10 = vpop.xlane.xlu1 %3771 }
 0x9c7   : > { %v10368_v61 = vsub.f32 %v10184_v27, %v3795_v60  ;;  %v10371_v23 = vsub.f32 %v10187_v28, %v3795_v60  ;;  %v3796_v7 = vmul.f32 0.00390625, %v3772_v10  ;;  %3893 = vadd.xlane.f32.xlu1 %v3892_v62 }
 0x9c8   : > { %4530 = vmatpush1.bf16.msra.mxu0 %v7607_v58 }
 0x9c9   : > { %v3853_v56 = vmul.f32 %v10368_v61, %v10368_v61  ;;  %v3854_v14 = vmul.f32 %v10371_v23, %v10371_v23  ;;  %v10378_v48 = vsub.f32 %v10190_v47, %v3796_v7  ;;  %v10381_v50 = vsub.f32 %v10193_v0, %v3796_v7  ;;  %v7610_v7 = vld [vmem:[%s8635_s17 + $0x1e0] ss:$16 sps:$4 sm:$0xff]   ;;  %4531 = vmatprep.subr.bf16.mxu0 %v7612_v31  ;;  %v7615_v31 = vld [vmem:[%s8635_s17 + $0xc] ss:$16 sps:$4 sm:$0xff]  }
 0x9cb   : > { %v3855_v62 = vmul.f32 %v10378_v48, %v10378_v48  ;;  %v3856_v44 = vmul.f32 %v10381_v50, %v10381_v50  ;;  %v3895_v60 = vadd.f32 %v3854_v14, %v3853_v56 }
 0x9cc   : > { %v3775_v10 = vpop.xlane.xlu0 %3774  ;;  %4532 = vmatpush1.bf16.msra.mxu0 %v7610_v7 }
 0x9cd   : > { %v3797_v28 = vmul.f32 0.00390625, %v3775_v10  ;;  %3896 = vadd.xlane.f32.xlu0 %v3895_v60  ;;  %v3898_v47 = vadd.f32 %v3856_v44, %v3855_v62  ;;  %4614 = vmatprep.subr.bf16.mxu0 %v7615_v31 }
 0x9ce   : > { %v3778_v0 = vpop.xlane.xlu1 %3777 }
 0x9cf   : > { %v10392_v34 = vsub.f32 %v10204_v55, %v3797_v28  ;;  %v10395_v27 = vsub.f32 %v10207_v15, %v3797_v28  ;;  %v3798_v63 = vmul.f32 0.00390625, %v3778_v0  ;;  %3899 = vadd.xlane.f32.xlu1 %v3898_v47 }
 0x9d1   : > { %v3857_v56 = vmul.f32 %v10392_v34, %v10392_v34  ;;  %v3858_v14 = vmul.f32 %v10395_v27, %v10395_v27  ;;  %v10402_v52 = vsub.f32 %v10210_v19, %v3798_v63  ;;  %v10405_v58 = vsub.f32 %v10213_v46, %v3798_v63 }
 0x9d3   : > { %v3859_v28 = vmul.f32 %v10402_v52, %v10402_v52  ;;  %v3860_v47 = vmul.f32 %v10405_v58, %v10405_v58  ;;  %v3901_v0 = vadd.f32 %v3858_v14, %v3857_v56 }
 0x9d4   : > { %v3781_v62 = vpop.xlane.xlu0 %3780 }
 0x9d5   : > { %v3799_v44 = vmul.f32 0.00390625, %v3781_v62  ;;  %3902 = vadd.xlane.f32.xlu0 %v3901_v0  ;;  %v3904_v60 = vadd.f32 %v3860_v47, %v3859_v28 }
 0x9d6   : > { %v3784_v10 = vpop.xlane.xlu1 %3783 }
 0x9d7   : > { %v10413_v19 = vsub.f32 %v10224_v25, %v3799_v44  ;;  %v10416_v63 = vsub.f32 %v10227_v43, %v3799_v44  ;;  %v3800_v7 = vmul.f32 0.00390625, %v3784_v10  ;;  %3905 = vadd.xlane.f32.xlu1 %v3904_v60 }
 0x9d9   : > { %v3861_v46 = vmul.f32 %v10413_v19, %v10413_v19  ;;  %v3862_v56 = vmul.f32 %v10416_v63, %v10416_v63  ;;  %v10423_v14 = vsub.f32 %v10230_v29, %v3800_v7  ;;  %v10426_v31 = vsub.f32 %v10233_v40, %v3800_v7 }
 0x9db   : > { %v3863_v28 = vmul.f32 %v10423_v14, %v10423_v14  ;;  %v3864_v47 = vmul.f32 %v10426_v31, %v10426_v31  ;;  %v3907_v0 = vadd.f32 %v3862_v56, %v3861_v46  ;;  %v3735_v46 = vld [vmem:[%s746_s11] sm:$0x3]  ;;  %s12195_s11 = sld [smem:[#allocation17_spill]] }
 0x9dd   : > { %3908 = vadd.xlane.f32.xlu0 %v3907_v0  ;;  %v3910_v62 = vadd.f32 %v3864_v47, %v3863_v28  ;;  %v10438_v0 = vrot.slane %v3735_v46, %v12158_v9 }
 0x9df   : > { %3911 = vadd.xlane.f32.xlu1 %v3910_v62 }
 0xa32   : > { %v3867_v44 = vpop.xlane.xlu0 %3866 }
 0xa33   : > { %v3913_v60 = vmul.f32 0.00390625, %v3867_v44 }
 0xa34   : > { %v3870_v10 = vpop.xlane.xlu1 %3869 }
 0xa35   : > { %v3929_v29 = vadd.f32 1e-05, %v3913_v60  ;;  %v3914_v43 = vmul.f32 0.00390625, %v3870_v10 }
 0xa37   : > { %7917 = vrsqrt.f32 %v3929_v29  ;;  %v3930_v7 = vadd.f32 1e-05, %v3914_v43  ;;  %v3736_v43 = vld [vmem:[%s750_s18] sm:$0x3]  ;;  %v10446_v29 = vrot.slane %v3735_v46, %v12159_v36 }
 0xa38   : > { %v10451_v10 = vrot.slane %v3736_v43, %v12158_v9 }
 0xa39   : > { %7919 = vrsqrt.f32 %v3930_v7  ;;  %v10454_v7 = vrot.slane %v3736_v43, %v12159_v36  ;;  %v7666_v43 = vld [vmem:[%s8589_s25 + $0x14] ss:$8 sps:$4 sm:$0xff]  }
 0xa3a   : > { %v3873_v40 = vpop.xlane.xlu0 %3872 }
 0xa3b   : > { %v3915_v25 = vmul.f32 0.00390625, %v3873_v40 }
 0xa3c   : > { %v3876_v15 = vpop.xlane.xlu1 %3875 }
 0xa3d   : > { %v3931_v56 = vadd.f32 1e-05, %v3915_v25  ;;  %v3916_v28 = vmul.f32 0.00390625, %v3876_v15 }
 0xa3f   : > { %7921 = vrsqrt.f32 %v3931_v56  ;;  %v3932_v47 = vadd.f32 1e-05, %v3916_v28 }
 0xa41   : > { %v7918_v40 = vpop.eup %7917  ;;  %7923 = vrsqrt.f32 %v3932_v47 }
 0xa42   : > { %v3961_v62 = vmul.f32 %v7918_v40, %v10260_v30  ;;  %v3879_v25 = vpop.xlane.xlu0 %3878  ;;  %v3962_v15 = vmul.f32 %v7918_v40, %v10263_v41  ;;  %v7661_v40 = vld [vmem:[%s8589_s25] ss:$8 sps:$4 sm:$0xff]  }
 0xa43   : > { %v7920_v44 = vpop.eup %7919  ;;  %v3917_v60 = vmul.f32 0.00390625, %v3879_v25  ;;  %5732 = vmatpush1.bf16.msra.mxu1 %v7661_v40 }
 0xa44   : > { %v4004_v46 = vmul.f32 %v10438_v0, %v3961_v62  ;;  %v3963_v56 = vmul.f32 %v7920_v44, %v10270_v32  ;;  %v3882_v28 = vpop.xlane.xlu1 %3881  ;;  %v3964_v30 = vmul.f32 %v7920_v44, %v10273_v26  ;;  %v4005_v47 = vmul.f32 %v10446_v29, %v3962_v15  ;;  %5733 = vmatprep.subr.bf16.mxu1 %v7666_v43 }
 0xa45   : > { %v3933_v55 = vadd.f32 1e-05, %v3917_v60  ;;  %v3918_v41 = vmul.f32 0.00390625, %v3882_v28  ;;  %v7664_v60 = vld [vmem:[%s8589_s25 + $0x10] ss:$8 sps:$4 sm:$0xff]  }
 0xa46   : > { %v4006_v25 = vmul.f32 %v10438_v0, %v3963_v56  ;;  %v4007_v18 = vmul.f32 %v10446_v29, %v3964_v30  ;;  %v4048_v32 = vadd.f32 %v10454_v7, %v4005_v47  ;;  %v4047_v26 = vadd.f32 %v10451_v10, %v4004_v46  ;;  %v7613_v30 = vld [vmem:[%s8635_s17 + $0x8] ss:$16 sps:$4 sm:$0xff]  }
 0xa47   : > { %7925 = vrsqrt.f32 %v3933_v55  ;;  %v3934_v62 = vadd.f32 1e-05, %v3918_v41  ;;  %5734 = vmatpush1.bf16.msra.mxu1 %v7664_v60 }
 0xa48   : > { %v4050_v16 = vadd.f32 %v10454_v7, %v4007_v18  ;;  %v4049_v15 = vadd.f32 %v10451_v10, %v4006_v25  ;;  %v7669_v25 = vld [vmem:[%s8589_s25 + $0x24] ss:$8 sps:$4 sm:$0xff]  }
 0xa49   : > { %v7922_v44 = vpop.eup %7921  ;;  %7927 = vrsqrt.f32 %v3934_v62  ;;  %5735 = vmatprep.subr.bf16.mxu1 %v7669_v25 }
 0xa4a   : > { %v3885_v56 = vpop.xlane.xlu0 %3884  ;;  %v10470_v28 = vpack.c.bf16 %v4050_v16, %v4048_v32  ;;  %v10472_v55 = vpack.c.bf16 %v4049_v15, %v4047_v26  ;;  %v3966_v47 = vmul.f32 %v7922_v44, %v10283_v17  ;;  %v3965_v18 = vmul.f32 %v7922_v44, %v10280_v11  ;;  %v7667_v26 = vld [vmem:[%s8589_s25 + $0x20] ss:$8 sps:$4 sm:$0xff]   ;;  %v7616_v15 = vld [vmem:[%s8635_s17 + $0x28] ss:$16 sps:$4 sm:$0xff]  }
 0xa4b   : > { %v7924_v46 = vpop.eup %7923  ;;  %v3919_v41 = vmul.f32 0.00390625, %v3885_v56  ;;  %5736 = vmatpush1.bf16.msra.mxu1 %v7667_v26  ;;  %v7675_v26 = vld [vmem:[%s8589_s25 + $0x44] ss:$8 sps:$4 sm:$0xff]  }
 0xa4c   : > { %4533 = vmatprep.mubr.bf16.mxu0 %v10470_v28  ;;  %v3888_v40 = vpop.xlane.xlu1 %3887  ;;  %v3968_v16 = vmul.f32 %v7924_v46, %v10293_v35  ;;  %v4009_v62 = vmul.f32 %v10446_v29, %v3966_v47  ;;  %v3967_v32 = vmul.f32 %v7924_v46, %v10290_v53  ;;  %v4008_v11 = vmul.f32 %v10438_v0, %v3965_v18  ;;  %v7621_v53 = vld [vmem:[%s8635_s17 + $0x4c] ss:$16 sps:$4 sm:$0xff]   ;;  %v7672_v47 = vld [vmem:[%s8589_s25 + $0x34] ss:$8 sps:$4 sm:$0xff]  }
 0xa4d   : > { %v3935_v17 = vadd.f32 1e-05, %v3919_v41  ;;  %v3920_v43 = vmul.f32 0.00390625, %v3888_v40  ;;  %4534 = vmatmul.mubr.bf16.vlgmr.msra.gmra.mrb[120].mxu0 %v10472_v55  ;;  %v7670_v40 = vld [vmem:[%s8589_s25 + $0x30] ss:$8 sps:$4 sm:$0xff]   ;;  %5737 = vmatprep.subr.bf16.mxu1 %v7672_v47 }
 0xa4e   : > { %4615 = vmatpush1.bf16.msra.mxu0 %v7613_v30  ;;  %v4011_v44 = vmul.f32 %v10446_v29, %v3968_v16  ;;  %v4010_v35 = vmul.f32 %v10438_v0, %v3967_v32  ;;  %v4052_v18 = vadd.f32 %v10454_v7, %v4009_v62  ;;  %v4051_v60 = vadd.f32 %v10451_v10, %v4008_v11  ;;  %v7619_v32 = vld [vmem:[%s8635_s17 + $0x48] ss:$16 sps:$4 sm:$0xff]  }
 0xa4f   : > { %7929 = vrsqrt.f32 %v3935_v17  ;;  %v3936_v56 = vadd.f32 1e-05, %v3920_v43  ;;  %4616 = vmatprep.subr.bf16.mxu0 %v7618_v1  ;;  %5738 = vmatpush1.bf16.msra.mxu1 %v7670_v40  ;;  %v7622_v47 = vld [vmem:[%s8635_s17 + $0x68] ss:$16 sps:$4 sm:$0xff]  }
 0xa50   : > { %v4054_v46 = vadd.f32 %v10454_v7, %v4011_v44  ;;  %v4053_v30 = vadd.f32 %v10451_v10, %v4010_v35  ;;  %v7624_v44 = vld [vmem:[%s8635_s17 + $0x6c] ss:$16 sps:$4 sm:$0xff]   ;;  %5739 = vmatprep.subr.bf16.mxu1 %v7675_v26 }
 0xa51   : > { %v7926_v41 = vpop.eup %7925  ;;  %7931 = vrsqrt.f32 %v3936_v56 }
 0xa52   : > { %v3891_v16 = vpop.xlane.xlu0 %3890  ;;  %4617 = vmatpush1.bf16.msra.mxu0 %v7616_v15  ;;  %v10496_v1 = vpack.c.bf16 %v4054_v46, %v4052_v18  ;;  %v10498_v25 = vpack.c.bf16 %v4053_v30, %v4051_v60  ;;  %v3970_v62 = vmul.f32 %v7926_v41, %v10303_v38  ;;  %v3969_v17 = vmul.f32 %v7926_v41, %v10300_v22  ;;  %v7678_v41 = vld [vmem:[%s8589_s25 + $0x54] ss:$8 sps:$4 sm:$0xff]  }
 0xa53   : > { %v7928_v11 = vpop.eup %7927  ;;  %v3921_v43 = vmul.f32 0.00390625, %v3891_v16  ;;  %4618 = vmatprep.subr.bf16.mxu0 %v7621_v53  ;;  %v7673_v53 = vld [vmem:[%s8589_s25 + $0x40] ss:$8 sps:$4 sm:$0xff]  }
 0xa54   : > { %4543 = vmatprep.mubr.bf16.mxu0 %v10496_v1  ;;  %v3894_v15 = vpop.xlane.xlu1 %3893  ;;  %v3972_v35 = vmul.f32 %v7928_v11, %v10313_v13  ;;  %v4013_v56 = vmul.f32 %v10446_v29, %v3970_v62  ;;  %v3971_v38 = vmul.f32 %v7928_v11, %v10310_v59  ;;  %v4012_v22 = vmul.f32 %v10438_v0, %v3969_v17  ;;  %v7627_v59 = vld [vmem:[%s8635_s17 + $0x8c] ss:$16 sps:$4 sm:$0xff]  }
 0xa55   : > { %v3937_v18 = vadd.f32 1e-05, %v3921_v43  ;;  %v3922_v46 = vmul.f32 0.00390625, %v3894_v15  ;;  %4544 = vmatmul.mubr.bf16.gmra.mrb[124].mxu0 %v10498_v25  ;;  %5740 = vmatpush1.bf16.msra.mxu1 %v7673_v53  ;;  %v7676_v11 = vld [vmem:[%s8589_s25 + $0x50] ss:$8 sps:$4 sm:$0xff]  }
 0xa56   : > { %4619 = vmatpush1.bf16.msra.mxu0 %v7619_v32  ;;  %v4015_v60 = vmul.f32 %v10446_v29, %v3972_v35  ;;  %v4014_v13 = vmul.f32 %v10438_v0, %v3971_v38  ;;  %v4056_v16 = vadd.f32 %v10454_v7, %v4013_v56  ;;  %v4055_v40 = vadd.f32 %v10451_v10, %v4012_v22  ;;  %v7625_v15 = vld [vmem:[%s8635_s17 + $0x88] ss:$16 sps:$4 sm:$0xff]  }
 0xa57   : > { %7933 = vrsqrt.f32 %v3937_v18  ;;  %v3938_v30 = vadd.f32 1e-05, %v3922_v46  ;;  %4620 = vmatprep.subr.bf16.mxu0 %v7624_v44  ;;  %v7630_v18 = vld [vmem:[%s8635_s17 + $0xac] ss:$16 sps:$4 sm:$0xff]   ;;  %5741 = vmatprep.subr.bf16.mxu1 %v7678_v41  ;;  %v7681_v46 = vld [vmem:[%s8589_s25 + $0x64] ss:$8 sps:$4 sm:$0xff]  }
 0xa58   : > { %v4058_v62 = vadd.f32 %v10454_v7, %v4015_v60  ;;  %v4057_v32 = vadd.f32 %v10451_v10, %v4014_v13  ;;  %v7628_v41 = vld [vmem:[%s8635_s17 + $0xa8] ss:$16 sps:$4 sm:$0xff]  }
 0xa59   : > { %v7930_v17 = vpop.eup %7929  ;;  %7935 = vrsqrt.f32 %v3938_v30  ;;  %5742 = vmatpush1.bf16.msra.mxu1 %v7676_v11 }
 0xa5a   : > { %v3897_v43 = vpop.xlane.xlu0 %3896  ;;  %4621 = vmatpush1.bf16.msra.mxu0 %v7622_v47  ;;  %v10522_v44 = vpack.c.bf16 %v4058_v62, %v4056_v16  ;;  %v10524_v26 = vpack.c.bf16 %v4057_v32, %v4055_v40  ;;  %v3974_v35 = vmul.f32 %v7930_v17, %v10323_v37  ;;  %v3973_v56 = vmul.f32 %v7930_v17, %v10320_v54  ;;  %v7633_v40 = vld [vmem:[%s8635_s17 + $0xcc] ss:$16 sps:$4 sm:$0xff]  }
 0xa5b   : > { %v7932_v38 = vpop.eup %7931  ;;  %v3923_v22 = vmul.f32 0.00390625, %v3897_v43  ;;  %4622 = vmatprep.subr.bf16.mxu0 %v7627_v59  ;;  %v7679_v59 = vld [vmem:[%s8589_s25 + $0x60] ss:$8 sps:$4 sm:$0xff]   ;;  %5743 = vmatprep.subr.bf16.mxu1 %v7681_v46 }
 0xa5c   : > { %4553 = vmatprep.mubr.bf16.mxu0 %v10522_v44  ;;  %v3900_v53 = vpop.xlane.xlu1 %3899  ;;  %v3976_v47 = vmul.f32 %v7932_v38, %v10333_v8  ;;  %v4017_v60 = vmul.f32 %v10446_v29, %v3974_v35  ;;  %v3975_v37 = vmul.f32 %v7932_v38, %v10330_v5  ;;  %v4016_v54 = vmul.f32 %v10438_v0, %v3973_v56  ;;  %v7631_v38 = vld [vmem:[%s8635_s17 + $0xc8] ss:$16 sps:$4 sm:$0xff]  }
 0xa5d   : > { %v3939_v13 = vadd.f32 1e-05, %v3923_v22  ;;  %v3924_v30 = vmul.f32 0.00390625, %v3900_v53  ;;  %4554 = vmatmul.mubr.bf16.gmra.mrb[128].mxu0 %v10524_v26  ;;  %5744 = vmatpush1.bf16.msra.mxu1 %v7679_v59 }
 0xa5e   : > { %4623 = vmatpush1.bf16.msra.mxu0 %v7625_v15  ;;  %v4019_v16 = vmul.f32 %v10446_v29, %v3976_v47  ;;  %v4018_v62 = vmul.f32 %v10438_v0, %v3975_v37  ;;  %v4060_v5 = vadd.f32 %v10454_v7, %v4017_v60  ;;  %v4059_v17 = vadd.f32 %v10451_v10, %v4016_v54  ;;  %v7636_v47 = vld [vmem:[%s8635_s17 + $0xec] ss:$16 sps:$4 sm:$0xff]  }
 0xa5f   : > { %7937 = vrsqrt.f32 %v3939_v13  ;;  %v3940_v8 = vadd.f32 1e-05, %v3924_v30  ;;  %4624 = vmatprep.subr.bf16.mxu0 %v7630_v18 }
 0xa60   : > { %v4062_v32 = vadd.f32 %v10454_v7, %v4019_v16  ;;  %v4061_v11 = vadd.f32 %v10451_v10, %v4018_v62 }
 0xa61   : > { %v7934_v43 = vpop.eup %7933  ;;  %7939 = vrsqrt.f32 %v3940_v8 }
 0xa62   : > { %v3903_v15 = vpop.xlane.xlu0 %3902  ;;  %4625 = vmatpush1.bf16.msra.mxu0 %v7628_v41  ;;  %v10546_v35 = vpack.c.bf16 %v4062_v32, %v4060_v5  ;;  %v10548_v56 = vpack.c.bf16 %v4061_v11, %v4059_v17  ;;  %v3978_v22 = vmul.f32 %v7934_v43, %v10346_v2  ;;  %v3977_v18 = vmul.f32 %v7934_v43, %v10343_v45  ;;  %v7634_v45 = vld [vmem:[%s8635_s17 + $0xe8] ss:$16 sps:$4 sm:$0xff]  }
 0xa63   : > { %v7936_v46 = vpop.eup %7935  ;;  %v3925_v53 = vmul.f32 0.00390625, %v3903_v15  ;;  %4626 = vmatprep.subr.bf16.mxu0 %v7633_v40  ;;  %v7637_v15 = vld [vmem:[%s8635_s17 + $0x108] ss:$16 sps:$4 sm:$0xff]  }
 0xa64   : > { %4563 = vmatprep.mubr.bf16.mxu0 %v10546_v35  ;;  %v3906_v60 = vpop.xlane.xlu1 %3905  ;;  %v3980_v37 = vmul.f32 %v7936_v46, %v10357_v33  ;;  %v4021_v54 = vmul.f32 %v10446_v29, %v3978_v22  ;;  %v3979_v13 = vmul.f32 %v7936_v46, %v10354_v49  ;;  %v4020_v30 = vmul.f32 %v10438_v0, %v3977_v18  ;;  %v7639_v33 = vld [vmem:[%s8635_s17 + $0x10c] ss:$16 sps:$4 sm:$0xff]  }
 0xa65   : > { %v3941_v2 = vadd.f32 1e-05, %v3925_v53  ;;  %v3926_v59 = vmul.f32 0.00390625, %v3906_v60  ;;  %4564 = vmatmul.mubr.bf16.gmra.mrb[132].mxu0 %v10548_v56  ;;  %v7642_v53 = vld [vmem:[%s8635_s17 + $0x12c] ss:$16 sps:$4 sm:$0xff]  }
 0xa66   : > { %4627 = vmatpush1.bf16.msra.mxu0 %v7631_v38  ;;  %v4023_v41 = vmul.f32 %v10446_v29, %v3980_v37  ;;  %v4022_v16 = vmul.f32 %v10438_v0, %v3979_v13  ;;  %v4064_v8 = vadd.f32 %v10454_v7, %v4021_v54  ;;  %v4063_v40 = vadd.f32 %v10451_v10, %v4020_v30 }
 0xa67   : > { %7941 = vrsqrt.f32 %v3941_v2  ;;  %v3942_v62 = vadd.f32 1e-05, %v3926_v59  ;;  %4628 = vmatprep.subr.bf16.mxu0 %v7636_v47 }
 0xa68   : > { %v4066_v49 = vadd.f32 %v10454_v7, %v4023_v41  ;;  %v4065_v5 = vadd.f32 %v10451_v10, %v4022_v16 }
 0xa69   : > { %v7938_v32 = vpop.eup %7937  ;;  %7943 = vrsqrt.f32 %v3942_v62 }
 0xa6a   : > { %v3909_v17 = vpop.xlane.xlu0 %3908  ;;  %4629 = vmatpush1.bf16.msra.mxu0 %v7634_v45  ;;  %v10568_v11 = vpack.c.bf16 %v4066_v49, %v4064_v8  ;;  %v10570_v43 = vpack.c.bf16 %v4065_v5, %v4063_v40  ;;  %v3982_v38 = vmul.f32 %v7938_v32, %v10371_v23  ;;  %v3981_v22 = vmul.f32 %v7938_v32, %v10368_v61  ;;  %v7640_v61 = vld [vmem:[%s8635_s17 + $0x128] ss:$16 sps:$4 sm:$0xff]  }
 0xa6b   : > { %v7940_v18 = vpop.eup %7939  ;;  %v3927_v46 = vmul.f32 0.00390625, %v3909_v17  ;;  %4630 = vmatprep.subr.bf16.mxu0 %v7639_v33  ;;  %v7643_v40 = vld [vmem:[%s8635_s17 + $0x148] ss:$16 sps:$4 sm:$0xff]  }
 0xa6c   : > { %4573 = vmatprep.mubr.bf16.mxu0 %v10568_v11  ;;  %v3912_v47 = vpop.xlane.xlu1 %3911  ;;  %v3984_v60 = vmul.f32 %v7940_v18, %v10381_v50  ;;  %v4025_v37 = vmul.f32 %v10446_v29, %v3982_v38  ;;  %v3983_v54 = vmul.f32 %v7940_v18, %v10378_v48  ;;  %v4024_v13 = vmul.f32 %v10438_v0, %v3981_v22  ;;  %v7645_v50 = vld [vmem:[%s8635_s17 + $0x14c] ss:$16 sps:$4 sm:$0xff]  }
 0xa6d   : > { %v3943_v23 = vadd.f32 1e-05, %v3927_v46  ;;  %v3928_v30 = vmul.f32 0.00390625, %v3912_v47  ;;  %4574 = vmatmul.mubr.bf16.gmra.mrb[136].mxu0 %v10570_v43  ;;  %v7651_v47 = vld [vmem:[%s8635_s17 + $0x18c] ss:$16 sps:$4 sm:$0xff]  }
 0xa6e   : > { %4631 = vmatpush1.bf16.msra.mxu0 %v7637_v15  ;;  %v4027_v2 = vmul.f32 %v10446_v29, %v3984_v60  ;;  %v4026_v59 = vmul.f32 %v10438_v0, %v3983_v54  ;;  %v4068_v48 = vadd.f32 %v10454_v7, %v4025_v37  ;;  %v4067_v16 = vadd.f32 %v10451_v10, %v4024_v13  ;;  %v7648_v15 = vld [vmem:[%s8635_s17 + $0x16c] ss:$16 sps:$4 sm:$0xff]  }
 0xa6f   : > { %7945 = vrsqrt.f32 %v3943_v23  ;;  %v3944_v45 = vadd.f32 1e-05, %v3928_v30  ;;  %4632 = vmatprep.subr.bf16.mxu0 %v7642_v53  ;;  %v7649_v30 = vld [vmem:[%s8635_s17 + $0x188] ss:$16 sps:$4 sm:$0xff]  }
 0xa70   : > { %v4070_v41 = vadd.f32 %v10454_v7, %v4027_v2  ;;  %v4069_v62 = vadd.f32 %v10451_v10, %v4026_v59 }
 0xa71   : > { %v7942_v33 = vpop.eup %7941  ;;  %7947 = vrsqrt.f32 %v3944_v45  ;;  %v7654_v45 = vld [vmem:[%s8635_s17 + $0x1ac] ss:$16 sps:$4 sm:$0xff]  }
 0xa72   : > { %4633 = vmatpush1.bf16.msra.mxu0 %v7640_v61  ;;  %v10590_v8 = vpack.c.bf16 %v4070_v41, %v4068_v48  ;;  %v10592_v49 = vpack.c.bf16 %v4069_v62, %v4067_v16  ;;  %v3986_v5 = vmul.f32 %v7942_v33, %v10395_v27  ;;  %v3985_v32 = vmul.f32 %v7942_v33, %v10392_v34  ;;  %v7646_v27 = vld [vmem:[%s8635_s17 + $0x168] ss:$16 sps:$4 sm:$0xff]   ;;  %v7657_v33 = vld [vmem:[%s8635_s17 + $0x1cc] ss:$16 sps:$4 sm:$0xff]  }
 0xa73   : > { %v7944_v17 = vpop.eup %7943  ;;  %4634 = vmatprep.subr.bf16.mxu0 %v7645_v50 }
 0xa74   : > { %4583 = vmatprep.mubr.bf16.mxu0 %v10590_v8  ;;  %v3988_v38 = vmul.f32 %v7944_v17, %v10405_v58  ;;  %v4029_v22 = vmul.f32 %v10446_v29, %v3986_v5  ;;  %v3987_v18 = vmul.f32 %v7944_v17, %v10402_v52  ;;  %v4028_v46 = vmul.f32 %v10438_v0, %v3985_v32 }
 0xa75   : > { %4584 = vmatmul.mubr.bf16.gmra.mrb[140].mxu0 %v10592_v49 }
 0xa76   : > { %4635 = vmatpush1.bf16.msra.mxu0 %v7643_v40  ;;  %v4031_v34 = vmul.f32 %v10446_v29, %v3988_v38  ;;  %v4030_v53 = vmul.f32 %v10438_v0, %v3987_v18  ;;  %v4072_v58 = vadd.f32 %v10454_v7, %v4029_v22  ;;  %v4071_v52 = vadd.f32 %v10451_v10, %v4028_v46  ;;  %v7705_v38 = vld [vmem:[%s8589_s25 + $0xe4] ss:$8 sps:$4 sm:$0xff]   ;;  %v7703_v22 = vld [vmem:[%s8589_s25 + $0xe0] ss:$8 sps:$4 sm:$0xff]   ;;  %v7708_v18 = vld [vmem:[%s8589_s25 + $0xf4] ss:$8 sps:$4 sm:$0xff]  }
 0xa77   : > { %4636 = vmatprep.subr.bf16.mxu0 %v7648_v15  ;;  %v7655_v15 = vld [vmem:[%s8635_s17 + $0x1c8] ss:$16 sps:$4 sm:$0xff]   ;;  %v7706_v46 = vld [vmem:[%s8589_s25 + $0xf0] ss:$8 sps:$4 sm:$0xff]  }
 0xa78   : > { %v4074_v60 = vadd.f32 %v10454_v7, %v4031_v34  ;;  %v4073_v37 = vadd.f32 %v10451_v10, %v4030_v53  ;;  %v10671_v34 = vld [vmem:[%s8583_s24] sm:$0xf] }
 0xa79   : > { %v7946_v54 = vpop.eup %7945  ;;  %v10675_v53 = vrot.slane %v10671_v34, %v12158_v9 }
 0xa7a   : > { %4637 = vmatpush1.bf16.msra.mxu0 %v7646_v27  ;;  %v10612_v13 = vpack.c.bf16 %v4074_v60, %v4072_v58  ;;  %v10614_v23 = vpack.c.bf16 %v4073_v37, %v4071_v52  ;;  %v3990_v61 = vmul.f32 %v7946_v54, %v10416_v63  ;;  %v3989_v2 = vmul.f32 %v7946_v54, %v10413_v19  ;;  %v7652_v63 = vld [vmem:[%s8635_s17 + $0x1a8] ss:$16 sps:$4 sm:$0xff]  }
 0xa7b   : > { %v7948_v59 = vpop.eup %7947  ;;  %4638 = vmatprep.subr.bf16.mxu0 %v7651_v47  ;;  %v7711_v27 = vld [vmem:[%s8589_s25 + $0x104] ss:$8 sps:$4 sm:$0xff]   ;;  %v10679_v47 = vrot.slane %v10671_v34, %v12159_v36 }
 0xa7c   : > { %4593 = vmatprep.mubr.bf16.mxu0 %v10612_v13  ;;  %v3992_v50 = vmul.f32 %v7948_v59, %v10426_v31  ;;  %v4033_v48 = vmul.f32 %v10446_v29, %v3990_v61  ;;  %v3991_v41 = vmul.f32 %v7948_v59, %v10423_v14  ;;  %v4032_v16 = vmul.f32 %v10438_v0, %v3989_v2 }
 0xa7d   : > { %4594 = vmatmul.mubr.bf16.gmra.mrb[144].mxu0 %v10614_v23 }
 0xa7e   : > { %4639 = vmatpush1.bf16.msra.mxu0 %v7649_v30  ;;  %v4035_v19 = vmul.f32 %v10446_v29, %v3992_v50  ;;  %v4034_v62 = vmul.f32 %v10438_v0, %v3991_v41  ;;  %v4076_v31 = vadd.f32 %v10454_v7, %v4033_v48  ;;  %v4075_v14 = vadd.f32 %v10451_v10, %v4032_v16  ;;  %v7660_v29 = vld [vmem:[%s8635_s17 + $0x1ec] ss:$16 sps:$4 sm:$0xff]   ;;  %v7658_v0 = vld [vmem:[%s8635_s17 + $0x1e8] ss:$16 sps:$4 sm:$0xff]   ;;  %s12227_s17 = sld [smem:[#allocation59_spill]] (!%p6984_p3) }
 0xa7f   : > { %4640 = vmatprep.subr.bf16.mxu0 %v7654_v45 }
 0xa80   : > { %v4078_v40 = vadd.f32 %v10454_v7, %v4035_v19  ;;  %v4077_v5 = vadd.f32 %v10451_v10, %v4034_v62  ;;  %v7684_v10 = vld [vmem:[%s8589_s25 + $0x74] ss:$8 sps:$4 sm:$0xff]   ;;  %v7682_v7 = vld [vmem:[%s8589_s25 + $0x70] ss:$8 sps:$4 sm:$0xff]  }
 0xa81   : > { %5745 = vmatprep.subr.bf16.mxu1 %v7684_v10 }
 0xa82   : > { %4641 = vmatpush1.bf16.msra.mxu0 %v7652_v63  ;;  %v4094_v32 = vpack.c.bf16 %v4078_v40, %v4076_v31  ;;  %v4093_v17 = vpack.c.bf16 %v4077_v5, %v4075_v14  ;;  %5746 = vmatpush1.bf16.msra.mxu1 %v7682_v7 }
 0xa83   : > { %4642 = vmatprep.subr.bf16.mxu0 %v7657_v33 }
 0xa84   : > { %4603 = vmatprep.mubr.bf16.mxu0 %v4094_v32 }
 0xa85   : > { %4604 = vmatmul.mubr.bf16.gmra.mrb[148].mxu0 %v4093_v17 }
 0xa86   : > { %4643 = vmatpush1.bf16.msra.mxu0 %v7655_v15  ;;  %4646 = vmatprep.mubr.bf16.mxu0 %v10470_v28  ;;  %v7687_v28 = vld [vmem:[%s8589_s25 + $0x84] ss:$8 sps:$4 sm:$0xff]  }
 0xa87   : > { %4644 = vmatprep.subr.bf16.mxu0 %v7660_v29  ;;  %5747 = vmatprep.subr.bf16.mxu1 %v7687_v28 }
 0xa8a   : > { %4645 = vmatpush1.bf16.msra.mxu0 %v7658_v0 }
 0xa8d   : > { %4647 = vmatmul.mubr.bf16.vlgmr.msra.gmra.mrb[152].mxu0 %v10472_v55  ;;  %v7685_v55 = vld [vmem:[%s8589_s25 + $0x80] ss:$8 sps:$4 sm:$0xff]  }
 0xa8e   : > { %4656 = vmatprep.mubr.bf16.mxu0 %v10496_v1  ;;  %5748 = vmatpush1.bf16.msra.mxu1 %v7685_v55  ;;  %v7690_v1 = vld [vmem:[%s8589_s25 + $0x94] ss:$8 sps:$4 sm:$0xff]  }
 0xa8f   : > { %5749 = vmatprep.subr.bf16.mxu1 %v7690_v1 }
 0xa95   : > { %4657 = vmatmul.mubr.bf16.gmra.mrb[156].mxu0 %v10498_v25  ;;  %v7688_v25 = vld [vmem:[%s8589_s25 + $0x90] ss:$8 sps:$4 sm:$0xff]  }
 0xa96   : > { %4666 = vmatprep.mubr.bf16.mxu0 %v10522_v44  ;;  %5750 = vmatpush1.bf16.msra.mxu1 %v7688_v25  ;;  %v7693_v44 = vld [vmem:[%s8589_s25 + $0xa4] ss:$8 sps:$4 sm:$0xff]  }
 0xa97   : > { %5751 = vmatprep.subr.bf16.mxu1 %v7693_v44 }
 0xa9d   : > { %4667 = vmatmul.mubr.bf16.gmra.mrb[160].mxu0 %v10524_v26  ;;  %v7691_v26 = vld [vmem:[%s8589_s25 + $0xa0] ss:$8 sps:$4 sm:$0xff]  }
 0xa9e   : > { %4676 = vmatprep.mubr.bf16.mxu0 %v10546_v35  ;;  %5752 = vmatpush1.bf16.msra.mxu1 %v7691_v26  ;;  %v7696_v35 = vld [vmem:[%s8589_s25 + $0xb4] ss:$8 sps:$4 sm:$0xff]  }
 0xa9f   : > { %5753 = vmatprep.subr.bf16.mxu1 %v7696_v35 }
 0xaa5   : > { %4677 = vmatmul.mubr.bf16.gmra.mrb[164].mxu0 %v10548_v56  ;;  %v7694_v56 = vld [vmem:[%s8589_s25 + $0xb0] ss:$8 sps:$4 sm:$0xff]  }
 0xaa6   : > { %4686 = vmatprep.mubr.bf16.mxu0 %v10568_v11  ;;  %5754 = vmatpush1.bf16.msra.mxu1 %v7694_v56  ;;  %v7699_v11 = vld [vmem:[%s8589_s25 + $0xc4] ss:$8 sps:$4 sm:$0xff]  }
 0xaa7   : > { %5755 = vmatprep.subr.bf16.mxu1 %v7699_v11 }
 0xaad   : > { %4687 = vmatmul.mubr.bf16.gmra.mrb[168].mxu0 %v10570_v43  ;;  %v7697_v43 = vld [vmem:[%s8589_s25 + $0xc0] ss:$8 sps:$4 sm:$0xff]  }
 0xaae   : > { %4696 = vmatprep.mubr.bf16.mxu0 %v10590_v8  ;;  %5756 = vmatpush1.bf16.msra.mxu1 %v7697_v43  ;;  %v7702_v8 = vld [vmem:[%s8589_s25 + $0xd4] ss:$8 sps:$4 sm:$0xff]  }
 0xaaf   : > { %5757 = vmatprep.subr.bf16.mxu1 %v7702_v8 }
 0xab5   : > { %4697 = vmatmul.mubr.bf16.gmra.mrb[172].mxu0 %v10592_v49  ;;  %v7700_v49 = vld [vmem:[%s8589_s25 + $0xd0] ss:$8 sps:$4 sm:$0xff]  }
 0xab6   : > { %4706 = vmatprep.mubr.bf16.mxu0 %v10612_v13  ;;  %5758 = vmatpush1.bf16.msra.mxu1 %v7700_v49 }
 0xab7   : > { %5759 = vmatprep.subr.bf16.mxu1 %v7705_v38 }
 0xaba   : > { %5760 = vmatpush1.bf16.msra.mxu1 %v7703_v22 }
 0xabb   : > { %5761 = vmatprep.subr.bf16.mxu1 %v7708_v18 }
 0xabd   : > { %4707 = vmatmul.mubr.bf16.gmra.mrb[176].mxu0 %v10614_v23 }
 0xabe   : > { %4716 = vmatprep.mubr.bf16.mxu0 %v4094_v32  ;;  %5762 = vmatpush1.bf16.msra.mxu1 %v7706_v46 }
 0xabf   : > { %5844 = vmatprep.subr.bf16.mxu1 %v7711_v27 }
 0xac5   : > { %4717 = vmatmul.mubr.bf16.gmra.mrb[180].mxu0 %v4093_v17 }
 0xb20   : > { %v4535_v58 = vpop.f32.mrb[120].mxu0 }
 0xb21   : > { %v10682_v60 = vadd.f32 %v4535_v58, %v10675_v53  ;;  %v4537_v52 = vpop.f32.mrb[121].mxu0 }
 0xb22   : > { %v10685_v37 = vadd.f32 %v4537_v52, %v10679_v47  ;;  %v4539_v54 = vpop.f32.mrb[122].mxu0 }
 0xb23   : > { %v4727_v13 = vmul.f32 %v10682_v60, %v10682_v60  ;;  %v10690_v23 = vadd.f32 %v4539_v54, %v10675_v53  ;;  %v4541_v30 = vpop.f32.mrb[123].mxu0 }
 0xb24   : > { %v4728_v61 = vmul.f32 %v10685_v37, %v10685_v37  ;;  %v10695_v2 = vadd.f32 %v4541_v30, %v10679_v47 }
 0xb25   : > { %v4791_v59 = vmul.f32 %v4727_v13, %v10682_v60  ;;  %v4731_v45 = vmul.f32 %v10690_v23, %v10690_v23  ;;  %v12190_v13 = vld [vmem:[#allocation18_spill] sm:$0xff] }
 0xb26   : > { %v4792_v50 = vmul.f32 %v4728_v61, %v10685_v37  ;;  %v4732_v48 = vmul.f32 %v10695_v2, %v10695_v2  ;;  %v12191_v30 = vsub.s32 2, %v12190_v13 }
 0xb27   : > { %v4855_v41 = vmul.f32 0.044715, %v4791_v59  ;;  %v4795_v16 = vmul.f32 %v4731_v45, %v10690_v23 }
 0xb28   : > { %v4856_v63 = vmul.f32 0.044715, %v4792_v50  ;;  %v4796_v19 = vmul.f32 %v4732_v48, %v10695_v2  ;;  %v4545_v62 = vpop.f32.mrb[124].mxu0  ;;  %v10740_v61 = vrot.slane %v10671_v34, %v12191_v30 }
 0xb29   : > { %v4919_v33 = vadd.f32 %v4855_v41, %v10682_v60  ;;  %v4859_v31 = vmul.f32 0.044715, %v4795_v16  ;;  %v10707_v40 = vadd.f32 %v4545_v62, %v10675_v53  ;;  %v4547_v14 = vpop.f32.mrb[125].mxu0 }
 0xb2a   : > { %v4920_v5 = vadd.f32 %v4856_v63, %v10685_v37  ;;  %v4860_v32 = vmul.f32 0.044715, %v4796_v19  ;;  %v10711_v17 = vadd.f32 %v4547_v14, %v10679_v47  ;;  %v4549_v15 = vpop.f32.mrb[126].mxu0 }
 0xb2b   : > { %v4983_v29 = vmul.f32 0.7978846, %v4919_v33  ;;  %v4923_v0 = vadd.f32 %v4859_v31, %v10690_v23  ;;  %v4735_v10 = vmul.f32 %v10707_v40, %v10707_v40  ;;  %v10717_v7 = vadd.f32 %v4549_v15, %v10675_v53  ;;  %v4551_v28 = vpop.f32.mrb[127].mxu0 }
 0xb2c   : > { %v4984_v55 = vmul.f32 0.7978846, %v4920_v5  ;;  %v4924_v1 = vadd.f32 %v4860_v32, %v10695_v2  ;;  %v4736_v25 = vmul.f32 %v10711_v17, %v10711_v17  ;;  %v10723_v44 = vadd.f32 %v4551_v28, %v10679_v47 }
 0xb2d   : > { %7949 = vtanh.f32 %v4983_v29  ;;  %v4987_v26 = vmul.f32 0.7978846, %v4923_v0  ;;  %v4799_v35 = vmul.f32 %v4735_v10, %v10707_v40  ;;  %v4739_v56 = vmul.f32 %v10717_v7, %v10717_v7 }
 0xb2e   : > { %7951 = vtanh.f32 %v4984_v55  ;;  %v4988_v11 = vmul.f32 0.7978846, %v4924_v1  ;;  %v4800_v43 = vmul.f32 %v4736_v25, %v10711_v17  ;;  %v4740_v8 = vmul.f32 %v10723_v44, %v10723_v44 }
 0xb2f   : > { %7953 = vtanh.f32 %v4987_v26  ;;  %v4863_v49 = vmul.f32 0.044715, %v4799_v35  ;;  %v4803_v38 = vmul.f32 %v4739_v56, %v10717_v7  ;;  %v12192_v26 = vsub.s32 3, %v12190_v13 }
 0xb30   : > { %v4864_v22 = vmul.f32 0.044715, %v4800_v43  ;;  %v4804_v18 = vmul.f32 %v4740_v8, %v10723_v44  ;;  %v4555_v46 = vpop.f32.mrb[128].mxu0  ;;  %7955 = vtanh.f32 %v4988_v11 }
 0xb31   : > { %v4927_v27 = vadd.f32 %v4863_v49, %v10707_v40  ;;  %v4867_v58 = vmul.f32 0.044715, %v4803_v38  ;;  %v10735_v52 = vadd.f32 %v4555_v46, %v10675_v53  ;;  %v4557_v54 = vpop.f32.mrb[129].mxu0  ;;  %v10768_v35 = vrot.slane %v10671_v34, %v12192_v26 }
 0xb32   : > { %v4928_v59 = vadd.f32 %v4864_v22, %v10711_v17  ;;  %v4868_v45 = vmul.f32 0.044715, %v4804_v18  ;;  %v10744_v50 = vadd.f32 %v4557_v54, %v10679_v47  ;;  %v4559_v48 = vpop.f32.mrb[130].mxu0 }
 0xb33   : > { %v4991_v41 = vmul.f32 0.7978846, %v4927_v27  ;;  %v4931_v16 = vadd.f32 %v4867_v58, %v10717_v7  ;;  %v4743_v63 = vmul.f32 %v10735_v52, %v10735_v52  ;;  %v10750_v19 = vadd.f32 %v4559_v48, %v10675_v53  ;;  %v4561_v62 = vpop.f32.mrb[131].mxu0 }
 0xb34   : > { %v4992_v33 = vmul.f32 0.7978846, %v4928_v59  ;;  %v4932_v31 = vadd.f32 %v4868_v45, %v10723_v44  ;;  %v4744_v14 = vmul.f32 %v10744_v50, %v10744_v50  ;;  %v10756_v5 = vadd.f32 %v4561_v62, %v10679_v47 }
 0xb35   : > { %7957 = vtanh.f32 %v4991_v41  ;;  %v4995_v32 = vmul.f32 0.7978846, %v4931_v16  ;;  %v4807_v15 = vmul.f32 %v4743_v63, %v10735_v52  ;;  %v4747_v29 = vmul.f32 %v10750_v19, %v10750_v19 }
 0xb36   : > { %7959 = vtanh.f32 %v4992_v33  ;;  %v4996_v0 = vmul.f32 0.7978846, %v4932_v31  ;;  %v4808_v10 = vmul.f32 %v4744_v14, %v10744_v50  ;;  %v4748_v28 = vmul.f32 %v10756_v5, %v10756_v5 }
 0xb37   : > { %v7950_v55 = vpop.eup %7949  ;;  %7961 = vtanh.f32 %v4995_v32  ;;  %v4871_v1 = vmul.f32 0.044715, %v4807_v15  ;;  %v4811_v25 = vmul.f32 %v4747_v29, %v10750_v19 }
 0xb38   : > { %v7952_v56 = vpop.eup %7951  ;;  %v5111_v11 = vadd.f32 1.0, %v7950_v55  ;;  %7963 = vtanh.f32 %v4996_v0  ;;  %v4872_v43 = vmul.f32 0.044715, %v4808_v10  ;;  %v4812_v8 = vmul.f32 %v4748_v28, %v10756_v5  ;;  %v4565_v49 = vpop.f32.mrb[132].mxu0 }
 0xb39   : > { %v7954_v38 = vpop.eup %7953  ;;  %v4935_v22 = vadd.f32 %v4871_v1, %v10735_v52  ;;  %v4875_v18 = vmul.f32 0.044715, %v4811_v25  ;;  %v10773_v46 = vadd.f32 %v4565_v49, %v10675_v53  ;;  %v4567_v27 = vpop.f32.mrb[133].mxu0  ;;  %v5112_v58 = vadd.f32 1.0, %v7952_v56 }
 0xb3a   : > { %v5175_v54 = vmul.f32 0.5, %v5111_v11  ;;  %v5115_v13 = vadd.f32 1.0, %v7954_v38  ;;  %v4936_v34 = vadd.f32 %v4872_v43, %v10744_v50  ;;  %v4876_v30 = vmul.f32 0.044715, %v4812_v8  ;;  %v4569_v59 = vpop.f32.mrb[134].mxu0  ;;  %v7956_v62 = vpop.eup %7955 }
 0xb3b   : > { %v4999_v45 = vmul.f32 0.7978846, %v4935_v22  ;;  %v4939_v48 = vadd.f32 %v4875_v18, %v10750_v19  ;;  %v4751_v41 = vmul.f32 %v10773_v46, %v10773_v46  ;;  %v10780_v16 = vadd.f32 %v4567_v27, %v10679_v47  ;;  %v4571_v63 = vpop.f32.mrb[135].mxu0 }
 0xb3c   : > { %v10783_v33 = vmul.f32 %v5175_v54, %v10682_v60  ;;  %v5179_v31 = vmul.f32 0.5, %v5115_v13  ;;  %v5000_v14 = vmul.f32 0.7978846, %v4936_v34  ;;  %v4940_v32 = vadd.f32 %v4876_v30, %v10756_v5 }
 0xb3d   : > { %7965 = vtanh.f32 %v4999_v45  ;;  %v5003_v15 = vmul.f32 0.7978846, %v4939_v48  ;;  %v4815_v29 = vmul.f32 %v4751_v41, %v10773_v46  ;;  %v4752_v0 = vmul.f32 %v10780_v16, %v10780_v16 }
 0xb3e   : > { %v10790_v10 = vmul.f32 %v5179_v31, %v10690_v23  ;;  %7967 = vtanh.f32 %v5000_v14  ;;  %v5004_v28 = vmul.f32 0.7978846, %v4940_v32  ;;  %v10793_v55 = vadd.f32 %v4569_v59, %v10675_v53  ;;  %v7709_v23 = vld [vmem:[%s8589_s25 + $0x100] ss:$8 sps:$4 sm:$0xff]  }
 0xb3f   : > { %v10795_v60 = vpop.eup %7957  ;;  %7969 = vtanh.f32 %v5003_v15  ;;  %v4879_v1 = vmul.f32 0.044715, %v4815_v29  ;;  %v4816_v25 = vmul.f32 %v4752_v0, %v10780_v16  ;;  %v10799_v26 = vadd.f32 %v4571_v63, %v10679_v47 }
 0xb40   : > { %v10801_v56 = vpop.eup %7959  ;;  %7971 = vtanh.f32 %v5004_v28  ;;  %v4755_v11 = vmul.f32 %v10793_v55, %v10793_v55  ;;  %v4575_v43 = vpop.f32.mrb[136].mxu0  ;;  %v5116_v8 = vadd.f32 1.0, %v7956_v62  ;;  %v5176_v45 = vmul.f32 0.5, %v5112_v58 }
 0xb41   : > { %v10807_v49 = vpop.eup %7961  ;;  %v4943_v38 = vadd.f32 %v4879_v1, %v10773_v46  ;;  %v4880_v22 = vmul.f32 0.044715, %v4816_v25  ;;  %v4756_v18 = vmul.f32 %v10799_v26, %v10799_v26  ;;  %v10813_v27 = vadd.f32 %v4575_v43, %v10675_v53  ;;  %v4577_v54 = vpop.f32.mrb[137].mxu0 }
 0xb42   : > { %v10815_v13 = vpop.eup %7963  ;;  %v4819_v34 = vmul.f32 %v4755_v11, %v10793_v55  ;;  %v10819_v30 = vadd.f32 %v4577_v54, %v10679_v47  ;;  %v4579_v59 = vpop.f32.mrb[138].mxu0  ;;  %v5180_v48 = vmul.f32 0.5, %v5116_v8  ;;  %v5240_v54 = vmul.f32 %v5176_v45, %v10685_v37 }
 0xb43   : > { %v5007_v41 = vmul.f32 0.7978846, %v4943_v38  ;;  %v4944_v63 = vadd.f32 %v4880_v22, %v10780_v16  ;;  %v4820_v62 = vmul.f32 %v4756_v18, %v10799_v26  ;;  %v4759_v31 = vmul.f32 %v10813_v27, %v10813_v27  ;;  %v4581_v14 = vpop.f32.mrb[139].mxu0 }
 0xb44   : > { %v4883_v32 = vmul.f32 0.044715, %v4819_v34  ;;  %v4760_v15 = vmul.f32 %v10819_v30, %v10819_v30  ;;  %v10828_v29 = vadd.f32 %v4579_v59, %v10675_v53  ;;  %v10831_v0 = vadd.f32 %v4581_v14, %v10679_v47 }
 0xb45   : > { %7973 = vtanh.f32 %v5007_v41  ;;  %v5008_v58 = vmul.f32 0.7978846, %v4944_v63  ;;  %v4884_v28 = vmul.f32 0.044715, %v4820_v62  ;;  %v4823_v1 = vmul.f32 %v4759_v31, %v10813_v27 }
 0xb46   : > { %v4947_v25 = vadd.f32 %v4883_v32, %v10793_v55  ;;  %v4824_v11 = vmul.f32 %v4760_v15, %v10819_v30  ;;  %v4763_v43 = vmul.f32 %v10828_v29, %v10828_v29  ;;  %v4764_v8 = vmul.f32 %v10831_v0, %v10831_v0 }
 0xb47   : > { %v10840_v38 = vpop.eup %7965  ;;  %7975 = vtanh.f32 %v5008_v58  ;;  %v4948_v22 = vadd.f32 %v4884_v28, %v10799_v26  ;;  %v4887_v18 = vmul.f32 0.044715, %v4823_v1  ;;  %v5244_v58 = vmul.f32 %v5180_v48, %v10695_v2 }
 0xb48   : > { %v10844_v34 = vpop.eup %7967  ;;  %v5011_v59 = vmul.f32 0.7978846, %v4947_v25  ;;  %v4888_v41 = vmul.f32 0.044715, %v4824_v11  ;;  %v4827_v63 = vmul.f32 %v4763_v43, %v10828_v29  ;;  %v4828_v62 = vmul.f32 %v4764_v8, %v10831_v0  ;;  %v4585_v31 = vpop.f32.mrb[140].mxu0 }
 0xb49   : > { %v10848_v14 = vpop.eup %7969  ;;  %v5012_v32 = vmul.f32 0.7978846, %v4948_v22  ;;  %v4951_v15 = vadd.f32 %v4887_v18, %v10813_v27  ;;  %v10853_v28 = vadd.f32 %v4585_v31, %v10675_v53  ;;  %v4587_v37 = vpop.f32.mrb[141].mxu0  ;;  %v5304_v22 = vpack.c.bf16 %v5244_v58, %v5240_v54 }
 0xb4a   : > { %v10855_v45 = vpop.eup %7971  ;;  %7977 = vtanh.f32 %v5011_v59  ;;  %v4952_v1 = vadd.f32 %v4888_v41, %v10819_v30  ;;  %v4891_v25 = vmul.f32 0.044715, %v4827_v63  ;;  %v4892_v11 = vmul.f32 0.044715, %v4828_v62  ;;  %v4589_v43 = vpop.f32.mrb[142].mxu0 }
 0xb4b   : > { %7979 = vtanh.f32 %v5012_v32  ;;  %v5015_v8 = vmul.f32 0.7978846, %v4951_v15  ;;  %v4767_v2 = vmul.f32 %v10853_v28, %v10853_v28  ;;  %v4591_v48 = vpop.f32.mrb[143].mxu0  ;;  %v7714_v59 = vld [vmem:[%s8589_s25 + $0x114] ss:$8 sps:$4 sm:$0xff]   ;;  %v10865_v41 = vadd.f32 %v4587_v37, %v10679_v47  ;;  %5763 = vmatprep.mubr.bf16.mxu1 %v5304_v22 }
 0xb4c   : > { %v5016_v18 = vmul.f32 0.7978846, %v4952_v1  ;;  %v4955_v31 = vadd.f32 %v4891_v25, %v10828_v29  ;;  %v4956_v51 = vadd.f32 %v4892_v11, %v10831_v0  ;;  %v10869_v54 = vadd.f32 %v4589_v43, %v10675_v53  ;;  %v7712_v11 = vld [vmem:[%s8589_s25 + $0x110] ss:$8 sps:$4 sm:$0xff]  }
 0xb4d   : > { %7981 = vtanh.f32 %v5015_v8  ;;  %v4831_v63 = vmul.f32 %v4767_v2, %v10853_v28  ;;  %v10872_v62 = vadd.f32 %v4591_v48, %v10679_v47  ;;  %v12193_v58 = vpack.c.bf16 %v10790_v10, %v10783_v33 }
 0xb4e   : > { %7983 = vtanh.f32 %v5016_v18  ;;  %v5019_v32 = vmul.f32 0.7978846, %v4955_v31  ;;  %v5020_v15 = vmul.f32 0.7978846, %v4956_v51  ;;  %v4768_v37 = vmul.f32 %v10865_v41, %v10865_v41 }
 0xb4f   : > { %5764 = vmatmul.mubr.bf16.vlgmr.msra.gmra.mrb[104].mxu1 %v12193_v58  ;;  %v10879_v1 = vpop.eup %7973  ;;  %v4895_v25 = vmul.f32 0.044715, %v4831_v63  ;;  %v4771_v43 = vmul.f32 %v10869_v54, %v10869_v54  ;;  %v4772_v8 = vmul.f32 %v10872_v62, %v10872_v62  ;;  %v5120_v51 = vadd.f32 1.0, %v10801_v56  ;;  %v7715_v56 = vld [vmem:[%s8589_s25 + $0x120] ss:$8 sps:$4 sm:$0xff]  }
 0xb50   : > { %5845 = vmatpush1.bf16.msra.mxu1 %v7709_v23  ;;  %7985 = vtanh.f32 %v5019_v32  ;;  %v4832_v33 = vmul.f32 %v4768_v37, %v10865_v41  ;;  %v5124_v10 = vadd.f32 1.0, %v10815_v13  ;;  %v5119_v22 = vadd.f32 1.0, %v10795_v60  ;;  %v7717_v23 = vld [vmem:[%s8589_s25 + $0x124] ss:$8 sps:$4 sm:$0xff]   ;;  %v4595_v2 = vpop.f32.mrb[144].mxu0 }
 0xb51   : > { %5846 = vmatprep.subr.bf16.mxu1 %v7714_v59  ;;  %v10891_v48 = vpop.eup %7975  ;;  %7987 = vtanh.f32 %v5020_v15  ;;  %v4959_v18 = vadd.f32 %v4895_v25, %v10853_v28  ;;  %v4835_v31 = vmul.f32 %v4771_v43, %v10869_v54  ;;  %v4836_v63 = vmul.f32 %v4772_v8, %v10872_v62  ;;  %v4597_v32 = vpop.f32.mrb[145].mxu0 }
 0xb52   : > { %v4896_v59 = vmul.f32 0.044715, %v4832_v33  ;;  %v5184_v58 = vmul.f32 0.5, %v5120_v51  ;;  %v5188_v37 = vmul.f32 0.5, %v5124_v10  ;;  %v5123_v13 = vadd.f32 1.0, %v10807_v49  ;;  %v4599_v60 = vpop.f32.mrb[146].mxu0 }
 0xb53   : > { %v5023_v4 = vmul.f32 0.7978846, %v4959_v18  ;;  %v4899_v42 = vmul.f32 0.044715, %v4835_v31  ;;  %v4900_v3 = vmul.f32 0.044715, %v4836_v63  ;;  %v10899_v15 = vadd.f32 %v4595_v2, %v10675_v53 }
 0xb54   : > { %5847 = vmatpush1.bf16.msra.mxu1 %v7712_v11  ;;  %v10901_v25 = vpop.eup %7977  ;;  %v4960_v43 = vadd.f32 %v4896_v59, %v10865_v41  ;;  %v5248_v8 = vmul.f32 %v5184_v58, %v10711_v17  ;;  %v5252_v33 = vmul.f32 %v5188_v37, %v10723_v44  ;;  %v5183_v51 = vmul.f32 0.5, %v5119_v22  ;;  %v7720_v10 = vld [vmem:[%s8589_s25 + $0x134] ss:$8 sps:$4 sm:$0xff]   ;;  %v4601_v49 = vpop.f32.mrb[147].mxu0 }
 0xb55   : > { %5848 = vmatprep.subr.bf16.mxu1 %v7717_v23  ;;  %v10907_v21 = vpop.eup %7979  ;;  %7989 = vtanh.f32 %v5023_v4  ;;  %v4963_v11 = vadd.f32 %v4899_v42, %v10869_v54  ;;  %v4964_v2 = vadd.f32 %v4900_v3, %v10872_v62  ;;  %v5187_v18 = vmul.f32 0.5, %v5123_v13 }
 0xb56   : > { %v5024_v31 = vmul.f32 0.7978846, %v4960_v43  ;;  %v5308_v63 = vpack.c.bf16 %v5252_v33, %v5248_v8  ;;  %v5247_v59 = vmul.f32 %v5183_v51, %v10707_v40  ;;  %v4775_v17 = vmul.f32 %v10899_v15, %v10899_v15  ;;  %v7718_v40 = vld [vmem:[%s8589_s25 + $0x130] ss:$8 sps:$4 sm:$0xff]   ;;  %v7723_v8 = vld [vmem:[%s8589_s25 + $0x144] ss:$8 sps:$4 sm:$0xff]  }
 0xb57   : > { %v10914_v44 = vpop.eup %7981  ;;  %v5027_v22 = vmul.f32 0.7978846, %v4963_v11  ;;  %v5028_v23 = vmul.f32 0.7978846, %v4964_v2  ;;  %v5251_v58 = vmul.f32 %v5187_v18, %v10717_v7  ;;  %v10918_v42 = vadd.f32 %v4597_v32, %v10679_v47 }
 0xb58   : > { %5849 = vmatpush1.bf16.msra.mxu1 %v7715_v56  ;;  %v10920_v3 = vpop.eup %7983  ;;  %7991 = vtanh.f32 %v5024_v31  ;;  %5773 = vmatprep.mubr.bf16.mxu1 %v5308_v63  ;;  %v4839_v4 = vmul.f32 %v4775_v17, %v10899_v15  ;;  %v10925_v37 = vadd.f32 %v4599_v60, %v10675_v53  ;;  %v10928_v13 = vadd.f32 %v4601_v49, %v10679_v47  ;;  %v4605_v7 = vpop.f32.mrb[148].mxu0 }
 0xb59   : > { %5850 = vmatprep.subr.bf16.mxu1 %v7720_v10  ;;  %7993 = vtanh.f32 %v5027_v22  ;;  %v5307_v56 = vpack.c.bf16 %v5251_v58, %v5247_v59  ;;  %v4776_v32 = vmul.f32 %v10918_v42, %v10918_v42  ;;  %v5128_v43 = vadd.f32 1.0, %v10844_v34  ;;  %v4607_v33 = vpop.f32.mrb[149].mxu0 }
 0xb5a   : > { %v10934_v51 = vpop.eup %7985  ;;  %7995 = vtanh.f32 %v5028_v23  ;;  %v4903_v10 = vmul.f32 0.044715, %v4839_v4  ;;  %v4779_v60 = vmul.f32 %v10925_v37, %v10925_v37  ;;  %v4780_v49 = vmul.f32 %v10928_v13, %v10928_v13  ;;  %v4609_v11 = vpop.f32.mrb[150].mxu0  ;;  %v7721_v4 = vld [vmem:[%s8589_s25 + $0x140] ss:$8 sps:$4 sm:$0xff]  }
 0xb5b   : > { %v10940_v2 = vpop.eup %7987  ;;  %5774 = vmatmul.mubr.bf16.gmra.mrb[108].mxu1 %v5307_v56  ;;  %v4840_v18 = vmul.f32 %v4776_v32, %v10918_v42  ;;  %v5132_v34 = vadd.f32 1.0, %v10855_v45  ;;  %v5192_v31 = vmul.f32 0.5, %v5128_v43  ;;  %v5127_v63 = vadd.f32 1.0, %v10840_v38  ;;  %v4611_v59 = vpop.f32.mrb[151].mxu0  ;;  %v7726_v45 = vld [vmem:[%s8589_s25 + $0x154] ss:$8 sps:$4 sm:$0xff]  }
 0xb5c   : > { %v4967_v17 = vadd.f32 %v4903_v10, %v10899_v15  ;;  %5851 = vmatpush1.bf16.msra.mxu1 %v7718_v40  ;;  %v4843_v22 = vmul.f32 %v4779_v60, %v10925_v37  ;;  %v4844_v23 = vmul.f32 %v4780_v49, %v10928_v13  ;;  %v5131_v58 = vadd.f32 1.0, %v10848_v14 }
 0xb5d   : > { %v4904_v56 = vmul.f32 0.044715, %v4840_v18  ;;  %v5196_v12 = vmul.f32 0.5, %v5132_v34  ;;  %v5256_v32 = vmul.f32 %v5192_v31, %v10744_v50  ;;  %v5191_v24 = vmul.f32 0.5, %v5127_v63  ;;  %5852 = vmatprep.subr.bf16.mxu1 %v7723_v8  ;;  %v7724_v34 = vld [vmem:[%s8589_s25 + $0x150] ss:$8 sps:$4 sm:$0xff]  }
 0xb5e   : > { %v5031_v38 = vmul.f32 0.7978846, %v4967_v17  ;;  %v4907_v43 = vmul.f32 0.044715, %v4843_v22  ;;  %v4908_v39 = vmul.f32 0.044715, %v4844_v23  ;;  %v10953_v40 = vadd.f32 %v4605_v7, %v10675_v53 }
 0xb5f   : > { %v10955_v10 = vpop.eup %7989  ;;  %v4968_v60 = vadd.f32 %v4904_v56, %v10918_v42  ;;  %v5260_v14 = vmul.f32 %v5196_v12, %v10756_v5  ;;  %v5195_v49 = vmul.f32 0.5, %v5131_v58  ;;  %v5255_v50 = vmul.f32 %v5191_v24, %v10735_v52  ;;  %v7729_v24 = vld [vmem:[%s8589_s25 + $0x164] ss:$8 sps:$4 sm:$0xff]  }
 0xb60   : > { %7997 = vtanh.f32 %v5031_v38  ;;  %v4971_v8 = vadd.f32 %v4907_v43, %v10925_v37  ;;  %v4972_v18 = vadd.f32 %v4908_v39, %v10928_v13  ;;  %5853 = vmatpush1.bf16.msra.mxu1 %v7721_v4  ;;  %v4783_v7 = vmul.f32 %v10953_v40, %v10953_v40  ;;  %v4648_v31 = vpop.f32.mrb[152].mxu0 }
 0xb61   : > { %v5032_v63 = vmul.f32 0.7978846, %v4968_v60  ;;  %v5312_v17 = vpack.c.bf16 %v5260_v14, %v5256_v32  ;;  %v5259_v22 = vmul.f32 %v5195_v49, %v10750_v19  ;;  %5854 = vmatprep.subr.bf16.mxu1 %v7726_v45  ;;  %v10967_v12 = vadd.f32 %v4607_v33, %v10679_v47  ;;  %v10970_v52 = vpop.f32.mrb[153].mxu0  ;;  %v7727_v14 = vld [vmem:[%s8589_s25 + $0x160] ss:$8 sps:$4 sm:$0xff]  }
 0xb62   : > { %v10972_v5 = vpop.eup %7991  ;;  %v5035_v39 = vmul.f32 0.7978846, %v4971_v8  ;;  %v5036_v23 = vmul.f32 0.7978846, %v4972_v18  ;;  %v4847_v58 = vmul.f32 %v4783_v7, %v10953_v40  ;;  %v10976_v4 = vadd.f32 %v4609_v11, %v10675_v53  ;;  %v4652_v56 = vpop.f32.mrb[154].mxu0 }
 0xb63   : > { %v10978_v32 = vpop.eup %7993  ;;  %7999 = vtanh.f32 %v5032_v63  ;;  %5783 = vmatprep.mubr.bf16.mxu1 %v5312_v17  ;;  %v5311_v19 = vpack.c.bf16 %v5259_v22, %v5255_v50  ;;  %v4784_v33 = vmul.f32 %v10967_v12, %v10967_v12  ;;  %v10983_v45 = vadd.f32 %v4611_v59, %v10679_v47  ;;  %v4654_v38 = vpop.f32.mrb[155].mxu0  ;;  %v7732_v50 = vld [vmem:[%s8589_s25 + $0x174] ss:$8 sps:$4 sm:$0xff]  }
 0xb64   : > { %v10985_v43 = vpop.eup %7995  ;;  %8001 = vtanh.f32 %v5035_v39  ;;  %v4911_v60 = vmul.f32 0.044715, %v4847_v58  ;;  %5855 = vmatpush1.bf16.msra.mxu1 %v7724_v34  ;;  %v4787_v53 = vmul.f32 %v10976_v4, %v10976_v4  ;;  %v5136_v11 = vadd.f32 1.0, %v10891_v48  ;;  %v7730_v39 = vld [vmem:[%s8589_s25 + $0x170] ss:$8 sps:$4 sm:$0xff]  }
 0xb65   : > { %8003 = vtanh.f32 %v5036_v23  ;;  %5784 = vmatmul.mubr.bf16.gmra.mrb[112].mxu1 %v5311_v19  ;;  %v4848_v49 = vmul.f32 %v4784_v33, %v10967_v12  ;;  %v4788_v47 = vmul.f32 %v10983_v45, %v10983_v45  ;;  %v5140_v59 = vadd.f32 1.0, %v10907_v21  ;;  %5856 = vmatprep.subr.bf16.mxu1 %v7729_v24 }
 0xb66   : > { %v4975_v8 = vadd.f32 %v4911_v60, %v10953_v40  ;;  %v4851_v18 = vmul.f32 %v4787_v53, %v10976_v4  ;;  %v5200_v7 = vmul.f32 0.5, %v5136_v11  ;;  %v5135_v48 = vadd.f32 1.0, %v10879_v1  ;;  %v7735_v11 = vld [vmem:[%s8589_s25 + $0x184] ss:$8 sps:$4 sm:$0xff]  }
 0xb67   : > { %v4912_v34 = vmul.f32 0.044715, %v4848_v49  ;;  %v4852_v63 = vmul.f32 %v4788_v47, %v10983_v45  ;;  %v5204_v17 = vmul.f32 0.5, %v5140_v59  ;;  %v5139_v22 = vadd.f32 1.0, %v10901_v25 }
 0xb68   : > { %v5039_v23 = vmul.f32 0.7978846, %v4975_v8  ;;  %v4915_v58 = vmul.f32 0.044715, %v4851_v18  ;;  %v5264_v21 = vmul.f32 %v5200_v7, %v10780_v16  ;;  %v5199_v24 = vmul.f32 0.5, %v5135_v48  ;;  %5857 = vmatpush1.bf16.msra.mxu1 %v7727_v14  ;;  %v11003_v19 = vpop.f32.mrb[156].mxu0 }
 0xb69   : > { %v4976_v33 = vadd.f32 %v4912_v34, %v10967_v12  ;;  %v4916_v60 = vmul.f32 0.044715, %v4852_v63  ;;  %v5268_v1 = vmul.f32 %v5204_v17, %v10799_v26  ;;  %v5203_v53 = vmul.f32 0.5, %v5139_v22  ;;  %5858 = vmatprep.subr.bf16.mxu1 %v7732_v50  ;;  %v11008_v49 = vpop.f32.mrb[157].mxu0  ;;  %v7733_v63 = vld [vmem:[%s8589_s25 + $0x180] ss:$8 sps:$4 sm:$0xff]  }
 0xb6a   : > { %v11010_v25 = vpop.eup %7997  ;;  %8005 = vtanh.f32 %v5039_v23  ;;  %v4979_v16 = vadd.f32 %v4915_v58, %v10976_v4  ;;  %v5263_v14 = vmul.f32 %v5199_v24, %v10773_v46  ;;  %v11015_v47 = vadd.f32 %v4648_v31, %v10740_v61  ;;  %v11017_v59 = vpop.f32.mrb[158].mxu0  ;;  %v7738_v58 = vld [vmem:[%s8589_s25 + $0x194] ss:$8 sps:$4 sm:$0xff]  }
 0xb6b   : > { %v5040_v8 = vmul.f32 0.7978846, %v4976_v33  ;;  %v4980_v26 = vadd.f32 %v4916_v60, %v10983_v45  ;;  %v5316_v50 = vpack.c.bf16 %v5268_v1, %v5264_v21  ;;  %v5267_v18 = vmul.f32 %v5203_v53, %v10793_v55  ;;  %v11021_v7 = vpop.f32.mrb[159].mxu0 }
 0xb6c   : > { %v5043_v48 = vmul.f32 0.7978846, %v4979_v16  ;;  %v4729_v34 = vmul.f32 %v11015_v47, %v11015_v47  ;;  %v11027_v46 = vadd.f32 %v10970_v52, %v10768_v35  ;;  %5859 = vmatpush1.bf16.msra.mxu1 %v7730_v39  ;;  %v11030_v31 = vadd.f32 %v4652_v56, %v10740_v61 }
 0xb6d   : > { %v11033_v17 = vpop.eup %7999  ;;  %8007 = vtanh.f32 %v5040_v8  ;;  %v5044_v22 = vmul.f32 0.7978846, %v4980_v26  ;;  %5793 = vmatprep.mubr.bf16.mxu1 %v5316_v50  ;;  %v5315_v55 = vpack.c.bf16 %v5267_v18, %v5263_v14  ;;  %v11036_v23 = vadd.f32 %v4654_v38, %v10768_v35  ;;  %5860 = vmatprep.subr.bf16.mxu1 %v7735_v11  ;;  %v7736_v14 = vld [vmem:[%s8589_s25 + $0x190] ss:$8 sps:$4 sm:$0xff]  }
 0xb6e   : > { %v11039_v21 = vpop.eup %8001  ;;  %8009 = vtanh.f32 %v5043_v48  ;;  %v4793_v52 = vmul.f32 %v4729_v34, %v11015_v47  ;;  %v4730_v56 = vmul.f32 %v11027_v46, %v11027_v46  ;;  %v4733_v39 = vmul.f32 %v11030_v31, %v11030_v31 }
 0xb6f   : > { %v11046_v24 = vpop.eup %8003  ;;  %8011 = vtanh.f32 %v5044_v22  ;;  %5794 = vmatmul.mubr.bf16.gmra.mrb[116].mxu1 %v5315_v55  ;;  %v4734_v38 = vmul.f32 %v11036_v23, %v11036_v23  ;;  %v5144_v33 = vadd.f32 1.0, %v10920_v3  ;;  %v5148_v60 = vadd.f32 1.0, %v10940_v2  ;;  %v7741_v3 = vld [vmem:[%s8589_s25 + $0x1a4] ss:$8 sps:$4 sm:$0xff]  }
 0xb70   : > { %v4857_v1 = vmul.f32 0.044715, %v4793_v52  ;;  %v4794_v53 = vmul.f32 %v4730_v56, %v11027_v46  ;;  %v4797_v11 = vmul.f32 %v4733_v39, %v11030_v31  ;;  %v5143_v16 = vadd.f32 1.0, %v10914_v44  ;;  %5861 = vmatpush1.bf16.msra.mxu1 %v7733_v63  ;;  %v11056_v8 = vpop.f32.mrb[160].mxu0 }
 0xb71   : > { %v4798_v26 = vmul.f32 %v4734_v38, %v11036_v23  ;;  %v5208_v50 = vmul.f32 0.5, %v5144_v33  ;;  %v5212_v18 = vmul.f32 0.5, %v5148_v60  ;;  %v5147_v48 = vadd.f32 1.0, %v10934_v51  ;;  %5862 = vmatprep.subr.bf16.mxu1 %v7738_v58  ;;  %v11061_v2 = vpop.f32.mrb[161].mxu0 }
 0xb72   : > { %v4921_v34 = vadd.f32 %v4857_v1, %v11015_v47  ;;  %v4858_v22 = vmul.f32 0.044715, %v4794_v53  ;;  %v4861_v55 = vmul.f32 0.044715, %v4797_v11  ;;  %v5207_v44 = vmul.f32 0.5, %v5143_v16  ;;  %v11064_v63 = vpop.f32.mrb[162].mxu0 }
 0xb73   : > { %v4862_v52 = vmul.f32 0.044715, %v4798_v26  ;;  %v5272_v56 = vmul.f32 %v5208_v50, %v10819_v30  ;;  %v5276_v39 = vmul.f32 %v5212_v18, %v10831_v0  ;;  %v5211_v38 = vmul.f32 0.5, %v5147_v48  ;;  %v11068_v51 = vpop.f32.mrb[163].mxu0  ;;  %v7739_v11 = vld [vmem:[%s8589_s25 + $0x1a0] ss:$8 sps:$4 sm:$0xff]  }
 0xb74   : > { %v11070_v58 = vpop.eup %8005  ;;  %v4985_v33 = vmul.f32 0.7978846, %v4921_v34  ;;  %v4922_v60 = vadd.f32 %v4858_v22, %v11027_v46  ;;  %v4925_v1 = vadd.f32 %v4861_v55, %v11030_v31  ;;  %v5271_v53 = vmul.f32 %v5207_v44, %v10813_v27  ;;  %5863 = vmatpush1.bf16.msra.mxu1 %v7736_v14  ;;  %v7744_v50 = vld [vmem:[%s8589_s25 + $0x1b4] ss:$8 sps:$4 sm:$0xff]  }
 0xb75   : > { %v4926_v16 = vadd.f32 %v4862_v52, %v11036_v23  ;;  %v5320_v30 = vpack.c.bf16 %v5276_v39, %v5272_v56  ;;  %v5275_v26 = vmul.f32 %v5211_v38, %v10828_v29  ;;  %v11080_v0 = vadd.f32 %v11003_v19, %v10740_v61  ;;  %5864 = vmatprep.subr.bf16.mxu1 %v7741_v3  ;;  %v7742_v52 = vld [vmem:[%s8589_s25 + $0x1b0] ss:$8 sps:$4 sm:$0xff]  }
 0xb76   : > { %8013 = vtanh.f32 %v4985_v33  ;;  %v4986_v18 = vmul.f32 0.7978846, %v4922_v60  ;;  %v4989_v48 = vmul.f32 0.7978846, %v4925_v1  ;;  %v11085_v27 = vadd.f32 %v11008_v49, %v10768_v35 }
 0xb77   : > { %v11087_v14 = vpop.eup %8007  ;;  %v4990_v34 = vmul.f32 0.7978846, %v4926_v16  ;;  %5803 = vmatprep.mubr.bf16.mxu1 %v5320_v30  ;;  %v5319_v22 = vpack.c.bf16 %v5275_v26, %v5271_v53  ;;  %v4737_v29 = vmul.f32 %v11080_v0, %v11080_v0  ;;  %v11093_v19 = vadd.f32 %v11017_v59, %v10740_v61 }
 0xb78   : > { %v11095_v3 = vpop.eup %8009  ;;  %8015 = vtanh.f32 %v4986_v18  ;;  %v4738_v49 = vmul.f32 %v11085_v27, %v11085_v27  ;;  %v11101_v55 = vadd.f32 %v11021_v7, %v10768_v35  ;;  %v5152_v44 = vadd.f32 1.0, %v10972_v5  ;;  %5865 = vmatpush1.bf16.msra.mxu1 %v7739_v11  ;;  %v11105_v56 = vpop.f32.mrb[164].mxu0  ;;  %v7747_v7 = vld [vmem:[%s8589_s25 + $0x1c4] ss:$8 sps:$4 sm:$0xff]  }
 0xb79   : > { %v11107_v39 = vpop.eup %8011  ;;  %8017 = vtanh.f32 %v4989_v48  ;;  %5804 = vmatmul.mubr.bf16.gmra.mrb[120].mxu1 %v5319_v22  ;;  %v4801_v59 = vmul.f32 %v4737_v29, %v11080_v0  ;;  %v4741_v38 = vmul.f32 %v11093_v19, %v11093_v19  ;;  %v5156_v33 = vadd.f32 1.0, %v10985_v43  ;;  %5866 = vmatprep.subr.bf16.mxu1 %v7744_v50  ;;  %v11114_v60 = vpop.f32.mrb[165].mxu0  ;;  %v7745_v29 = vld [vmem:[%s8589_s25 + $0x1c0] ss:$8 sps:$4 sm:$0xff]  }
 0xb7a   : > { %8019 = vtanh.f32 %v4990_v34  ;;  %v4802_v5 = vmul.f32 %v4738_v49, %v11085_v27  ;;  %v4742_v1 = vmul.f32 %v11101_v55, %v11101_v55  ;;  %v5216_v53 = vmul.f32 0.5, %v5152_v44  ;;  %v11119_v11 = vpop.f32.mrb[166].mxu0 }
 0xb7b   : > { %v4865_v16 = vmul.f32 0.044715, %v4801_v59  ;;  %v4805_v30 = vmul.f32 %v4741_v38, %v11093_v19  ;;  %v5220_v26 = vmul.f32 0.5, %v5156_v33  ;;  %v5151_v43 = vadd.f32 1.0, %v10955_v10  ;;  %v11123_v50 = vpop.f32.mrb[167].mxu0 }
 0xb7c   : > { %v4866_v18 = vmul.f32 0.044715, %v4802_v5  ;;  %v4806_v48 = vmul.f32 %v4742_v1, %v11101_v55  ;;  %v5280_v34 = vmul.f32 %v5216_v53, %v10865_v41  ;;  %v5155_v22 = vadd.f32 1.0, %v10978_v32  ;;  %5867 = vmatpush1.bf16.msra.mxu1 %v7742_v52  ;;  %v7750_v33 = vld [vmem:[%s8589_s25 + $0x1d4] ss:$8 sps:$4 sm:$0xff]  }
 0xb7d   : > { %v4929_v49 = vadd.f32 %v4865_v16, %v11080_v0  ;;  %v4869_v44 = vmul.f32 0.044715, %v4805_v30  ;;  %v5284_v59 = vmul.f32 %v5220_v26, %v10872_v62  ;;  %v5215_v38 = vmul.f32 0.5, %v5151_v43  ;;  %5868 = vmatprep.subr.bf16.mxu1 %v7747_v7 }
 0xb7e   : > { %v4930_v10 = vadd.f32 %v4866_v18, %v11085_v27  ;;  %v4870_v6 = vmul.f32 0.044715, %v4806_v48  ;;  %v5219_v5 = vmul.f32 0.5, %v5155_v22  ;;  %v11135_v1 = vadd.f32 %v11056_v8, %v10740_v61  ;;  %v7748_v48 = vld [vmem:[%s8589_s25 + $0x1d0] ss:$8 sps:$4 sm:$0xff]  }
 0xb7f   : > { %v4993_v41 = vmul.f32 0.7978846, %v4929_v49  ;;  %v4933_v32 = vadd.f32 %v4869_v44, %v11093_v19  ;;  %v5324_v52 = vpack.c.bf16 %v5284_v59, %v5280_v34  ;;  %v5279_v53 = vmul.f32 %v5215_v38, %v10853_v28  ;;  %v7753_v49 = vld [vmem:[%s8589_s25 + $0x1e4] ss:$8 sps:$4 sm:$0xff]  }
 0xb80   : > { %v8014_v16 = vpop.eup %8013  ;;  %v4994_v62 = vmul.f32 0.7978846, %v4930_v10  ;;  %v4934_v7 = vadd.f32 %v4870_v6, %v11101_v55  ;;  %v5283_v30 = vmul.f32 %v5219_v5, %v10869_v54  ;;  %v4745_v26 = vmul.f32 %v11135_v1, %v11135_v1  ;;  %5869 = vmatpush1.bf16.msra.mxu1 %v7745_v29  ;;  %v11143_v8 = vpop.f32.mrb[168].mxu0 }
 0xb81   : > { %v5113_v43 = vadd.f32 1.0, %v8014_v16  ;;  %8021 = vtanh.f32 %v4993_v41  ;;  %v4997_v18 = vmul.f32 0.7978846, %v4933_v32  ;;  %5813 = vmatprep.mubr.bf16.mxu1 %v5324_v52  ;;  %v11147_v28 = vadd.f32 %v11061_v2, %v10768_v35  ;;  %5870 = vmatprep.subr.bf16.mxu1 %v7750_v33  ;;  %v11150_v6 = vpop.f32.mrb[169].mxu0 }
 0xb82   : > { %v11152_v54 = vpop.eup %8015  ;;  %8023 = vtanh.f32 %v4994_v62  ;;  %v4998_v34 = vmul.f32 0.7978846, %v4934_v7  ;;  %v5323_v22 = vpack.c.bf16 %v5283_v30, %v5279_v53  ;;  %v4809_v29 = vmul.f32 %v4745_v26, %v11135_v1  ;;  %v11156_v44 = vpop.f32.mrb[170].mxu0  ;;  %v7751_v7 = vld [vmem:[%s8589_s25 + $0x1e0] ss:$8 sps:$4 sm:$0xff]  }
 0xb83   : > { %v8018_v59 = vpop.eup %8017  ;;  %v5177_v38 = vmul.f32 0.5, %v5113_v43  ;;  %8025 = vtanh.f32 %v4997_v18  ;;  %v4746_v2 = vmul.f32 %v11147_v28, %v11147_v28  ;;  %v11162_v33 = vadd.f32 %v11064_v63, %v10740_v61  ;;  %v11164_v10 = vpop.f32.mrb[171].mxu0 }
 0xb84   : > { %v11166_v5 = vpop.eup %8019  ;;  %v5117_v41 = vadd.f32 1.0, %v8018_v59  ;;  %8027 = vtanh.f32 %v4998_v34  ;;  %5814 = vmatmul.mubr.bf16.gmra.mrb[124].mxu1 %v5323_v22  ;;  %v4873_v32 = vmul.f32 0.044715, %v4809_v29  ;;  %v11170_v52 = vadd.f32 %v11068_v51, %v10768_v35 }
 0xb85   : > { %v11173_v53 = vmul.f32 %v5177_v38, %v11015_v47  ;;  %v4810_v16 = vmul.f32 %v4746_v2, %v11147_v28  ;;  %v4749_v63 = vmul.f32 %v11162_v33, %v11162_v33  ;;  %v5160_v62 = vadd.f32 1.0, %v11033_v17  ;;  %5871 = vmatpush1.bf16.msra.mxu1 %v7748_v48  ;;  %v7756_v47 = vld [vmem:[%s8589_s25 + $0x1f4] ss:$8 sps:$4 sm:$0xff]  }
 0xb86   : > { %v5181_v30 = vmul.f32 0.5, %v5117_v41  ;;  %v4937_v26 = vadd.f32 %v4873_v32, %v11135_v1  ;;  %v4750_v43 = vmul.f32 %v11170_v52, %v11170_v52  ;;  %v5164_v51 = vadd.f32 1.0, %v11046_v24  ;;  %5872 = vmatprep.subr.bf16.mxu1 %v7753_v49 }
 0xb87   : > { %v4874_v18 = vmul.f32 0.044715, %v4810_v16  ;;  %v4813_v34 = vmul.f32 %v4749_v63, %v11162_v33  ;;  %v5224_v22 = vmul.f32 0.5, %v5160_v62  ;;  %v5159_v29 = vadd.f32 1.0, %v11010_v25  ;;  %v7754_v16 = vld [vmem:[%s8589_s25 + $0x1f0] ss:$8 sps:$4 sm:$0xff]  }
 0xb88   : > { %v11188_v17 = vmul.f32 %v5181_v30, %v11030_v31  ;;  %v5001_v48 = vmul.f32 0.7978846, %v4937_v26  ;;  %v4814_v59 = vmul.f32 %v4750_v43, %v11170_v52  ;;  %v5228_v38 = vmul.f32 0.5, %v5164_v51  ;;  %v11191_v2 = vpop.f32.mrb[172].mxu0  ;;  %s12226_s25 = sld [smem:[#allocation58_spill]] (!%p6984_p3) }
 0xb89   : > { %v4938_v24 = vadd.f32 %v4874_v18, %v11147_v28  ;;  %v4877_v49 = vmul.f32 0.044715, %v4813_v34  ;;  %v5288_v41 = vmul.f32 %v5224_v22, %v10918_v42  ;;  %v5163_v32 = vadd.f32 1.0, %v11039_v21  ;;  %5873 = vmatpush1.bf16.msra.mxu1 %v7751_v7  ;;  %v11197_v63 = vpop.f32.mrb[173].mxu0 }
 0xb8a   : > { %8029 = vtanh.f32 %v5001_v48  ;;  %v4878_v31 = vmul.f32 0.044715, %v4814_v59  ;;  %v5292_v62 = vmul.f32 %v5228_v38, %v10928_v13  ;;  %5874 = vmatprep.subr.bf16.mxu1 %v7756_v47  ;;  %v11202_v30 = vpop.f32.mrb[174].mxu0  ;;  %v5223_v21 = vmul.f32 0.5, %v5159_v29 }
 0xb8b   : > { %v11204_v26 = vpop.eup %8021  ;;  %v5002_v43 = vmul.f32 0.7978846, %v4938_v24  ;;  %v4941_v42 = vadd.f32 %v4877_v49, %v11162_v33  ;;  %v5227_v7 = vmul.f32 0.5, %v5163_v32  ;;  %v11207_v51 = vpop.f32.mrb[175].mxu0  ;;  %v11214_v13 = vadd.f32 %v11105_v56, %v10740_v61 }
 0xb8c   : > { %v11209_v18 = vpop.eup %8023  ;;  %v4942_v34 = vadd.f32 %v4878_v31, %v11170_v52  ;;  %v5328_v22 = vpack.c.bf16 %v5292_v62, %v5288_v41  ;;  %v11218_v47 = vadd.f32 %v11114_v60, %v10768_v35  ;;  %v5287_v59 = vmul.f32 %v5223_v21, %v10899_v15 }
 0xb8d   : > { %v11220_v48 = vpop.eup %8025  ;;  %8031 = vtanh.f32 %v5002_v43  ;;  %v5005_v29 = vmul.f32 0.7978846, %v4941_v42  ;;  %v5291_v38 = vmul.f32 %v5227_v7, %v10925_v37  ;;  %5875 = vmatpush1.bf16.msra.mxu1 %v7754_v16  ;;  %v4753_v56 = vmul.f32 %v11214_v13, %v11214_v13 }
 0xb8e   : > { %v11224_v24 = vpop.eup %8027  ;;  %v5006_v49 = vmul.f32 0.7978846, %v4942_v34  ;;  %5823 = vmatprep.mubr.bf16.mxu1 %v5328_v22  ;;  %v4754_v60 = vmul.f32 %v11218_v47, %v11218_v47  ;;  %v11232_v41 = vadd.f32 %v11119_v11, %v10740_v61  ;;  %v11236_v15 = vadd.f32 %v11123_v50, %v10768_v35 }
 0xb8f   : > { %8033 = vtanh.f32 %v5005_v29  ;;  %v5327_v32 = vpack.c.bf16 %v5291_v38, %v5287_v59  ;;  %v5168_v37 = vadd.f32 1.0, %v11087_v14  ;;  %v4817_v16 = vmul.f32 %v4753_v56, %v11214_v13 }
 0xb90   : > { %8035 = vtanh.f32 %v5006_v49  ;;  %v4818_v31 = vmul.f32 %v4754_v60, %v11218_v47  ;;  %v4757_v62 = vmul.f32 %v11232_v41, %v11232_v41  ;;  %v11243_v43 = vpop.f32.mrb[176].mxu0  ;;  %v4758_v11 = vmul.f32 %v11236_v15, %v11236_v15 }
 0xb91   : > { %5824 = vmatmul.mubr.bf16.gmra.mrb[128].mxu1 %v5327_v32  ;;  %v5172_v42 = vadd.f32 1.0, %v11107_v39  ;;  %v5232_v50 = vmul.f32 0.5, %v5168_v37  ;;  %v5167_v21 = vadd.f32 1.0, %v11070_v58  ;;  %v11249_v14 = vpop.f32.mrb[177].mxu0  ;;  %v4881_v7 = vmul.f32 0.044715, %v4817_v16 }
 0xb92   : > { %v4882_v34 = vmul.f32 0.044715, %v4818_v31  ;;  %v4821_v22 = vmul.f32 %v4757_v62, %v11232_v41  ;;  %v5171_v29 = vadd.f32 1.0, %v11095_v3  ;;  %v11253_v59 = vpop.f32.mrb[178].mxu0  ;;  %v4822_v38 = vmul.f32 %v4758_v11, %v11236_v15 }
 0xb93   : > { %v5236_v49 = vmul.f32 0.5, %v5172_v42  ;;  %v5296_v56 = vmul.f32 %v5232_v50, %v10967_v12  ;;  %v5231_v60 = vmul.f32 0.5, %v5167_v21  ;;  %v11257_v39 = vpop.f32.mrb[179].mxu0  ;;  %v4945_v58 = vadd.f32 %v4881_v7, %v11214_v13 }
 0xb94   : > { %v11259_v32 = vpop.eup %8029  ;;  %v4946_v37 = vadd.f32 %v4882_v34, %v11218_v47  ;;  %v4885_v16 = vmul.f32 0.044715, %v4821_v22  ;;  %v5235_v31 = vmul.f32 0.5, %v5171_v29  ;;  %v4886_v62 = vmul.f32 0.044715, %v4822_v38 }
 0xb95   : > { %v5300_v3 = vmul.f32 %v5236_v49, %v10983_v45  ;;  %v5295_v25 = vmul.f32 %v5231_v60, %v10953_v40  ;;  %v11267_v11 = vadd.f32 %v11143_v8, %v10740_v61  ;;  %v5009_v12 = vmul.f32 0.7978846, %v4945_v58 }
 0xb96   : > { %v5010_v42 = vmul.f32 0.7978846, %v4946_v37  ;;  %v4949_v50 = vadd.f32 %v4885_v16, %v11232_v41  ;;  %v5299_v21 = vmul.f32 %v5235_v31, %v10976_v4  ;;  %v4950_v34 = vadd.f32 %v4886_v62, %v11236_v15 }
 0xb97   : > { %v11271_v7 = vpop.eup %8031  ;;  %v5332_v22 = vpack.c.bf16 %v5300_v3, %v5296_v56  ;;  %v4761_v45 = vmul.f32 %v11267_v11, %v11267_v11  ;;  %v11278_v40 = vadd.f32 %v11150_v6, %v10768_v35  ;;  %8037 = vtanh.f32 %v5009_v12 }
 0xb98   : > { %v5013_v8 = vmul.f32 0.7978846, %v4949_v50  ;;  %v5331_v29 = vpack.c.bf16 %v5299_v21, %v5295_v25  ;;  %v11282_v38 = vadd.f32 %v11156_v44, %v10740_v61  ;;  %v11284_v4 = vpop.f32.mrb[180].mxu0  ;;  %8039 = vtanh.f32 %v5010_v42 }
 0xb99   : > { %v11286_v49 = vpop.eup %8033  ;;  %v5014_v56 = vmul.f32 0.7978846, %v4950_v34  ;;  %5833 = vmatprep.mubr.bf16.mxu1 %v5332_v22  ;;  %v4825_v60 = vmul.f32 %v4761_v45, %v11267_v11  ;;  %v4762_v6 = vmul.f32 %v11278_v40, %v11278_v40  ;;  %v11291_v58 = vpop.f32.mrb[181].mxu0  ;;  %v11299_v25 = vadd.f32 %v11164_v10, %v10768_v35 }
 0xb9a   : > { %v11293_v37 = vpop.eup %8035  ;;  %8041 = vtanh.f32 %v5013_v8  ;;  %5834 = vmatmul.mubr.bf16.gmra.mrb[132].mxu1 %v5331_v29  ;;  %v4765_v44 = vmul.f32 %v11282_v38, %v11282_v38  ;;  %v5114_v16 = vadd.f32 1.0, %v11152_v54  ;;  %v11302_v31 = vpop.f32.mrb[182].mxu0  ;;  %v5118_v12 = vadd.f32 1.0, %v11166_v5 }
 0xb9b   : > { %8043 = vtanh.f32 %v5014_v56  ;;  %v4889_v62 = vmul.f32 0.044715, %v4825_v60  ;;  %v4826_v3 = vmul.f32 %v4762_v6, %v11278_v40  ;;  %v11306_v42 = vpop.f32.mrb[183].mxu0  ;;  %v4766_v21 = vmul.f32 %v11299_v25, %v11299_v25 }
 0xb9c   : > { %v4829_v50 = vmul.f32 %v4765_v44, %v11282_v38  ;;  %v5178_v34 = vmul.f32 0.5, %v5114_v16  ;;  %v11313_v10 = vadd.f32 %v11191_v2, %v10740_v61  ;;  %v5182_v45 = vmul.f32 0.5, %v5118_v12 }
 0xb9d   : > { %v4953_v54 = vadd.f32 %v4889_v62, %v11267_v11  ;;  %v4890_v22 = vmul.f32 0.044715, %v4826_v3  ;;  %v11318_v8 = vadd.f32 %v11197_v63, %v10768_v35  ;;  %v4830_v29 = vmul.f32 %v4766_v21, %v11299_v25 }
 0xb9e   : > { %v4893_v5 = vmul.f32 0.044715, %v4829_v50  ;;  %v5242_v56 = vmul.f32 %v5178_v34, %v11027_v46  ;;  %v4769_v60 = vmul.f32 %v11313_v10, %v11313_v10  ;;  %v5246_v44 = vmul.f32 %v5182_v45, %v11036_v23 }
 0xb9f   : > { %v5017_v6 = vmul.f32 0.7978846, %v4953_v54  ;;  %v4954_v2 = vadd.f32 %v4890_v22, %v11278_v40  ;;  %v4770_v16 = vmul.f32 %v11318_v8, %v11318_v8  ;;  %v4894_v63 = vmul.f32 0.044715, %v4830_v29 }
 0xba0   : > { %v4957_v62 = vadd.f32 %v4893_v5, %v11282_v38  ;;  %v4833_v3 = vmul.f32 %v4769_v60, %v11313_v10  ;;  %v11332_v12 = vadd.f32 %v11202_v30, %v10740_v61  ;;  %v5306_v50 = vpack.c.bf16 %v5246_v44, %v5242_v56 }
 0xba1   : > { %8045 = vtanh.f32 %v5017_v6  ;;  %v5018_v46 = vmul.f32 0.7978846, %v4954_v2  ;;  %v4834_v21 = vmul.f32 %v4770_v16, %v11318_v8  ;;  %v11335_v34 = vpop.eup %8037  ;;  %v4958_v54 = vadd.f32 %v4894_v63, %v11299_v25 }
 0xba2   : > { %v5021_v23 = vmul.f32 0.7978846, %v4957_v62  ;;  %v4897_v22 = vmul.f32 0.044715, %v4833_v3  ;;  %v4773_v45 = vmul.f32 %v11332_v12, %v11332_v12  ;;  %v11340_v5 = vpop.eup %8039  ;;  %5876 = vmatprep.mubr.bf16.mxu1 %v5306_v50  ;;  %v11344_v29 = vadd.f32 %v11207_v51, %v10768_v35 }
 0xba3   : > { %8047 = vtanh.f32 %v5018_v46  ;;  %v4898_v30 = vmul.f32 0.044715, %v4834_v21  ;;  %v5122_v56 = vadd.f32 1.0, %v11209_v18  ;;  %v5022_v6 = vmul.f32 0.7978846, %v4958_v54 }
 0xba4   : > { %v11347_v60 = vpop.eup %8041  ;;  %8049 = vtanh.f32 %v5021_v23  ;;  %v12194_v2 = vpack.c.bf16 %v11188_v17, %v11173_v53  ;;  %v4961_v44 = vadd.f32 %v4897_v22, %v11313_v10  ;;  %v4837_v16 = vmul.f32 %v4773_v45, %v11332_v12 }
 0xba5   : > { %v11354_v62 = vpop.eup %8043  ;;  %v4962_v63 = vadd.f32 %v4898_v30, %v11318_v8  ;;  %v4774_v51 = vmul.f32 %v11344_v29, %v11344_v29  ;;  %v5126_v18 = vadd.f32 1.0, %v11224_v24  ;;  %v5186_v3 = vmul.f32 0.5, %v5122_v56 }
 0xba6   : > { %5877 = vmatmul.mubr.bf16.vlgmr.msra.gmra.mrb[104].mxu1 %v12194_v2  ;;  %8051 = vtanh.f32 %v5022_v6  ;;  %v5025_v46 = vmul.f32 0.7978846, %v4961_v44  ;;  %v4901_v50 = vmul.f32 0.044715, %v4837_v16  ;;  %v5121_v53 = vadd.f32 1.0, %v11204_v26 }
 0xba7   : > { %v5026_v17 = vmul.f32 0.7978846, %v4962_v63  ;;  %v4838_v21 = vmul.f32 %v4774_v51, %v11344_v29  ;;  %v5190_v23 = vmul.f32 0.5, %v5126_v18  ;;  %v5250_v54 = vmul.f32 %v5186_v3, %v11085_v27 }
 0xba8   : > { %8053 = vtanh.f32 %v5025_v46  ;;  %v4965_v22 = vadd.f32 %v4901_v50, %v11332_v12  ;;  %v5125_v45 = vadd.f32 1.0, %v11220_v48  ;;  %v5185_v30 = vmul.f32 0.5, %v5121_v53 }
 0xba9   : > { %8055 = vtanh.f32 %v5026_v17  ;;  %v4902_v24 = vmul.f32 0.044715, %v4838_v21  ;;  %v5254_v56 = vmul.f32 %v5190_v23, %v11101_v55  ;;  %v11368_v6 = vadd.f32 %v11243_v43, %v10740_v61 }
 0xbaa   : > { %v5029_v26 = vmul.f32 0.7978846, %v4965_v22  ;;  %v5189_v2 = vmul.f32 0.5, %v5125_v45  ;;  %v5249_v44 = vmul.f32 %v5185_v30, %v11080_v0  ;;  %v11373_v27 = vadd.f32 %v11249_v14, %v10768_v35 }
 0xbab   : > { %v11375_v16 = vpop.eup %8045  ;;  %v4966_v48 = vadd.f32 %v4902_v24, %v11344_v29  ;;  %v5310_v63 = vpack.c.bf16 %v5254_v56, %v5250_v54  ;;  %v4777_v55 = vmul.f32 %v11368_v6, %v11368_v6  ;;  %v11382_v43 = vadd.f32 %v11253_v59, %v10740_v61 }
 0xbac   : > { %8057 = vtanh.f32 %v5029_v26  ;;  %v5253_v51 = vmul.f32 %v5189_v2, %v11093_v19  ;;  %v4778_v0 = vmul.f32 %v11373_v27, %v11373_v27  ;;  %v11389_v14 = vadd.f32 %v11257_v39, %v10768_v35 }
 0xbad   : > { %v11391_v18 = vpop.eup %8047  ;;  %v5030_v3 = vmul.f32 0.7978846, %v4966_v48  ;;  %5886 = vmatprep.mubr.bf16.mxu1 %v5310_v63  ;;  %v4841_v46 = vmul.f32 %v4777_v55, %v11368_v6  ;;  %v4781_v59 = vmul.f32 %v11382_v43, %v11382_v43  ;;  %v5130_v50 = vadd.f32 1.0, %v11271_v7 }
 0xbae   : > { %v11397_v53 = vpop.eup %8049  ;;  %v5309_v19 = vpack.c.bf16 %v5253_v51, %v5249_v44  ;;  %v4842_v17 = vmul.f32 %v4778_v0, %v11373_v27  ;;  %v4782_v39 = vmul.f32 %v11389_v14, %v11389_v14  ;;  %v5134_v21 = vadd.f32 1.0, %v11293_v37 }
 0xbaf   : > { %8059 = vtanh.f32 %v5030_v3  ;;  %v4905_v23 = vmul.f32 0.044715, %v4841_v46  ;;  %v4845_v54 = vmul.f32 %v4781_v59, %v11382_v43  ;;  %v5194_v22 = vmul.f32 0.5, %v5130_v50 }
 0xbb0   : > { %v11404_v45 = vpop.eup %8051  ;;  %5887 = vmatmul.mubr.bf16.gmra.mrb[108].mxu1 %v5309_v19  ;;  %v4906_v30 = vmul.f32 0.044715, %v4842_v17  ;;  %v4846_v7 = vmul.f32 %v4782_v39, %v11389_v14  ;;  %v5198_v24 = vmul.f32 0.5, %v5134_v21  ;;  %v5129_v56 = vadd.f32 1.0, %v11259_v32 }
 0xbb1   : > { %v4969_v26 = vadd.f32 %v4905_v23, %v11368_v6  ;;  %v4909_v2 = vmul.f32 0.044715, %v4845_v54  ;;  %v5258_v44 = vmul.f32 %v5194_v22, %v11147_v28  ;;  %v5133_v37 = vadd.f32 1.0, %v11286_v49 }
 0xbb2   : > { %v11411_v48 = vpop.eup %8053  ;;  %v4970_v63 = vadd.f32 %v4906_v30, %v11373_v27  ;;  %v4910_v55 = vmul.f32 0.044715, %v4846_v7  ;;  %v5262_v51 = vmul.f32 %v5198_v24, %v11170_v52  ;;  %v5193_v0 = vmul.f32 0.5, %v5129_v56 }
 0xbb3   : > { %v11415_v3 = vpop.eup %8055  ;;  %v5033_v46 = vmul.f32 0.7978846, %v4969_v26  ;;  %v4973_v32 = vadd.f32 %v4909_v2, %v11382_v43  ;;  %v5197_v59 = vmul.f32 0.5, %v5133_v37  ;;  %v11420_v50 = vadd.f32 %v11284_v4, %v10740_v61 }
 0xbb4   : > { %v5034_v28 = vmul.f32 0.7978846, %v4970_v63  ;;  %v4974_v49 = vadd.f32 %v4910_v55, %v11389_v14  ;;  %v5314_v19 = vpack.c.bf16 %v5262_v51, %v5258_v44  ;;  %v5257_v17 = vmul.f32 %v5193_v0, %v11135_v1 }
 0xbb5   : > { %8061 = vtanh.f32 %v5033_v46  ;;  %v5037_v39 = vmul.f32 0.7978846, %v4973_v32  ;;  %v5261_v52 = vmul.f32 %v5197_v59, %v11162_v33  ;;  %v4785_v21 = vmul.f32 %v11420_v50, %v11420_v50 }
 0xbb6   : > { %v11427_v23 = vpop.eup %8057  ;;  %8063 = vtanh.f32 %v5034_v28  ;;  %v5038_v54 = vmul.f32 0.7978846, %v4974_v49  ;;  %5896 = vmatprep.mubr.bf16.mxu1 %v5314_v19  ;;  %v11431_v4 = vadd.f32 %v11291_v58, %v10768_v35  ;;  %v11435_v22 = vadd.f32 %v11302_v31, %v10740_v61 }
 0xbb7   : > { %8065 = vtanh.f32 %v5037_v39  ;;  %v5313_v1 = vpack.c.bf16 %v5261_v52, %v5257_v17  ;;  %v4849_v33 = vmul.f32 %v4785_v21, %v11420_v50  ;;  %v11440_v30 = vadd.f32 %v11306_v42, %v10768_v35 }
 0xbb8   : > { %8067 = vtanh.f32 %v5038_v54  ;;  %v4786_v7 = vmul.f32 %v11431_v4, %v11431_v4  ;;  %v4789_v58 = vmul.f32 %v11435_v22, %v11435_v22  ;;  %v5138_v24 = vadd.f32 1.0, %v11340_v5 }
 0xbb9   : > { %v8060_v56 = vpop.eup %8059  ;;  %5897 = vmatmul.mubr.bf16.gmra.mrb[112].mxu1 %v5313_v1  ;;  %v4913_v61 = vmul.f32 0.044715, %v4849_v33  ;;  %v4790_v31 = vmul.f32 %v11440_v30, %v11440_v30  ;;  %v5142_v26 = vadd.f32 1.0, %v11354_v62  ;;  %v5137_v35 = vadd.f32 1.0, %v11335_v34 }
 0xbba   : > { %v4850_v42 = vmul.f32 %v4786_v7, %v11431_v4  ;;  %v4853_v2 = vmul.f32 %v4789_v58, %v11435_v22  ;;  %v5202_v44 = vmul.f32 0.5, %v5138_v24  ;;  %v5141_v37 = vadd.f32 1.0, %v11347_v60 }
 0xbbb   : > { %v4977_v63 = vadd.f32 %v4913_v61, %v11420_v50  ;;  %v4854_v5 = vmul.f32 %v4790_v31, %v11440_v30  ;;  %v5206_v55 = vmul.f32 0.5, %v5142_v26  ;;  %v5201_v51 = vmul.f32 0.5, %v5137_v35 }
 0xbbc   : > { %v4914_v0 = vmul.f32 0.044715, %v4850_v42  ;;  %v4917_v46 = vmul.f32 0.044715, %v4853_v2  ;;  %v5266_v32 = vmul.f32 %v5202_v44, %v11218_v47  ;;  %v5205_v62 = vmul.f32 0.5, %v5141_v37 }
 0xbbd   : > { %v5041_v59 = vmul.f32 0.7978846, %v4977_v63  ;;  %v4918_v34 = vmul.f32 0.044715, %v4854_v5  ;;  %v5270_v28 = vmul.f32 %v5206_v55, %v11236_v15  ;;  %v5265_v49 = vmul.f32 %v5201_v51, %v11214_v13 }
 0xbbe   : > { %v4978_v19 = vadd.f32 %v4914_v0, %v11431_v4  ;;  %v4981_v60 = vadd.f32 %v4917_v46, %v11435_v22  ;;  %v5269_v17 = vmul.f32 %v5205_v62, %v11232_v41  ;;  %v5146_v39 = vadd.f32 1.0, %v11391_v18 }
 0xbbf   : > { %v8062_v52 = vpop.eup %8061  ;;  %8069 = vtanh.f32 %v5041_v59  ;;  %v4982_v21 = vadd.f32 %v4918_v34, %v11440_v30  ;;  %v5318_v47 = vpack.c.bf16 %v5270_v28, %v5266_v32  ;;  %v5150_v54 = vadd.f32 1.0, %v11404_v45 }
 0xbc0   : > { %v8064_v1 = vpop.eup %8063  ;;  %v5042_v33 = vmul.f32 0.7978846, %v4978_v19  ;;  %v5045_v15 = vmul.f32 0.7978846, %v4981_v60  ;;  %v5317_v7 = vpack.c.bf16 %v5269_v17, %v5265_v49  ;;  %v5210_v13 = vmul.f32 0.5, %v5146_v39 }
 0xbc1   : > { %v8066_v58 = vpop.eup %8065  ;;  %v5046_v24 = vmul.f32 0.7978846, %v4982_v21  ;;  %5906 = vmatprep.mubr.bf16.mxu1 %v5318_v47  ;;  %v5214_v61 = vmul.f32 0.5, %v5150_v54  ;;  %v5145_v41 = vadd.f32 1.0, %v11375_v16  ;;  %v5149_v18 = vadd.f32 1.0, %v11397_v53 }
 0xbc2   : > { %v8068_v31 = vpop.eup %8067  ;;  %8071 = vtanh.f32 %v5042_v33  ;;  %5907 = vmatmul.mubr.bf16.gmra.mrb[116].mxu1 %v5317_v7  ;;  %v5274_v26 = vmul.f32 %v5210_v13, %v11278_v40  ;;  %v5154_v45 = vadd.f32 1.0, %v11415_v3  ;;  %v5158_v35 = vadd.f32 1.0, %v8060_v56 }
 0xbc3   : > { %8073 = vtanh.f32 %v5045_v15  ;;  %v5278_v42 = vmul.f32 %v5214_v61, %v11299_v25  ;;  %v5209_v2 = vmul.f32 0.5, %v5145_v41  ;;  %v5213_v44 = vmul.f32 0.5, %v5149_v18  ;;  %v5399_v18 = vld [vmem:[%s12195_s11] sm:$0x3] }
 0xbc4   : > { %8075 = vtanh.f32 %v5046_v24  ;;  %v5218_v37 = vmul.f32 0.5, %v5154_v45  ;;  %v5222_v63 = vmul.f32 0.5, %v5158_v35  ;;  %v5153_v16 = vadd.f32 1.0, %v11411_v48 }
 0xbc5   : > { %v5322_v5 = vpack.c.bf16 %v5278_v42, %v5274_v26  ;;  %v5273_v53 = vmul.f32 %v5209_v2, %v11267_v11  ;;  %v5277_v55 = vmul.f32 %v5213_v44, %v11282_v38  ;;  %v5157_v40 = vadd.f32 1.0, %v11427_v23 }
 0xbc6   : > { %v5282_v3 = vmul.f32 %v5218_v37, %v11318_v8  ;;  %v5286_v56 = vmul.f32 %v5222_v63, %v11344_v29  ;;  %v5217_v51 = vmul.f32 0.5, %v5153_v16  ;;  %v5162_v25 = vadd.f32 1.0, %v8064_v1  ;;  %v12197_v63 = vld [vmem:[#allocation22_spill] sm:$0xff] }
 0xbc7   : > { %5916 = vmatprep.mubr.bf16.mxu1 %v5322_v5  ;;  %v5321_v0 = vpack.c.bf16 %v5277_v55, %v5273_v53  ;;  %v5221_v46 = vmul.f32 0.5, %v5157_v40  ;;  %v5166_v32 = vadd.f32 1.0, %v8068_v31  ;;  %v5161_v62 = vadd.f32 1.0, %v8062_v52  ;;  %v12198_v40 = vld [vmem:[#allocation23_spill] sm:$0xff] }
 0xbc8   : > { %v5326_v59 = vpack.c.bf16 %v5286_v56, %v5282_v3  ;;  %v5226_v48 = vmul.f32 0.5, %v5162_v25  ;;  %v5165_v34 = vadd.f32 1.0, %v8066_v58  ;;  %v5281_v11 = vmul.f32 %v5217_v51, %v11313_v10  ;;  %v12199_v25 = vld [vmem:[#allocation24_spill] sm:$0xff] }
 0xbc9   : > { %v8070_v28 = vpop.eup %8069  ;;  %v5285_v38 = vmul.f32 %v5221_v46, %v11332_v12  ;;  %v5230_v23 = vmul.f32 0.5, %v5166_v32  ;;  %v5225_v49 = vmul.f32 0.5, %v5161_v62  ;;  %v11488_v31 = vrot.slane %v5399_v18, %v12158_v9  ;;  %v12200_v32 = vld [vmem:[#allocation25_spill] sm:$0xff] }
 0xbca   : > { %5917 = vmatmul.mubr.bf16.gmra.mrb[120].mxu1 %v5321_v0  ;;  %v5229_v8 = vmul.f32 0.5, %v5165_v34  ;;  %v5169_v29 = vadd.f32 1.0, %v8070_v28  ;;  %v5290_v60 = vmul.f32 %v5226_v48, %v11373_v27  ;;  %v11491_v26 = vrot.slane %v5399_v18, %v12159_v36  ;;  %v12196_v36 = vld [vmem:[#allocation21_spill] sm:$0xff] }
 0xbcb   : > { %5926 = vmatprep.mubr.bf16.mxu1 %v5326_v59  ;;  %v5325_v19 = vpack.c.bf16 %v5285_v38, %v5281_v11  ;;  %v5294_v17 = vmul.f32 %v5230_v23, %v11389_v14  ;;  %v5289_v52 = vmul.f32 %v5225_v49, %v11368_v6  ;;  %v12201_v59 = vld [vmem:[#allocation26_spill] sm:$0xff]  ;;  %v12202_v49 = vld [vmem:[#allocation27_spill] sm:$0xff] }
 0xbcc   : > { %v8072_v39 = vpop.eup %8071  ;;  %v5293_v21 = vmul.f32 %v5229_v8, %v11382_v43  ;;  %v5233_v15 = vmul.f32 0.5, %v5169_v29 }
 0xbcd   : > { %v8074_v47 = vpop.eup %8073  ;;  %v5330_v10 = vpack.c.bf16 %v5294_v17, %v5290_v60  ;;  %v5170_v54 = vadd.f32 1.0, %v8072_v39  ;;  %v12203_v60 = vld [vmem:[#allocation28_spill] sm:$0xff] }
 0xbce   : > { %v8076_v12 = vpop.eup %8075  ;;  %v5329_v1 = vpack.c.bf16 %v5293_v21, %v5289_v52  ;;  %v5173_v33 = vadd.f32 1.0, %v8074_v47  ;;  %v5297_v27 = vmul.f32 %v5233_v15, %v11420_v50  ;;  %v12204_v52 = vld [vmem:[#allocation29_spill] sm:$0xff]  ;;  %v12205_v47 = vld [vmem:[#allocation30_spill] sm:$0xff] }
 0xbcf   : > { %v5174_v7 = vadd.f32 1.0, %v8076_v12  ;;  %v5234_v13 = vmul.f32 0.5, %v5170_v54 }
 0xbd0   : > { %v5237_v58 = vmul.f32 0.5, %v5173_v33 }
 0xbd1   : > { %v5238_v24 = vmul.f32 0.5, %v5174_v7  ;;  %v5298_v6 = vmul.f32 %v5234_v13, %v11431_v4  ;;  %v12206_v7 = vld [vmem:[#allocation31_spill] sm:$0xff] }
 0xbd2   : > { %5927 = vmatmul.mubr.bf16.gmra.mrb[124].mxu1 %v5325_v19  ;;  %v5301_v14 = vmul.f32 %v5237_v58, %v11435_v22 }
 0xbd3   : > { %5936 = vmatprep.mubr.bf16.mxu1 %v5330_v10  ;;  %v5302_v43 = vmul.f32 %v5238_v24, %v11440_v30 }
 0xbd4   : > { %v5333_v61 = vpack.c.bf16 %v5301_v14, %v5297_v27  ;;  %v12207_v27 = vld [vmem:[#allocation32_spill] sm:$0xff] }
 0xbd5   : > { %v5334_v41 = vpack.c.bf16 %v5302_v43, %v5298_v6  ;;  %v12208_v43 = vld [vmem:[#allocation33_spill] sm:$0xff] }
 0xbda   : > { %5937 = vmatmul.mubr.bf16.gmra.mrb[128].mxu1 %v5329_v1 }
 0xbdb   : > { %5946 = vmatprep.mubr.bf16.mxu1 %v5334_v41  ;;  %v12209_v41 = vld [vmem:[#allocation34_spill] sm:$0xff] }
 0xbe2   : > { %5947 = vmatmul.mubr.bf16.gmra.mrb[132].mxu1 %v5333_v61 }
 0xc79   : > { %v5878_v50 = vpop.f32.mrb[104].mxu1 }
 0xc7a   : > { %v7249_v22 = vadd.f32 %v5878_v50, %v11488_v31  ;;  %v5880_v45 = vpop.f32.mrb[105].mxu1 }
 0xc7b   : > { %v7250_v4 = vadd.f32 %v5880_v45, %v11491_v26  ;;  %v5882_v35 = vpop.f32.mrb[106].mxu1 }
 0xc7c   : > { %v11496_v30 = vadd.f32 %v7249_v22, %v10084_v57  ;;  %v7251_v42 = vadd.f32 %v5882_v35, %v11488_v31  ;;  %v5884_v2 = vpop.f32.mrb[107].mxu1 }
 0xc7d   : > { %v11500_v44 = vadd.f32 %v7250_v4, %v10087_v20  ;;  %v7252_v9 = vadd.f32 %v5884_v2, %v11491_v26 }
 0xc7e   : > { %5989 = vst [vmem:[#allocation2] sm:$0xff] %v11496_v30  ;;  %v11505_v37 = vadd.f32 %v7251_v42, %v12196_v36  ;;  %v12210_v42 = vld [vmem:[#allocation35_spill] sm:$0xff] }
 0xc7f   : > { %5990 = vst [vmem:[#allocation2 + $0x8] sm:$0xff] %v11500_v44  ;;  %v11509_v16 = vadd.f32 %v7252_v9, %v12197_v63  ;;  %v12211_v63 = vld [vmem:[#allocation36_spill] sm:$0xff] }
 0xc80   : > { %5991 = vst [vmem:[#allocation2 + $0x10] sm:$0xff] %v11505_v37 }
 0xc81   : > { %5992 = vst [vmem:[#allocation2 + $0x18] sm:$0xff] %v11509_v16 }
 0xc83   : > { %v5888_v57 = vpop.f32.mrb[108].mxu1 }
 0xc84   : > { %v7253_v20 = vadd.f32 %v5888_v57, %v11488_v31  ;;  %v5890_v5 = vpop.f32.mrb[109].mxu1 }
 0xc85   : > { %v7254_v53 = vadd.f32 %v5890_v5, %v11491_v26  ;;  %v5892_v55 = vpop.f32.mrb[110].mxu1  ;;  %v12212_v5 = vld [vmem:[#allocation37_spill] sm:$0xff] }
 0xc86   : > { %v11516_v3 = vadd.f32 %v7253_v20, %v12198_v40  ;;  %v7255_v56 = vadd.f32 %v5892_v55, %v11488_v31  ;;  %v5894_v51 = vpop.f32.mrb[111].mxu1  ;;  %v12213_v55 = vld [vmem:[#allocation38_spill] sm:$0xff] }
 0xc87   : > { %v11520_v0 = vadd.f32 %v7254_v53, %v12199_v25  ;;  %v7256_v46 = vadd.f32 %v5894_v51, %v11491_v26 }
 0xc88   : > { %5993 = vst [vmem:[#allocation2 + $0x20] sm:$0xff] %v11516_v3  ;;  %v11525_v62 = vadd.f32 %v7255_v56, %v12200_v32 }
 0xc89   : > { %5994 = vst [vmem:[#allocation2 + $0x28] sm:$0xff] %v11520_v0  ;;  %v11529_v48 = vadd.f32 %v7256_v46, %v12201_v59  ;;  %v12214_v59 = vld [vmem:[#allocation39_spill] sm:$0xff] }
 0xc8a   : > { %5995 = vst [vmem:[#allocation2 + $0x30] sm:$0xff] %v11525_v62 }
 0xc8b   : > { %5996 = vst [vmem:[#allocation2 + $0x38] sm:$0xff] %v11529_v48 }
 0xc8c   : > { %v5898_v34 = vpop.f32.mrb[112].mxu1 }
 0xc8d   : > { %v7257_v28 = vadd.f32 %v5898_v34, %v11488_v31  ;;  %v5900_v11 = vpop.f32.mrb[113].mxu1 }
 0xc8e   : > { %v7258_v38 = vadd.f32 %v5900_v11, %v11491_v26  ;;  %v5902_v23 = vpop.f32.mrb[114].mxu1 }
 0xc8f   : > { %v11536_v8 = vadd.f32 %v7257_v28, %v12202_v49  ;;  %v7259_v29 = vadd.f32 %v5902_v23, %v11488_v31  ;;  %v5904_v19 = vpop.f32.mrb[115].mxu1 }
 0xc90   : > { %v11540_v17 = vadd.f32 %v7258_v38, %v12203_v60  ;;  %v7260_v39 = vadd.f32 %v5904_v19, %v11491_v26  ;;  %v12215_v38 = vld [vmem:[#allocation40_spill] sm:$0xff]  ;;  %v12217_v60 = vld [vmem:[#allocation42_spill] sm:$0xff] }
 0xc91   : > { %5997 = vst [vmem:[#allocation2 + $0x40] sm:$0xff] %v11536_v8  ;;  %v11545_v21 = vadd.f32 %v7259_v29, %v12204_v52  ;;  %v12216_v29 = vld [vmem:[#allocation41_spill] sm:$0xff] }
 0xc92   : > { %5998 = vst [vmem:[#allocation2 + $0x48] sm:$0xff] %v11540_v17  ;;  %v11549_v10 = vadd.f32 %v7260_v39, %v12205_v47 }
 0xc93   : > { %5999 = vst [vmem:[#allocation2 + $0x50] sm:$0xff] %v11545_v21 }
 0xc94   : > { %6000 = vst [vmem:[#allocation2 + $0x58] sm:$0xff] %v11549_v10 }
 0xc95   : > { %v5908_v54 = vpop.f32.mrb[116].mxu1 }
 0xc96   : > { %v7261_v12 = vadd.f32 %v5908_v54, %v11488_v31  ;;  %v5910_v1 = vpop.f32.mrb[117].mxu1 }
 0xc97   : > { %v7262_v33 = vadd.f32 %v5910_v1, %v11491_v26  ;;  %v5912_v15 = vpop.f32.mrb[118].mxu1 }
 0xc98   : > { %v11556_v13 = vadd.f32 %v7261_v12, %v12206_v7  ;;  %v7263_v58 = vadd.f32 %v5912_v15, %v11488_v31  ;;  %v5914_v24 = vpop.f32.mrb[119].mxu1 }
 0xc99   : > { %v11560_v14 = vadd.f32 %v7262_v33, %v12207_v27  ;;  %v7264_v6 = vadd.f32 %v5914_v24, %v11491_v26  ;;  %v12218_v33 = vld [vmem:[#allocation43_spill] sm:$0xff]  ;;  %v12219_v24 = vld [vmem:[#allocation44_spill] sm:$0xff] }
 0xc9a   : > { %6001 = vst [vmem:[#allocation2 + $0x60] sm:$0xff] %v11556_v13  ;;  %v11565_v61 = vadd.f32 %v7263_v58, %v12208_v43  ;;  %v12220_v43 = vld [vmem:[#allocation45_spill] sm:$0xff] }
 0xc9b   : > { %6002 = vst [vmem:[#allocation2 + $0x68] sm:$0xff] %v11560_v14  ;;  %v11569_v18 = vadd.f32 %v7264_v6, %v12209_v41 }
 0xc9c   : > { %6003 = vst [vmem:[#allocation2 + $0x70] sm:$0xff] %v11565_v61 }
 0xc9d   : > { %6004 = vst [vmem:[#allocation2 + $0x78] sm:$0xff] %v11569_v18  ;;  %v5918_v50 = vpop.f32.mrb[120].mxu1 }
 0xc9e   : > { %v7265_v22 = vadd.f32 %v5918_v50, %v11488_v31  ;;  %v5920_v45 = vpop.f32.mrb[121].mxu1  ;;  %v12221_v50 = vld [vmem:[#allocation46_spill] sm:$0xff] }
 0xc9f   : > { %v7266_v4 = vadd.f32 %v5920_v45, %v11491_v26  ;;  %v5922_v35 = vpop.f32.mrb[122].mxu1 }
 0xca0   : > { %v11576_v2 = vadd.f32 %v7265_v22, %v12210_v42  ;;  %v7267_v9 = vadd.f32 %v5922_v35, %v11488_v31  ;;  %v5924_v36 = vpop.f32.mrb[123].mxu1 }
 0xca1   : > { %v11580_v57 = vadd.f32 %v7266_v4, %v12211_v63  ;;  %v7268_v20 = vadd.f32 %v5924_v36, %v11491_v26  ;;  %v12222_v36 = vld [vmem:[#allocation47_spill] sm:$0xff] }
 0xca2   : > { %6005 = vst [vmem:[#allocation2 + $0x80] sm:$0xff] %v11576_v2  ;;  %v11585_v53 = vadd.f32 %v7267_v9, %v12212_v5 }
 0xca3   : > { %6006 = vst [vmem:[#allocation2 + $0x88] sm:$0xff] %v11580_v57  ;;  %v11589_v40 = vadd.f32 %v7268_v20, %v12213_v55  ;;  %v12223_v55 = vld [vmem:[#allocation48_spill] sm:$0xff] }
 0xca4   : > { %6007 = vst [vmem:[#allocation2 + $0x90] sm:$0xff] %v11585_v53 }
 0xca5   : > { %6008 = vst [vmem:[#allocation2 + $0x98] sm:$0xff] %v11589_v40  ;;  %v5928_v56 = vpop.f32.mrb[124].mxu1 }
 0xca6   : > { %v7269_v51 = vadd.f32 %v5928_v56, %v11488_v31  ;;  %v5930_v25 = vpop.f32.mrb[125].mxu1 }
 0xca7   : > { %v7270_v46 = vadd.f32 %v5930_v25, %v11491_v26  ;;  %v5932_v32 = vpop.f32.mrb[126].mxu1  ;;  %v12224_v25 = vld [vmem:[#allocation49_spill] sm:$0xff] }
 0xca8   : > { %v11596_v34 = vadd.f32 %v7269_v51, %v12214_v59  ;;  %v7271_v28 = vadd.f32 %v5932_v32, %v11488_v31  ;;  %v5934_v11 = vpop.f32.mrb[127].mxu1  ;;  %v12225_v32 = vld [vmem:[#allocation50_spill] sm:$0xff] }
 0xca9   : > { %v11600_v23 = vadd.f32 %v7270_v46, %v12215_v38  ;;  %v7272_v49 = vadd.f32 %v5934_v11, %v11491_v26  ;;  %v6036_v11 = vadd.f32 (!%p6984_p3), %v11529_v48, %v11525_v62  ;;  %v6039_v38 = vadd.f32 (!%p6984_p3), %v11540_v17, %v11536_v8 }
 0xcaa   : > { %6009 = vst [vmem:[#allocation2 + $0xa0] sm:$0xff] %v11596_v34  ;;  %v11605_v19 = vadd.f32 %v7271_v28, %v12216_v29  ;;  %v6030_v28 = vadd.f32 (!%p6984_p3), %v11509_v16, %v11505_v37  ;;  %v6045_v29 = vadd.f32 (!%p6984_p3), %v11560_v14, %v11556_v13 }
 0xcab   : > { %6010 = vst [vmem:[#allocation2 + $0xa8] sm:$0xff] %v11600_v23  ;;  %v11609_v39 = vadd.f32 %v7272_v49, %v12217_v60  ;;  %v6042_v49 = vadd.f32 (!%p6984_p3), %v11549_v10, %v11545_v21  ;;  %v6048_v60 = vadd.f32 (!%p6984_p3), %v11569_v18, %v11565_v61 }
 0xcac   : > { %6011 = vst [vmem:[#allocation2 + $0xb0] sm:$0xff] %v11605_v19 }
 0xcad   : > { %6012 = vst [vmem:[#allocation2 + $0xb8] sm:$0xff] %v11609_v39  ;;  %v5938_v52 = vpop.f32.mrb[128].mxu1 }
 0xcae   : > { %v7273_v47 = vadd.f32 %v5938_v52, %v11488_v31  ;;  %v5940_v54 = vpop.f32.mrb[129].mxu1  ;;  %v6051_v52 = vadd.f32 (!%p6984_p3), %v11580_v57, %v11576_v2 }
 0xcaf   : > { %v7274_v12 = vadd.f32 %v5940_v54, %v11491_v26  ;;  %v5942_v1 = vpop.f32.mrb[130].mxu1  ;;  %v6057_v54 = vadd.f32 (!%p6984_p3), %v11600_v23, %v11596_v34 }
 0xcb0   : > { %v11616_v15 = vadd.f32 %v7273_v47, %v12218_v33  ;;  %v7275_v7 = vadd.f32 %v5942_v1, %v11488_v31  ;;  %v5944_v58 = vpop.f32.mrb[131].mxu1  ;;  %v6054_v47 = vadd.f32 (!%p6984_p3), %v11589_v40, %v11585_v53 }
 0xcb1   : > { %v11620_v27 = vadd.f32 %v7274_v12, %v12219_v24  ;;  %v7276_v6 = vadd.f32 %v5944_v58, %v11491_v26  ;;  %v6060_v12 = vadd.f32 (!%p6984_p3), %v11609_v39, %v11605_v19 }
 0xcb2   : > { %6013 = vst [vmem:[#allocation2 + $0xc0] sm:$0xff] %v11616_v15  ;;  %v11625_v41 = vadd.f32 %v7275_v7, %v12220_v43 }
 0xcb3   : > { %6014 = vst [vmem:[#allocation2 + $0xc8] sm:$0xff] %v11620_v27  ;;  %v11629_v22 = vadd.f32 %v7276_v6, %v12221_v50  ;;  %v6063_v1 = vadd.f32 (!%p6984_p3), %v11620_v27, %v11616_v15 }
 0xcb4   : > { %6015 = vst [vmem:[#allocation2 + $0xd0] sm:$0xff] %v11625_v41 }
 0xcb5   : > { %6016 = vst [vmem:[#allocation2 + $0xd8] sm:$0xff] %v11629_v22  ;;  %v5948_v45 = vpop.f32.mrb[132].mxu1  ;;  %v6066_v33 = vadd.f32 (!%p6984_p3), %v11629_v22, %v11625_v41 }
 0xcb6   : > { %v7277_v4 = vadd.f32 %v5948_v45, %v11488_v31  ;;  %v5950_v35 = vpop.f32.mrb[133].mxu1 }
 0xcb7   : > { %v7278_v42 = vadd.f32 %v5950_v35, %v11491_v26  ;;  %v5952_v9 = vpop.f32.mrb[134].mxu1  ;;  %6024 = sbr.rel (%p6984_p3) target bundleno = 3614 (0xe1e), region = 104 }
 0xcb8   : > { %v11636_v63 = vadd.f32 %v7277_v4, %v12222_v36  ;;  %v7279_v20 = vadd.f32 %v5952_v9, %v11488_v31  ;;  %v5954_v5 = vpop.f32.mrb[135].mxu1  ;;  %v6027_v31 = vadd.f32 (!%p6984_p3), %v11500_v44, %v11496_v30 }
 0xcb9   : > { %v11640_v56 = vadd.f32 %v7278_v42, %v12223_v55  ;;  %v7280_v51 = vadd.f32 %v5954_v5, %v11491_v26  ;;  %v6033_v26 = vadd.f32 (!%p6984_p3), %v11520_v0, %v11516_v3 }
 0xcba   : > { %6017 = vst [vmem:[#allocation2 + $0xe0] sm:$0xff] %v11636_v63  ;;  %v11645_v46 = vadd.f32 %v7279_v20, %v12224_v25  ;;  %6028 = vadd.xlane.f32.xlu0 (!%p6984_p3), %v6027_v31 }
 0xcbb   : > { %6018 = vst [vmem:[#allocation2 + $0xe8] sm:$0xff] %v11640_v56  ;;  %v11649_v59 = vadd.f32 %v7280_v51, %v12225_v32  ;;  %6034 = vadd.xlane.f32.xlu1 (!%p6984_p3), %v6033_v26  ;;  %v6069_v7 = vadd.f32 (!%p6984_p3), %v11640_v56, %v11636_v63 }
 0xcbc   : > { %6019 = vst [vmem:[#allocation2 + $0xf0] sm:$0xff] %v11645_v46 }
 0xcbd   : > { %6020 = vst [vmem:[#allocation2 + $0xf8] sm:$0xff] %v11649_v59  ;;  %v6072_v58 = vadd.f32 (!%p6984_p3), %v11649_v59, %v11645_v46 }
 0xcbe   : > { %6031 = vadd.xlane.f32.xlu0 %v6030_v28 }
 0xcbf   : > { %6037 = vadd.xlane.f32.xlu1 %v6036_v11 }
 0xcc2   : > { %6040 = vadd.xlane.f32.xlu0 %v6039_v38 }
 0xcc3   : > { %6043 = vadd.xlane.f32.xlu1 %v6042_v49 }
 0xcc6   : > { %6046 = vadd.xlane.f32.xlu0 %v6045_v29 }
 0xcc7   : > { %6049 = vadd.xlane.f32.xlu1 %v6048_v60 }
 0xcca   : > { %6052 = vadd.xlane.f32.xlu0 %v6051_v52 }
 0xccb   : > { %6055 = vadd.xlane.f32.xlu1 %v6054_v47 }
 0xcce   : > { %6058 = vadd.xlane.f32.xlu0 %v6057_v54 }
 0xccf   : > { %6061 = vadd.xlane.f32.xlu1 %v6060_v12 }
 0xcd2   : > { %6064 = vadd.xlane.f32.xlu0 %v6063_v1 }
 0xcd3   : > { %6067 = vadd.xlane.f32.xlu1 %v6066_v33 }
 0xcd6   : > { %6070 = vadd.xlane.f32.xlu0 %v6069_v7 }
 0xcd7   : > { %6073 = vadd.xlane.f32.xlu1 %v6072_v58 }
 0xd47   : > { %v6029_v24 = vpop.xlane.xlu0 %6028 }
 0xd48   : > { %v6035_v6 = vpop.xlane.xlu1 %6034  ;;  %v6075_v43 = vmul.f32 0.00390625, %v6029_v24 }
 0xd49   : > { %v6077_v50 = vmul.f32 0.00390625, %v6035_v6 }
 0xd4a   : > { %v11687_v45 = vsub.f32 %v11496_v30, %v6075_v43  ;;  %v11690_v4 = vsub.f32 %v11500_v44, %v6075_v43 }
 0xd4b   : > { %v11693_v35 = vsub.f32 %v11516_v3, %v6077_v50  ;;  %v11696_v42 = vsub.f32 %v11520_v0, %v6077_v50  ;;  %v6032_v9 = vpop.xlane.xlu0 %6031 }
 0xd4c   : > { %v6038_v36 = vpop.xlane.xlu1 %6037  ;;  %v6076_v20 = vmul.f32 0.00390625, %v6032_v9  ;;  %v6123_v55 = vmul.f32 %v11687_v45, %v11687_v45  ;;  %v6124_v30 = vmul.f32 %v11690_v4, %v11690_v4 }
 0xd4d   : > { %v6078_v5 = vmul.f32 0.00390625, %v6038_v36  ;;  %v6127_v44 = vmul.f32 %v11693_v35, %v11693_v35  ;;  %v6128_v3 = vmul.f32 %v11696_v42, %v11696_v42 }
 0xd4e   : > { %v11707_v51 = vsub.f32 %v11505_v37, %v6076_v20  ;;  %v11710_v0 = vsub.f32 %v11509_v16, %v6076_v20  ;;  %v6155_v26 = vadd.f32 %v6124_v30, %v6123_v55 }
 0xd4f   : > { %v11713_v25 = vsub.f32 %v11525_v62, %v6078_v5  ;;  %v11716_v32 = vsub.f32 %v11529_v48, %v6078_v5  ;;  %v6041_v31 = vpop.xlane.xlu0 %6040  ;;  %v6161_v16 = vadd.f32 %v6128_v3, %v6127_v44 }
 0xd50   : > { %v6044_v28 = vpop.xlane.xlu1 %6043  ;;  %v6079_v11 = vmul.f32 0.00390625, %v6041_v31  ;;  %v6125_v49 = vmul.f32 %v11707_v51, %v11707_v51  ;;  %v6126_v37 = vmul.f32 %v11710_v0, %v11710_v0  ;;  %6156 = vadd.xlane.f32.xlu0 %v6155_v26 }
 0xd51   : > { %v6080_v38 = vmul.f32 0.00390625, %v6044_v28  ;;  %v6129_v62 = vmul.f32 %v11713_v25, %v11713_v25  ;;  %v6130_v48 = vmul.f32 %v11716_v32, %v11716_v32 }
 0xd52   : > { %v11727_v29 = vsub.f32 %v11536_v8, %v6079_v11  ;;  %v11730_v60 = vsub.f32 %v11540_v17, %v6079_v11  ;;  %v6158_v12 = vadd.f32 %v6126_v37, %v6125_v49 }
 0xd53   : > { %v11733_v52 = vsub.f32 %v11545_v21, %v6080_v38  ;;  %v11736_v47 = vsub.f32 %v11549_v10, %v6080_v38  ;;  %v6047_v54 = vpop.xlane.xlu0 %6046  ;;  %v6164_v17 = vadd.f32 %v6130_v48, %v6129_v62 }
 0xd54   : > { %v6050_v1 = vpop.xlane.xlu1 %6049  ;;  %v6081_v33 = vmul.f32 0.00390625, %v6047_v54  ;;  %v6131_v58 = vmul.f32 %v11727_v29, %v11727_v29  ;;  %v6132_v8 = vmul.f32 %v11730_v60, %v11730_v60  ;;  %6162 = vadd.xlane.f32.xlu0 %v6161_v16  ;;  %6159 = vadd.xlane.f32.xlu1 %v6158_v12 }
 0xd55   : > { %v6082_v7 = vmul.f32 0.00390625, %v6050_v1  ;;  %v6133_v21 = vmul.f32 %v11733_v52, %v11733_v52  ;;  %v6134_v10 = vmul.f32 %v11736_v47, %v11736_v47 }
 0xd56   : > { %v11747_v24 = vsub.f32 %v11556_v13, %v6081_v33  ;;  %v11750_v6 = vsub.f32 %v11560_v14, %v6081_v33  ;;  %v6167_v36 = vadd.f32 %v6132_v8, %v6131_v58 }
 0xd57   : > { %v11753_v43 = vsub.f32 %v11565_v61, %v6082_v7  ;;  %v11756_v50 = vsub.f32 %v11569_v18, %v6082_v7  ;;  %v6053_v9 = vpop.xlane.xlu0 %6052  ;;  %v6170_v14 = vadd.f32 %v6134_v10, %v6133_v21 }
 0xd58   : > { %v6056_v20 = vpop.xlane.xlu1 %6055  ;;  %v6083_v5 = vmul.f32 0.00390625, %v6053_v9  ;;  %v6135_v30 = vmul.f32 %v11747_v24, %v11747_v24  ;;  %v6136_v13 = vmul.f32 %v11750_v6, %v11750_v6  ;;  %6165 = vadd.xlane.f32.xlu1 %v6164_v17  ;;  %6168 = vadd.xlane.f32.xlu0 %v6167_v36 }
 0xd59   : > { %v6084_v55 = vmul.f32 0.00390625, %v6056_v20  ;;  %v6137_v61 = vmul.f32 %v11753_v43, %v11753_v43  ;;  %v6138_v18 = vmul.f32 %v11756_v50, %v11756_v50 }
 0xd5a   : > { %v11767_v44 = vsub.f32 %v11576_v2, %v6083_v5  ;;  %v11770_v3 = vsub.f32 %v11580_v57, %v6083_v5  ;;  %v6173_v11 = vadd.f32 %v6136_v13, %v6135_v30 }
 0xd5b   : > { %v11773_v31 = vsub.f32 %v11585_v53, %v6084_v55  ;;  %v11776_v26 = vsub.f32 %v11589_v40, %v6084_v55  ;;  %v6059_v28 = vpop.xlane.xlu0 %6058  ;;  %v6176_v57 = vadd.f32 %v6138_v18, %v6137_v61 }
 0xd5c   : > { %v6062_v38 = vpop.xlane.xlu1 %6061  ;;  %v6085_v49 = vmul.f32 0.00390625, %v6059_v28  ;;  %v6139_v16 = vmul.f32 %v11767_v44, %v11767_v44  ;;  %v6140_v2 = vmul.f32 %v11770_v3, %v11770_v3  ;;  %6171 = vadd.xlane.f32.xlu1 %v6170_v14  ;;  %6174 = vadd.xlane.f32.xlu0 %v6173_v11 }
 0xd5d   : > { %v6086_v37 = vmul.f32 0.00390625, %v6062_v38  ;;  %v6141_v53 = vmul.f32 %v11773_v31, %v11773_v31  ;;  %v6142_v40 = vmul.f32 %v11776_v26, %v11776_v26 }
 0xd5e   : > { %v11787_v62 = vsub.f32 %v11596_v34, %v6085_v49  ;;  %v11790_v48 = vsub.f32 %v11600_v23, %v6085_v49  ;;  %v6179_v33 = vadd.f32 %v6140_v2, %v6139_v16 }
 0xd5f   : > { %v11793_v54 = vsub.f32 %v11605_v19, %v6086_v37  ;;  %v11796_v12 = vsub.f32 %v11609_v39, %v6086_v37  ;;  %v6065_v1 = vpop.xlane.xlu0 %6064  ;;  %v6182_v23 = vadd.f32 %v6142_v40, %v6141_v53 }
 0xd60   : > { %v6068_v7 = vpop.xlane.xlu1 %6067  ;;  %v6087_v58 = vmul.f32 0.00390625, %v6065_v1  ;;  %v6143_v17 = vmul.f32 %v11787_v62, %v11787_v62  ;;  %v6144_v34 = vmul.f32 %v11790_v48, %v11790_v48  ;;  %6177 = vadd.xlane.f32.xlu1 %v6176_v57  ;;  %6180 = vadd.xlane.f32.xlu0 %v6179_v33 }
 0xd61   : > { %v6088_v8 = vmul.f32 0.00390625, %v6068_v7  ;;  %v6145_v19 = vmul.f32 %v11793_v54, %v11793_v54  ;;  %v6146_v39 = vmul.f32 %v11796_v12, %v11796_v12 }
 0xd62   : > { %v11807_v21 = vsub.f32 %v11616_v15, %v6087_v58  ;;  %v11810_v10 = vsub.f32 %v11620_v27, %v6087_v58  ;;  %v6185_v5 = vadd.f32 %v6144_v34, %v6143_v17 }
 0xd63   : > { %v11813_v9 = vsub.f32 %v11625_v41, %v6088_v8  ;;  %v11816_v36 = vsub.f32 %v11629_v22, %v6088_v8  ;;  %v6071_v20 = vpop.xlane.xlu0 %6070  ;;  %v6188_v27 = vadd.f32 %v6146_v39, %v6145_v19  ;;  %v6025_v39 = vld [vmem:[%s12226_s25] sm:$0x3] }
 0xd64   : > { %v6074_v55 = vpop.xlane.xlu1 %6073  ;;  %v6089_v30 = vmul.f32 0.00390625, %v6071_v20  ;;  %v6147_v14 = vmul.f32 %v11807_v21, %v11807_v21  ;;  %v6148_v15 = vmul.f32 %v11810_v10, %v11810_v10  ;;  %6183 = vadd.xlane.f32.xlu1 %v6182_v23  ;;  %6186 = vadd.xlane.f32.xlu0 %v6185_v5 }
 0xd65   : > { %v6090_v13 = vmul.f32 0.00390625, %v6074_v55  ;;  %v6149_v41 = vmul.f32 %v11813_v9, %v11813_v9  ;;  %v6150_v22 = vmul.f32 %v11816_v36, %v11816_v36 }
 0xd66   : > { %v11827_v61 = vsub.f32 %v11636_v63, %v6089_v30  ;;  %v11830_v18 = vsub.f32 %v11640_v56, %v6089_v30  ;;  %v6191_v38 = vadd.f32 %v6148_v15, %v6147_v14 }
 0xd67   : > { %v11833_v28 = vsub.f32 %v11645_v46, %v6090_v13  ;;  %v11836_v11 = vsub.f32 %v11649_v59, %v6090_v13  ;;  %v6194_v63 = vadd.f32 %v6150_v22, %v6149_v41  ;;  %v6026_v13 = vld [vmem:[%s12227_s17] sm:$0x3]  ;;  %v12229_v22 = vld [vmem:[#allocation19_spill] sm:$0xff] }
 0xd68   : > { %v6151_v49 = vmul.f32 %v11827_v61, %v11827_v61  ;;  %v6152_v37 = vmul.f32 %v11830_v18, %v11830_v18  ;;  %6189 = vadd.xlane.f32.xlu1 %v6188_v27  ;;  %6192 = vadd.xlane.f32.xlu0 %v6191_v38  ;;  %v12228_v27 = vld [vmem:[#allocation20_spill] sm:$0xff]  ;;  %v11856_v38 = vrot.slane %v6025_v39, %v12229_v22 }
 0xd69   : > { %v6153_v56 = vmul.f32 %v11833_v28, %v11833_v28  ;;  %v6154_v46 = vmul.f32 %v11836_v11, %v11836_v11  ;;  %v11853_v41 = vrot.slane %v6025_v39, %v12228_v27 }
 0xd6a   : > { %v6197_v16 = vadd.f32 %v6152_v37, %v6151_v49 }
 0xd6b   : > { %v6200_v59 = vadd.f32 %v6154_v46, %v6153_v56 }
 0xd6c   : > { %6195 = vadd.xlane.f32.xlu1 %v6194_v63  ;;  %6198 = vadd.xlane.f32.xlu0 %v6197_v16  ;;  %v11861_v16 = vrot.slane %v6026_v13, %v12228_v27 }
 0xd70   : > { %6201 = vadd.xlane.f32.xlu1 %v6200_v59  ;;  %v11864_v59 = vrot.slane %v6026_v13, %v12229_v22 }
 0xddd   : > { %v6157_v2 = vpop.xlane.xlu0 %6156 }
 0xdde   : > { %v6203_v57 = vmul.f32 0.00390625, %v6157_v2 }
 0xde0   : > { %v6219_v53 = vadd.f32 1e-05, %v6203_v57 }
 0xde1   : > { %v6160_v40 = vpop.xlane.xlu1 %6159  ;;  %v6163_v1 = vpop.xlane.xlu0 %6162 }
 0xde2   : > { %8109 = vrsqrt.f32 %v6219_v53  ;;  %v6204_v33 = vmul.f32 0.00390625, %v6160_v40  ;;  %v6205_v7 = vmul.f32 0.00390625, %v6163_v1 }
 0xde4   : > { %v6220_v58 = vadd.f32 1e-05, %v6204_v33  ;;  %v6221_v8 = vadd.f32 1e-05, %v6205_v7 }
 0xde5   : > { %v6166_v17 = vpop.xlane.xlu1 %6165  ;;  %v6169_v34 = vpop.xlane.xlu0 %6168 }
 0xde6   : > { %8111 = vrsqrt.f32 %v6220_v58  ;;  %v6206_v23 = vmul.f32 0.00390625, %v6166_v17  ;;  %v6207_v19 = vmul.f32 0.00390625, %v6169_v34 }
 0xde7   : > { %8113 = vrsqrt.f32 %v6221_v8 }
 0xde8   : > { %v6222_v20 = vadd.f32 1e-05, %v6206_v23  ;;  %v6223_v5 = vadd.f32 1e-05, %v6207_v19 }
 0xde9   : > { %v6172_v55 = vpop.xlane.xlu1 %6171  ;;  %v6175_v30 = vpop.xlane.xlu0 %6174 }
 0xdea   : > { %8115 = vrsqrt.f32 %v6222_v20  ;;  %v6208_v14 = vmul.f32 0.00390625, %v6172_v55  ;;  %v6209_v15 = vmul.f32 0.00390625, %v6175_v30 }
 0xdeb   : > { %8117 = vrsqrt.f32 %v6223_v5 }
 0xdec   : > { %v8110_v49 = vpop.eup %8109  ;;  %v6224_v37 = vadd.f32 1e-05, %v6208_v14  ;;  %v6225_v63 = vadd.f32 1e-05, %v6209_v15 }
 0xded   : > { %v6251_v56 = vmul.f32 %v8110_v49, %v11687_v45  ;;  %v6252_v46 = vmul.f32 %v8110_v49, %v11690_v4  ;;  %v6178_v2 = vpop.xlane.xlu1 %6177  ;;  %v6181_v57 = vpop.xlane.xlu0 %6180 }
 0xdee   : > { %8119 = vrsqrt.f32 %v6224_v37  ;;  %v6210_v53 = vmul.f32 0.00390625, %v6178_v2  ;;  %v6211_v40 = vmul.f32 0.00390625, %v6181_v57 }
 0xdef   : > { %v6294_v1 = vmul.f32 %v11853_v41, %v6251_v56  ;;  %v6295_v33 = vmul.f32 %v11856_v38, %v6252_v46  ;;  %8121 = vrsqrt.f32 %v6225_v63 }
 0xdf0   : > { %v8112_v7 = vpop.eup %8111  ;;  %v6226_v45 = vadd.f32 1e-05, %v6210_v53  ;;  %v6227_v58 = vadd.f32 1e-05, %v6211_v40 }
 0xdf1   : > { %v8114_v4 = vpop.eup %8113  ;;  %v6337_v8 = vadd.f32 %v11861_v16, %v6294_v1  ;;  %v6338_v17 = vadd.f32 %v11864_v59, %v6295_v33  ;;  %v6253_v34 = vmul.f32 %v8112_v7, %v11707_v51  ;;  %v6254_v23 = vmul.f32 %v8112_v7, %v11710_v0  ;;  %v6184_v19 = vpop.xlane.xlu1 %6183 }
 0xdf2   : > { %v6187_v39 = vpop.xlane.xlu0 %6186  ;;  %v6255_v20 = vmul.f32 %v8114_v4, %v11693_v35  ;;  %v6256_v5 = vmul.f32 %v8114_v4, %v11696_v42  ;;  %8123 = vrsqrt.f32 %v6226_v45  ;;  %v6212_v55 = vmul.f32 0.00390625, %v6184_v19 }
 0xdf3   : > { %v7009_v30 = vpack.c.bf16 %v6338_v17, %v6337_v8  ;;  %v6296_v13 = vmul.f32 %v11853_v41, %v6253_v34  ;;  %v6297_v14 = vmul.f32 %v11856_v38, %v6254_v23  ;;  %8125 = vrsqrt.f32 %v6227_v58 }
 0xdf4   : > { %v8116_v15 = vpop.eup %8115  ;;  %v6298_v27 = vmul.f32 %v11853_v41, %v6255_v20  ;;  %v6299_v51 = vmul.f32 %v11856_v38, %v6256_v5  ;;  %v6228_v0 = vadd.f32 1e-05, %v6212_v55  ;;  %v6213_v22 = vmul.f32 0.00390625, %v6187_v39 }
 0xdf5   : > { %v8118_v49 = vpop.eup %8117  ;;  %6465 = vst [vmem:[%s12230_s19] sm:$0xff] %v7009_v30  ;;  %v6339_v35 = vadd.f32 %v11861_v16, %v6296_v13  ;;  %v6340_v42 = vadd.f32 %v11864_v59, %v6297_v14  ;;  %v6257_v37 = vmul.f32 %v8116_v15, %v11713_v25  ;;  %v6258_v63 = vmul.f32 %v8116_v15, %v11716_v32  ;;  %v6190_v56 = vpop.xlane.xlu1 %6189 }
 0xdf6   : > { %v6341_v46 = vadd.f32 %v11861_v16, %v6298_v27  ;;  %v6342_v2 = vadd.f32 %v11864_v59, %v6299_v51  ;;  %v6259_v57 = vmul.f32 %v8118_v49, %v11727_v29  ;;  %v6260_v53 = vmul.f32 %v8118_v49, %v11730_v60  ;;  %v6193_v20 = vpop.xlane.xlu0 %6192 }
 0xdf7   : > { %v7010_v40 = vpack.c.bf16 %v6340_v42, %v6339_v35  ;;  %v6300_v1 = vmul.f32 %v11853_v41, %v6257_v37  ;;  %v6301_v33 = vmul.f32 %v11856_v38, %v6258_v63  ;;  %8127 = vrsqrt.f32 %v6228_v0 }
 0xdf8   : > { %v8120_v7 = vpop.eup %8119  ;;  %v7011_v45 = vpack.c.bf16 %v6342_v2, %v6341_v46  ;;  %v6302_v25 = vmul.f32 %v11853_v41, %v6259_v57  ;;  %v6303_v32 = vmul.f32 %v11856_v38, %v6260_v53  ;;  %v6229_v58 = vadd.f32 1e-05, %v6213_v22 }
 0xdf9   : > { %v8122_v4 = vpop.eup %8121  ;;  %6466 = vst [vmem:[%s12231_s26 + $0x8] sm:$0xff] %v7010_v40  ;;  %v6343_v29 = vadd.f32 %v11861_v16, %v6300_v1  ;;  %v6344_v60 = vadd.f32 %v11864_v59, %v6301_v33  ;;  %v6261_v8 = vmul.f32 %v8120_v7, %v11733_v52  ;;  %v6262_v17 = vmul.f32 %v8120_v7, %v11736_v47  ;;  %v6196_v47 = vpop.xlane.xlu1 %6195 }
 0xdfa   : > { %6467 = vst [vmem:[%s12231_s26 + $0x10] sm:$0xff] %v7011_v45  ;;  %v6345_v34 = vadd.f32 %v11861_v16, %v6302_v25  ;;  %v6346_v23 = vadd.f32 %v11864_v59, %v6303_v32  ;;  %v6263_v19 = vmul.f32 %v8122_v4, %v11747_v24  ;;  %v6264_v39 = vmul.f32 %v8122_v4, %v11750_v6  ;;  %v6199_v40 = vpop.xlane.xlu0 %6198 }
 0xdfb   : > { %v7012_v5 = vpack.c.bf16 %v6344_v60, %v6343_v29  ;;  %v6304_v55 = vmul.f32 %v11853_v41, %v6261_v8  ;;  %v6305_v52 = vmul.f32 %v11856_v38, %v6262_v17  ;;  %8129 = vrsqrt.f32 %v6229_v58 }
 0xdfc   : > { %v8124_v30 = vpop.eup %8123  ;;  %v7013_v13 = vpack.c.bf16 %v6346_v23, %v6345_v34  ;;  %v6306_v14 = vmul.f32 %v11853_v41, %v6263_v19  ;;  %v6307_v15 = vmul.f32 %v11856_v38, %v6264_v39  ;;  %v6214_v27 = vmul.f32 0.00390625, %v6190_v56 }
 0xdfd   : > { %v8126_v51 = vpop.eup %8125  ;;  %6468 = vst [vmem:[%s12231_s26 + $0x18] sm:$0xff] %v7012_v5  ;;  %v6347_v24 = vadd.f32 %v11861_v16, %v6304_v55  ;;  %v6348_v6 = vadd.f32 %v11864_v59, %v6305_v52  ;;  %v6265_v0 = vmul.f32 %v8124_v30, %v11753_v43  ;;  %v6266_v22 = vmul.f32 %v8124_v30, %v11756_v50  ;;  %v6202_v7 = vpop.xlane.xlu1 %6201 }
 0xdfe   : > { %6469 = vst [vmem:[%s12231_s26 + $0x20] sm:$0xff] %v7013_v13  ;;  %v6349_v49 = vadd.f32 %v11861_v16, %v6306_v14  ;;  %v6350_v35 = vadd.f32 %v11864_v59, %v6307_v15  ;;  %v6267_v42 = vmul.f32 %v8126_v51, %v11767_v44  ;;  %v6268_v37 = vmul.f32 %v8126_v51, %v11770_v3 }
 0xdff   : > { %v7014_v63 = vpack.c.bf16 %v6348_v6, %v6347_v24  ;;  %v6308_v56 = vmul.f32 %v11853_v41, %v6265_v0  ;;  %v6309_v46 = vmul.f32 %v11856_v38, %v6266_v22  ;;  %v6230_v43 = vadd.f32 1e-05, %v6214_v27 }
 0xe00   : > { %v7015_v2 = vpack.c.bf16 %v6350_v35, %v6349_v49  ;;  %v6310_v50 = vmul.f32 %v11853_v41, %v6267_v42  ;;  %v6311_v57 = vmul.f32 %v11856_v38, %v6268_v37  ;;  %v6215_v53 = vmul.f32 0.00390625, %v6193_v20 }
 0xe01   : > { %v8128_v1 = vpop.eup %8127  ;;  %6470 = vst [vmem:[%s12231_s26 + $0x28] sm:$0xff] %v7014_v63  ;;  %v6351_v44 = vadd.f32 %v11861_v16, %v6308_v56  ;;  %v6352_v3 = vadd.f32 %v11864_v59, %v6309_v46  ;;  %8131 = vrsqrt.f32 %v6230_v43  ;;  %v6216_v33 = vmul.f32 0.00390625, %v6196_v47 }
 0xe02   : > { %6471 = vst [vmem:[%s12231_s26 + $0x30] sm:$0xff] %v7015_v2  ;;  %v6353_v45 = vadd.f32 %v11861_v16, %v6310_v50  ;;  %v6354_v25 = vadd.f32 %v11864_v59, %v6311_v57  ;;  %v6269_v32 = vmul.f32 %v8128_v1, %v11773_v31  ;;  %v6270_v58 = vmul.f32 %v8128_v1, %v11776_v26 }
 0xe03   : > { %v7016_v4 = vpack.c.bf16 %v6352_v3, %v6351_v44  ;;  %v6231_v29 = vadd.f32 1e-05, %v6215_v53  ;;  %v6232_v60 = vadd.f32 1e-05, %v6216_v33  ;;  %v6217_v8 = vmul.f32 0.00390625, %v6199_v40 }
 0xe04   : > { %v7017_v17 = vpack.c.bf16 %v6354_v25, %v6353_v45  ;;  %v6312_v34 = vmul.f32 %v11853_v41, %v6269_v32  ;;  %v6313_v23 = vmul.f32 %v11856_v38, %v6270_v58  ;;  %v6218_v19 = vmul.f32 0.00390625, %v6202_v7 }
 0xe05   : > { %v8130_v39 = vpop.eup %8129  ;;  %6472 = vst [vmem:[%s12231_s26 + $0x38] sm:$0xff] %v7016_v4  ;;  %8133 = vrsqrt.f32 %v6231_v29  ;;  %v6233_v20 = vadd.f32 1e-05, %v6217_v8 }
 0xe06   : > { %6473 = vst [vmem:[%s12231_s26 + $0x40] sm:$0xff] %v7017_v17  ;;  %v6355_v31 = vadd.f32 %v11861_v16, %v6312_v34  ;;  %v6356_v26 = vadd.f32 %v11864_v59, %v6313_v23  ;;  %v6271_v5 = vmul.f32 %v8130_v39, %v11787_v62  ;;  %v6272_v55 = vmul.f32 %v8130_v39, %v11790_v48 }
 0xe07   : > { %8135 = vrsqrt.f32 %v6232_v60  ;;  %v6234_v52 = vadd.f32 1e-05, %v6218_v19 }
 0xe08   : > { %v7018_v47 = vpack.c.bf16 %v6356_v26, %v6355_v31  ;;  %v6314_v30 = vmul.f32 %v11853_v41, %v6271_v5  ;;  %v6315_v13 = vmul.f32 %v11856_v38, %v6272_v55  ;;  %8137 = vrsqrt.f32 %v6233_v20 }
 0xe09   : > { %8139 = vrsqrt.f32 %v6234_v52 }
 0xe0a   : > { %6474 = vst [vmem:[%s12231_s26 + $0x48] sm:$0xff] %v7018_v47  ;;  %v6357_v14 = vadd.f32 %v11861_v16, %v6314_v30  ;;  %v6358_v15 = vadd.f32 %v11864_v59, %v6315_v13 }
 0xe0b   : > { %v8132_v62 = vpop.eup %8131 }
 0xe0c   : > { %v7019_v27 = vpack.c.bf16 %v6358_v15, %v6357_v14  ;;  %v6273_v48 = vmul.f32 %v8132_v62, %v11793_v54  ;;  %v6274_v51 = vmul.f32 %v8132_v62, %v11796_v12 }
 0xe0e   : > { %6475 = vst [vmem:[%s12231_s26 + $0x50] sm:$0xff] %v7019_v27  ;;  %v6316_v24 = vmul.f32 %v11853_v41, %v6273_v48  ;;  %v6317_v6 = vmul.f32 %v11856_v38, %v6274_v51 }
 0xe0f   : > { %v8134_v0 = vpop.eup %8133 }
 0xe10   : > { %v6359_v22 = vadd.f32 %v11861_v16, %v6316_v24  ;;  %v6360_v49 = vadd.f32 %v11864_v59, %v6317_v6  ;;  %v6275_v35 = vmul.f32 %v8134_v0, %v11807_v21  ;;  %v6276_v42 = vmul.f32 %v8134_v0, %v11810_v10 }
 0xe11   : > { %v8136_v54 = vpop.eup %8135 }
 0xe12   : > { %v8138_v37 = vpop.eup %8137  ;;  %v7020_v12 = vpack.c.bf16 %v6360_v49, %v6359_v22  ;;  %v6318_v63 = vmul.f32 %v11853_v41, %v6275_v35  ;;  %v6319_v56 = vmul.f32 %v11856_v38, %v6276_v42  ;;  %v6277_v46 = vmul.f32 %v8136_v54, %v11813_v9 }
 0xe13   : > { %v8140_v43 = vpop.eup %8139  ;;  %v6278_v2 = vmul.f32 %v8136_v54, %v11816_v36  ;;  %v6279_v50 = vmul.f32 %v8138_v37, %v11827_v61  ;;  %v6280_v57 = vmul.f32 %v8138_v37, %v11830_v18 }
 0xe14   : > { %6476 = vst [vmem:[%s12231_s26 + $0x58] sm:$0xff] %v7020_v12  ;;  %v6361_v21 = vadd.f32 %v11861_v16, %v6318_v63  ;;  %v6362_v10 = vadd.f32 %v11864_v59, %v6319_v56  ;;  %v6320_v53 = vmul.f32 %v11853_v41, %v6277_v46  ;;  %v6281_v40 = vmul.f32 %v8140_v43, %v11833_v28 }
 0xe15   : > { %v6321_v9 = vmul.f32 %v11856_v38, %v6278_v2  ;;  %v6322_v36 = vmul.f32 %v11853_v41, %v6279_v50  ;;  %v6323_v61 = vmul.f32 %v11856_v38, %v6280_v57  ;;  %v6282_v18 = vmul.f32 %v8140_v43, %v11836_v11 }
 0xe16   : > { %v7021_v1 = vpack.c.bf16 %v6362_v10, %v6361_v21  ;;  %v6363_v44 = vadd.f32 %v11861_v16, %v6320_v53  ;;  %v6324_v3 = vmul.f32 %v11853_v41, %v6281_v40 }
 0xe17   : > { %v6364_v33 = vadd.f32 %v11864_v59, %v6321_v9  ;;  %v6365_v7 = vadd.f32 %v11861_v16, %v6322_v36  ;;  %v6366_v45 = vadd.f32 %v11864_v59, %v6323_v61  ;;  %v6325_v28 = vmul.f32 %v11856_v38, %v6282_v18 }
 0xe18   : > { %6477 = vst [vmem:[%s12231_s26 + $0x60] sm:$0xff] %v7021_v1  ;;  %v6367_v25 = vadd.f32 %v11861_v16, %v6324_v3 }
 0xe19   : > { %v7022_v11 = vpack.c.bf16 %v6364_v33, %v6363_v44  ;;  %v7023_v32 = vpack.c.bf16 %v6366_v45, %v6365_v7  ;;  %v6368_v58 = vadd.f32 %v11864_v59, %v6325_v28 }
 0xe1b   : > { %6478 = vst [vmem:[%s12231_s26 + $0x68] sm:$0xff] %v7022_v11  ;;  %6479 = vst [vmem:[%s12231_s26 + $0x70] sm:$0xff] %v7023_v32  ;;  %v7024_v41 = vpack.c.bf16 %v6368_v58, %v6367_v25 }
 0xe1d   : > { %6480 = vst [vmem:[%s12231_s26 + $0x78] sm:$0xff] %v7024_v41 }
 0xe1e PF: > { %s12232_s21 = sld [smem:[#allocation15_spill]]  ;;  %s12233_s18 = sld [smem:[#allocation13_spill]] }
 0xe1f   : > { %s12234_s19 = sld [smem:[#allocation14_spill]]  ;;  %s12235_s20 = sld [smem:[#allocation16_spill]] }
 0xe24   : > { %p31_p5 = scmp.ge.s32.totalorder %s12232_s21, 4  }
 0xe26   :  { %33 = sbr.rel (!%p31_p5) target bundleno = 18 (0x12), region = 185 }
 0xe2d   :  { %6492 = vsyncpa [#allocation4], 1 }
 0xe2e   :  { %6494 = vsyncpa [#allocation4 + $0x1], 1 }
 0xe2f   :  { %6495 = vsyncpa [#allocation6], 1 }
 0xe30   :  { %6497 = vsyncpa [#allocation6 + $0x1], 1 }
 0xe31   :  { %6498 = vsyncpa [#allocation9], 1 }
 0xe32   :  { %6500 = vsyncpa [#allocation9 + $0x1], 1 }

</bundles_post_ra>
